<compile_context>
chip_gen: v6e
topology: v6e:2x2x1
jax: 0.10.0
libtpu: 0.0.40
codegen_flags: <defaults>
</compile_context>

<pallas_src>
import functools

import jax
import jax.numpy as jnp
from jax.experimental import pallas as pl
from jax.experimental.pallas import tpu as pltpu

C3 = 128  # conv3 output channels


# ------------------------- kernel 1: fused conv stack ------------------------
def _conv_stack_kernel(x_ref, mask_ref, w1_ref, b1_ref, w2_ref, b2_ref,
                       w3_ref, b3_ref, o_ref, g1, g2, *, Wp, G, Rt):
    """conv1+ReLU -> conv2+ReLU -> conv3+ReLU for a tile of Bt images stacked
    along the row axis (Rt = Bt * Hp * Wp rows, channels in lanes).  Each conv
    is a single MXU dot with the 9 taps folded into the contraction."""
    interior = mask_ref[...] > 0.0                          # [Rt, 1] bool
    deltas = [(kh - 1) * Wp + (kw - 1) for kh in range(3) for kw in range(3)]

    def finish(acc, b_ref):
        y = jnp.maximum(acc + b_ref[...], 0.0)              # bias + ReLU in f32
        return jnp.where(interior, y, 0.0)                  # zero border rows

    def conv3x3(src_ref, w_ref, b_ref):
        # Fold the 9 taps into the matmul contraction: [Rt, 9*Cin] @ [9*Cin, Cout]
        parts = [src_ref[pl.ds(G + d, Rt), :] for d in deltas]
        a = jnp.concatenate(parts, axis=-1)                 # [Rt, 9*Cin] bf16
        return finish(
            jnp.dot(a, w_ref[...], preferred_element_type=jnp.float32), b_ref)

    def zero_guards(g):
        c = g.shape[1]
        g[pl.ds(0, G), :] = jnp.zeros((G, c), g.dtype)
        g[pl.ds(G + Rt, G), :] = jnp.zeros((G, c), g.dtype)

    # Only the guard rows are (re)zeroed -- interior rows are fully overwritten.
    zero_guards(g1)
    zero_guards(g2)

    # conv1: the wrapper already provides the 9-tap im2col [Rt, 9*Cin] -> 1 dot.
    y1 = finish(
        jnp.dot(x_ref[0], w1_ref[...], preferred_element_type=jnp.float32),
        b1_ref)
    g1[pl.ds(G, Rt), :] = y1.astype(g1.dtype)               # bf16 activations

    y2 = conv3x3(g1, w2_ref, b2_ref)
    g2[pl.ds(G, Rt), :] = y2.astype(g2.dtype)

    y3 = conv3x3(g2, w3_ref, b3_ref)
    o_ref[0] = y3.astype(o_ref.dtype)                       # bf16 HBM writeback


def conv_stack(xt, mask, params, *, Wp, G, Rt):
    """xt: [nb, Rt, 9*Cin] bf16 (batch-tiled, im2col'd for conv1).
    Returns [nb, Rt, 128] bf16 conv3 activations on the padded (hp, wp) grid."""
    nb, _, K1 = xt.shape
    kernel = functools.partial(_conv_stack_kernel, Wp=Wp, G=G, Rt=Rt)
    return pl.pallas_call(
        kernel,
        out_shape=jax.ShapeDtypeStruct((nb, Rt, C3), jnp.bfloat16),
        grid=(nb,),
        in_specs=[
            pl.BlockSpec((1, Rt, K1), lambda b: (b, 0, 0)),
            pl.BlockSpec((Rt, 1), lambda b: (0, 0)),
            pl.BlockSpec((K1, 32), lambda b: (0, 0)),
            pl.BlockSpec((1, 32), lambda b: (0, 0)),
            pl.BlockSpec((9 * 32, 64), lambda b: (0, 0)),
            pl.BlockSpec((1, 64), lambda b: (0, 0)),
            pl.BlockSpec((9 * 64, C3), lambda b: (0, 0)),
            pl.BlockSpec((1, C3), lambda b: (0, 0)),
        ],
        out_specs=pl.BlockSpec((1, Rt, C3), lambda b: (b, 0, 0)),
        scratch_shapes=[
            pltpu.VMEM((Rt + 2 * G, 32), jnp.bfloat16),
            pltpu.VMEM((Rt + 2 * G, 64), jnp.bfloat16),
        ],
        compiler_params=pltpu.CompilerParams(
            dimension_semantics=("parallel",)),
    )(xt, mask, params["conv1_w"], params["conv1_b"],
      params["conv2_w"], params["conv2_b"],
      params["conv3_w"], params["conv3_b"])


# --------------------------- kernel 2: fused FC head -------------------------
def _head_kernel(x_ref, w1_ref, b1_ref, w2_ref, b2_ref, w3_ref, b3_ref,
                 o_ref, acc_ref, *, n_actions):
    """K-pipelined fc1 accumulation, then (on the last K step) tanh ->
    [policy_fc|value_fc]+tanh -> [policy_head|value_head] -> masked softmax.
    Output slab [B, 128]: cols 0:A = policy probs, col A = value."""
    k = pl.program_id(0)

    @pl.when(k == 0)
    def _init():
        acc_ref[...] = jnp.zeros_like(acc_ref)

    acc_ref[...] += jnp.dot(x_ref[...], w1_ref[...],
                            preferred_element_type=jnp.float32)

    @pl.when(k == pl.num_programs(0) - 1)
    def _finalize():
        h = jnp.tanh(acc_ref[...] + b1_ref[...])
        pv = jnp.tanh(jnp.dot(h.astype(jnp.bfloat16), w2_ref[...],
                              preferred_element_type=jnp.float32) + b2_ref[...])
        out = (jnp.dot(pv.astype(jnp.bfloat16), w3_ref[...],
                       preferred_element_type=jnp.float32) + b3_ref[...])

        Bq, N = out.shape
        col = jax.lax.broadcasted_iota(jnp.int32, (Bq, N), 1)
        is_logit = col < n_actions
        neg = jnp.full_like(out, -1e30)
        m = jnp.max(jnp.where(is_logit, out, neg), axis=-1, keepdims=True)
        e = jnp.where(is_logit, jnp.exp(out - m), 0.0)
        denom = jnp.sum(e, axis=-1, keepdims=True)
        probs = e / denom                                   # exact division
        res = jnp.where(is_logit, probs,
                        jnp.where(col == n_actions, out, 0.0))
        o_ref[...] = res.astype(o_ref.dtype)


def head_forward(xh, params, *, n_actions, rp):
    """xh: [B, rp*128] bf16.  Returns [B, 128] f32 slab (probs | value | 0)."""
    Bq, K = xh.shape
    assert K == rp * C3
    # K-reduction steps: pick a divisor of rp so each fc1_w block is ~hundreds
    # of KB (overlaps the 3.3 MB weight DMA with the accumulation matmuls).
    target = max(1, rp // 8)
    nk = max(d for d in range(1, rp + 1) if rp % d == 0 and d <= target)
    tk = (rp // nk) * C3

    kernel = functools.partial(_head_kernel, n_actions=n_actions)
    return pl.pallas_call(
        kernel,
        out_shape=jax.ShapeDtypeStruct((Bq, 128), jnp.float32),
        grid=(nk,),
        in_specs=[
            pl.BlockSpec((Bq, tk), lambda k: (0, k)),
            pl.BlockSpec((tk, 128), lambda k: (k, 0)),
            pl.BlockSpec((1, 128), lambda k: (0, 0)),
            pl.BlockSpec((128, 128), lambda k: (0, 0)),
            pl.BlockSpec((1, 128), lambda k: (0, 0)),
            pl.BlockSpec((128, 128), lambda k: (0, 0)),
            pl.BlockSpec((1, 128), lambda k: (0, 0)),
        ],
        out_specs=pl.BlockSpec((Bq, 128), lambda k: (0, 0)),
        scratch_shapes=[pltpu.VMEM((Bq, 128), jnp.float32)],
        compiler_params=pltpu.CompilerParams(
            dimension_semantics=("arbitrary",)),
    )(xh, params["fc1_w"], params["fc1_b"], params["pv_w"], params["pv_b"],
      params["head_w"], params["head_b"])


# ---------------------------------- forward ----------------------------------
def ppo_forward(x, params, *, state_shape, in_channels, n_actions):
    """x: [B, C, H, W] (PyTorch NCHW).  Returns (policy [B, A], value [B, 1])."""
    H, W = state_shape
    Hp, Wp = H + 2, W + 2
    RP = Hp * Wp
    G = ((Wp + 1 + 15) // 16) * 16        # guard rows (>= Wp+1, bf16-tile mult)

    x = x.reshape(-1, in_channels, H, W)             # torch x.view(-1, C, H, W)
    B = x.shape[0]
    x = jnp.transpose(x, (0, 2, 3, 1))               # NCHW -> NHWC (tiny)
    xp = jnp.pad(x, ((0, 0), (1, 1), (1, 1), (0, 0)))           # conv padding
    xpp = jnp.pad(xp, ((0, 0), (1, 1), (1, 1), (0, 0)))         # for im2col taps
    taps = [xpp[:, kh:kh + Hp, kw:kw + Wp, :]
            for kh in range(3) for kw in range(3)]
    x_i2c = jnp.concatenate(taps, axis=-1)                      # [B,Hp,Wp,9*Cin]
    x_i2c = x_i2c.reshape(B, RP, 9 * in_channels).astype(jnp.bfloat16)

    Bt = min(B, 8)                         # images stacked per grid step
    nb = -(-B // Bt)
    Bpad = nb * Bt
    Rt = Bt * RP
    if Bpad != B:
        x_i2c = jnp.pad(x_i2c, ((0, Bpad - B), (0, 0), (0, 0)))
    xt = x_i2c.reshape(nb, Rt, 9 * in_channels)

    # interior-row mask on the padded (hp, wp) grid, tiled over the batch tile
    p = jnp.arange(RP)
    hp, wp = p // Wp, p % Wp
    m = (((hp >= 1) & (hp <= H)) & ((wp >= 1) & (wp <= W))).astype(jnp.float32)
    mask = jnp.tile(m, (Bt,)).reshape(Rt, 1)

    conv_out = conv_stack(xt, mask, params, Wp=Wp, G=G, Rt=Rt)  # [nb,Rt,128] bf16
    head_in = conv_out.reshape(Bpad, RP * C3)                   # free reshape
    out = head_forward(head_in, params, n_actions=n_actions, rp=RP)
    out = out[:B]
    policy = out[:, :n_actions]
    value = out[:, n_actions:n_actions + 1]
    return policy, value


# -------------------------------- initialization ------------------------------
def _orthogonal(key, rows, cols, gain=1.0):
    """Deterministic orthogonal init (same spirit as nn.init.orthogonal_)."""
    n, m = max(rows, cols), min(rows, cols)
    a = jax.random.normal(key, (n, m), dtype=jnp.float32)
    q, r = jnp.linalg.qr(a)
    q = q * jnp.sign(jnp.diagonal(r))
    if rows < cols:
        q = q.T
    return (gain * q[:rows, :cols]).astype(jnp.float32)


def _conv_w_folded(key, cin, cout):
    # torch layout [Cout, Cin, 3, 3] -> tap-folded [(kh*3+kw)*Cin + c, Cout] bf16
    w = _orthogonal(key, cout, cin * 9).reshape(cout, cin, 3, 3)
    w = jnp.transpose(w, (2, 3, 1, 0))               # (kh, kw, cin, cout)
    return w.reshape(9 * cin, cout).astype(jnp.bfloat16)


def init_params(key, state_shape, in_channels, n_actions):
    assert n_actions + 1 <= 128, "output slab holds n_actions probs + 1 value"
    H, W = state_shape
    Hp, Wp = H + 2, W + 2
    ks = jax.random.split(key, 8)

    cnn_out = C3 * H * W
    # fc1: torch weight [128, cnn_out] with input flatten order (c, h, w).
    # Permute rows to (h, w, c) order and scatter into the padded (hp, wp, c)
    # grid so the conv output can be flattened directly (border rows multiply
    # exact zeros -> mathematically identical to the compacted contraction).
    w_fc1 = _orthogonal(ks[3], 128, cnn_out)             # [out, in=(c,h,w)]
    w_chwo = w_fc1.T.reshape(C3, H, W, 128)              # (c, h, w, out)
    w_hwco = jnp.transpose(w_chwo, (1, 2, 0, 3))         # (h, w, c, out)
    w_padded = jnp.pad(w_hwco, ((1, 1), (1, 1), (0, 0), (0, 0)))
    fc1_w = w_padded.reshape(Hp * Wp * C3, 128).astype(jnp.bfloat16)

    # policy_fc / value_fc concatenated into one lane-full [128, 128] weight
    w_pfc = _orthogonal(ks[4], 64, 128)                  # [out=64, in=128]
    w_vfc = _orthogonal(ks[6], 64, 128)
    pv_w = jnp.concatenate([w_pfc.T, w_vfc.T], axis=1).astype(jnp.bfloat16)

    # policy_head / value_head as a block-diagonal [128, 128] weight
    w_ph = _orthogonal(ks[5], n_actions, 64)             # [A, 64]
    w_vh = _orthogonal(ks[7], 1, 64)                     # [1, 64]
    head_w = jnp.zeros((128, 128), jnp.float32)
    head_w = head_w.at[0:64, 0:n_actions].set(w_ph.T)
    head_w = head_w.at[64:128, n_actions].set(w_vh[0])
    head_w = head_w.astype(jnp.bfloat16)

    return {
        "conv1_w": _conv_w_folded(ks[0], in_channels, 32),
        "conv1_b": jnp.zeros((1, 32), jnp.float32),
        "conv2_w": _conv_w_folded(ks[1], 32, 64),
        "conv2_b": jnp.zeros((1, 64), jnp.float32),
        "conv3_w": _conv_w_folded(ks[2], 64, C3),
        "conv3_b": jnp.zeros((1, C3), jnp.float32),
        "fc1_w": fc1_w,
        "fc1_b": jnp.zeros((1, 128), jnp.float32),
        "pv_w": pv_w,
        "pv_b": jnp.zeros((1, 128), jnp.float32),
        "head_w": head_w,
        "head_b": jnp.zeros((1, 128), jnp.float32),
    }


# ----------------------- pure-JAX reference (same numerics) -------------------
def ref_forward(x, params, *, state_shape, in_channels, n_actions):
    H, W = state_shape
    x = x.reshape(-1, in_channels, H, W)
    x = jnp.transpose(x, (0, 2, 3, 1))                   # NHWC f32

    def conv(y, wk, bk, cin, cout):
        w = params[wk].reshape(3, 3, cin, cout)          # HWIO bf16
        z = jax.lax.conv_general_dilated(
            y.astype(jnp.bfloat16), w, (1, 1), "SAME",
            dimension_numbers=("NHWC", "HWIO", "NHWC"),
            preferred_element_type=jnp.float32)
        return jnp.maximum(z + params[bk].reshape(1, 1, 1, cout), 0.0)

    y = conv(x, "conv1_w", "conv1_b", in_channels, 32)
    y = conv(y, "conv2_w", "conv2_b", 32, 64)
    y = conv(y, "conv3_w", "conv3_b", 64, C3)            # [B, H, W, 128] f32
    flat = y.astype(jnp.bfloat16).reshape(y.shape[0], -1)       # (h, w, c)

    w_fc1 = params["fc1_w"].reshape(H + 2, W + 2, C3, 128)
    w_fc1 = w_fc1[1:H + 1, 1:W + 1].reshape(H * W * C3, 128)
    h = jnp.tanh(jnp.dot(flat, w_fc1, preferred_element_type=jnp.float32)
                 + params["fc1_b"])
    pv = jnp.tanh(jnp.dot(h.astype(jnp.bfloat16), params["pv_w"],
                          preferred_element_type=jnp.float32) + params["pv_b"])
    out = (jnp.dot(pv.astype(jnp.bfloat16), params["head_w"],
                   preferred_element_type=jnp.float32) + params["head_b"])
    policy = jax.nn.softmax(out[:, :n_actions], axis=-1)
    value = out[:, n_actions:n_actions + 1]
    return policy, value


# ------------------------------------ main ------------------------------------
if __name__ == "__main__":
    state_shape = (8, 8)
    in_channels = 4
    n_actions = 9
    batch = 2

    key = jax.random.PRNGKey(0)
    k_params, k_x = jax.random.split(key)
    params = init_params(k_params, state_shape, in_channels, n_actions)
    x = jax.random.normal(
        k_x, (batch, in_channels, state_shape[0], state_shape[1]),
        dtype=jnp.float32)

    fwd = jax.jit(functools.partial(
        ppo_forward, state_shape=state_shape, in_channels=in_channels,
        n_actions=n_actions))
    policy, value = jax.block_until_ready(fwd(x, params))

    assert policy.shape == (batch, n_actions)
    assert value.shape == (batch, 1)
    assert bool(jnp.all(jnp.isfinite(policy))) and bool(jnp.all(jnp.isfinite(value)))
    assert bool(jnp.allclose(jnp.sum(policy, axis=-1), 1.0, atol=1e-3))

    # Cross-check against a plain-JAX reference with matched bf16 numerics.
    p_ref, v_ref = jax.block_until_ready(ref_forward(
        x, params, state_shape=state_shape, in_channels=in_channels,
        n_actions=n_actions))
    assert bool(jnp.allclose(policy, p_ref, atol=2e-2, rtol=2e-2))
    assert bool(jnp.allclose(value, v_ref, atol=2e-2, rtol=2e-2))

    print("KERNEL_OK")
</pallas_src>

<mosaic_0001>
module attributes {stable_mosaic.version = 11 : i64} {
  func.func @_conv_stack_kernel(%arg0: i32, %arg1: memref<1x200x36xbf16, #tpu.memory_space<vmem>>, %arg2: memref<200x1xf32, #tpu.memory_space<vmem>>, %arg3: memref<36x32xbf16, #tpu.memory_space<vmem>>, %arg4: memref<1x32xf32, #tpu.memory_space<vmem>>, %arg5: memref<288x64xbf16, #tpu.memory_space<vmem>>, %arg6: memref<1x64xf32, #tpu.memory_space<vmem>>, %arg7: memref<576x128xbf16, #tpu.memory_space<vmem>>, %arg8: memref<1x128xf32, #tpu.memory_space<vmem>>, %arg9: memref<1x200x128xbf16, #tpu.memory_space<vmem>>, %arg10: memref<232x32xbf16, #tpu.memory_space<vmem>>, %arg11: memref<232x64xbf16, #tpu.memory_space<vmem>>) attributes {dimension_semantics = [#tpu.dimension_semantics<parallel>], iteration_bounds = array<i64: 1>, scalar_prefetch = 0 : i64, scratch_operands = 2 : i64, tpu.core_type = #tpu.core_type<tc>, window_params = [{transform_indices = @transform_0, window_bounds = array<i64: 1, 200, 36>}, {pipeline_mode = #tpu.pipeline_mode<synchronous>, transform_indices = @transform_1, window_bounds = array<i64: 200, 1>}, {pipeline_mode = #tpu.pipeline_mode<synchronous>, transform_indices = @transform_2, window_bounds = array<i64: 36, 32>}, {pipeline_mode = #tpu.pipeline_mode<synchronous>, transform_indices = @transform_3, window_bounds = array<i64: 1, 32>}, {pipeline_mode = #tpu.pipeline_mode<synchronous>, transform_indices = @transform_4, window_bounds = array<i64: 288, 64>}, {pipeline_mode = #tpu.pipeline_mode<synchronous>, transform_indices = @transform_5, window_bounds = array<i64: 1, 64>}, {pipeline_mode = #tpu.pipeline_mode<synchronous>, transform_indices = @transform_6, window_bounds = array<i64: 576, 128>}, {pipeline_mode = #tpu.pipeline_mode<synchronous>, transform_indices = @transform_7, window_bounds = array<i64: 1, 128>}, {transform_indices = @transform_8, window_bounds = array<i64: 1, 200, 128>}]} {
    %c0 = arith.constant 0 : index
    %c0_0 = arith.constant 0 : index
    %0 = vector.load %arg2[%c0, %c0_0] : memref<200x1xf32, #tpu.memory_space<vmem>>, vector<200x1xf32>
    %cst = arith.constant 0.000000e+00 : f32
    %1 = vector.broadcast %cst : f32 to vector<200x1xf32>
    %2 = arith.cmpf ogt, %0, %1 : vector<200x1xf32>
    %cst_1 = arith.constant 0.000000e+00 : bf16
    %3 = vector.broadcast %cst_1 : bf16 to vector<16x32xbf16>
    %c0_2 = arith.constant 0 : index
    %c0_3 = arith.constant 0 : index
    %4 = vector.load %arg10[%c0_2, %c0_3] : memref<232x32xbf16, #tpu.memory_space<vmem>>, vector<16x32xbf16>
    tpu.vector_store %arg10[%c0_2, %c0_3], %3 {strides = array<i32>} : memref<232x32xbf16, #tpu.memory_space<vmem>>, vector<16x32xbf16>,
    %cst_4 = arith.constant 0.000000e+00 : bf16
    %5 = vector.broadcast %cst_4 : bf16 to vector<16x32xbf16>
    %c216 = arith.constant 216 : index
    %c0_5 = arith.constant 0 : index
    %6 = vector.load %arg10[%c216, %c0_5] : memref<232x32xbf16, #tpu.memory_space<vmem>>, vector<16x32xbf16>
    tpu.vector_store %arg10[%c216, %c0_5], %5 {strides = array<i32>} : memref<232x32xbf16, #tpu.memory_space<vmem>>, vector<16x32xbf16>,
    %cst_6 = arith.constant 0.000000e+00 : bf16
    %7 = vector.broadcast %cst_6 : bf16 to vector<16x64xbf16>
    %c0_7 = arith.constant 0 : index
    %c0_8 = arith.constant 0 : index
    %8 = vector.load %arg11[%c0_7, %c0_8] : memref<232x64xbf16, #tpu.memory_space<vmem>>, vector<16x64xbf16>
    tpu.vector_store %arg11[%c0_7, %c0_8], %7 {strides = array<i32>} : memref<232x64xbf16, #tpu.memory_space<vmem>>, vector<16x64xbf16>,
    %cst_9 = arith.constant 0.000000e+00 : bf16
    %9 = vector.broadcast %cst_9 : bf16 to vector<16x64xbf16>
    %c216_10 = arith.constant 216 : index
    %c0_11 = arith.constant 0 : index
    %10 = vector.load %arg11[%c216_10, %c0_11] : memref<232x64xbf16, #tpu.memory_space<vmem>>, vector<16x64xbf16>
    tpu.vector_store %arg11[%c216_10, %c0_11], %9 {strides = array<i32>} : memref<232x64xbf16, #tpu.memory_space<vmem>>, vector<16x64xbf16>,
    %c0_12 = arith.constant 0 : index
    %c0_13 = arith.constant 0 : index
    %c0_14 = arith.constant 0 : index
    %11 = vector.load %arg1[%c0_12, %c0_13, %c0_14] : memref<1x200x36xbf16, #tpu.memory_space<vmem>>, vector<1x200x36xbf16>
    %12 = vector.shape_cast %11 : vector<1x200x36xbf16> to vector<200x36xbf16>
    %c0_15 = arith.constant 0 : index
    %c0_16 = arith.constant 0 : index
    %13 = vector.load %arg3[%c0_15, %c0_16] : memref<36x32xbf16, #tpu.memory_space<vmem>>, vector<36x32xbf16>
    %cst_17 = arith.constant dense<0.000000e+00> : vector<200x32xf32>
    %14 = tpu.matmul %12, %13, %cst_17 {dimension_numbers = #tpu.dot_dimension_numbers<[1], [0], [0], [1], [0, 0, 1, 1], [], []>} : vector<200x36xbf16>, vector<36x32xbf16>, vector<200x32xf32> -> vector<200x32xf32>
    %c0_18 = arith.constant 0 : index
    %c0_19 = arith.constant 0 : index
    %15 = vector.load %arg4[%c0_18, %c0_19] : memref<1x32xf32, #tpu.memory_space<vmem>>, vector<1x32xf32>
    %16 = vector.broadcast %15 : vector<1x32xf32> to vector<200x32xf32>
    %17 = arith.addf %14, %16 : vector<200x32xf32>
    %cst_20 = arith.constant 0.000000e+00 : f32
    %18 = vector.broadcast %cst_20 : f32 to vector<200x32xf32>
    %19 = arith.maximumf %17, %18 : vector<200x32xf32>
    %cst_21 = arith.constant 0.000000e+00 : f32
    %20 = vector.shape_cast %2 : vector<200x1xi1> to vector<200x1xi1>
    %21 = vector.broadcast %20 : vector<200x1xi1> to vector<200x32xi1>
    %22 = vector.broadcast %cst_21 : f32 to vector<200x32xf32>
    %23 = arith.select %21, %19, %22 : vector<200x32xi1>, vector<200x32xf32>
    %24 = arith.truncf %23 : vector<200x32xf32> to vector<200x32xbf16>
    %c16 = arith.constant 16 : index
    %c0_22 = arith.constant 0 : index
    %25 = vector.load %arg10[%c16, %c0_22] : memref<232x32xbf16, #tpu.memory_space<vmem>>, vector<200x32xbf16>
    tpu.vector_store %arg10[%c16, %c0_22], %24 {strides = array<i32>} : memref<232x32xbf16, #tpu.memory_space<vmem>>, vector<200x32xbf16>,
    %c5 = arith.constant 5 : index
    %c0_23 = arith.constant 0 : index
    %26 = vector.load %arg10[%c5, %c0_23] : memref<232x32xbf16, #tpu.memory_space<vmem>>, vector<200x32xbf16>
    %c6 = arith.constant 6 : index
    %c0_24 = arith.constant 0 : index
    %27 = vector.load %arg10[%c6, %c0_24] : memref<232x32xbf16, #tpu.memory_space<vmem>>, vector<200x32xbf16>
    %c7 = arith.constant 7 : index
    %c0_25 = arith.constant 0 : index
    %28 = vector.load %arg10[%c7, %c0_25] : memref<232x32xbf16, #tpu.memory_space<vmem>>, vector<200x32xbf16>
    %c15 = arith.constant 15 : index
    %c0_26 = arith.constant 0 : index
    %29 = vector.load %arg10[%c15, %c0_26] : memref<232x32xbf16, #tpu.memory_space<vmem>>, vector<200x32xbf16>
    %c16_27 = arith.constant 16 : index
    %c0_28 = arith.constant 0 : index
    %30 = vector.load %arg10[%c16_27, %c0_28] : memref<232x32xbf16, #tpu.memory_space<vmem>>, vector<200x32xbf16>
    %c17 = arith.constant 17 : index
    %c0_29 = arith.constant 0 : index
    %31 = vector.load %arg10[%c17, %c0_29] : memref<232x32xbf16, #tpu.memory_space<vmem>>, vector<200x32xbf16>
    %c25 = arith.constant 25 : index
    %c0_30 = arith.constant 0 : index
    %32 = vector.load %arg10[%c25, %c0_30] : memref<232x32xbf16, #tpu.memory_space<vmem>>, vector<200x32xbf16>
    %c26 = arith.constant 26 : index
    %c0_31 = arith.constant 0 : index
    %33 = vector.load %arg10[%c26, %c0_31] : memref<232x32xbf16, #tpu.memory_space<vmem>>, vector<200x32xbf16>
    %c27 = arith.constant 27 : index
    %c0_32 = arith.constant 0 : index
    %34 = vector.load %arg10[%c27, %c0_32] : memref<232x32xbf16, #tpu.memory_space<vmem>>, vector<200x32xbf16>
    %35 = tpu.concatenate %26, %27, %28, %29, %30, %31, %32, %33, %34 in 1 : vector<200x32xbf16>, vector<200x32xbf16>, vector<200x32xbf16>, vector<200x32xbf16>, vector<200x32xbf16>, vector<200x32xbf16>, vector<200x32xbf16>, vector<200x32xbf16>, vector<200x32xbf16> -> vector<200x288xbf16>
    %c0_33 = arith.constant 0 : index
    %c0_34 = arith.constant 0 : index
    %36 = vector.load %arg5[%c0_33, %c0_34] : memref<288x64xbf16, #tpu.memory_space<vmem>>, vector<288x64xbf16>
    %cst_35 = arith.constant dense<0.000000e+00> : vector<200x64xf32>
    %37 = tpu.matmul %35, %36, %cst_35 {dimension_numbers = #tpu.dot_dimension_numbers<[1], [0], [0], [1], [0, 0, 1, 1], [], []>} : vector<200x288xbf16>, vector<288x64xbf16>, vector<200x64xf32> -> vector<200x64xf32>
    %c0_36 = arith.constant 0 : index
    %c0_37 = arith.constant 0 : index
    %38 = vector.load %arg6[%c0_36, %c0_37] : memref<1x64xf32, #tpu.memory_space<vmem>>, vector<1x64xf32>
    %39 = vector.broadcast %38 : vector<1x64xf32> to vector<200x64xf32>
    %40 = arith.addf %37, %39 : vector<200x64xf32>
    %cst_38 = arith.constant 0.000000e+00 : f32
    %41 = vector.broadcast %cst_38 : f32 to vector<200x64xf32>
    %42 = arith.maximumf %40, %41 : vector<200x64xf32>
    %cst_39 = arith.constant 0.000000e+00 : f32
    %43 = vector.shape_cast %2 : vector<200x1xi1> to vector<200x1xi1>
    %44 = vector.broadcast %43 : vector<200x1xi1> to vector<200x64xi1>
    %45 = vector.broadcast %cst_39 : f32 to vector<200x64xf32>
    %46 = arith.select %44, %42, %45 : vector<200x64xi1>, vector<200x64xf32>
    %47 = arith.truncf %46 : vector<200x64xf32> to vector<200x64xbf16>
    %c16_40 = arith.constant 16 : index
    %c0_41 = arith.constant 0 : index
    %48 = vector.load %arg11[%c16_40, %c0_41] : memref<232x64xbf16, #tpu.memory_space<vmem>>, vector<200x64xbf16>
    tpu.vector_store %arg11[%c16_40, %c0_41], %47 {strides = array<i32>} : memref<232x64xbf16, #tpu.memory_space<vmem>>, vector<200x64xbf16>,
    %c5_42 = arith.constant 5 : index
    %c0_43 = arith.constant 0 : index
    %49 = vector.load %arg11[%c5_42, %c0_43] : memref<232x64xbf16, #tpu.memory_space<vmem>>, vector<200x64xbf16>
    %c6_44 = arith.constant 6 : index
    %c0_45 = arith.constant 0 : index
    %50 = vector.load %arg11[%c6_44, %c0_45] : memref<232x64xbf16, #tpu.memory_space<vmem>>, vector<200x64xbf16>
    %c7_46 = arith.constant 7 : index
    %c0_47 = arith.constant 0 : index
    %51 = vector.load %arg11[%c7_46, %c0_47] : memref<232x64xbf16, #tpu.memory_space<vmem>>, vector<200x64xbf16>
    %c15_48 = arith.constant 15 : index
    %c0_49 = arith.constant 0 : index
    %52 = vector.load %arg11[%c15_48, %c0_49] : memref<232x64xbf16, #tpu.memory_space<vmem>>, vector<200x64xbf16>
    %c16_50 = arith.constant 16 : index
    %c0_51 = arith.constant 0 : index
    %53 = vector.load %arg11[%c16_50, %c0_51] : memref<232x64xbf16, #tpu.memory_space<vmem>>, vector<200x64xbf16>
    %c17_52 = arith.constant 17 : index
    %c0_53 = arith.constant 0 : index
    %54 = vector.load %arg11[%c17_52, %c0_53] : memref<232x64xbf16, #tpu.memory_space<vmem>>, vector<200x64xbf16>
    %c25_54 = arith.constant 25 : index
    %c0_55 = arith.constant 0 : index
    %55 = vector.load %arg11[%c25_54, %c0_55] : memref<232x64xbf16, #tpu.memory_space<vmem>>, vector<200x64xbf16>
    %c26_56 = arith.constant 26 : index
    %c0_57 = arith.constant 0 : index
    %56 = vector.load %arg11[%c26_56, %c0_57] : memref<232x64xbf16, #tpu.memory_space<vmem>>, vector<200x64xbf16>
    %c27_58 = arith.constant 27 : index
    %c0_59 = arith.constant 0 : index
    %57 = vector.load %arg11[%c27_58, %c0_59] : memref<232x64xbf16, #tpu.memory_space<vmem>>, vector<200x64xbf16>
    %58 = tpu.concatenate %49, %50, %51, %52, %53, %54, %55, %56, %57 in 1 : vector<200x64xbf16>, vector<200x64xbf16>, vector<200x64xbf16>, vector<200x64xbf16>, vector<200x64xbf16>, vector<200x64xbf16>, vector<200x64xbf16>, vector<200x64xbf16>, vector<200x64xbf16> -> vector<200x576xbf16>
    %c0_60 = arith.constant 0 : index
    %c0_61 = arith.constant 0 : index
    %59 = vector.load %arg7[%c0_60, %c0_61] : memref<576x128xbf16, #tpu.memory_space<vmem>>, vector<576x128xbf16>
    %cst_62 = arith.constant dense<0.000000e+00> : vector<200x128xf32>
    %60 = tpu.matmul %58, %59, %cst_62 {dimension_numbers = #tpu.dot_dimension_numbers<[1], [0], [0], [1], [0, 0, 1, 1], [], []>} : vector<200x576xbf16>, vector<576x128xbf16>, vector<200x128xf32> -> vector<200x128xf32>
    %c0_63 = arith.constant 0 : index
    %c0_64 = arith.constant 0 : index
    %61 = vector.load %arg8[%c0_63, %c0_64] : memref<1x128xf32, #tpu.memory_space<vmem>>, vector<1x128xf32>
    %62 = vector.broadcast %61 : vector<1x128xf32> to vector<200x128xf32>
    %63 = arith.addf %60, %62 : vector<200x128xf32>
    %cst_65 = arith.constant 0.000000e+00 : f32
    %64 = vector.broadcast %cst_65 : f32 to vector<200x128xf32>
    %65 = arith.maximumf %63, %64 : vector<200x128xf32>
    %cst_66 = arith.constant 0.000000e+00 : f32
    %66 = vector.shape_cast %2 : vector<200x1xi1> to vector<200x1xi1>
    %67 = vector.broadcast %66 : vector<200x1xi1> to vector<200x128xi1>
    %68 = vector.broadcast %cst_66 : f32 to vector<200x128xf32>
    %69 = arith.select %67, %65, %68 : vector<200x128xi1>, vector<200x128xf32>
    %70 = arith.truncf %69 : vector<200x128xf32> to vector<200x128xbf16>
    %c0_67 = arith.constant 0 : index
    %c0_68 = arith.constant 0 : index
    %c0_69 = arith.constant 0 : index
    %71 = vector.load %arg9[%c0_67, %c0_68, %c0_69] : memref<1x200x128xbf16, #tpu.memory_space<vmem>>, vector<1x200x128xbf16>
    %72 = vector.shape_cast %71 : vector<1x200x128xbf16> to vector<200x128xbf16>
    %73 = vector.shape_cast %70 : vector<200x128xbf16> to vector<1x200x128xbf16>
    tpu.vector_store %arg9[%c0_67, %c0_68, %c0_69], %73 {strides = array<i32>} : memref<1x200x128xbf16, #tpu.memory_space<vmem>>, vector<1x200x128xbf16>,
    return
  }
  func.func @transform_0(%arg0: i32) -> (i32, i32, i32) {
    %c0_i32 = arith.constant 0 : i32
    %c0_i32_0 = arith.constant 0 : i32
    %c0_i32_1 = arith.constant 0 : i32
    return %arg0, %c0_i32, %c0_i32_0 : i32, i32, i32
  }
  func.func @transform_1(%arg0: i32) -> (i32, i32) {
    %c0_i32 = arith.constant 0 : i32
    %c0_i32_0 = arith.constant 0 : i32
    %c0_i32_1 = arith.constant 0 : i32
    return %c0_i32, %c0_i32_0 : i32, i32
  }
  func.func @transform_2(%arg0: i32) -> (i32, i32) {
    %c0_i32 = arith.constant 0 : i32
    %c0_i32_0 = arith.constant 0 : i32
    %c0_i32_1 = arith.constant 0 : i32
    return %c0_i32, %c0_i32_0 : i32, i32
  }
  func.func @transform_3(%arg0: i32) -> (i32, i32) {
    %c0_i32 = arith.constant 0 : i32
    %c0_i32_0 = arith.constant 0 : i32
    %c0_i32_1 = arith.constant 0 : i32
    return %c0_i32, %c0_i32_0 : i32, i32
  }
  func.func @transform_4(%arg0: i32) -> (i32, i32) {
    %c0_i32 = arith.constant 0 : i32
    %c0_i32_0 = arith.constant 0 : i32
    %c0_i32_1 = arith.constant 0 : i32
    return %c0_i32, %c0_i32_0 : i32, i32
  }
  func.func @transform_5(%arg0: i32) -> (i32, i32) {
    %c0_i32 = arith.constant 0 : i32
    %c0_i32_0 = arith.constant 0 : i32
    %c0_i32_1 = arith.constant 0 : i32
    return %c0_i32, %c0_i32_0 : i32, i32
  }
  func.func @transform_6(%arg0: i32) -> (i32, i32) {
    %c0_i32 = arith.constant 0 : i32
    %c0_i32_0 = arith.constant 0 : i32
    %c0_i32_1 = arith.constant 0 : i32
    return %c0_i32, %c0_i32_0 : i32, i32
  }
  func.func @transform_7(%arg0: i32) -> (i32, i32) {
    %c0_i32 = arith.constant 0 : i32
    %c0_i32_0 = arith.constant 0 : i32
    %c0_i32_1 = arith.constant 0 : i32
    return %c0_i32, %c0_i32_0 : i32, i32
  }
  func.func @transform_8(%arg0: i32) -> (i32, i32, i32) {
    %c0_i32 = arith.constant 0 : i32
    %c0_i32_0 = arith.constant 0 : i32
    %c0_i32_1 = arith.constant 0 : i32
    return %arg0, %c0_i32, %c0_i32_0 : i32, i32, i32
  }
}

module attributes {stable_mosaic.version = 11 : i64} {
  func.func @_head_kernel(%arg0: i32, %arg1: memref<2x1280xbf16, #tpu.memory_space<vmem>>, %arg2: memref<1280x128xbf16, #tpu.memory_space<vmem>>, %arg3: memref<1x128xf32, #tpu.memory_space<vmem>>, %arg4: memref<128x128xbf16, #tpu.memory_space<vmem>>, %arg5: memref<1x128xf32, #tpu.memory_space<vmem>>, %arg6: memref<128x128xbf16, #tpu.memory_space<vmem>>, %arg7: memref<1x128xf32, #tpu.memory_space<vmem>>, %arg8: memref<2x128xf32, #tpu.memory_space<vmem>>, %arg9: memref<2x128xf32, #tpu.memory_space<vmem>>) attributes {dimension_semantics = [#tpu.dimension_semantics<arbitrary>], iteration_bounds = array<i64: 10>, scalar_prefetch = 0 : i64, scratch_operands = 1 : i64, tpu.core_type = #tpu.core_type<tc>, window_params = [{transform_indices = @transform_0, window_bounds = array<i64: 2, 1280>}, {transform_indices = @transform_1, window_bounds = array<i64: 1280, 128>}, {pipeline_mode = #tpu.pipeline_mode<synchronous>, transform_indices = @transform_2, window_bounds = array<i64: 1, 128>}, {pipeline_mode = #tpu.pipeline_mode<synchronous>, transform_indices = @transform_3, window_bounds = array<i64: 128, 128>}, {pipeline_mode = #tpu.pipeline_mode<synchronous>, transform_indices = @transform_4, window_bounds = array<i64: 1, 128>}, {pipeline_mode = #tpu.pipeline_mode<synchronous>, transform_indices = @transform_5, window_bounds = array<i64: 128, 128>}, {pipeline_mode = #tpu.pipeline_mode<synchronous>, transform_indices = @transform_6, window_bounds = array<i64: 1, 128>}, {pipeline_mode = #tpu.pipeline_mode<synchronous>, transform_indices = @transform_7, window_bounds = array<i64: 2, 128>}]} {
    %c0_i32 = arith.constant 0 : i32
    %0 = arith.cmpi eq, %arg0, %c0_i32 : i32
    %1 = arith.extui %0 : i1 to i32
    %c0_i32_0 = arith.constant 0 : i32
    %2 = arith.cmpi ne, %1, %c0_i32_0 : i32
    scf.if %2 {
      %cst_9 = arith.constant 0.000000e+00 : f32
      %12 = vector.broadcast %cst_9 : f32 to vector<2x128xf32>
      %c0_10 = arith.constant 0 : index
      %c0_11 = arith.constant 0 : index
      %13 = vector.load %arg9[%c0_10, %c0_11] : memref<2x128xf32, #tpu.memory_space<vmem>>, vector<2x128xf32>
      tpu.vector_store %arg9[%c0_10, %c0_11], %12 {strides = array<i32>} : memref<2x128xf32, #tpu.memory_space<vmem>>, vector<2x128xf32>,
    } else {
    }
    %c0 = arith.constant 0 : index
    %c0_1 = arith.constant 0 : index
    %3 = vector.load %arg9[%c0, %c0_1] : memref<2x128xf32, #tpu.memory_space<vmem>>, vector<2x128xf32>
    %c0_2 = arith.constant 0 : index
    %c0_3 = arith.constant 0 : index
    %4 = vector.load %arg1[%c0_2, %c0_3] : memref<2x1280xbf16, #tpu.memory_space<vmem>>, vector<2x1280xbf16>
    %c0_4 = arith.constant 0 : index
    %c0_5 = arith.constant 0 : index
    %5 = vector.load %arg2[%c0_4, %c0_5] : memref<1280x128xbf16, #tpu.memory_space<vmem>>, vector<1280x128xbf16>
    %cst = arith.constant dense<0.000000e+00> : vector<2x128xf32>
    %6 = tpu.matmul %4, %5, %cst {dimension_numbers = #tpu.dot_dimension_numbers<[1], [0], [0], [1], [0, 0, 1, 1], [], []>} : vector<2x1280xbf16>, vector<1280x128xbf16>, vector<2x128xf32> -> vector<2x128xf32>
    %7 = arith.addf %3, %6 : vector<2x128xf32>
    %c0_6 = arith.constant 0 : index
    %c0_7 = arith.constant 0 : index
    %8 = vector.load %arg9[%c0_6, %c0_7] : memref<2x128xf32, #tpu.memory_space<vmem>>, vector<2x128xf32>
    tpu.vector_store %arg9[%c0_6, %c0_7], %7 {strides = array<i32>} : memref<2x128xf32, #tpu.memory_space<vmem>>, vector<2x128xf32>,
    %c9_i32 = arith.constant 9 : i32
    %9 = arith.cmpi eq, %arg0, %c9_i32 : i32
    %10 = arith.extui %9 : i1 to i32
    %c0_i32_8 = arith.constant 0 : i32
    %11 = arith.cmpi ne, %10, %c0_i32_8 : i32
    scf.if %11 {
      %c0_9 = arith.constant 0 : index
      %c0_10 = arith.constant 0 : index
      %12 = vector.load %arg9[%c0_9, %c0_10] : memref<2x128xf32, #tpu.memory_space<vmem>>, vector<2x128xf32>
      %c0_11 = arith.constant 0 : index
      %c0_12 = arith.constant 0 : index
      %13 = vector.load %arg3[%c0_11, %c0_12] : memref<1x128xf32, #tpu.memory_space<vmem>>, vector<1x128xf32>
      %14 = vector.broadcast %13 : vector<1x128xf32> to vector<2x128xf32>
      %15 = arith.addf %12, %14 : vector<2x128xf32>
      %16 = math.tanh %15 : vector<2x128xf32>
      %17 = arith.truncf %16 : vector<2x128xf32> to vector<2x128xbf16>
      %c0_13 = arith.constant 0 : index
      %c0_14 = arith.constant 0 : index
      %18 = vector.load %arg4[%c0_13, %c0_14] : memref<128x128xbf16, #tpu.memory_space<vmem>>, vector<128x128xbf16>
      %cst_15 = arith.constant dense<0.000000e+00> : vector<2x128xf32>
      %19 = tpu.matmul %17, %18, %cst_15 {dimension_numbers = #tpu.dot_dimension_numbers<[1], [0], [0], [1], [0, 0, 1, 1], [], []>} : vector<2x128xbf16>, vector<128x128xbf16>, vector<2x128xf32> -> vector<2x128xf32>
      %c0_16 = arith.constant 0 : index
      %c0_17 = arith.constant 0 : index
      %20 = vector.load %arg5[%c0_16, %c0_17] : memref<1x128xf32, #tpu.memory_space<vmem>>, vector<1x128xf32>
      %21 = vector.broadcast %20 : vector<1x128xf32> to vector<2x128xf32>
      %22 = arith.addf %19, %21 : vector<2x128xf32>
      %23 = math.tanh %22 : vector<2x128xf32>
      %24 = arith.truncf %23 : vector<2x128xf32> to vector<2x128xbf16>
      %c0_18 = arith.constant 0 : index
      %c0_19 = arith.constant 0 : index
      %25 = vector.load %arg6[%c0_18, %c0_19] : memref<128x128xbf16, #tpu.memory_space<vmem>>, vector<128x128xbf16>
      %cst_20 = arith.constant dense<0.000000e+00> : vector<2x128xf32>
      %26 = tpu.matmul %24, %25, %cst_20 {dimension_numbers = #tpu.dot_dimension_numbers<[1], [0], [0], [1], [0, 0, 1, 1], [], []>} : vector<2x128xbf16>, vector<128x128xbf16>, vector<2x128xf32> -> vector<2x128xf32>
      %c0_21 = arith.constant 0 : index
      %c0_22 = arith.constant 0 : index
      %27 = vector.load %arg7[%c0_21, %c0_22] : memref<1x128xf32, #tpu.memory_space<vmem>>, vector<1x128xf32>
      %28 = vector.broadcast %27 : vector<1x128xf32> to vector<2x128xf32>
      %29 = arith.addf %26, %28 : vector<2x128xf32>
      %30 = tpu.iota {dimensions = array<i32: 1>} : vector<2x128xi32>
      %c9_i32_23 = arith.constant 9 : i32
      %31 = vector.broadcast %c9_i32_23 : i32 to vector<2x128xi32>
      %32 = arith.cmpi slt, %30, %31 : vector<2x128xi32>
      %cst_24 = arith.constant -1.000000e+30 : f32
      %33 = vector.broadcast %cst_24 : f32 to vector<2x128xf32>
      %34 = arith.select %32, %29, %33 : vector<2x128xi1>, vector<2x128xf32>
      %cst_25 = arith.constant dense<0xFF800000> : vector<2xf32>
      %35 = vector.multi_reduction <maximumf>, %34, %cst_25 [1] : vector<2x128xf32> to vector<2xf32>
      %36 = vector.shape_cast %35 : vector<2xf32> to vector<2x1xf32>
      %37 = vector.broadcast %36 : vector<2x1xf32> to vector<2x128xf32>
      %38 = arith.subf %29, %37 : vector<2x128xf32>
      %39 = math.exp %38 : vector<2x128xf32>
      %cst_26 = arith.constant 0.000000e+00 : f32
      %40 = vector.broadcast %cst_26 : f32 to vector<2x128xf32>
      %41 = arith.select %32, %39, %40 : vector<2x128xi1>, vector<2x128xf32>
      %cst_27 = arith.constant dense<0.000000e+00> : vector<2xf32>
      %42 = vector.multi_reduction <add>, %41, %cst_27 [1] : vector<2x128xf32> to vector<2xf32>
      %43 = vector.shape_cast %42 : vector<2xf32> to vector<2x1xf32>
      %44 = vector.broadcast %43 : vector<2x1xf32> to vector<2x128xf32>
      %45 = arith.divf %41, %44 : vector<2x128xf32>
      %c9_i32_28 = arith.constant 9 : i32
      %46 = vector.broadcast %c9_i32_28 : i32 to vector<2x128xi32>
      %47 = arith.cmpi eq, %30, %46 : vector<2x128xi32>
      %cst_29 = arith.constant 0.000000e+00 : f32
      %48 = vector.broadcast %cst_29 : f32 to vector<2x128xf32>
      %49 = arith.select %47, %29, %48 : vector<2x128xi1>, vector<2x128xf32>
      %50 = arith.select %32, %45, %49 : vector<2x128xi1>, vector<2x128xf32>
      %c0_30 = arith.constant 0 : index
      %c0_31 = arith.constant 0 : index
      %51 = vector.load %arg8[%c0_30, %c0_31] : memref<2x128xf32, #tpu.memory_space<vmem>>, vector<2x128xf32>
      tpu.vector_store %arg8[%c0_30, %c0_31], %50 {strides = array<i32>} : memref<2x128xf32, #tpu.memory_space<vmem>>, vector<2x128xf32>,
    } else {
    }
    return
  }
  func.func @transform_0(%arg0: i32) -> (i32, i32) {
    %c0_i32 = arith.constant 0 : i32
    %c0_i32_0 = arith.constant 0 : i32
    return %c0_i32, %arg0 : i32, i32
  }
  func.func @transform_1(%arg0: i32) -> (i32, i32) {
    %c0_i32 = arith.constant 0 : i32
    %c0_i32_0 = arith.constant 0 : i32
    return %arg0, %c0_i32 : i32, i32
  }
  func.func @transform_2(%arg0: i32) -> (i32, i32) {
    %c0_i32 = arith.constant 0 : i32
    %c0_i32_0 = arith.constant 0 : i32
    %c0_i32_1 = arith.constant 0 : i32
    return %c0_i32, %c0_i32_0 : i32, i32
  }
  func.func @transform_3(%arg0: i32) -> (i32, i32) {
    %c0_i32 = arith.constant 0 : i32
    %c0_i32_0 = arith.constant 0 : i32
    %c0_i32_1 = arith.constant 0 : i32
    return %c0_i32, %c0_i32_0 : i32, i32
  }
  func.func @transform_4(%arg0: i32) -> (i32, i32) {
    %c0_i32 = arith.constant 0 : i32
    %c0_i32_0 = arith.constant 0 : i32
    %c0_i32_1 = arith.constant 0 : i32
    return %c0_i32, %c0_i32_0 : i32, i32
  }
  func.func @transform_5(%arg0: i32) -> (i32, i32) {
    %c0_i32 = arith.constant 0 : i32
    %c0_i32_0 = arith.constant 0 : i32
    %c0_i32_1 = arith.constant 0 : i32
    return %c0_i32, %c0_i32_0 : i32, i32
  }
  func.func @transform_6(%arg0: i32) -> (i32, i32) {
    %c0_i32 = arith.constant 0 : i32
    %c0_i32_0 = arith.constant 0 : i32
    %c0_i32_1 = arith.constant 0 : i32
    return %c0_i32, %c0_i32_0 : i32, i32
  }
  func.func @transform_7(%arg0: i32) -> (i32, i32) {
    %c0_i32 = arith.constant 0 : i32
    %c0_i32_0 = arith.constant 0 : i32
    %c0_i32_1 = arith.constant 0 : i32
    return %c0_i32, %c0_i32_0 : i32, i32
  }
}

</mosaic_0001>

<bundles_post_ra>
// kernel: tile.8
= control target key start
LH: loop header
LB: loop body
LE: loop exit
PB: predicated region body
PF: predicated region fallthrough
CT: control target
= control target key end

     0   :  { %s22_s0 = inlined_call_operand.vmem [shape: f32[100], index: 0, kind: input, shape index: {}]   ;;  %s23_s1 = inlined_call_operand.vmem [shape: f32[2,100], index: 1, kind: output, shape index: {}]  }
   0x1   :  { %v4_v0 = vld [vmem:[%s22_s0] ss:$0 sm:$0xff] }
   0x2   :  { %5 = vst [vmem:[%s23_s1] sm:$0x3] %v4_v0 }

// kernel: tile.0
= control target key start
LH: loop header
LB: loop body
LE: loop exit
PB: predicated region body
PF: predicated region fallthrough
CT: control target
= control target key end

     0   :  { %s827_s8 = smov 125   ;;  %s828_s9 = smov 126   ;;  %vm8_vm0 = vcmask 7168   ;;  %s1338_s0 = inlined_call_operand.vmem [shape: f32[2,100], index: 0, kind: input, shape index: {}]   ;;  %s1339_s1 = inlined_call_operand.vmem [shape: f32[200,1], index: 1, kind: output, shape index: {}]  }
   0x1   :  { %v5_v0 = vld [vmem:[%s1338_s0] sm:$0x3]  ;;  %s826_s0 = smov 127   ;;  %s829_s10 = smov 124  }
   0x2   :  { %6 = vst [vmem:[#allocation0] sm:$0x3] %v5_v0  ;;  %s830_s11 = smov 123   ;;  %s831_s12 = smov 122  }
   0x3   :  { %s832_s13 = smov 121   ;;  %s833_s14 = smov 120  }
   0x4   :  { %s834_s15 = smov 119   ;;  %s835_s16 = smov 118  }
   0x5   :  { %s836_s17 = smov 117   ;;  %s837_s18 = smov 116  }
   0x6   :  { %s838_s19 = smov 115   ;;  %s839_s20 = smov 114  }
   0x7   :  { %s840_s21 = smov 113   ;;  %s841_s22 = smov 112  }
   0x8   :  { %s842_s23 = smov 111   ;;  %s843_s24 = smov 110  }
   0x9   :  { %v10_v1 = vld [vmem:[#allocation0] sm:$0x3]   ;;  %s844_s25 = smov 109   ;;  %s845_s26 = smov 108  }
   0xa   :  { %v22_v2 = vld [vmem:[#allocation0] sm:$0x3]   ;;  %11 = vrot.lane.b32.xlu0 %v10_v1, %s826_s0  ;;  %s846_s27 = smov 107   ;;  %s847_s28 = smov 106  }
   0xb   :  { %23 = vrot.lane.b32.xlu1 %v22_v2, %s827_s8  ;;  %v16_v3 = vld [vmem:[#allocation0] sm:$0x3]   ;;  %s848_s29 = smov 105   ;;  %s849_s30 = smov 104  }
   0xc   :  { %v28_v4 = vld [vmem:[#allocation0] sm:$0x3]   ;;  %s173_s2 = smov 3  ;;  %s850_s3 = smov 103  }
   0xd   :  { %v34_v5 = vld [vmem:[#allocation0] sm:$0x3]   ;;  %s851_s4 = smov 102   ;;  %s181_s5 = smov 3 }
   0xe   :  { %17 = vrot.lane.b32.xlu0 %v16_v3, %s828_s9  ;;  %v40_v6 = vld [vmem:[#allocation0] sm:$0x3]   ;;  %s189_s6 = smov 3  ;;  %s852_s7 = smov 101  }
   0xf   :  { %29 = vrot.lane.b32.xlu1 %v28_v4, %s829_s10  ;;  %v46_v7 = vld [vmem:[#allocation0] sm:$0x3]   ;;  %s853_s0 = smov 100   ;;  %s197_s8 = smov 3 }
  0x10   :  { %v52_v8 = vld [vmem:[#allocation0] sm:$0x3]   ;;  %s854_s9 = smov 99   ;;  %s855_s10 = smov 98  }
  0x11   :  { %v58_v9 = vld [vmem:[#allocation0] sm:$0x3]  }
  0x12   :  { %35 = vrot.lane.b32.xlu0 %v34_v5, %s830_s11  ;;  %v64_v10 = vld [vmem:[#allocation0] sm:$0x3]   ;;  %s856_s11 = smov 97  }
  0x13   :  { %41 = vrot.lane.b32.xlu1 %v40_v6, %s831_s12  ;;  %v70_v11 = vld [vmem:[#allocation0] sm:$0x3]   ;;  %s857_s12 = smov 96  }
  0x14   :  { %v76_v12 = vld [vmem:[#allocation0] sm:$0x3]  }
  0x15   :  { %v82_v13 = vld [vmem:[#allocation0] sm:$0x3]  }
  0x16   :  { %47 = vrot.lane.b32.xlu0 %v46_v7, %s832_s13  ;;  %v88_v14 = vld [vmem:[#allocation0] sm:$0x3]   ;;  %s858_s13 = smov 95  }
  0x17   :  { %53 = vrot.lane.b32.xlu1 %v52_v8, %s833_s14  ;;  %v94_v15 = vld [vmem:[#allocation0] sm:$0x3]   ;;  %s859_s14 = smov 94  }
  0x18   :  { %v100_v16 = vld [vmem:[#allocation0] sm:$0x3]  }
  0x19   :  { %v106_v17 = vld [vmem:[#allocation0] sm:$0x3]  }
  0x1a   :  { %59 = vrot.lane.b32.xlu0 %v58_v9, %s834_s15  ;;  %v112_v18 = vld [vmem:[#allocation0] sm:$0x3]   ;;  %s860_s15 = smov 93  }
  0x1b   :  { %65 = vrot.lane.b32.xlu1 %v64_v10, %s835_s16  ;;  %v118_v19 = vld [vmem:[#allocation0] sm:$0x3]   ;;  %s861_s16 = smov 92  }
  0x1c   :  { %v124_v20 = vld [vmem:[#allocation0] sm:$0x3]  }
  0x1d   :  { %v130_v21 = vld [vmem:[#allocation0] sm:$0x3]  }
  0x1e   :  { %71 = vrot.lane.b32.xlu0 %v70_v11, %s836_s17  ;;  %v136_v22 = vld [vmem:[#allocation0] sm:$0x3]   ;;  %s862_s17 = smov 91  }
  0x1f   :  { %77 = vrot.lane.b32.xlu1 %v76_v12, %s837_s18  ;;  %v142_v23 = vld [vmem:[#allocation0] sm:$0x3]   ;;  %s863_s18 = smov 90  }
  0x20   :  { %v148_v24 = vld [vmem:[#allocation0] sm:$0x3]  }
  0x21   :  { %v154_v25 = vld [vmem:[#allocation0] sm:$0x3]  }
  0x22   :  { %83 = vrot.lane.b32.xlu0 %v82_v13, %s838_s19  ;;  %v160_v26 = vld [vmem:[#allocation0] sm:$0x3]   ;;  %s864_s19 = smov 89  }
  0x23   :  { %89 = vrot.lane.b32.xlu1 %v88_v14, %s839_s20  ;;  %v166_v27 = vld [vmem:[#allocation0] sm:$0x3]   ;;  %s865_s20 = smov 88  }
  0x24   :  { %v174_v28 = vld [vmem:[#allocation0 + $0x1] ss:$-1 sm:%s173_s2]   ;;  %s876_s2 = smov 77  }
  0x25   :  { %v182_v29 = vld [vmem:[#allocation0 + $0x1] ss:$-1 sm:%s181_s5]   ;;  %s879_s5 = smov 74  }
  0x26   :  { %95 = vrot.lane.b32.xlu0 %v94_v15, %s840_s21  ;;  %v190_v30 = vld [vmem:[#allocation0 + $0x1] ss:$-1 sm:%s189_s6]   ;;  %s866_s21 = smov 87   ;;  %s880_s6 = smov 73  }
  0x27   :  { %101 = vrot.lane.b32.xlu1 %v100_v16, %s841_s22  ;;  %v198_v31 = vld [vmem:[#allocation0 + $0x1] ss:$-1 sm:%s197_s8]   ;;  %s867_s22 = smov 86   ;;  %s882_s8 = smov 71  }
  0x28   :  { %v204_v32 = vld [vmem:[#allocation0] sm:$0x3]  }
  0x29   :  { %v210_v33 = vld [vmem:[#allocation0] sm:$0x3]  }
  0x2a   :  { %107 = vrot.lane.b32.xlu0 %v106_v17, %s842_s23  ;;  %v216_v34 = vld [vmem:[#allocation0] sm:$0x3]   ;;  %s868_s23 = smov 85  }
  0x2b   :  { %113 = vrot.lane.b32.xlu1 %v112_v18, %s843_s24  ;;  %v222_v35 = vld [vmem:[#allocation0] sm:$0x3]   ;;  %s869_s24 = smov 84  }
  0x2c   :  { %v228_v36 = vld [vmem:[#allocation0] sm:$0x3]  }
  0x2d   :  { %v234_v37 = vld [vmem:[#allocation0] sm:$0x3]  }
  0x2e   :  { %119 = vrot.lane.b32.xlu0 %v118_v19, %s844_s25  ;;  %v240_v38 = vld [vmem:[#allocation0] sm:$0x3]   ;;  %s870_s25 = smov 83  }
  0x2f   :  { %125 = vrot.lane.b32.xlu1 %v124_v20, %s845_s26  ;;  %v246_v39 = vld [vmem:[#allocation0] sm:$0x3]   ;;  %s871_s26 = smov 82  }
  0x30   :  { %v252_v40 = vld [vmem:[#allocation0] sm:$0x3]  }
  0x31   :  { %v258_v41 = vld [vmem:[#allocation0] sm:$0x3]  }
  0x32   :  { %131 = vrot.lane.b32.xlu0 %v130_v21, %s846_s27  ;;  %v264_v42 = vld [vmem:[#allocation0] sm:$0x3]   ;;  %s872_s27 = smov 81  }
  0x33   :  { %137 = vrot.lane.b32.xlu1 %v136_v22, %s847_s28  ;;  %v270_v43 = vld [vmem:[#allocation0] sm:$0x3]   ;;  %s873_s28 = smov 80  }
  0x34   :  { %v276_v44 = vld [vmem:[#allocation0] sm:$0x3]  }
  0x35   :  { %v282_v45 = vld [vmem:[#allocation0] sm:$0x3]  }
  0x36   :  { %143 = vrot.lane.b32.xlu0 %v142_v23, %s848_s29  ;;  %v288_v46 = vld [vmem:[#allocation0] sm:$0x3]   ;;  %s874_s29 = smov 79  }
  0x37   :  { %149 = vrot.lane.b32.xlu1 %v148_v24, %s849_s30  ;;  %v294_v47 = vld [vmem:[#allocation0] sm:$0x3]   ;;  %s875_s30 = smov 78  }
  0x38   :  { %v300_v48 = vld [vmem:[#allocation0] sm:$0x3]  }
  0x39   :  { %v306_v49 = vld [vmem:[#allocation0] sm:$0x3]  }
  0x3a   :  { %155 = vrot.lane.b32.xlu0 %v154_v25, %s850_s3  ;;  %v312_v50 = vld [vmem:[#allocation0] sm:$0x3]   ;;  %s877_s3 = smov 76  }
  0x3b   :  { %161 = vrot.lane.b32.xlu1 %v160_v26, %s851_s4  ;;  %v318_v51 = vld [vmem:[#allocation0] sm:$0x3]   ;;  %s878_s4 = smov 75  }
  0x3c   :  { %v324_v52 = vld [vmem:[#allocation0] sm:$0x3]  }
  0x3d   :  { %v330_v53 = vld [vmem:[#allocation0] sm:$0x3]  }
  0x3e   :  { %167 = vrot.lane.b32.xlu0 %v166_v27, %s852_s7  ;;  %v336_v54 = vld [vmem:[#allocation0] sm:$0x3]   ;;  %s881_s7 = smov 72  }
  0x3f   :  { %175 = vrot.lane.b32.xlu1 %v174_v28, %s853_s0  ;;  %v342_v55 = vld [vmem:[#allocation0] sm:$0x3]   ;;  %s373_s0 = smov 3 }
  0x40   :  { %v348_v56 = vld [vmem:[#allocation0] sm:$0x3]  }
  0x41   :  { %v354_v57 = vld [vmem:[#allocation0] sm:$0x3]  }
  0x42   :  { %183 = vrot.lane.b32.xlu0 %v182_v29, %s854_s9  ;;  %v360_v58 = vld [vmem:[#allocation0] sm:$0x3]   ;;  %s883_s9 = smov 70  }
  0x43   :  { %191 = vrot.lane.b32.xlu1 %v190_v30, %s855_s10  ;;  %v366_v59 = vld [vmem:[#allocation0] sm:$0x3]   ;;  %s381_s10 = smov 3 }
  0x44   :  { %v374_v60 = vld [vmem:[#allocation0 + $0x1] ss:$-1 sm:%s373_s0]  }
  0x45   :  { %v382_v63 = vld [vmem:[#allocation0 + $0x1] ss:$-1 sm:%s381_s10]  }
  0x46   :  { %199 = vrot.lane.b32.xlu0 %v198_v31, %s856_s11  ;;  %s389_s11 = smov 3  ;;  %v404_v4 = vld [vmem:[#allocation0] sm:$0x3]  }
  0x47   :  { %205 = vrot.lane.b32.xlu1 %v204_v32, %s857_s12  ;;  %v390_v0 = vld [vmem:[#allocation0 + $0x1] ss:$-1 sm:%s389_s11]   ;;  %s892_s11 = smov 61   ;;  %s893_s12 = smov 60  }
  0x48   :  { %v410_v7 = vld [vmem:[#allocation0] sm:$0x3]  }
  0x49   :  { %v416_v8 = vld [vmem:[#allocation0] sm:$0x3]  }
  0x4a   :  { %211 = vrot.lane.b32.xlu0 %v210_v33, %s858_s13  ;;  %v422_v11 = vld [vmem:[#allocation0] sm:$0x3]   ;;  %s573_s13 = smov 3 }
  0x4b   :  { %217 = vrot.lane.b32.xlu1 %v216_v34, %s859_s14  ;;  %v428_v12 = vld [vmem:[#allocation0] sm:$0x3]  }
  0x4c   :  { %v434_v15 = vld [vmem:[#allocation0] sm:$0x3]  }
  0x4d   :  { %v440_v16 = vld [vmem:[#allocation0] sm:$0x3]  }
  0x4e   :  { %223 = vrot.lane.b32.xlu0 %v222_v35, %s860_s15  ;;  %v446_v19 = vld [vmem:[#allocation0] sm:$0x3]  }
  0x4f   :  { %229 = vrot.lane.b32.xlu1 %v228_v36, %s861_s16  ;;  %s884_s16 = smov 69   ;;  %v452_v20 = vld [vmem:[#allocation0] sm:$0x3]  }
  0x50   :  { %v458_v23 = vld [vmem:[#allocation0] sm:$0x3]  }
  0x51   :  { %v464_v24 = vld [vmem:[#allocation0] sm:$0x3]  }
  0x52   :  { %235 = vrot.lane.b32.xlu0 %v234_v37, %s862_s17  ;;  %s885_s17 = smov 68   ;;  %v470_v27 = vld [vmem:[#allocation0] sm:$0x3]  }
  0x53   :  { %241 = vrot.lane.b32.xlu1 %v240_v38, %s863_s18  ;;  %s397_s18 = smov 3  ;;  %v476_v28 = vld [vmem:[#allocation0] sm:$0x3]  }
  0x54   :  { %v398_v3 = vld [vmem:[#allocation0 + $0x1] ss:$-1 sm:%s397_s18]   ;;  %s895_s18 = smov 58  }
  0x55   :  { %v482_v31 = vld [vmem:[#allocation0] sm:$0x3]  }
  0x56   :  { %247 = vrot.lane.b32.xlu0 %v246_v39, %s864_s19  ;;  %v488_v32 = vld [vmem:[#allocation0] sm:$0x3]   ;;  %s915_s19 = smov 38  }
  0x57   :  { %253 = vrot.lane.b32.xlu1 %v252_v40, %s865_s20  ;;  %v494_v35 = vld [vmem:[#allocation0] sm:$0x3]   ;;  %s581_s20 = smov 3 }
  0x58   :  { %v500_v36 = vld [vmem:[#allocation0] sm:$0x3]  }
  0x59   :  { %v506_v39 = vld [vmem:[#allocation0] sm:$0x3]  }
  0x5a   :  { %259 = vrot.lane.b32.xlu0 %v258_v41, %s866_s21  ;;  %v512_v40 = vld [vmem:[#allocation0] sm:$0x3]   ;;  %s589_s21 = smov 3 }
  0x5b   :  { %265 = vrot.lane.b32.xlu1 %v264_v42, %s867_s22 }
  0x5e   :  { %271 = vrot.lane.b32.xlu0 %v270_v43, %s868_s23  ;;  %s886_s23 = smov 67   ;;  %v518_v43 = vld [vmem:[#allocation0] sm:$0x3]  }
  0x5f   :  { %277 = vrot.lane.b32.xlu1 %v276_v44, %s869_s24  ;;  %s887_s24 = smov 66   ;;  %v524_v44 = vld [vmem:[#allocation0] sm:$0x3]  }
  0x62   :  { %283 = vrot.lane.b32.xlu0 %v282_v45, %s870_s25 }
  0x63   :  { %289 = vrot.lane.b32.xlu1 %v288_v46, %s871_s26  ;;  %s916_s26 = smov 37  }
  0x66   :  { %295 = vrot.lane.b32.xlu0 %v294_v47, %s872_s27  ;;  %v530_v47 = vld [vmem:[#allocation0] sm:$0x3]   ;;  %s917_s27 = smov 36  }
  0x67   :  { %301 = vrot.lane.b32.xlu1 %v300_v48, %s873_s28  ;;  %v536_v48 = vld [vmem:[#allocation0] sm:$0x3]   ;;  %s597_s28 = smov 3 }
  0x6a   :  { %307 = vrot.lane.b32.xlu0 %v306_v49, %s874_s29  ;;  %s888_s29 = smov 65  }
  0x6b   :  { %313 = vrot.lane.b32.xlu1 %v312_v50, %s875_s30  ;;  %s889_s30 = smov 64  }
  0x6e   :  { %319 = vrot.lane.b32.xlu0 %v318_v51, %s876_s2  ;;  %v542_v51 = vld [vmem:[#allocation0] sm:$0x3]  }
  0x6f   :  { %325 = vrot.lane.b32.xlu1 %v324_v52, %s877_s3  ;;  %v548_v52 = vld [vmem:[#allocation0] sm:$0x3]  }
  0x72   :  { %331 = vrot.lane.b32.xlu0 %v330_v53, %s878_s4 }
  0x73   :  { %337 = vrot.lane.b32.xlu1 %v336_v54, %s879_s5 }
  0x76   :  { %343 = vrot.lane.b32.xlu0 %v342_v55, %s880_s6  ;;  %s890_s6 = smov 63   ;;  %v554_v55 = vld [vmem:[#allocation0] sm:$0x3]  }
  0x77   :  { %349 = vrot.lane.b32.xlu1 %v348_v56, %s881_s7  ;;  %s891_s7 = smov 62   ;;  %v560_v56 = vld [vmem:[#allocation0] sm:$0x3]  }
  0x7a   :  { %355 = vrot.lane.b32.xlu0 %v354_v57, %s882_s8 }
  0x7b   :  { %361 = vrot.lane.b32.xlu1 %v360_v58, %s883_s9 }
  0x7c   :  { %v12_v61 = vpop.permute.xlu0 %11  }
  0x7d   :  { %v24_v62 = vpop.permute.xlu1 %23   ;;  %628 = vst.msk [vmem:[%s1339_s1 + $0x1] ss:$100 sm:$0x3] %vm8_vm0, %v12_v61  }
  0x7e   :  { %630 = vst.msk [vmem:[%s1339_s1 + $0x3] ss:$100 sm:$0x3] %vm8_vm0, %v24_v62   ;;  %367 = vrot.lane.b32.xlu0 %v366_v59, %s884_s16  ;;  %v566_v59 = vld [vmem:[#allocation0] sm:$0x3]  }
  0x7f   :  { %375 = vrot.lane.b32.xlu1 %v374_v60, %s885_s17  ;;  %s894_s17 = smov 59   ;;  %v574_v60 = vld [vmem:[#allocation0 + $0x1] ss:$-1 sm:%s573_s13]  }
  0x80   :  { %v18_v1 = vpop.permute.xlu0 %17  }
  0x81   :  { %v30_v2 = vpop.permute.xlu1 %29   ;;  %629 = vst.msk [vmem:[%s1339_s1 + $0x2] ss:$100 sm:$0x3] %vm8_vm0, %v18_v1  }
  0x82   :  { %631 = vst.msk [vmem:[%s1339_s1 + $0x4] ss:$100 sm:$0x3] %vm8_vm0, %v30_v2   ;;  %383 = vrot.lane.b32.xlu0 %v382_v63, %s886_s23  ;;  %s896_s23 = smov 57   ;;  %v582_v63 = vld [vmem:[#allocation0 + $0x1] ss:$-1 sm:%s581_s20]  }
  0x83   :  { %391 = vrot.lane.b32.xlu1 %v390_v0, %s887_s24  ;;  %s897_s24 = smov 56   ;;  %v590_v0 = vld [vmem:[#allocation0 + $0x1] ss:$-1 sm:%s589_s21]  }
  0x84   :  { %v36_v5 = vpop.permute.xlu0 %35  }
  0x85   :  { %v42_v6 = vpop.permute.xlu1 %41   ;;  %632 = vst.msk [vmem:[%s1339_s1 + $0x5] ss:$100 sm:$0x3] %vm8_vm0, %v36_v5   ;;  %v604_v5 = vld [vmem:[#allocation0] sm:$0x3]  }
  0x86   :  { %633 = vst.msk [vmem:[%s1339_s1 + $0x6] ss:$100 sm:$0x3] %vm8_vm0, %v42_v6   ;;  %399 = vrot.lane.b32.xlu0 %v398_v3, %s888_s29  ;;  %s898_s29 = smov 55   ;;  %v7_v3 = vld [vmem:[#allocation0] sm:$0x3]  }
  0x87   :  { %405 = vrot.lane.b32.xlu1 %v404_v4, %s889_s30  ;;  %s899_s30 = smov 54   ;;  %9 = vst.msk [vmem:[%s1339_s1] ss:$100 sm:$0x3] %vm8_vm0, %v7_v3   ;;  %v598_v4 = vld [vmem:[#allocation0 + $0x1] ss:$-1 sm:%s597_s28]  }
  0x88   :  { %v48_v9 = vpop.permute.xlu0 %47  }
  0x89   :  { %v54_v10 = vpop.permute.xlu1 %53   ;;  %634 = vst.msk [vmem:[%s1339_s1 + $0x7] ss:$100 sm:$0x3] %vm8_vm0, %v48_v9   ;;  %v616_v9 = vld [vmem:[#allocation0] sm:$0x3]  }
  0x8a   :  { %635 = vst.msk [vmem:[%s1339_s1 + $0x8] ss:$100 sm:$0x3] %vm8_vm0, %v54_v10   ;;  %411 = vrot.lane.b32.xlu0 %v410_v7, %s890_s6  ;;  %s900_s6 = smov 53  }
  0x8b   :  { %417 = vrot.lane.b32.xlu1 %v416_v8, %s891_s7  ;;  %s901_s7 = smov 52   ;;  %v610_v8 = vld [vmem:[#allocation0] sm:$0x3]  }
  0x8c   :  { %v60_v13 = vpop.permute.xlu0 %59  }
  0x8d   :  { %v66_v14 = vpop.permute.xlu1 %65   ;;  %636 = vst.msk [vmem:[%s1339_s1 + $0x9] ss:$100 sm:$0x3] %vm8_vm0, %v60_v13  }
  0x8e   :  { %637 = vst.msk [vmem:[%s1339_s1 + $0xa] ss:$100 sm:$0x3] %vm8_vm0, %v66_v14   ;;  %423 = vrot.lane.b32.xlu0 %v422_v11, %s892_s11  ;;  %s902_s11 = smov 51  }
  0x8f   :  { %429 = vrot.lane.b32.xlu1 %v428_v12, %s893_s12  ;;  %s903_s12 = smov 50   ;;  %v622_v12 = vld [vmem:[#allocation0] sm:$0x3]  }
  0x90   :  { %v72_v17 = vpop.permute.xlu0 %71  }
  0x91   :  { %v78_v18 = vpop.permute.xlu1 %77   ;;  %638 = vst.msk [vmem:[%s1339_s1 + $0xb] ss:$100 sm:$0x3] %vm8_vm0, %v72_v17  }
  0x92   :  { %639 = vst.msk [vmem:[%s1339_s1 + $0xc] ss:$100 sm:$0x3] %vm8_vm0, %v78_v18   ;;  %435 = vrot.lane.b32.xlu0 %v434_v15, %s894_s17  ;;  %s904_s17 = smov 49  }
  0x93   :  { %441 = vrot.lane.b32.xlu1 %v440_v16, %s895_s18  ;;  %s905_s18 = smov 48  }
  0x94   :  { %v84_v21 = vpop.permute.xlu0 %83  }
  0x95   :  { %v90_v22 = vpop.permute.xlu1 %89   ;;  %640 = vst.msk [vmem:[%s1339_s1 + $0xd] ss:$100 sm:$0x3] %vm8_vm0, %v84_v21  }
  0x96   :  { %641 = vst.msk [vmem:[%s1339_s1 + $0xe] ss:$100 sm:$0x3] %vm8_vm0, %v90_v22   ;;  %447 = vrot.lane.b32.xlu0 %v446_v19, %s896_s23  ;;  %s906_s23 = smov 47  }
  0x97   :  { %453 = vrot.lane.b32.xlu1 %v452_v20, %s897_s24  ;;  %s907_s24 = smov 46  }
  0x98   :  { %v96_v25 = vpop.permute.xlu0 %95  }
  0x99   :  { %v102_v26 = vpop.permute.xlu1 %101   ;;  %642 = vst.msk [vmem:[%s1339_s1 + $0xf] ss:$100 sm:$0x3] %vm8_vm0, %v96_v25  }
  0x9a   :  { %643 = vst.msk [vmem:[%s1339_s1 + $0x10] ss:$100 sm:$0x3] %vm8_vm0, %v102_v26   ;;  %459 = vrot.lane.b32.xlu0 %v458_v23, %s898_s29  ;;  %s908_s29 = smov 45  }
  0x9b   :  { %465 = vrot.lane.b32.xlu1 %v464_v24, %s899_s30  ;;  %s909_s30 = smov 44  }
  0x9c   :  { %v108_v29 = vpop.permute.xlu0 %107  }
  0x9d   :  { %v114_v30 = vpop.permute.xlu1 %113   ;;  %644 = vst.msk [vmem:[%s1339_s1 + $0x11] ss:$100 sm:$0x3] %vm8_vm0, %v108_v29  }
  0x9e   :  { %645 = vst.msk [vmem:[%s1339_s1 + $0x12] ss:$100 sm:$0x3] %vm8_vm0, %v114_v30   ;;  %471 = vrot.lane.b32.xlu0 %v470_v27, %s900_s6  ;;  %s910_s6 = smov 43  }
  0x9f   :  { %477 = vrot.lane.b32.xlu1 %v476_v28, %s901_s7  ;;  %s911_s7 = smov 42  }
  0xa0   :  { %v120_v33 = vpop.permute.xlu0 %119  }
  0xa1   :  { %v126_v34 = vpop.permute.xlu1 %125   ;;  %646 = vst.msk [vmem:[%s1339_s1 + $0x13] ss:$100 sm:$0x3] %vm8_vm0, %v120_v33  }
  0xa2   :  { %647 = vst.msk [vmem:[%s1339_s1 + $0x14] ss:$100 sm:$0x3] %vm8_vm0, %v126_v34   ;;  %483 = vrot.lane.b32.xlu0 %v482_v31, %s902_s11  ;;  %s912_s11 = smov 41  }
  0xa3   :  { %489 = vrot.lane.b32.xlu1 %v488_v32, %s903_s12  ;;  %s913_s12 = smov 40  }
  0xa4   :  { %v132_v37 = vpop.permute.xlu0 %131  }
  0xa5   :  { %v138_v38 = vpop.permute.xlu1 %137   ;;  %648 = vst.msk [vmem:[%s1339_s1 + $0x15] ss:$100 sm:$0x3] %vm8_vm0, %v132_v37  }
  0xa6   :  { %649 = vst.msk [vmem:[%s1339_s1 + $0x16] ss:$100 sm:$0x3] %vm8_vm0, %v138_v38   ;;  %495 = vrot.lane.b32.xlu0 %v494_v35, %s904_s17  ;;  %s922_s17 = smov 31  }
  0xa7   :  { %501 = vrot.lane.b32.xlu1 %v500_v36, %s905_s18  ;;  %s914_s18 = smov 39  }
  0xa8   :  { %v144_v41 = vpop.permute.xlu0 %143  }
  0xa9   :  { %v150_v42 = vpop.permute.xlu1 %149   ;;  %650 = vst.msk [vmem:[%s1339_s1 + $0x17] ss:$100 sm:$0x3] %vm8_vm0, %v144_v41  }
  0xaa   :  { %651 = vst.msk [vmem:[%s1339_s1 + $0x18] ss:$100 sm:$0x3] %vm8_vm0, %v150_v42   ;;  %507 = vrot.lane.b32.xlu0 %v506_v39, %s906_s23  ;;  %s924_s23 = smov 29  }
  0xab   :  { %513 = vrot.lane.b32.xlu1 %v512_v40, %s907_s24 }
  0xac   :  { %v156_v45 = vpop.permute.xlu0 %155  }
  0xad   :  { %v162_v46 = vpop.permute.xlu1 %161   ;;  %652 = vst.msk [vmem:[%s1339_s1 + $0x19] ss:$100 sm:$0x3] %vm8_vm0, %v156_v45  }
  0xae   :  { %653 = vst.msk [vmem:[%s1339_s1 + $0x1a] ss:$100 sm:$0x3] %vm8_vm0, %v162_v46   ;;  %519 = vrot.lane.b32.xlu0 %v518_v43, %s908_s29 }
  0xaf   :  { %525 = vrot.lane.b32.xlu1 %v524_v44, %s909_s30 }
  0xb0   :  { %v168_v49 = vpop.permute.xlu0 %167  }
  0xb1   :  { %v176_v50 = vpop.permute.xlu1 %175   ;;  %654 = vst.msk [vmem:[%s1339_s1 + $0x1b] ss:$100 sm:$0x3] %vm8_vm0, %v168_v49  }
  0xb2   :  { %655 = vst.msk [vmem:[%s1339_s1 + $0x80] ss:$-100 sm:$0x3] %vm8_vm0, %v176_v50   ;;  %531 = vrot.lane.b32.xlu0 %v530_v47, %s910_s6  ;;  %s918_s6 = smov 35  }
  0xb3   :  { %537 = vrot.lane.b32.xlu1 %v536_v48, %s911_s7  ;;  %s919_s7 = smov 34  }
  0xb4   :  { %v184_v53 = vpop.permute.xlu0 %183  }
  0xb5   :  { %v192_v54 = vpop.permute.xlu1 %191   ;;  %656 = vst.msk [vmem:[%s1339_s1 + $0x81] ss:$-100 sm:$0x3] %vm8_vm0, %v184_v53  }
  0xb6   :  { %657 = vst.msk [vmem:[%s1339_s1 + $0x82] ss:$-100 sm:$0x3] %vm8_vm0, %v192_v54   ;;  %543 = vrot.lane.b32.xlu0 %v542_v51, %s912_s11  ;;  %s920_s11 = smov 33  }
  0xb7   :  { %549 = vrot.lane.b32.xlu1 %v548_v52, %s913_s12  ;;  %s921_s12 = smov 32  }
  0xb8   :  { %v200_v57 = vpop.permute.xlu0 %199  }
  0xb9   :  { %v206_v58 = vpop.permute.xlu1 %205   ;;  %658 = vst.msk [vmem:[%s1339_s1 + $0x83] ss:$-100 sm:$0x3] %vm8_vm0, %v200_v57  }
  0xba   :  { %659 = vst.msk [vmem:[%s1339_s1 + $0x20] ss:$100 sm:$0x3] %vm8_vm0, %v206_v58   ;;  %555 = vrot.lane.b32.xlu0 %v554_v55, %s914_s18  ;;  %s923_s18 = smov 30  }
  0xbb   :  { %561 = vrot.lane.b32.xlu1 %v560_v56, %s915_s19 }
  0xbc   :  { %v212_v61 = vpop.permute.xlu0 %211  }
  0xbd   :  { %v218_v62 = vpop.permute.xlu1 %217   ;;  %660 = vst.msk [vmem:[%s1339_s1 + $0x21] ss:$100 sm:$0x3] %vm8_vm0, %v212_v61  }
  0xbe   :  { %661 = vst.msk [vmem:[%s1339_s1 + $0x22] ss:$100 sm:$0x3] %vm8_vm0, %v218_v62   ;;  %567 = vrot.lane.b32.xlu0 %v566_v59, %s916_s26 }
  0xbf   :  { %575 = vrot.lane.b32.xlu1 %v574_v60, %s917_s27 }
  0xc0   :  { %v224_v1 = vpop.permute.xlu0 %223  }
  0xc1   :  { %v230_v2 = vpop.permute.xlu1 %229   ;;  %662 = vst.msk [vmem:[%s1339_s1 + $0x23] ss:$100 sm:$0x3] %vm8_vm0, %v224_v1  }
  0xc2   :  { %663 = vst.msk [vmem:[%s1339_s1 + $0x24] ss:$100 sm:$0x3] %vm8_vm0, %v230_v2   ;;  %583 = vrot.lane.b32.xlu0 %v582_v63, %s918_s6 }
  0xc3   :  { %591 = vrot.lane.b32.xlu1 %v590_v0, %s919_s7 }
  0xc4   :  { %v236_v6 = vpop.permute.xlu0 %235  }
  0xc5   :  { %v242_v7 = vpop.permute.xlu1 %241   ;;  %664 = vst.msk [vmem:[%s1339_s1 + $0x25] ss:$100 sm:$0x3] %vm8_vm0, %v236_v6  }
  0xc6   :  { %665 = vst.msk [vmem:[%s1339_s1 + $0x26] ss:$100 sm:$0x3] %vm8_vm0, %v242_v7   ;;  %599 = vrot.lane.b32.xlu0 %v598_v4, %s920_s11 }
  0xc7   :  { %605 = vrot.lane.b32.xlu1 %v604_v5, %s921_s12 }
  0xc8   :  { %v248_v10 = vpop.permute.xlu0 %247  }
  0xc9   :  { %v254_v11 = vpop.permute.xlu1 %253   ;;  %666 = vst.msk [vmem:[%s1339_s1 + $0x27] ss:$100 sm:$0x3] %vm8_vm0, %v248_v10  }
  0xca   :  { %667 = vst.msk [vmem:[%s1339_s1 + $0x28] ss:$100 sm:$0x3] %vm8_vm0, %v254_v11   ;;  %611 = vrot.lane.b32.xlu0 %v610_v8, %s922_s17 }
  0xcb   :  { %617 = vrot.lane.b32.xlu1 %v616_v9, %s923_s18 }
  0xcc   :  { %v260_v13 = vpop.permute.xlu0 %259  }
  0xcd   :  { %v266_v14 = vpop.permute.xlu1 %265   ;;  %668 = vst.msk [vmem:[%s1339_s1 + $0x29] ss:$100 sm:$0x3] %vm8_vm0, %v260_v13  }
  0xce   :  { %669 = vst.msk [vmem:[%s1339_s1 + $0x2a] ss:$100 sm:$0x3] %vm8_vm0, %v266_v14   ;;  %623 = vrot.lane.b32.xlu0 %v622_v12, %s924_s23 }
  0xd0   :  { %v272_v15 = vpop.permute.xlu0 %271  }
  0xd1   :  { %v278_v16 = vpop.permute.xlu1 %277   ;;  %670 = vst.msk [vmem:[%s1339_s1 + $0x2b] ss:$100 sm:$0x3] %vm8_vm0, %v272_v15  }
  0xd2   :  { %671 = vst.msk [vmem:[%s1339_s1 + $0x2c] ss:$100 sm:$0x3] %vm8_vm0, %v278_v16  }
  0xd4   :  { %v284_v17 = vpop.permute.xlu0 %283  }
  0xd5   :  { %v290_v18 = vpop.permute.xlu1 %289   ;;  %672 = vst.msk [vmem:[%s1339_s1 + $0x2d] ss:$100 sm:$0x3] %vm8_vm0, %v284_v17  }
  0xd6   :  { %673 = vst.msk [vmem:[%s1339_s1 + $0x2e] ss:$100 sm:$0x3] %vm8_vm0, %v290_v18  }
  0xd8   :  { %v296_v19 = vpop.permute.xlu0 %295  }
  0xd9   :  { %v302_v20 = vpop.permute.xlu1 %301   ;;  %674 = vst.msk [vmem:[%s1339_s1 + $0x2f] ss:$100 sm:$0x3] %vm8_vm0, %v296_v19  }
  0xda   :  { %675 = vst.msk [vmem:[%s1339_s1 + $0x30] ss:$100 sm:$0x3] %vm8_vm0, %v302_v20  }
  0xdc   :  { %v308_v21 = vpop.permute.xlu0 %307  }
  0xdd   :  { %v314_v22 = vpop.permute.xlu1 %313   ;;  %676 = vst.msk [vmem:[%s1339_s1 + $0x31] ss:$100 sm:$0x3] %vm8_vm0, %v308_v21  }
  0xde   :  { %677 = vst.msk [vmem:[%s1339_s1 + $0x32] ss:$100 sm:$0x3] %vm8_vm0, %v314_v22  }
  0xe0   :  { %v320_v23 = vpop.permute.xlu0 %319  }
  0xe1   :  { %v326_v24 = vpop.permute.xlu1 %325   ;;  %678 = vst.msk [vmem:[%s1339_s1 + $0x33] ss:$100 sm:$0x3] %vm8_vm0, %v320_v23  }
  0xe2   :  { %679 = vst.msk [vmem:[%s1339_s1 + $0x34] ss:$100 sm:$0x3] %vm8_vm0, %v326_v24  }
  0xe4   :  { %v332_v25 = vpop.permute.xlu0 %331  }
  0xe5   :  { %v338_v26 = vpop.permute.xlu1 %337   ;;  %680 = vst.msk [vmem:[%s1339_s1 + $0x35] ss:$100 sm:$0x3] %vm8_vm0, %v332_v25  }
  0xe6   :  { %681 = vst.msk [vmem:[%s1339_s1 + $0x36] ss:$100 sm:$0x3] %vm8_vm0, %v338_v26  }
  0xe8   :  { %v344_v27 = vpop.permute.xlu0 %343  }
  0xe9   :  { %v350_v28 = vpop.permute.xlu1 %349   ;;  %682 = vst.msk [vmem:[%s1339_s1 + $0x37] ss:$100 sm:$0x3] %vm8_vm0, %v344_v27  }
  0xea   :  { %683 = vst.msk [vmem:[%s1339_s1 + $0x38] ss:$100 sm:$0x3] %vm8_vm0, %v350_v28  }
  0xec   :  { %v356_v29 = vpop.permute.xlu0 %355  }
  0xed   :  { %v362_v30 = vpop.permute.xlu1 %361   ;;  %684 = vst.msk [vmem:[%s1339_s1 + $0x39] ss:$100 sm:$0x3] %vm8_vm0, %v356_v29  }
  0xee   :  { %685 = vst.msk [vmem:[%s1339_s1 + $0x3a] ss:$100 sm:$0x3] %vm8_vm0, %v362_v30  }
  0xf0   :  { %v368_v31 = vpop.permute.xlu0 %367  }
  0xf1   :  { %v376_v32 = vpop.permute.xlu1 %375   ;;  %686 = vst.msk [vmem:[%s1339_s1 + $0x3b] ss:$100 sm:$0x3] %vm8_vm0, %v368_v31  }
  0xf2   :  { %687 = vst.msk [vmem:[%s1339_s1 + $0xa0] ss:$-100 sm:$0x3] %vm8_vm0, %v376_v32  }
  0xf4   :  { %v384_v33 = vpop.permute.xlu0 %383  }
  0xf5   :  { %v392_v34 = vpop.permute.xlu1 %391   ;;  %688 = vst.msk [vmem:[%s1339_s1 + $0xa1] ss:$-100 sm:$0x3] %vm8_vm0, %v384_v33  }
  0xf6   :  { %689 = vst.msk [vmem:[%s1339_s1 + $0xa2] ss:$-100 sm:$0x3] %vm8_vm0, %v392_v34  }
  0xf8   :  { %v400_v35 = vpop.permute.xlu0 %399  }
  0xf9   :  { %v406_v36 = vpop.permute.xlu1 %405   ;;  %690 = vst.msk [vmem:[%s1339_s1 + $0xa3] ss:$-100 sm:$0x3] %vm8_vm0, %v400_v35  }
  0xfa   :  { %691 = vst.msk [vmem:[%s1339_s1 + $0x40] ss:$100 sm:$0x3] %vm8_vm0, %v406_v36  }
  0xfc   :  { %v412_v37 = vpop.permute.xlu0 %411  }
  0xfd   :  { %v418_v38 = vpop.permute.xlu1 %417   ;;  %692 = vst.msk [vmem:[%s1339_s1 + $0x41] ss:$100 sm:$0x3] %vm8_vm0, %v412_v37  }
  0xfe   :  { %693 = vst.msk [vmem:[%s1339_s1 + $0x42] ss:$100 sm:$0x3] %vm8_vm0, %v418_v38  }
 0x100   :  { %v424_v39 = vpop.permute.xlu0 %423  }
 0x101   :  { %v430_v40 = vpop.permute.xlu1 %429   ;;  %694 = vst.msk [vmem:[%s1339_s1 + $0x43] ss:$100 sm:$0x3] %vm8_vm0, %v424_v39  }
 0x102   :  { %695 = vst.msk [vmem:[%s1339_s1 + $0x44] ss:$100 sm:$0x3] %vm8_vm0, %v430_v40  }
 0x104   :  { %v436_v41 = vpop.permute.xlu0 %435  }
 0x105   :  { %v442_v42 = vpop.permute.xlu1 %441   ;;  %696 = vst.msk [vmem:[%s1339_s1 + $0x45] ss:$100 sm:$0x3] %vm8_vm0, %v436_v41  }
 0x106   :  { %697 = vst.msk [vmem:[%s1339_s1 + $0x46] ss:$100 sm:$0x3] %vm8_vm0, %v442_v42  }
 0x108   :  { %v448_v43 = vpop.permute.xlu0 %447  }
 0x109   :  { %v454_v44 = vpop.permute.xlu1 %453   ;;  %698 = vst.msk [vmem:[%s1339_s1 + $0x47] ss:$100 sm:$0x3] %vm8_vm0, %v448_v43  }
 0x10a   :  { %699 = vst.msk [vmem:[%s1339_s1 + $0x48] ss:$100 sm:$0x3] %vm8_vm0, %v454_v44  }
 0x10c   :  { %v460_v45 = vpop.permute.xlu0 %459  }
 0x10d   :  { %v466_v46 = vpop.permute.xlu1 %465   ;;  %700 = vst.msk [vmem:[%s1339_s1 + $0x49] ss:$100 sm:$0x3] %vm8_vm0, %v460_v45  }
 0x10e   :  { %701 = vst.msk [vmem:[%s1339_s1 + $0x4a] ss:$100 sm:$0x3] %vm8_vm0, %v466_v46  }
 0x110   :  { %v472_v47 = vpop.permute.xlu0 %471  }
 0x111   :  { %v478_v48 = vpop.permute.xlu1 %477   ;;  %702 = vst.msk [vmem:[%s1339_s1 + $0x4b] ss:$100 sm:$0x3] %vm8_vm0, %v472_v47  }
 0x112   :  { %703 = vst.msk [vmem:[%s1339_s1 + $0x4c] ss:$100 sm:$0x3] %vm8_vm0, %v478_v48  }
 0x114   :  { %v484_v49 = vpop.permute.xlu0 %483  }
 0x115   :  { %v490_v50 = vpop.permute.xlu1 %489   ;;  %704 = vst.msk [vmem:[%s1339_s1 + $0x4d] ss:$100 sm:$0x3] %vm8_vm0, %v484_v49  }
 0x116   :  { %705 = vst.msk [vmem:[%s1339_s1 + $0x4e] ss:$100 sm:$0x3] %vm8_vm0, %v490_v50  }
 0x118   :  { %v496_v51 = vpop.permute.xlu0 %495  }
 0x119   :  { %v502_v52 = vpop.permute.xlu1 %501   ;;  %706 = vst.msk [vmem:[%s1339_s1 + $0x4f] ss:$100 sm:$0x3] %vm8_vm0, %v496_v51  }
 0x11a   :  { %707 = vst.msk [vmem:[%s1339_s1 + $0x50] ss:$100 sm:$0x3] %vm8_vm0, %v502_v52  }
 0x11c   :  { %v508_v53 = vpop.permute.xlu0 %507  }
 0x11d   :  { %v514_v54 = vpop.permute.xlu1 %513   ;;  %708 = vst.msk [vmem:[%s1339_s1 + $0x51] ss:$100 sm:$0x3] %vm8_vm0, %v508_v53  }
 0x11e   :  { %709 = vst.msk [vmem:[%s1339_s1 + $0x52] ss:$100 sm:$0x3] %vm8_vm0, %v514_v54  }
 0x120   :  { %v520_v55 = vpop.permute.xlu0 %519  }
 0x121   :  { %v526_v56 = vpop.permute.xlu1 %525   ;;  %710 = vst.msk [vmem:[%s1339_s1 + $0x53] ss:$100 sm:$0x3] %vm8_vm0, %v520_v55  }
 0x122   :  { %711 = vst.msk [vmem:[%s1339_s1 + $0x54] ss:$100 sm:$0x3] %vm8_vm0, %v526_v56  }
 0x124   :  { %v532_v57 = vpop.permute.xlu0 %531  }
 0x125   :  { %v538_v58 = vpop.permute.xlu1 %537   ;;  %712 = vst.msk [vmem:[%s1339_s1 + $0x55] ss:$100 sm:$0x3] %vm8_vm0, %v532_v57  }
 0x126   :  { %713 = vst.msk [vmem:[%s1339_s1 + $0x56] ss:$100 sm:$0x3] %vm8_vm0, %v538_v58  }
 0x128   :  { %v544_v59 = vpop.permute.xlu0 %543  }
 0x129   :  { %v550_v60 = vpop.permute.xlu1 %549   ;;  %714 = vst.msk [vmem:[%s1339_s1 + $0x57] ss:$100 sm:$0x3] %vm8_vm0, %v544_v59  }
 0x12a   :  { %715 = vst.msk [vmem:[%s1339_s1 + $0x58] ss:$100 sm:$0x3] %vm8_vm0, %v550_v60  }
 0x12c   :  { %v556_v61 = vpop.permute.xlu0 %555  }
 0x12d   :  { %v562_v62 = vpop.permute.xlu1 %561   ;;  %716 = vst.msk [vmem:[%s1339_s1 + $0x59] ss:$100 sm:$0x3] %vm8_vm0, %v556_v61  }
 0x12e   :  { %717 = vst.msk [vmem:[%s1339_s1 + $0x5a] ss:$100 sm:$0x3] %vm8_vm0, %v562_v62  }
 0x130   :  { %v568_v63 = vpop.permute.xlu0 %567  }
 0x131   :  { %v576_v0 = vpop.permute.xlu1 %575   ;;  %718 = vst.msk [vmem:[%s1339_s1 + $0x5b] ss:$100 sm:$0x3] %vm8_vm0, %v568_v63  }
 0x132   :  { %719 = vst.msk [vmem:[%s1339_s1 + $0xc0] ss:$-100 sm:$0x3] %vm8_vm0, %v576_v0  }
 0x134   :  { %v584_v1 = vpop.permute.xlu0 %583  }
 0x135   :  { %v592_v2 = vpop.permute.xlu1 %591   ;;  %720 = vst.msk [vmem:[%s1339_s1 + $0xc1] ss:$-100 sm:$0x3] %vm8_vm0, %v584_v1  }
 0x136   :  { %721 = vst.msk [vmem:[%s1339_s1 + $0xc2] ss:$-100 sm:$0x3] %vm8_vm0, %v592_v2  }
 0x138   :  { %v600_v3 = vpop.permute.xlu0 %599  }
 0x139   :  { %v606_v4 = vpop.permute.xlu1 %605   ;;  %722 = vst.msk [vmem:[%s1339_s1 + $0xc3] ss:$-100 sm:$0x3] %vm8_vm0, %v600_v3  }
 0x13a   :  { %723 = vst.msk [vmem:[%s1339_s1 + $0x60] ss:$100 sm:$0x3] %vm8_vm0, %v606_v4  }
 0x13c   :  { %v612_v5 = vpop.permute.xlu0 %611  }
 0x13d   :  { %v618_v6 = vpop.permute.xlu1 %617   ;;  %724 = vst.msk [vmem:[%s1339_s1 + $0x61] ss:$100 sm:$0x3] %vm8_vm0, %v612_v5  }
 0x13e   :  { %725 = vst.msk [vmem:[%s1339_s1 + $0x62] ss:$100 sm:$0x3] %vm8_vm0, %v618_v6  }
 0x140   :  { %v624_v7 = vpop.permute.xlu0 %623  }
 0x141   :  { %726 = vst.msk [vmem:[%s1339_s1 + $0x63] ss:$100 sm:$0x3] %vm8_vm0, %v624_v7  }

// kernel: ppo_forward.3
= control target key start
LH: loop header
LB: loop body
LE: loop exit
PB: predicated region body
PF: predicated region fallthrough
CT: control target
= control target key end

     0   :  { %12 = vsyncpa [#allocation4], 0  ;;  %s2709_s0 = inlined_call_operand.vmem [shape: bf16[2,12800], index: 0, kind: input, shape index: {}]   ;;  %s2710_s1 = inlined_call_operand.hbm [shape: bf16[12800,128], index: 1, kind: input, shape index: {}]   ;;  %s2711_s2 = inlined_call_operand.hbm [shape: f32[1,128], index: 2, kind: input, shape index: {}]   ;;  %s2712_s3 = inlined_call_operand.hbm [shape: bf16[128,128], index: 3, kind: input, shape index: {}]   ;;  %s2713_s4 = inlined_call_operand.hbm [shape: f32[1,128], index: 4, kind: input, shape index: {}]   ;;  %s2714_s5 = inlined_call_operand.hbm [shape: bf16[128,128], index: 5, kind: input, shape index: {}]   ;;  %s2715_s6 = inlined_call_operand.hbm [shape: f32[1,128], index: 6, kind: input, shape index: {}]   ;;  %s2716_s7 = inlined_call_operand.vmem [shape: f32[2,128], index: 7, kind: output, shape index: {}]  }
   0x1   :  { %14 = vsyncpa [#allocation4 + $0x1], 0 }
   0x2   :  { %15 = vsyncpa [#allocation6], 0 }
   0x3   :  { %16 = vsyncpa [#allocation9], 0 }
   0x4   :  { %17 = vsyncpa [#allocation12], 0  ;;  %s2410_s24 = smov 0   ;;  %s2412_s25 = smov 0  }
   0x5   :  { %s2414_s26 = smov 0   ;;  %s2416_s27 = smov 0  }
   0x6 LB: > { %s2358_s28 = smov [#allocation5]   ;;  %s2431_s30 = sadd.s32 4294967295, %s2356_s27   ;;  %s2356_s27 = sphi %s2416_s27, %s2738_s27   ;;  %s2352_s26 = sphi %s2414_s26, %s2737_s26   ;;  %s2348_s25 = sphi %s2412_s25, %s2736_s25   ;;  %s2344_s24 = sphi %s2410_s24, %s2735_s24  }
   0x7   : > { %s219_s29 = sshll.u32 %s2358_s28, 4  ;;  %p1662_p0 = scmp.ge.s32.totalorder %s2356_s27, 1  ;;  %s220_s29 = int_to_ptr.vmem [resolvable:$true] %s219_s29 }
   0x8   : > { %p2717_p1 = scmp.eq.s32.totalorder %s2431_s30, 0  ;;  %p206_p2 = scmp.lt.s32.totalorder %s2356_s27, 11 }
   0x9   : > { %s2359_s9 = smov [#allocation8]   ;;  %s2360_s11 = smov [#allocation7]  }
   0xa   : > { %p2437_p4 = pnand %p1662_p0, %p206_p2  ;;  %s243_s10 = sshll.u32 %s2359_s9, 4  ;;  %s244_s10 = int_to_ptr.vmem [resolvable:$true] %s243_s10 }
   0xb   : > { %s229_s12 = sshll.u32 %s2360_s11, 4  ;;  %s2163_s15 = scalar_lea.vmem %s220_s29, 16  ;;  %s2449_s12 = int_to_ptr.vmem [resolvable:$true] %s229_s12 }
   0xc   : > { %s2720_s8 = scalar_select %p2437_p4, 1, 0 }
   0xd   : > { %p1973_p5 = pneg %p2437_p4  ;;  %p2164_p8 = scmp.ne.s32.totalorder %s220_s29, %s2163_s15 }
   0xe   : > { %s2170_s16 = scalar_lea.vmem %s220_s29, 32  ;;  %p2171_p11 = scmp.lt.s32.totalorder %s220_s29, %s220_s29 }
   0xf   : > { %p2445_p6 = pnand %p1973_p5, %p2717_p1  ;;  %p2172_p12 = scmp.lt.s32.totalorder %s2170_s16, %s2163_s15 }
  0x11   : > { %p2453_p7 = pneg %p2445_p6  ;;  %p2173_p13 = por %p2172_p12, %p2171_p11 }
  0x13   : > { %p2166_p9 = pnand %p2164_p8, %p2453_p7 }
  0x15   : > { %p2167_p10 = pneg %p2166_p9 }
  0x17   : > { %p2174_p0 = pnand %p2173_p13, %p2167_p10 }
  0x19   : > { %2177 = shalt.err (!%p2174_p0)
}
  0x1a   : > { %1976 = dma.hbm_to_vmem [thread:$0]  (!%p2445_p6), %s2711_s2, 16, %s220_s29, [#allocation6]  }
  0x1b   : > { %s2189_s19 = scalar_lea.vmem %s244_s10, 16  ;;  %s2196_s20 = scalar_lea.vmem %s244_s10, 32 }
  0x1c   : > { %p2190_p2 = scmp.ne.s32.totalorder %s244_s10, %s2189_s19  ;;  %p2197_p8 = scmp.lt.s32.totalorder %s244_s10, %s244_s10 }
  0x1d   : > { %p2198_p9 = scmp.lt.s32.totalorder %s2196_s20, %s2189_s19 }
  0x1e   : > { %p2192_p5 = pnand %p2190_p2, %p2453_p7 }
  0x1f   : > { %p2199_p1 = por %p2198_p9, %p2197_p8 }
  0x20   : > { %p2193_p3 = pneg %p2192_p5 }
  0x22   : > { %p2200_p4 = pnand %p2199_p1, %p2193_p3 }
  0x24   : > { %2203 = shalt.err (!%p2200_p4)
}
  0x25   : > { %1982 = dma.hbm_to_vmem [thread:$0]  (!%p2445_p6), %s2713_s4, 16, %s244_s10, [#allocation9]  }
  0x26   : > { %s2215_s23 = scalar_lea.vmem %s2449_s12, 1024  ;;  %p2223_p13 = scmp.lt.s32.totalorder %s2449_s12, %s2449_s12 }
  0x27   : > { %p2216_p10 = scmp.ne.s32.totalorder %s2449_s12, %s2215_s23  ;;  %p2224_p0 = scmp.lt.s32.totalorder %s2215_s23, %s2215_s23 }
  0x29   : > { %p2218_p11 = pnand %p2216_p10, %p2453_p7  ;;  %p2225_p1 = por %p2224_p0, %p2223_p13 }
  0x2b   : > { %p2219_p12 = pneg %p2218_p11 }
  0x2d   : > { %p2226_p3 = pnand %p2225_p1, %p2219_p12 }
  0x2f   : > { %2229 = shalt.err (!%p2226_p3)
}
  0x30   : > { %s2361_s28 = smov 64   ;;  %s2362_s29 = smov 4  }
  0x31   : > { %1979 = dma.hbm_to_vmem [thread:$0]  (!%p2445_p6), %s2712_s3, 1024, %s2449_s12, [#allocation6], %s2361_s28, %s2361_s28, %s2362_s29  }
  0x32   : > { %s2363_s11 = smov [#allocation10]   ;;  %s2364_s16 = smov [#allocation11]  }
  0x33   : > { %s253_s15 = sshll.u32 %s2363_s11, 4  ;;  %s267_s17 = sshll.u32 %s2364_s16, 4  ;;  %s254_s15 = int_to_ptr.vmem [resolvable:$true] %s253_s15  ;;  %s268_s17 = int_to_ptr.vmem [resolvable:$true] %s267_s17 }
  0x34   : > { %s2241_s18 = scalar_lea.vmem %s254_s15, 1024  ;;  %p2249_p8 = scmp.lt.s32.totalorder %s254_s15, %s254_s15 }
  0x35   : > { %p2242_p4 = scmp.ne.s32.totalorder %s254_s15, %s2241_s18  ;;  %p2250_p9 = scmp.lt.s32.totalorder %s2241_s18, %s2241_s18 }
  0x37   : > { %p2244_p2 = pnand %p2242_p4, %p2453_p7  ;;  %p2251_p10 = por %p2250_p9, %p2249_p8 }
  0x39   : > { %p2245_p5 = pneg %p2244_p2 }
  0x3b   : > { %p2252_p11 = pnand %p2251_p10, %p2245_p5 }
  0x3d   : > { %2255 = shalt.err (!%p2252_p11)
}
  0x3e   : > { %1985 = dma.hbm_to_vmem [thread:$0]  (!%p2445_p6), %s2714_s5, 1024, %s254_s15, [#allocation9], %s2361_s28, %s2361_s28, %s2362_s29  }
  0x3f   : > { %s2267_s20 = scalar_lea.vmem %s268_s17, 16  ;;  %s2274_s21 = scalar_lea.vmem %s268_s17, 32 }
  0x40   : > { %p2268_p12 = scmp.ne.s32.totalorder %s268_s17, %s2267_s20  ;;  %p2275_p1 = scmp.lt.s32.totalorder %s268_s17, %s268_s17 }
  0x41   : > { %p2276_p3 = scmp.lt.s32.totalorder %s2274_s21, %s2267_s20 }
  0x42   : > { %p2270_p13 = pnand %p2268_p12, %p2453_p7 }
  0x43   : > { %p2277_p4 = por %p2276_p3, %p2275_p1 }
  0x44   : > { %p2271_p0 = pneg %p2270_p13 }
  0x46   : > { %p2278_p2 = pnand %p2277_p4, %p2271_p0 }
  0x48   : > { %2281 = shalt.err (!%p2278_p2)
}
  0x49   : > { %1988 = dma.hbm_to_vmem [thread:$0]  (!%p2445_p6), %s2715_s6, 16, %s268_s17, [#allocation12]  }
  0x4a   : > { %s2504_s14 = sadd.s32 1, %s2356_s27   ;;  %s56_s9 = sadd.s32 1, %s2352_s26 }
  0x4b   : > { %s53_s13 = ssub.s32 %s2356_s27, %s2504_s14  ;;  %p63_p5 = scmp.ne.s32.totalorder %s2352_s26, %s2348_s25 }
  0x4c   : > { %p54_p7 = scmp.eq.s32.totalorder %s53_s13, 0  ;;  %p64_p8 = scmp.eq.s32.totalorder %s2356_s27, 0 }
  0x4d   : > { %p69_p9 = scmp.ne.s32.totalorder %s2348_s25, %s2344_s24  ;;  %p2723_p11 = scmp.eq.s32.totalorder %s2431_s30, 0 }
  0x4e   : > { %s2515_s10 = scalar_select %p54_p7, %s2352_s26, %s56_s9  }
  0x4f   : > { %p65_p10 = por %p64_p8, %p63_p5  ;;  %p2519_p12 = por %p2723_p11, %p69_p9 }
  0x50   : > { %p1998_p13 = scmp.lt.s32.totalorder %s2356_s27, 10  ;;  %s286_s15 = sand.u32 1, %s2352_s26  }
  0x51   : > { %s2724_s11 = scalar_select %p2519_p12, 1, 0 }
  0x52   : > { %s1949_s16 = smul.u32 640, %s286_s15  ;;  %p2526_p6 = pnand %p1998_p13, %p65_p10 }
  0x53   : > { %s1780_s17 = smul.u32 10240, %s2356_s27  ;;  %s2537_s22 = scalar_lea.sflag [#allocation4], %s286_s15 }
  0x54   : > { %s290_s20 = scalar_lea.vmem [#allocation3], %s1949_s16  ;;  %p2284_p1 = pneg %p2526_p6 }
  0x55   : > { %s2533_s24 = scalar_lea.hbm %s2710_s1, %s1780_s17  ;;  %s297_s21 = sshll.u32 %s290_s20, 4  ;;  %s2535_s21 = int_to_ptr.vmem [resolvable:$true] %s297_s21 }
  0x56   : > { %s2282_s27 = scalar_lea.hbm %s2533_s24, 10240  ;;  %s2287_s9 = scalar_lea.hbm %s2710_s1, 102400 }
  0x57   : > { %p2283_p0 = scmp.ne.s32.totalorder %s2533_s24, %s2282_s27  ;;  %p2288_p2 = scmp.lt.s32.totalorder %s2533_s24, %s2710_s1 }
  0x58   : > { %p2289_p7 = scmp.lt.s32.totalorder %s2287_s9, %s2282_s27 }
  0x59   : > { %p2285_p3 = pnand %p2284_p1, %p2283_p0 }
  0x5a   : > { %p2290_p5 = por %p2289_p7, %p2288_p2 }
  0x5b   : > { %p2286_p4 = pneg %p2285_p3 }
  0x5d   : > { %p2291_p8 = pnand %p2290_p5, %p2286_p4 }
  0x5f   : > { %2294 = shalt.err (!%p2291_p8)
}
  0x60   : > { %s2295_s15 = scalar_lea.vmem %s2535_s21, 10240  ;;  %s2365_s16 = smov [#allocation3]  }
  0x61   : > { %p2296_p9 = scmp.ne.s32.totalorder %s2535_s21, %s2295_s15  ;;  %s2300_s19 = sshll.u32 %s2365_s16, 4  ;;  %s2301_s19 = int_to_ptr.vmem [resolvable:$false] %s2300_s19 }
  0x62   : > { %s2302_s20 = scalar_lea.vmem %s2301_s19, 20480  ;;  %p2303_p13 = scmp.lt.s32.totalorder %s2535_s21, %s2301_s19 }
  0x63   : > { %p2298_p10 = pnand %p2296_p9, %p2284_p1  ;;  %p2304_p0 = scmp.lt.s32.totalorder %s2302_s20, %s2295_s15 }
  0x65   : > { %p2299_p11 = pneg %p2298_p10  ;;  %p2305_p3 = por %p2304_p0, %p2303_p13 }
  0x67   : > { %p2306_p12 = pnand %p2305_p3, %p2299_p11 }
  0x69   : > { %2309 = shalt.err (!%p2306_p12)
}
  0x6a   : > { %1992 = dma.hbm_to_vmem [thread:$0]  (!%p2526_p6), %s2533_s24, 10240, %s2535_s21, %s2537_s22, %s2361_s28, %s2361_s28, %s2362_s29  }
  0x6b   : > { %p2726_p1 = scmp.ne.s32.totalorder %s2720_s8, 0 }
  0x6c   : > { %s311_s27 = sand.u32 (!%p2726_p1), 1, %s2348_s25   ;;  %p2727_p12 = scmp.ne.s32.totalorder (!%p2726_p1), %s2724_s11, 0 }
  0x6d   : > { %309 = sbr.rel (%p2726_p1) target bundleno = 1188 (0x4a4), region = 48  ;;  %s312_s13 = scalar_lea.sflag (!%p2726_p1), [#allocation4], %s311_s27 }
  0x6e   : > { %s1950_s23 = smul.u32 (!%p2726_p1), 640, %s311_s27 }
  0x70   : > { %s2564_s9 = scalar_lea.vmem (!%p2726_p1), [#allocation3], %s1950_s23 }
  0x72   : > { %2327 = dma.done.wait (%p2727_p12), %s312_s13, 10240  }
  0x73   : > { %2329 = vsyncadd (%p2727_p12), %s312_s13, 4294957056  ;;  %p2728_p4 = scmp.eq.s32.totalorder %s2431_s30, 0 }
  0x75   : > { %2331 = dma.done.wait (%p2728_p4), [#allocation6], 1040   ;;  %p2729_p6 = pmov %p2728_p4 }
  0x76   : > { %p2730_p2 = pmov %p2728_p4 }
  0x77   : > { %2333 = vsyncadd (%p2729_p6), [#allocation6], 4294966256 }
  0x78   : > { %2335 = dma.done.wait (%p2730_p2), [#allocation9], 1040   ;;  %p2731_p7 = pmov %p2730_p2 }
  0x79   : > { %p2732_p5 = pmov %p2730_p2 }
  0x7a   : > { %2337 = vsyncadd (%p2731_p7), [#allocation9], 4294966256 }
  0x7b   : > { %2339 = dma.done.wait (%p2732_p5), [#allocation12], 16   ;;  %p2733_p8 = pmov %p2730_p2 }
  0x7c   : > { %s365_s8 = smul.u32 10, %s2431_s30  ;;  %p2734_p10 = scmp.ne.s32.totalorder %s2431_s30, 0 }
  0x7d   : > { %2341 = vsyncadd (%p2733_p8), [#allocation12], 4294967280 }
  0x7e   : > { %p366_p9 = scmp.lt.s32.totalorder %s365_s8, 99  ;;  %375 = sbr.rel (%p2734_p10) target bundleno = 133 (0x85), region = 76 }
  0x80   : > { %s2740_s8 = smov (!%p366_p9, %s365_s8), 99 }
  0x81   : > { %s2586_s11 = scalar_lea.vmem %s2709_s0, %s2740_s8 }
  0x83   : > { %v2366_v0 = vmov 0.0  }
  0x84   : > { %376 = vst [vmem:[#allocation2] sm:$0x3] %v2366_v0 }
  0x85 PF: > { %v2047_v1 = vld [vmem:[%s2564_s9 + $0x78] sm:$0xff]   ;;  %v2051_v5 = vld [vmem:[%s2564_s9 + $0x70] sm:$0xff]   ;;  %v2055_v9 = vld [vmem:[%s2564_s9 + $0x68] sm:$0xff]   ;;  %v546_v30 = vlaneseq  ;;  %v2367_v36 = vmov 1966171168   ;;  %p1758_p11 = scmp.ne.s32.totalorder %s2431_s30, 9 }
  0x86   : > { %v2048_v2 = vld [vmem:[%s2564_s9 + $0xf8] sm:$0xff]   ;;  %1781 = vmatprep.subr.bf16.mxu0 %v2047_v1  ;;  %v2052_v6 = vld [vmem:[%s2564_s9 + $0xf0] sm:$0xff]   ;;  %v2056_v10 = vld [vmem:[%s2564_s9 + $0xe8] sm:$0xff]   ;;  %v544_v37 = vunpack.c.l.s4 %v2367_v36 }
  0x87   : > { %v2049_v3 = vld [vmem:[%s2564_s9 + $0x38] sm:$0xff]   ;;  %1803 = vmatprep.subr.bf16.mxu1 %v2048_v2  ;;  %v2053_v7 = vld [vmem:[%s2564_s9 + $0x30] sm:$0xff]   ;;  %v2057_v11 = vld [vmem:[%s2564_s9 + $0x28] sm:$0xff]   ;;  %v547_v34 = vshrl.u32 %v546_v30, 7 }
  0x88   : > { %v2050_v4 = vld [vmem:[%s2564_s9 + $0xb8] sm:$0xff]   ;;  %1782 = vmatpush3.bf16.msra.mxu0 %v2049_v3  ;;  %v2054_v8 = vld [vmem:[%s2564_s9 + $0xb0] sm:$0xff]   ;;  %v2058_v12 = vld [vmem:[%s2564_s9 + $0xa8] sm:$0xff]   ;;  %v545_v40 = vunpack.c.0.s8 %v544_v37 }
  0x89   : > { %1804 = vmatpush3.bf16.msra.mxu1 %v2050_v4  ;;  %1783 = vmatprep.subr.bf16.mxu0 %v2051_v5  ;;  %v2059_v13 = vld [vmem:[%s2564_s9 + $0x60] sm:$0xff]   ;;  %v2063_v17 = vld [vmem:[%s2564_s9 + $0x58] sm:$0xff]   ;;  %v2067_v21 = vld [vmem:[%s2564_s9 + $0x50] sm:$0xff]  }
  0x8a   : > { %1805 = vmatprep.subr.bf16.mxu1 %v2052_v6  ;;  %v2060_v14 = vld [vmem:[%s2564_s9 + $0xe0] sm:$0xff]   ;;  %v2064_v18 = vld [vmem:[%s2564_s9 + $0xd8] sm:$0xff]   ;;  %v2068_v22 = vld [vmem:[%s2564_s9 + $0xd0] sm:$0xff]   ;;  %v2626_v42 = vsub.s32 %v545_v40, %v547_v34 }
  0x8b   : > { %v2061_v15 = vld [vmem:[%s2564_s9 + $0x20] sm:$0xff]   ;;  %v2065_v19 = vld [vmem:[%s2564_s9 + $0x18] sm:$0xff]   ;;  %v2069_v23 = vld [vmem:[%s2564_s9 + $0x10] sm:$0xff]  }
  0x8c   : > { %1784 = vmatpush3.bf16.msra.mxu0 %v2053_v7  ;;  %v2062_v16 = vld [vmem:[%s2564_s9 + $0xa0] sm:$0xff]   ;;  %v2066_v20 = vld [vmem:[%s2564_s9 + $0x98] sm:$0xff]   ;;  %v2070_v24 = vld [vmem:[%s2564_s9 + $0x90] sm:$0xff]  }
  0x8d   : > { %1806 = vmatpush3.bf16.msra.mxu1 %v2054_v8  ;;  %1785 = vmatprep.subr.bf16.mxu0 %v2055_v9  ;;  %v2071_v25 = vld [vmem:[%s2564_s9 + $0x48] sm:$0xff]   ;;  %v2075_v29 = vld [vmem:[%s2564_s9 + $0x40] sm:$0xff]   ;;  %v2080_v35 = vld [vmem:[%s2564_s9 + $0x178] sm:$0xff]  }
  0x8e   : > { %1807 = vmatprep.subr.bf16.mxu1 %v2056_v10  ;;  %v2072_v26 = vld [vmem:[%s2564_s9 + $0xc8] sm:$0xff]   ;;  %v2076_v31 = vld [vmem:[%s2564_s9 + $0xc0] sm:$0xff]   ;;  %v2082_v41 = vld [vmem:[%s2564_s9 + $0x1f8] sm:$0xff]  }
  0x8f   : > { %v2073_v27 = vld [vmem:[%s2564_s9 + $0x8] sm:$0xff]   ;;  %v2077_v32 = vld [vmem:[%s2564_s9] sm:$0xff]   ;;  %v2081_v49 = vld [vmem:[%s2564_s9 + $0x138] sm:$0xff]  }
  0x90   : > { %1786 = vmatpush3.bf16.msra.mxu0 %v2057_v11  ;;  %v2074_v28 = vld [vmem:[%s2564_s9 + $0x88] sm:$0xff]   ;;  %v2078_v33 = vld [vmem:[%s2564_s9 + $0x80] sm:$0xff]   ;;  %v2084_v52 = vld [vmem:[%s2564_s9 + $0x170] sm:$0xff]  }
  0x91   : > { %1808 = vmatpush3.bf16.msra.mxu1 %v2058_v12  ;;  %1787 = vmatprep.subr.bf16.mxu0 %v2059_v13  ;;  %v378_v38 = vld [vmem:[%s2586_s11] sm:$0xff]  ;;  %v2086_v55 = vld [vmem:[%s2564_s9 + $0x1f0] sm:$0xff]   ;;  %v2088_v58 = vld [vmem:[%s2564_s9 + $0x168] sm:$0xff]  }
  0x92   : > { %1809 = vmatprep.subr.bf16.mxu1 %v2060_v14  ;;  %v542_v39 = vcombine.high %v378_v38, %v378_v38  ;;  %v549_v43 = vrot.slane %v378_v38, %v2626_v42  ;;  %v2083_v54 = vld [vmem:[%s2564_s9 + $0x1b8] sm:$0xff]   ;;  %v2085_v57 = vld [vmem:[%s2564_s9 + $0x130] sm:$0xff]   ;;  %v2090_v60 = vld [vmem:[%s2564_s9 + $0x1e8] sm:$0xff]  }
  0x93   : > { %v2087_v59 = vld [vmem:[%s2564_s9 + $0x1b0] sm:$0xff]   ;;  %v2089_v61 = vld [vmem:[%s2564_s9 + $0x128] sm:$0xff]   ;;  %v2092_v62 = vld [vmem:[%s2564_s9 + $0x160] sm:$0xff]  }
  0x94   : > { %1788 = vmatpush3.bf16.msra.mxu0 %v2061_v15  ;;  %v2630_v44 = vrot.slane %v542_v39, %v2626_v42  ;;  %v557_v45 = vcombine.high %v549_v43, %v549_v43  ;;  %v565_v46 = vrot.slane %v549_v43, %v2626_v42  ;;  %v2091_v63 = vld [vmem:[%s2564_s9 + $0x1a8] sm:$0xff]   ;;  %v2094_v0 = vld [vmem:[%s2564_s9 + $0x1e0] sm:$0xff]   ;;  %v2096_v2 = vld [vmem:[%s2564_s9 + $0x158] sm:$0xff]  }
  0x95   : > { %1810 = vmatpush3.bf16.msra.mxu1 %v2062_v16  ;;  %1789 = vmatprep.subr.bf16.mxu0 %v2063_v17  ;;  %v2093_v1 = vld [vmem:[%s2564_s9 + $0x120] sm:$0xff]   ;;  %v2098_v4 = vld [vmem:[%s2564_s9 + $0x1d8] sm:$0xff]   ;;  %v2100_v6 = vld [vmem:[%s2564_s9 + $0x150] sm:$0xff]  }
  0x96   : > { %1811 = vmatprep.subr.bf16.mxu1 %v2064_v18  ;;  %v558_v47 = vcombine.high %v2630_v44, %v2630_v44  ;;  %v579_v48 = vrot.slane %v557_v45, %v2626_v42  ;;  %v587_v51 = vcombine.high %v565_v46, %v565_v46  ;;  %v2095_v3 = vld [vmem:[%s2564_s9 + $0x1a0] sm:$0xff]   ;;  %v2097_v5 = vld [vmem:[%s2564_s9 + $0x118] sm:$0xff]   ;;  %v2102_v8 = vld [vmem:[%s2564_s9 + $0x1d0] sm:$0xff]   ;;  %v572_v18 = vrot.slane %v2630_v44, %v2626_v42 }
  0x97   : > { %v2099_v7 = vld [vmem:[%s2564_s9 + $0x198] sm:$0xff]   ;;  %v2101_v9 = vld [vmem:[%s2564_s9 + $0x110] sm:$0xff]   ;;  %v2104_v10 = vld [vmem:[%s2564_s9 + $0x148] sm:$0xff]  }
  0x98   : > { %1790 = vmatpush3.bf16.msra.mxu0 %v2065_v19  ;;  %v586_v50 = vrot.slane %v558_v47, %v2626_v42  ;;  %1135 = vmatprep.mubr.bf16.mxu0 %v579_v48  ;;  %v589_v53 = vcombine.high %v579_v48, %v579_v48  ;;  %v2103_v11 = vld [vmem:[%s2564_s9 + $0x190] sm:$0xff]   ;;  %v2106_v12 = vld [vmem:[%s2564_s9 + $0x1c8] sm:$0xff]   ;;  %v2108_v14 = vld [vmem:[%s2564_s9 + $0x140] sm:$0xff]  }
  0x99   : > { %1812 = vmatpush3.bf16.msra.mxu1 %v2066_v20  ;;  %1791 = vmatprep.subr.bf16.mxu0 %v2067_v21  ;;  %v2105_v13 = vld [vmem:[%s2564_s9 + $0x108] sm:$0xff]   ;;  %v2110_v16 = vld [vmem:[%s2564_s9 + $0x1c0] sm:$0xff]   ;;  %v2112_v19 = vld [vmem:[%s2564_s9 + $0x278] sm:$0xff]  }
  0x9a   : > { %1813 = vmatprep.subr.bf16.mxu1 %v2068_v22  ;;  %v590_v56 = vcombine.high %v586_v50, %v586_v50  ;;  %1175 = vmatprep.mubr.bf16.mxu1 %v589_v53  ;;  %v2107_v15 = vld [vmem:[%s2564_s9 + $0x188] sm:$0xff]   ;;  %v2109_v17 = vld [vmem:[%s2564_s9 + $0x100] sm:$0xff]   ;;  %v2113_v21 = vld [vmem:[%s2564_s9 + $0x238] sm:$0xff]   ;;  %v588_v22 = vcombine.high %v572_v18, %v572_v18 }
  0x9b   : > { %v2111_v20 = vld [vmem:[%s2564_s9 + $0x180] sm:$0xff]   ;;  %v2121_v34 = vld [vmem:[%s2564_s9 + $0x218] sm:$0xff]   ;;  %v2123_v36 = vld [vmem:[%s2564_s9 + $0x210] sm:$0xff]  }
  0x9c   : > { %1792 = vmatpush3.bf16.msra.mxu0 %v2069_v23  ;;  %v2114_v23 = vld [vmem:[%s2564_s9 + $0x270] sm:$0xff]   ;;  %v2124_v37 = vld [vmem:[%s2564_s9 + $0x248] sm:$0xff]   ;;  %v2126_v39 = vld [vmem:[%s2564_s9 + $0x240] sm:$0xff]  }
  0x9d   : > { %1814 = vmatpush3.bf16.msra.mxu1 %v2070_v24  ;;  %1793 = vmatprep.subr.bf16.mxu0 %v2071_v25  ;;  %v2115_v24 = vld [vmem:[%s2564_s9 + $0x230] sm:$0xff]   ;;  %v2116_v25 = vld [vmem:[%s2564_s9 + $0x268] sm:$0xff]   ;;  %v2127_v40 = vld [vmem:[%s2564_s9 + $0x200] sm:$0xff]  }
  0x9e   : > { %1815 = vmatprep.subr.bf16.mxu1 %v2072_v26  ;;  %v1677_v26 = vld.sshfl [vmem:[%s2586_s11 + $0x8] sm:$0x11 pattern:$0x75316420]  ;;  %v2125_v38 = vld [vmem:[%s2564_s9 + $0x208] sm:$0xff]  }
  0xa0   : > { %1794 = vmatpush3.bf16.msra.mxu0 %v2073_v27  ;;  %v598_v27 = vcombine.high %v1677_v26, %v1677_v26 }
  0xa1   : > { %1816 = vmatpush3.bf16.msra.mxu1 %v2074_v28  ;;  %1795 = vmatprep.subr.bf16.mxu0 %v2075_v29  ;;  %v2117_v28 = vld [vmem:[%s2564_s9 + $0x228] sm:$0xff]  }
  0xa2   : > { %1817 = vmatprep.subr.bf16.mxu1 %v2076_v31  ;;  %v612_v29 = vrot.slane %v598_v27, %v2626_v42  ;;  %v2118_v31 = vld [vmem:[%s2564_s9 + $0x260] sm:$0xff]  }
  0xa4   : > { %1796 = vmatpush3.bf16.msra.mxu0 %v2077_v32  ;;  %v2119_v32 = vld [vmem:[%s2564_s9 + $0x220] sm:$0xff]  }
  0xa5   : > { %1818 = vmatpush3.bf16.msra.mxu1 %v2078_v33  ;;  %1825 = vmatprep.subr.bf16.mxu0 %v2080_v35  ;;  %v2120_v33 = vld [vmem:[%s2564_s9 + $0x258] sm:$0xff]   ;;  %v2122_v35 = vld [vmem:[%s2564_s9 + $0x250] sm:$0xff]  }
  0xa6   : > { %1847 = vmatprep.subr.bf16.mxu1 %v2082_v41  ;;  %v605_v41 = vrot.slane %v1677_v26, %v2626_v42 }
  0xa7   : > { %1136 = vmatmul.mubr.bf16.vlgmr.msra.gmra.mxu0 %v565_v46 }
  0xa8   : > { %1826 = vmatpush3.bf16.msra.mxu0 %v2081_v49  ;;  %1176 = vmatmul.mubr.bf16.vlgmr.msra.gmra.mxu1 %v587_v51 }
  0xa9   : > { %1827 = vmatprep.subr.bf16.mxu0 %v2084_v52  ;;  %1848 = vmatpush3.bf16.msra.mxu1 %v2083_v54 }
  0xaa   : > { %1215 = vmatprep.mubr.bf16.mxu0 %v586_v50  ;;  %1849 = vmatprep.subr.bf16.mxu1 %v2086_v55 }
  0xab   : > { %1255 = vmatprep.mubr.bf16.mxu1 %v590_v56 }
  0xac   : > { %1828 = vmatpush3.bf16.msra.mxu0 %v2085_v57 }
  0xad   : > { %1829 = vmatprep.subr.bf16.mxu0 %v2088_v58  ;;  %1850 = vmatpush3.bf16.msra.mxu1 %v2087_v59 }
  0xae   : > { %1851 = vmatprep.subr.bf16.mxu1 %v2090_v60 }
  0xb0   : > { %1830 = vmatpush3.bf16.msra.mxu0 %v2089_v61 }
  0xb1   : > { %1831 = vmatprep.subr.bf16.mxu0 %v2092_v62  ;;  %1852 = vmatpush3.bf16.msra.mxu1 %v2091_v63 }
  0xb2   : > { %1853 = vmatprep.subr.bf16.mxu1 %v2094_v0 }
  0xb4   : > { %1832 = vmatpush3.bf16.msra.mxu0 %v2093_v1 }
  0xb5   : > { %1833 = vmatprep.subr.bf16.mxu0 %v2096_v2  ;;  %1854 = vmatpush3.bf16.msra.mxu1 %v2095_v3 }
  0xb6   : > { %1855 = vmatprep.subr.bf16.mxu1 %v2098_v4  ;;  %v377_v4 = vld [vmem:[#allocation2] sm:$0x3] }
  0xb8   : > { %1834 = vmatpush3.bf16.msra.mxu0 %v2097_v5 }
  0xb9   : > { %1835 = vmatprep.subr.bf16.mxu0 %v2100_v6  ;;  %1856 = vmatpush3.bf16.msra.mxu1 %v2099_v7 }
  0xba   : > { %1857 = vmatprep.subr.bf16.mxu1 %v2102_v8 }
  0xbc   : > { %1836 = vmatpush3.bf16.msra.mxu0 %v2101_v9 }
  0xbd   : > { %1837 = vmatprep.subr.bf16.mxu0 %v2104_v10  ;;  %1858 = vmatpush3.bf16.msra.mxu1 %v2103_v11 }
  0xbe   : > { %1859 = vmatprep.subr.bf16.mxu1 %v2106_v12 }
  0xc0   : > { %1838 = vmatpush3.bf16.msra.mxu0 %v2105_v13 }
  0xc1   : > { %1839 = vmatprep.subr.bf16.mxu0 %v2108_v14  ;;  %1860 = vmatpush3.bf16.msra.mxu1 %v2107_v15 }
  0xc2   : > { %1861 = vmatprep.subr.bf16.mxu1 %v2110_v16 }
  0xc4   : > { %1840 = vmatpush3.bf16.msra.mxu0 %v2109_v17 }
  0xc5   : > { %1869 = vmatprep.subr.bf16.mxu0 %v2112_v19  ;;  %1862 = vmatpush3.bf16.msra.mxu1 %v2111_v20 }
  0xc7   : > { %1216 = vmatmul.mubr.bf16.vlgmr.msra.gmra.mxu0 %v572_v18 }
  0xc8   : > { %1870 = vmatpush3.bf16.msra.mxu0 %v2113_v21  ;;  %1256 = vmatmul.mubr.bf16.vlgmr.msra.gmra.mxu1 %v588_v22 }
  0xc9   : > { %1871 = vmatprep.subr.bf16.mxu0 %v2114_v23  ;;  %1295 = vmatprep.mubr.bf16.mxu0 %v612_v29 }
  0xcc   : > { %1872 = vmatpush3.bf16.msra.mxu0 %v2115_v24 }
  0xcd   : > { %1873 = vmatprep.subr.bf16.mxu0 %v2116_v25 }
  0xd0   : > { %1874 = vmatpush3.bf16.msra.mxu0 %v2117_v28 }
  0xd1   : > { %1875 = vmatprep.subr.bf16.mxu0 %v2118_v31 }
  0xd4   : > { %1876 = vmatpush3.bf16.msra.mxu0 %v2119_v32 }
  0xd5   : > { %1877 = vmatprep.subr.bf16.mxu0 %v2120_v33 }
  0xd8   : > { %1878 = vmatpush3.bf16.msra.mxu0 %v2121_v34 }
  0xd9   : > { %1879 = vmatprep.subr.bf16.mxu0 %v2122_v35 }
  0xdc   : > { %1880 = vmatpush3.bf16.msra.mxu0 %v2123_v36 }
  0xdd   : > { %1881 = vmatprep.subr.bf16.mxu0 %v2124_v37 }
  0xe0   : > { %1882 = vmatpush3.bf16.msra.mxu0 %v2125_v38 }
  0xe1   : > { %1883 = vmatprep.subr.bf16.mxu0 %v2126_v39 }
  0xe4   : > { %1884 = vmatpush3.bf16.msra.mxu0 %v2127_v40 }
  0xe7   : > { %1296 = vmatmul.mubr.bf16.vlgmr.msra.gmra.mxu0 %v605_v41 }
 0x167   : > { %v1797_v43 = vpop.f32.mrf.mxu0 }
 0x168   : > { %v1819_v44 = vpop.f32.mrf.mxu1 }
 0x169   : > { %v1798_v45 = vpop.f32.mrf.mxu0 }
 0x16a   : > { %v1820_v46 = vpop.f32.mrf.mxu1  ;;  %v1799_v59 = vadd.f32 %v1798_v45, %v1797_v43 }
 0x16b   : > { %v1800_v47 = vpop.f32.mrf.mxu0  ;;  %v1821_v42 = vadd.f32 %v1820_v46, %v1819_v44 }
 0x16c   : > { %v1822_v49 = vpop.f32.mrf.mxu1 }
 0x16d   : > { %v1801_v48 = vpop.f32.mrf.mxu0  ;;  %v1178_v61 = vadd.f32 %v1821_v42, %v1799_v59 }
 0x16e   : > { %v1823_v50 = vpop.f32.mrf.mxu1 }
 0x187   : > { %v1841_v51 = vpop.f32.mrf.mxu0 }
 0x188   : > { %v1863_v53 = vpop.f32.mrf.mxu1 }
 0x189   : > { %v1842_v52 = vpop.f32.mrf.mxu0 }
 0x18a   : > { %v1864_v55 = vpop.f32.mrf.mxu1  ;;  %v1843_v60 = vadd.f32 %v1842_v52, %v1841_v51 }
 0x18b   : > { %v1844_v54 = vpop.f32.mrf.mxu0  ;;  %v1865_v63 = vadd.f32 %v1864_v55, %v1863_v53 }
 0x18c   : > { %v1866_v57 = vpop.f32.mrf.mxu1  ;;  %v1218_v62 = vadd.f32 %v1843_v60, %v1178_v61 }
 0x18d   : > { %v1845_v56 = vpop.f32.mrf.mxu0 }
 0x18e   : > { %v1867_v58 = vpop.f32.mrf.mxu1  ;;  %v1258_v2 = vadd.f32 %v1865_v63, %v1218_v62 }
 0x1a7   : > { %v1885_v0 = vpop.f32.mrf.mxu0 }
 0x1a9   : > { %v1886_v1 = vpop.f32.mrf.mxu0 }
 0x1aa   : > { %v1887_v3 = vadd.f32 %v1886_v1, %v1885_v0 }
 0x1ab   : > { %v1888_v5 = vpop.f32.mrf.mxu0 }
 0x1ac   : > { %v1298_v6 = vadd.f32 %v1887_v3, %v1258_v2  ;;  %1308 = sbr.rel (%p1758_p11) target bundleno = 1188 (0x4a4), region = 80 }
 0x1ad   : > { %v1889_v7 = vpop.f32.mrf.mxu0 }
 0x1ae   : > { %v1303_v8 = vadd.f32 %v1298_v6, %v377_v4 }
 0x1b0   : > { %1304 = vst [vmem:[#allocation2] sm:$0x3] %v1303_v8 }
 0x1b1   : > { %v2128_v9 = vld [vmem:[#allocation7 + $0x38] sm:$0xff]   ;;  %v2368_v10 = vmov 0.0   ;;  %v2129_v11 = vld [vmem:[#allocation7 + $0x30] sm:$0xff]   ;;  %vm2369_vm0 = vmmov 0   ;;  %v2130_v12 = vld [vmem:[#allocation7 + $0x28] sm:$0xff]   ;;  %v1545_v40 = vand.u32 127, %v546_v30 }
 0x1b2   : > { %1909 = vmatprep.subr.bf16.mxu0 %v2368_v10  ;;  %1929 = vmatprep.subr.bf16.mxu1 %v2368_v10  ;;  %v1759_v14 = vld [vmem:[#allocation5] ss:$0 sm:$0xff]  ;;  %v2131_v17 = vld [vmem:[#allocation7 + $0x20] sm:$0xff]   ;;  %v2137_v18 = vld [vmem:[#allocation10 + $0x30] sm:$0xff]   ;;  %vm1548_vm2 = vcmask 1041408  }
 0x1b3   : > { %1910 = vmatpush3.bf16.msra.mxu0 %v2128_v9  ;;  %1925 = vmatprep.mubr.msk.bf16.mxu0 %vm2369_vm0, %v2368_v10  ;;  %v2136_v16 = vld [vmem:[#allocation10 + $0x38] sm:$0xff]   ;;  %v2138_v20 = vld [vmem:[#allocation10 + $0x28] sm:$0xff]   ;;  %v2139_v26 = vld [vmem:[#allocation10 + $0x20] sm:$0xff]   ;;  %vm1546_vm1 = vcmp.lt.s32.totalorder %v1545_v40, 9  ;;  %vm1561_vm3 = vcmp.eq.s32.totalorder %v1545_v40, 9 }
 0x1b4   : > { %1911 = vmatprep.subr.bf16.mxu0 %v2368_v10  ;;  %1945 = vmatprep.mubr.msk.bf16.mxu1 %vm2369_vm0, %v2368_v10  ;;  %v2132_v19 = vld [vmem:[#allocation7 + $0x18] sm:$0xff]   ;;  %v2133_v21 = vld [vmem:[#allocation7 + $0x10] sm:$0xff]   ;;  %v2134_v22 = vld [vmem:[#allocation7 + $0x8] sm:$0xff]  }
 0x1b5   : > { %1930 = vmatpush3.bf16.msra.mxu1 %v2136_v16  ;;  %v2135_v24 = vld [vmem:[#allocation7] sm:$0xff]   ;;  %v2141_v28 = vld [vmem:[#allocation10 + $0x10] sm:$0xff]   ;;  %v2142_v29 = vld [vmem:[#allocation10 + $0x8] sm:$0xff]  }
 0x1b6   : > { %1931 = vmatprep.subr.bf16.mxu1 %v2368_v10  ;;  %v2140_v27 = vld [vmem:[#allocation10 + $0x18] sm:$0xff]   ;;  %v2143_v31 = vld [vmem:[#allocation10] sm:$0xff]  }
 0x1b7   : > { %1912 = vmatpush3.bf16.msra.mxu0 %v2129_v11  ;;  %v1309_v13 = vld [vmem:[#allocation2] sm:$0x3]  ;;  %v1760_v32 = vld [vmem:[#allocation8] ss:$0 sm:$0xff]  ;;  %v1769_v41 = vld [vmem:[#allocation11] ss:$0 sm:$0xff] }
 0x1b8   : > { %1913 = vmatprep.subr.bf16.mxu0 %v2368_v10  ;;  %v1317_v15 = vadd.f32 %v1759_v14, %v1309_v13 }
 0x1b9   : > { %1932 = vmatpush3.bf16.msra.mxu1 %v2137_v18 }
 0x1ba   : > { %2144 = vtanh.f32 %v1317_v15  ;;  %1933 = vmatprep.subr.bf16.mxu1 %v2368_v10 }
 0x1bb   : > { %1914 = vmatpush3.bf16.msra.mxu0 %v2130_v12 }
 0x1bc   : > { %1915 = vmatprep.subr.bf16.mxu0 %v2368_v10 }
 0x1bd   : > { %1934 = vmatpush3.bf16.msra.mxu1 %v2138_v20 }
 0x1be   : > { %1935 = vmatprep.subr.bf16.mxu1 %v2368_v10 }
 0x1bf   : > { %1916 = vmatpush3.bf16.msra.mxu0 %v2131_v17 }
 0x1c0   : > { %1917 = vmatprep.subr.bf16.mxu0 %v2368_v10 }
 0x1c1   : > { %1936 = vmatpush3.bf16.msra.mxu1 %v2139_v26 }
 0x1c2   : > { %1937 = vmatprep.subr.bf16.mxu1 %v2368_v10 }
 0x1c3   : > { %1918 = vmatpush3.bf16.msra.mxu0 %v2132_v19 }
 0x1c4   : > { %1919 = vmatprep.subr.bf16.mxu0 %v2368_v10 }
 0x1c5   : > { %1938 = vmatpush3.bf16.msra.mxu1 %v2140_v27 }
 0x1c6   : > { %1939 = vmatprep.subr.bf16.mxu1 %v2368_v10 }
 0x1c7   : > { %1920 = vmatpush3.bf16.msra.mxu0 %v2133_v21  ;;  %v2145_v23 = vpop.eup %2144 }
 0x1c8   : > { %1921 = vmatprep.subr.bf16.mxu0 %v2368_v10  ;;  %v1319_v25 = vpack.c.bf16 %v2145_v23, %v2145_v23 }
 0x1c9   : > { %1940 = vmatpush3.bf16.msra.mxu1 %v2141_v28 }
 0x1ca   : > { %1941 = vmatprep.subr.bf16.mxu1 %v2368_v10 }
 0x1cb   : > { %1922 = vmatpush3.bf16.msra.mxu0 %v2134_v22 }
 0x1cc   : > { %1923 = vmatprep.subr.bf16.mxu0 %v2368_v10 }
 0x1cd   : > { %1942 = vmatpush3.bf16.msra.mxu1 %v2142_v29 }
 0x1ce   : > { %1943 = vmatprep.subr.bf16.mxu1 %v2368_v10 }
 0x1cf   : > { %1924 = vmatpush3.bf16.msra.mxu0 %v2135_v24 }
 0x1d1   : > { %1944 = vmatpush3.bf16.msra.mxu1 %v2143_v31 }
 0x1d2   : > { %1926 = vmatmul.mubr.bf16.vlgmr.msra.gmra.mxu0 %v1319_v25 }
 0x292   : > { %v1425_v33 = vpop.f32.mrf.mxu0 }
 0x293   : > { %v1426_v34 = vadd.f32 %v1760_v32, %v1425_v33 }
 0x294   : > { %v1927_v35 = vpop.f32.mrf.mxu0 }
 0x295   : > { %2146 = vtanh.f32 %v1426_v34 }
 0x296   : > { %v1428_v36 = vpop.f32.mrf.mxu0 }
 0x298   : > { %v1928_v37 = vpop.f32.mrf.mxu0 }
 0x2a2   : > { %v2147_v38 = vpop.eup %2146 }
 0x2a3   : > { %v1432_v39 = vpack.c.bf16 %v2147_v38, %v2147_v38 }
 0x2a5   : > { %1946 = vmatmul.mubr.bf16.vlgmr.msra.gmra.mxu1 %v1432_v39 }
 0x365   : > { %v1538_v43 = vpop.f32.mrf.mxu1 }
 0x366   : > { %v1539_v44 = vadd.f32 %v1769_v41, %v1538_v43 }
 0x367   : > { %v1947_v45 = vpop.f32.mrf.mxu1 }
 0x368   : > { %v1547_v46 = vsel %vm1546_vm1, %v1539_v44, -1e+30  ;;  %v1562_v58 = vsel %vm1561_vm3, %v1539_v44, 0.0 }
 0x369   : > { %v1541_v47 = vpop.f32.mrf.mxu1  ;;  %v1549_v48 = vsel %vm1548_vm2, %v1547_v46, -inf }
 0x36a   : > { %1550 = vmax.xlane.f32.xlu0 %v1549_v48 }
 0x36b   : > { %v1948_v49 = vpop.f32.mrf.mxu1 }
 0x3f3   : > { %v1551_v50 = vpop.xlane.xlu0 %1550 }
 0x3f4   : > { %v1552_v51 = vsub.f32 %v1539_v44, %v1551_v50 }
 0x3f6   : > { %v1553_v52 = vmul.f32 1.442695, %v1552_v51 }
 0x3f8   : > { %2148 = vpow2.f32 %v1553_v52 }
 0x405   : > { %v2149_v53 = vpop.eup %2148 }
 0x406   : > { %v1555_v54 = vsel %vm1546_vm1, %v2149_v53, 0.0 }
 0x407   : > { %v1556_v30 = vsel %vm1548_vm2, %v1555_v54, 0.0 }
 0x408   : > { %1557 = vadd.xlane.f32.xlu0 %v1556_v30 }
 0x491   : > { %v1558_v55 = vpop.xlane.xlu0 %1557 }
 0x492   : > { %2150 = vrcp.f32 %v1558_v55 }
 0x49f   : > { %v2151_v56 = vpop.eup %2150 }
 0x4a0   : > { %v1560_v57 = vmul.f32 %v2151_v56, %v1555_v54 }
 0x4a2   : > { %v1563_v59 = vsel %vm1546_vm1, %v1560_v57, %v1562_v58 }
 0x4a3   : > { %1564 = vst [vmem:[%s2716_s7] sm:$0x3] %v1563_v59 }
 0x4a4 PF: > { %p20_p13 = scmp.ge.s32.totalorder %s2504_s14, 12   ;;  %s2735_s24 = smov %s2348_s25 }
 0x4a5   : > { %s2736_s25 = smov %s2352_s26  ;;  %s2737_s26 = smov %s2515_s10 }
 0x4a6   : > { %s2738_s27 = smov %s2504_s14  ;;  %22 = sbr.rel (!%p20_p13) target bundleno = 6 (0x6), region = 115 }
 0x4ab   :  { %1576 = vsyncpa [#allocation4], 1 }
 0x4ac   :  { %1578 = vsyncpa [#allocation4 + $0x1], 1 }
 0x4ad   :  { %1579 = vsyncpa [#allocation6], 1 }
 0x4ae   :  { %1580 = vsyncpa [#allocation9], 1 }
 0x4af   :  { %1581 = vsyncpa [#allocation12], 1 }

// kernel: ppo_forward.2
= control target key start
LH: loop header
LB: loop body
LE: loop exit
PB: predicated region body
PF: predicated region fallthrough
CT: control target
= control target key end

     0   :  { %13 = vsyncpa [#allocation5], 0  ;;  %s8794_s0 = inlined_call_operand.vmem [shape: bf16[1,200,36], index: 0, kind: input, shape index: {}]   ;;  %s8795_s1 = inlined_call_operand.vmem [shape: f32[200,1], index: 1, kind: input, shape index: {}]   ;;  %s8796_s2 = inlined_call_operand.vmem [shape: bf16[36,32], index: 2, kind: input, shape index: {}]   ;;  %s8797_s3 = inlined_call_operand.hbm [shape: f32[1,32], index: 3, kind: input, shape index: {}]   ;;  %s8798_s4 = inlined_call_operand.vmem [shape: bf16[288,64], index: 4, kind: input, shape index: {}]   ;;  %s8799_s5 = inlined_call_operand.hbm [shape: f32[1,64], index: 5, kind: input, shape index: {}]   ;;  %s8800_s6 = inlined_call_operand.hbm [shape: bf16[576,128], index: 6, kind: input, shape index: {}]   ;;  %s8801_s7 = inlined_call_operand.hbm [shape: f32[1,128], index: 7, kind: input, shape index: {}]   ;;  %s8802_s8 = inlined_call_operand.vmem [shape: bf16[1,200,128], index: 8, kind: output, shape index: {}]  }
   0x1   :  { %14 = vsyncpa [#allocation7], 0 }
   0x2   :  { %15 = vsyncpa [#allocation10], 0  ;;  %s6024_s27 = smov [#allocation6]   ;;  %s6025_s29 = smov [#allocation4]  }
   0x3   :  { %s40_s28 = sshll.u32 %s6024_s27, 4  ;;  %s28_s30 = sshll.u32 %s6025_s29, 4  ;;  %s41_s28 = int_to_ptr.vmem [resolvable:$true] %s40_s28  ;;  %s29_s30 = int_to_ptr.vmem [resolvable:$true] %s28_s30 }
   0x4   :  { %s5946_s9 = scalar_lea.vmem %s41_s28, 16  ;;  %s5950_s10 = scalar_lea.vmem %s41_s28, 32 }
   0x5   :  { %p5947_p0 = scmp.ne.s32.totalorder %s41_s28, %s5946_s9  ;;  %p5951_p1 = scmp.lt.s32.totalorder %s41_s28, %s41_s28 }
   0x6   :  { %p5952_p2 = scmp.lt.s32.totalorder %s5950_s10, %s5946_s9 }
   0x8   :  { %p5953_p3 = por %p5952_p2, %p5951_p1 }
   0xa   :  { %p5954_p4 = pnand %p5953_p3, %p5947_p0 }
   0xc   :  { %5957 = shalt.err (!%p5954_p4)
}
   0xd   :  { %43 = dma.hbm_to_vmem [thread:$0]  %s8799_s5, 16, %s41_s28, [#allocation7]  }
   0xe   :  { %s5966_s13 = scalar_lea.vmem %s29_s30, 16  ;;  %s5970_s14 = scalar_lea.vmem %s29_s30, 32 }
   0xf   :  { %p5967_p5 = scmp.ne.s32.totalorder %s29_s30, %s5966_s13  ;;  %p5971_p6 = scmp.lt.s32.totalorder %s29_s30, %s29_s30 }
  0x10   :  { %p5972_p7 = scmp.lt.s32.totalorder %s5970_s14, %s5966_s13 }
  0x12   :  { %p5973_p8 = por %p5972_p7, %p5971_p6 }
  0x14   :  { %p5974_p9 = pnand %p5973_p8, %p5967_p5 }
  0x16   :  { %5977 = shalt.err (!%p5974_p9)
}
  0x17   :  { %31 = dma.hbm_to_vmem [thread:$0]  %s8797_s3, 16, %s29_s30, [#allocation5]  }
  0x18   :  { %s6026_s17 = smov [#allocation8]  }
  0x19   :  { %s49_s18 = sshll.u32 %s6026_s17, 4  ;;  %s50_s18 = int_to_ptr.vmem [resolvable:$true] %s49_s18 }
  0x1a   :  { %s5986_s19 = scalar_lea.vmem %s50_s18, 4608  ;;  %p5991_p11 = scmp.lt.s32.totalorder %s50_s18, %s50_s18 }
  0x1b   :  { %p5987_p10 = scmp.ne.s32.totalorder %s50_s18, %s5986_s19  ;;  %p5992_p12 = scmp.lt.s32.totalorder %s5986_s19, %s5986_s19 }
  0x1d   :  { %p5993_p13 = por %p5992_p12, %p5991_p11 }
  0x1f   :  { %p5994_p0 = pnand %p5993_p13, %p5987_p10 }
  0x21   :  { %5997 = shalt.err (!%p5994_p0)
}
  0x22   :  { %s6027_s5 = smov 64   ;;  %s6028_s20 = smov 4  }
  0x23   :  { %55 = dma.hbm_to_vmem [thread:$0]  %s8800_s6, 4608, %s50_s18, [#allocation7], %s6027_s5, %s6027_s5, %s6028_s20  }
  0x24   :  { %s6029_s23 = smov [#allocation9]  }
  0x25   :  { %s62_s3 = sshll.u32 %s6029_s23, 4  ;;  %s63_s3 = int_to_ptr.vmem [resolvable:$true] %s62_s3 }
  0x26   :  { %s6006_s24 = scalar_lea.vmem %s63_s3, 16  ;;  %s6010_s25 = scalar_lea.vmem %s63_s3, 32 }
  0x27   :  { %p6007_p1 = scmp.ne.s32.totalorder %s63_s3, %s6006_s24  ;;  %p6011_p2 = scmp.lt.s32.totalorder %s63_s3, %s63_s3 }
  0x28   :  { %p6012_p3 = scmp.lt.s32.totalorder %s6010_s25, %s6006_s24 }
  0x2a   :  { %p6013_p4 = por %p6012_p3, %p6011_p2 }
  0x2c   :  { %p6014_p5 = pnand %p6013_p4, %p6007_p1 }
  0x2e   :  { %6017 = shalt.err (!%p6014_p5)
}
  0x2f   :  { %65 = dma.hbm_to_vmem [thread:$0]  %s8801_s7, 16, %s63_s3, [#allocation10]  }
  0x30   :  { %6018 = dma.done.wait [#allocation5], 16  }
  0x31   :  { %6019 = vsyncadd [#allocation5], 4294967280 }
  0x32   :  { %6020 = dma.done.wait [#allocation7], 4624  }
  0x33   :  { %6021 = vsyncadd [#allocation7], 4294962672 }
  0x34   :  { %6022 = dma.done.wait [#allocation10], 16  }
  0x35   :  { %6023 = vsyncadd [#allocation10], 4294967280  ;;  %v8816_v0 = vmov 0.0   ;;  %vm6031_vm0 = vmmov 0   ;;  %v8814_v1 = vmov 0   ;;  %vm294_vm1 = vcmask 1041408  }
  0x36   :  { %5625 = vmatprep.subr.bf16.mxu0 %v8816_v0  ;;  %5631 = vmatprep.mubr.msk.bf16.mxu0 %vm6031_vm0, %v8816_v0  ;;  %v5828_v2 = vld [vmem:[%s8796_s2 + $0x10] ss:$0 sps:$4 sm:$0x33]   ;;  %v5829_v4 = vld [vmem:[%s8796_s2 + $0x8] sm:$0xff]   ;;  %v5830_v5 = vld [vmem:[%s8796_s2] sm:$0xff]   ;;  %vm254_vm5 = vcmask 293888  }
  0x37   :  { %5826 = vset.pattern.permute.xlu0 %v8814_v1  ;;  %5827 = vset.pattern.permute.xlu1 %v8814_v1  ;;  %v296_v3 = vsel %vm294_vm1, %v5828_v2, 0  ;;  %v79_v6 = vld [vmem:[%s8795_s1] sm:$0xff]  ;;  %v81_v7 = vld [vmem:[%s8795_s1 + $0x10] sm:$0xff]  ;;  %v80_v8 = vld [vmem:[%s8795_s1 + $0x8] sm:$0xff]  ;;  %s6033_s20 = smov 32   ;;  %s6034_s24 = smov 96  }
  0x38   :  { %5626 = vmatpush3.bf16.msra.mxu0 %v296_v3  ;;  %vm104_vm2 = vcmp.gt.f32.partialorder %v79_v6, 0.0  ;;  %v5831_v9 = vld [vmem:[%s8794_s0] sm:$0xff]   ;;  %vm106_vm3 = vcmp.gt.f32.partialorder %v81_v7, 0.0  ;;  %vm105_vm4 = vcmp.gt.f32.partialorder %v80_v8, 0.0  ;;  %v82_v12 = vld [vmem:[%s8795_s1 + $0x18] sm:$0xff]  ;;  %v84_v14 = vld [vmem:[%s8795_s1 + $0x28] sm:$0xff] }
  0x39   :  { %5627 = vmatprep.subr.bf16.mxu0 %v8816_v0  ;;  %v459_v10 = vsel %vm104_vm2, 1, %v8814_v1  ;;  %v461_v11 = vsel %vm106_vm3, 1, %v8814_v1  ;;  %v83_v13 = vld [vmem:[%s8795_s1 + $0x20] sm:$0xff]  ;;  %v460_v15 = vsel %vm105_vm4, 1, %v8814_v1  ;;  %vm107_vm6 = vcmp.gt.f32.partialorder %v82_v12, 0.0  ;;  %v85_v17 = vld [vmem:[%s8795_s1 + $0x30] sm:$0xff] }
  0x3a   :  { %485 = vperm.xlu0 %5826, %v459_v10   ;;  %491 = vperm.xlu1 %5827, %v461_v11   ;;  %v462_v16 = vsel %vm107_vm6, 1, %v8814_v1  ;;  %vm108_vm7 = vcmp.gt.f32.partialorder %v83_v13, 0.0  ;;  %vm109_vm8 = vcmp.gt.f32.partialorder %v84_v14, 0.0  ;;  %v86_v18 = vld [vmem:[%s8795_s1 + $0x38] sm:$0xff]  ;;  %v87_v20 = vld [vmem:[%s8795_s1 + $0x40] sm:$0xff]  ;;  %v88_v21 = vld [vmem:[%s8795_s1 + $0x48] sm:$0xff] }
  0x3b   :  { %v463_v19 = vsel %vm108_vm7, 1, %v8814_v1  ;;  %v464_v22 = vsel %vm109_vm8, 1, %v8814_v1  ;;  %vm110_vm9 = vcmp.gt.f32.partialorder %v85_v17, 0.0  ;;  %v89_v23 = vld [vmem:[%s8795_s1 + $0x50] sm:$0xff]  ;;  %v5832_v24 = vld [vmem:[%s8794_s0 + $0x8] sm:$0xff]   ;;  %vm111_vm10 = vcmp.gt.f32.partialorder %v86_v18, 0.0 }
  0x3c   :  { %5628 = vmatpush3.bf16.msra.mxu0 %v5829_v4  ;;  %v90_v25 = vld [vmem:[%s8795_s1 + $0x58] sm:$0xff]  ;;  %vm112_vm11 = vcmp.gt.f32.partialorder %v87_v20, 0.0  ;;  %vm113_vm12 = vcmp.gt.f32.partialorder %v88_v21, 0.0  ;;  %v91_v26 = vld [vmem:[%s8795_s1 + $0x60] sm:$0xff]  ;;  %v92_v27 = vld [vmem:[%s8795_s1 + $0x68] sm:$0xff]  ;;  %v465_v28 = vsel %vm110_vm9, 1, %v8814_v1 }
  0x3d   :  { %5629 = vmatprep.subr.bf16.mxu0 %v8816_v0  ;;  %vm114_vm13 = vcmp.gt.f32.partialorder %v89_v23, 0.0  ;;  %v93_v29 = vld [vmem:[%s8795_s1 + $0x70] sm:$0xff]  ;;  %v94_v30 = vld [vmem:[%s8795_s1 + $0x78] sm:$0xff]  ;;  %v95_v31 = vld [vmem:[%s8795_s1 + $0x80] sm:$0xff]  ;;  %v466_v32 = vsel %vm111_vm10, 1, %v8814_v1  ;;  %vm115_vm14 = vcmp.gt.f32.partialorder %v90_v25, 0.0 }
  0x3e   :  { %488 = vperm.xlu0 %5826, %v460_v15   ;;  %494 = vperm.xlu1 %5827, %v462_v16   ;;  %v96_v33 = vld [vmem:[%s8795_s1 + $0x88] sm:$0xff]  ;;  %v97_v34 = vld [vmem:[%s8795_s1 + $0x90] sm:$0xff]  ;;  %v467_v35 = vsel %vm112_vm11, 1, %v8814_v1  ;;  %v468_v36 = vsel %vm113_vm12, 1, %v8814_v1  ;;  %vm116_vm15 = vcmp.gt.f32.partialorder %v91_v26, 0.0  ;;  %vm117_vm2 = vcmp.gt.f32.partialorder %v92_v27, 0.0 }
  0x3f   :  { %v469_v37 = vsel %vm114_vm13, 1, %v8814_v1  ;;  %vm118_vm3 = vcmp.gt.f32.partialorder %v93_v29, 0.0  ;;  %vm119_vm4 = vcmp.gt.f32.partialorder %v94_v30, 0.0  ;;  %vm120_vm6 = vcmp.gt.f32.partialorder %v95_v31, 0.0  ;;  %v98_v38 = vld [vmem:[%s8795_s1 + $0x98] sm:$0xff]  ;;  %v99_v39 = vld [vmem:[%s8795_s1 + $0xa0] sm:$0xff] }
  0x40   :  { %5630 = vmatpush3.bf16.msra.mxu0 %v5830_v5  ;;  %v470_v40 = vsel %vm115_vm14, 1, %v8814_v1  ;;  %vm121_vm7 = vcmp.gt.f32.partialorder %v96_v33, 0.0  ;;  %vm122_vm8 = vcmp.gt.f32.partialorder %v97_v34, 0.0  ;;  %v100_v41 = vld [vmem:[%s8795_s1 + $0xa8] sm:$0xff]  ;;  %v471_v42 = vsel %vm116_vm15, 1, %v8814_v1  ;;  %v5833_v44 = vld [vmem:[%s8794_s0 + $0x10] sm:$0xff]  }
  0x41   :  { %v472_v43 = vsel %vm117_vm2, 1, %v8814_v1  ;;  %vm123_vm9 = vcmp.gt.f32.partialorder %v98_v38, 0.0  ;;  %vm124_vm10 = vcmp.gt.f32.partialorder %v99_v39, 0.0  ;;  %v473_v45 = vsel %vm118_vm3, 1, %v8814_v1  ;;  %v101_v52 = vld [vmem:[%s8795_s1 + $0xb0] sm:$0xff]  ;;  %v102_v53 = vld [vmem:[%s8795_s1 + $0xb8] sm:$0xff] }
  0x42   :  { %497 = vperm.xlu0 %5826, %v463_v19   ;;  %500 = vperm.xlu1 %5827, %v464_v22   ;;  %v474_v46 = vsel %vm119_vm4, 1, %v8814_v1  ;;  %v475_v47 = vsel %vm120_vm6, 1, %v8814_v1  ;;  %vm125_vm11 = vcmp.gt.f32.partialorder %v100_v41, 0.0  ;;  %v476_v48 = vsel %vm121_vm7, 1, %v8814_v1  ;;  %v103_v55 = vld [vmem:[%s8795_s1 + $0xc0] sm:$0xff]  ;;  %v5834_v56 = vld [vmem:[%s8794_s0 + $0x18] sm:$0xff]  }
  0x43   :  { %5632 = vmatmul.mubr.msk.bf16.vlgmr.msra.gmra.mxu0 %vm254_vm5, %v5831_v9  ;;  %v477_v49 = vsel %vm122_vm8, 1, %v8814_v1  ;;  %v478_v50 = vsel %vm123_vm9, 1, %v8814_v1  ;;  %v479_v51 = vsel %vm124_vm10, 1, %v8814_v1  ;;  %v480_v54 = vsel %vm125_vm11, 1, %v8814_v1  ;;  %v5835_v57 = vld [vmem:[%s8794_s0 + $0x20] sm:$0xff]   ;;  %v5836_v61 = vld [vmem:[%s8794_s0 + $0x28] sm:$0xff]  }
  0x44   :  { %5635 = vmatprep.mubr.msk.bf16.mxu0 %vm6031_vm0, %v8816_v0  ;;  %vm126_vm12 = vcmp.gt.f32.partialorder %v101_v52, 0.0  ;;  %vm127_vm13 = vcmp.gt.f32.partialorder %v102_v53, 0.0  ;;  %vm128_vm14 = vcmp.gt.f32.partialorder %v103_v55, 0.0  ;;  %vm129_vm15 = vcmask 257024   ;;  %v5837_v62 = vld [vmem:[%s8794_s0 + $0x30] sm:$0xff]   ;;  %v5838_v63 = vld [vmem:[%s8794_s0 + $0x38] sm:$0xff]  }
  0x45   :  { %v481_v58 = vsel %vm126_vm12, 1, %v8814_v1  ;;  %v482_v59 = vsel %vm127_vm13, 1, %v8814_v1  ;;  %v483_v60 = vsel %vm128_vm14, 1, %v8814_v1  ;;  %130 = vst.msk [vmem:[#allocation2] sm:$0xf] %vm129_vm15, %v8814_v1  ;;  %v5839_v2 = vld [vmem:[%s8794_s0 + $0x40] sm:$0xff]  }
  0x46   :  { %503 = vperm.xlu0 %5826, %v465_v28   ;;  %506 = vperm.xlu1 %5827, %v466_v32   ;;  %131 = vst.msk [vmem:[#allocation2 + $0x4] sm:$0xf] %vm129_vm15, %v8814_v1  ;;  %132 = vst.msk [vmem:[#allocation2 + $0x6c] sm:$0xf] %vm129_vm15, %v8814_v1  ;;  %v5840_v3 = vld [vmem:[%s8794_s0 + $0x48] sm:$0xff]   ;;  %v5841_v4 = vld [vmem:[%s8794_s0 + $0x50] sm:$0xff]  }
  0x47   :  { %133 = vst.msk [vmem:[#allocation2 + $0x70] sm:$0xf] %vm129_vm15, %v8814_v1  ;;  %v5842_v5 = vld [vmem:[%s8794_s0 + $0x58] sm:$0xff]   ;;  %v5843_v6 = vld [vmem:[%s8794_s0 + $0x60] ss:$0 sps:$4 sm:$0xff]   ;;  %v5853_v9 = vld [vmem:[%s8798_s4 + $0x70] sm:$0xff]  }
  0x48   :  { %v5849_v7 = vld [vmem:[%s8798_s4 + $0x78] sm:$0xff]   ;;  %v5854_v10 = vld [vmem:[%s8798_s4 + $0x30] sm:$0xff]   ;;  %v6313_v11 = vld [vmem:[#allocation4] ss:$0 sm:$0xff]  ;;  %vm971_vm8 = vcmask 1046528  }
  0x49   :  { %v5850_v8 = vld [vmem:[%s8798_s4 + $0x38] sm:$0xff]   ;;  %5311 = vmatprep.subr.bf16.mxu0 %v5849_v7  ;;  %5799 = vmatprep.subr.bf16.mxu1 %v5849_v7  ;;  %v5857_v21 = vld [vmem:[%s8798_s4 + $0x68] sm:$0xff]   ;;  %v5862_v55 = vld [vmem:[%s8798_s4 + $0x60] sm:$0xff]   ;;  %vm838_vm10 = vsmask.f32 7424 }
  0x4a   :  { %509 = vperm.xlu0 %5826, %v467_v35   ;;  %512 = vperm.xlu1 %5827, %v468_v36   ;;  %v5859_v26 = vld [vmem:[%s8798_s4 + $0x28] sm:$0xff]   ;;  %vm1092_vm11 = vsmask.f32 2304 }
  0x4b   :  { %5636 = vmatmul.mubr.msk.bf16.gmra.mxu0 %vm254_vm5, %v5832_v24  ;;  %5807 = vmatpush3.bf16.msra.mxu1 %v5850_v8 }
  0x4c   :  { %5639 = vmatprep.mubr.msk.bf16.mxu0 %vm6031_vm0, %v8816_v0  ;;  %5312 = vmatpush3.bf16.msra.mxu0 %v5850_v8  ;;  %v761_v35 = vld [vmem:[#allocation2] sm:$0x8] }
  0x4d   :  { %5313 = vmatprep.subr.bf16.mxu0 %v5853_v9  ;;  %5800 = vmatprep.subr.bf16.mxu1 %v5853_v9  ;;  %v736_v34 = vld [vmem:[#allocation2 + $0x4] sm:$0xf] }
  0x4e   :  { %515 = vperm.xlu0 %5826, %v469_v37   ;;  %518 = vperm.xlu1 %5827, %v470_v40  }
  0x4f   :  { %5808 = vmatpush3.bf16.msra.mxu1 %v5854_v10 }
  0x50   :  { %5314 = vmatpush3.bf16.msra.mxu0 %v5854_v10  ;;  %5801 = vmatprep.subr.bf16.mxu1 %v5857_v21 }
  0x51   :  { %5315 = vmatprep.subr.bf16.mxu0 %v5857_v21 }
  0x52   :  { %521 = vperm.xlu0 %5826, %v471_v42   ;;  %524 = vperm.xlu1 %5827, %v472_v43   ;;  %v4964_v42 = vcombine.low %v761_v35, %v736_v34 }
  0x53   :  { %5640 = vmatmul.mubr.msk.bf16.gmra.mxu0 %vm254_vm5, %v5833_v44  ;;  %5809 = vmatpush3.bf16.msra.mxu1 %v5859_v26 }
  0x54   :  { %5643 = vmatprep.mubr.msk.bf16.mxu0 %vm6031_vm0, %v8816_v0  ;;  %5316 = vmatpush3.bf16.msra.mxu0 %v5859_v26  ;;  %v842_v52 = vshll.u32 %v4964_v42, 16 }
  0x55   :  { %5317 = vmatprep.subr.bf16.mxu0 %v5862_v55  ;;  %5802 = vmatprep.subr.bf16.mxu1 %v5862_v55 }
  0x56   :  { %527 = vperm.xlu0 %5826, %v473_v45   ;;  %530 = vperm.xlu1 %5827, %v474_v46  }
  0x5a   :  { %533 = vperm.xlu0 %5826, %v475_v47   ;;  %536 = vperm.xlu1 %5827, %v476_v48  }
  0x5b   :  { %5644 = vmatmul.mubr.msk.bf16.gmra.mxu0 %vm254_vm5, %v5834_v56 }
  0x5c   :  { %5647 = vmatprep.mubr.msk.bf16.mxu0 %vm6031_vm0, %v8816_v0 }
  0x5e   :  { %539 = vperm.xlu0 %5826, %v477_v49   ;;  %542 = vperm.xlu1 %5827, %v478_v50  }
  0x62   :  { %545 = vperm.xlu0 %5826, %v479_v51   ;;  %548 = vperm.xlu1 %5827, %v480_v54  }
  0x63   :  { %5648 = vmatmul.mubr.msk.bf16.gmra.mxu0 %vm254_vm5, %v5835_v57 }
  0x64   :  { %5651 = vmatprep.mubr.msk.bf16.mxu0 %vm6031_vm0, %v8816_v0 }
  0x66   :  { %551 = vperm.xlu0 %5826, %v481_v58   ;;  %554 = vperm.xlu1 %5827, %v482_v59   ;;  %v972_v58 = vrot.slane %v4964_v42, 1  ;;  %v5863_v59 = vld [vmem:[%s8798_s4 + $0x20] sm:$0xff]  }
  0x67   :  { %5318 = vmatpush3.bf16.msra.mxu0 %v5863_v59  ;;  %5810 = vmatpush3.bf16.msra.mxu1 %v5863_v59 }
  0x6a   :  { %557 = vperm.xlu0 %5826, %v483_v60  }
  0x6b   :  { %5652 = vmatmul.mubr.msk.bf16.gmra.mxu0 %vm254_vm5, %v5836_v61 }
  0x6c   :  { %5655 = vmatprep.mubr.msk.bf16.mxu0 %vm6031_vm0, %v8816_v0 }
  0x73   :  { %5656 = vmatmul.mubr.msk.bf16.gmra.mxu0 %vm254_vm5, %v5837_v62 }
  0x74   :  { %5659 = vmatprep.mubr.msk.bf16.mxu0 %vm6031_vm0, %v8816_v0 }
  0x7b   :  { %5660 = vmatmul.mubr.msk.bf16.gmra.mxu0 %vm254_vm5, %v5838_v63  ;;  %v840_v63 = vshrl.u32 %v4964_v42, 16 }
  0x7c   :  { %5663 = vmatprep.mubr.msk.bf16.mxu0 %vm6031_vm0, %v8816_v0 }
  0x83   :  { %5664 = vmatmul.mubr.msk.bf16.gmra.mxu0 %vm254_vm5, %v5839_v2 }
  0x84   :  { %5667 = vmatprep.mubr.msk.bf16.mxu0 %vm6031_vm0, %v8816_v0 }
  0x8b   :  { %5668 = vmatmul.mubr.msk.bf16.gmra.mxu0 %vm254_vm5, %v5840_v3 }
  0x8c   :  { %5671 = vmatprep.mubr.msk.bf16.mxu0 %vm6031_vm0, %v8816_v0 }
  0x93   :  { %5672 = vmatmul.mubr.msk.bf16.gmra.mxu0 %vm254_vm5, %v5841_v4 }
  0x94   :  { %5675 = vmatprep.mubr.msk.bf16.mxu0 %vm6031_vm0, %v8816_v0 }
  0x9b   :  { %5676 = vmatmul.mubr.msk.bf16.gmra.mxu0 %vm254_vm5, %v5842_v5 }
  0x9c   :  { %5679 = vmatprep.mubr.msk.bf16.mxu0 %vm6031_vm0, %v8816_v0 }
  0xa3   :  { %5680 = vmatmul.mubr.msk.bf16.gmra.mxu0 %vm254_vm5, %v5843_v6  ;;  %v844_v6 = vrot.slane %v842_v52, 1 }
  0xb5   :  { %v6315_v12 = vpop.permute.xlu0 %485  ;;  %v6332_v27 = vpop.permute.xlu1 %491 }
  0xb6   :  { %8921 = vst [vmem:[#allocation14_spill] sm:$0xff] %v6315_v12  ;;  %vm559_vm5 = vcmp.eq.s32.totalorder %v6315_v12, 1  ;;  %8923 = vst [vmem:[#allocation16_spill] sm:$0xff] %v6332_v27  ;;  %vm561_vm3 = vcmp.eq.s32.totalorder %v6332_v27, 1 }
  0xb9   :  { %v6319_v18 = vpop.permute.xlu0 %488  ;;  %v6342_v40 = vpop.permute.xlu1 %494 }
  0xba   :  { %8922 = vst [vmem:[#allocation15_spill] sm:$0xff] %v6319_v18  ;;  %vm560_vm2 = vcmp.eq.s32.totalorder %v6319_v18, 1  ;;  %8924 = vst [vmem:[#allocation17_spill] sm:$0xff] %v6342_v40  ;;  %vm562_vm4 = vcmp.eq.s32.totalorder %v6342_v40, 1 }
  0xbd   :  { %v6349_v48 = vpop.permute.xlu0 %497  ;;  %v6369_v3 = vpop.permute.xlu1 %500 }
  0xbe   :  { %8925 = vst [vmem:[#allocation18_spill] sm:$0xff] %v6349_v48  ;;  %vm563_vm6 = vcmp.eq.s32.totalorder %v6349_v48, 1  ;;  %8926 = vst [vmem:[#allocation19_spill] sm:$0xff] %v6369_v3  ;;  %vm8851_vm7 = vcmp.eq.s32.totalorder %v6369_v3, 1 }
 0x103   :  { %v332_v13 = vpop.f32.mrf.mxu0 }
 0x104   :  { %v333_v14 = vadd.f32 %v6313_v11, %v332_v13 }
 0x105   :  { %v5633_v15 = vpop.f32.mrf.mxu0 }
 0x106   :  { %v434_v16 = vmax.f32 %v333_v14, 0.0 }
 0x107   :  { %v335_v17 = vpop.f32.mrf.mxu0 }
 0x108   :  { %v584_v19 = vsel %vm559_vm5, %v434_v16, 0.0  ;;  %v336_v20 = vadd.f32 %v6313_v11, %v335_v17 }
 0x109   :  { %v5149_v22 = vpack.c.bf16 %v584_v19, %v584_v19  ;;  %v5634_v23 = vpop.f32.mrf.mxu0  ;;  %v6381_v19 = vpop.permute.xlu0 %503 }
 0x10a   :  { %v435_v24 = vmax.f32 %v336_v20, 0.0  ;;  %8927 = vst [vmem:[#allocation20_spill] sm:$0xff] %v6381_v19  ;;  %vm8811_vm9 = vcmp.eq.s32.totalorder %v6381_v19, 1 }
 0x10b   :  { %710 = vst.msk [vmem:[#allocation2 + $0x8] sm:$0xf] %vm129_vm15, %v5149_v22  ;;  %v340_v25 = vpop.f32.mrf.mxu0  ;;  %v845_v22 = vor.u32 %v844_v6, %v840_v63 }
 0x10c   :  { %v585_v28 = vsel %vm560_vm2, %v435_v24, 0.0  ;;  %v341_v29 = vadd.f32 %v6313_v11, %v340_v25 }
 0x10d   :  { %v5150_v30 = vpack.c.bf16 %v585_v28, %v585_v28  ;;  %v5637_v31 = vpop.f32.mrf.mxu0 }
 0x10e   :  { %v436_v32 = vmax.f32 %v341_v29, 0.0  ;;  %v6393_v29 = vpop.permute.xlu1 %506 }
 0x10f   :  { %711 = vst.msk [vmem:[#allocation2 + $0xc] sm:$0xf] %vm129_vm15, %v5150_v30  ;;  %v343_v33 = vpop.f32.mrf.mxu0  ;;  %8929 = vst [vmem:[#allocation22_spill] sm:$0xff] %v6393_v29  ;;  %vm8810_vm12 = vcmp.eq.s32.totalorder %v6393_v29, 1 }
 0x110   :  { %v586_v36 = vsel %vm561_vm3, %v436_v32, 0.0  ;;  %v344_v37 = vadd.f32 %v6313_v11, %v343_v33 }
 0x111   :  { %v5151_v38 = vpack.c.bf16 %v586_v36, %v586_v36  ;;  %v5638_v39 = vpop.f32.mrf.mxu0 }
 0x112   :  { %v437_v41 = vmax.f32 %v344_v37, 0.0  ;;  %v6351_v50 = vld [vmem:[#allocation2 + $0x8] sm:$0xf]  ;;  %v763_v37 = vld [vmem:[#allocation2 + $0x4] sm:$0x8] }
 0x113   :  { %712 = vst.msk [vmem:[#allocation2 + $0x10] sm:$0xf] %vm129_vm15, %v5151_v38  ;;  %v348_v43 = vpop.f32.mrf.mxu0 }
 0x114   :  { %v587_v44 = vsel %vm562_vm4, %v437_v41, 0.0  ;;  %v349_v45 = vadd.f32 %v6313_v11, %v348_v43 }
 0x115   :  { %v5152_v46 = vpack.c.bf16 %v587_v44, %v587_v44  ;;  %v5641_v47 = vpop.f32.mrf.mxu0 }
 0x116   :  { %v438_v49 = vmax.f32 %v349_v45, 0.0  ;;  %v738_v51 = vld [vmem:[#allocation2 + $0xc] sm:$0xf] }
 0x117   :  { %713 = vst.msk [vmem:[#allocation2 + $0x14] sm:$0xf] %vm129_vm15, %v5152_v46  ;;  %v351_v53 = vpop.f32.mrf.mxu0  ;;  %v6356_v54 = vcombine.low %v6351_v50, %v738_v51  ;;  %v768_v33 = vld [vmem:[#allocation2 + $0xc] sm:$0xe] }
 0x118   :  { %v588_v56 = vsel %vm563_vm6, %v438_v49, 0.0  ;;  %v352_v57 = vadd.f32 %v6313_v11, %v351_v53  ;;  %v4966_v53 = vcombine.low %v763_v37, %v6351_v50 }
 0x119   :  { %v5153_v60 = vpack.c.bf16 %v588_v56, %v588_v56  ;;  %v5642_v61 = vpop.f32.mrf.mxu0  ;;  %v1158_v62 = vrot.slane %v6356_v54, 6  ;;  %v847_v2 = vshll.u32 %v6356_v54, 16  ;;  %v973_v5 = vrot.slane %v6356_v54, 1 }
 0x11a   :  { %v439_v4 = vmax.f32 %v352_v57, 0.0  ;;  %v851_v7 = vshrl.u32 %v6356_v54, 16  ;;  %v739_v17 = vld [vmem:[#allocation2 + $0x10] sm:$0xf]  ;;  %v6423_v61 = vpop.permute.xlu0 %509 }
 0x11b   :  { %714 = vst.msk [vmem:[#allocation2 + $0x18] sm:$0xf] %vm129_vm15, %v5153_v60  ;;  %v356_v8 = vpop.f32.mrf.mxu0  ;;  %1183 = vrot.lane.b32.xlu1 %v1158_v62, %s6033_s20  ;;  %v1094_v14 = vrot.slane %v847_v2, 6  ;;  %v974_v21 = vsel %vm971_vm8, %v972_v58, %v973_v5  ;;  %v849_v23 = vrot.slane %v847_v2, 1  ;;  %v6398_v32 = vcombine.low %v738_v51, %v739_v17  ;;  %8930 = vst [vmem:[#allocation23_spill] sm:$0xff] %v6423_v61 }
 0x11c   :  { %v589_v9 = vsel %vm8851_vm7, %v439_v4, 0.0  ;;  %v357_v10 = vadd.f32 %v6313_v11, %v356_v8  ;;  %v1093_v13 = vrot.slane %v851_v7, 5  ;;  %v6402_v39 = vcombine.low %v768_v33, %v739_v17 }
 0x11d   :  { %v5154_v15 = vpack.c.bf16 %v589_v9, %v589_v9  ;;  %v5645_v16 = vpop.f32.mrf.mxu0  ;;  %v850_v42 = vsel %vm838_vm10, %v845_v22, %v849_v23  ;;  %v1214_v58 = vrot.slane %v6398_v32, 6  ;;  %v1041_v2 = vrot.slane %v6398_v32, 1 }
 0x11e   :  { %v440_v20 = vmax.f32 %v357_v10, 0.0  ;;  %v740_v24 = vld [vmem:[#allocation2 + $0x14] sm:$0xf]  ;;  %v6391_v28 = vor.u32 %v1094_v14, %v1093_v13  ;;  %v1270_v59 = vshrl.u32 %v6402_v39, 16  ;;  %v1273_v60 = vshll.u32 %v6402_v39, 16  ;;  %v5866_v13 = vld [vmem:[%s8798_s4 + $0x58] sm:$0xff]  }
 0x11f   :  { %715 = vst.msk [vmem:[#allocation2 + $0x1c] sm:$0xf] %vm129_vm15, %v5154_v15  ;;  %v359_v25 = vpop.f32.mrf.mxu0  ;;  %997 = vrot.lane.b32.xlu1 %v974_v21, %s6027_s5  ;;  %v6389_v26 = vcombine.low %v739_v17, %v740_v24  ;;  %vm8805_vm13 = vcmp.eq.s32.totalorder %v6423_v61, 1  ;;  %v5867_v14 = vld [vmem:[%s8798_s4 + $0x18] sm:$0xff]   ;;  %v1040_v17 = vrot.slane %v4966_v53, 1  ;;  %5319 = vmatprep.subr.bf16.mxu0 %v5866_v13  ;;  %vm1414_vm7 = vcmask 1040384  }
 0x120   :  { %v590_v30 = vsel %vm8811_vm9, %v440_v20, 0.0  ;;  %v360_v31 = vadd.f32 %v6313_v11, %v359_v25  ;;  %v1272_v22 = vrot.slane %v1270_v59, 6  ;;  %5803 = vmatprep.subr.bf16.mxu1 %v5866_v13  ;;  %5320 = vmatpush3.bf16.msra.mxu0 %v5867_v14 }
 0x121   :  { %8928 = vst [vmem:[#allocation21_spill] sm:$0xff] %v6389_v26  ;;  %v5155_v34 = vpack.c.bf16 %v590_v30, %v590_v30  ;;  %v5646_v35 = vpop.f32.mrf.mxu0  ;;  %v1159_v36 = vrot.slane %v6389_v26, 6  ;;  %v855_v38 = vshll.u32 %v6389_v26, 16  ;;  %v859_v43 = vshrl.u32 %v6389_v26, 16  ;;  %5811 = vmatpush3.bf16.msra.mxu1 %v5867_v14 }
 0x122   :  { %v441_v41 = vmax.f32 %v360_v31, 0.0  ;;  %v975_v46 = vrot.slane %v6389_v26, 1  ;;  %v741_v49 = vld [vmem:[#allocation2 + $0x18] sm:$0xf]  ;;  %v1042_v31 = vsel %vm971_vm8, %v1040_v17, %v1041_v2 }
 0x123   :  { %716 = vst.msk [vmem:[#allocation2 + $0x20] sm:$0xf] %vm129_vm15, %v5155_v34  ;;  %v364_v44 = vpop.f32.mrf.mxu0  ;;  %942 = vrot.lane.b32.xlu1 %v850_v42, %s6033_s20  ;;  %v1160_v45 = vsel %vm294_vm1, %v1158_v62, %v1159_v36  ;;  %v1097_v47 = vrot.slane %v855_v38, 6  ;;  %v1096_v55 = vrot.slane %v859_v43, 5  ;;  %v6425_v62 = vpop.permute.xlu1 %512  ;;  %v6428_v4 = vrot.slane %v855_v38, 1 }
 0x124   :  { %v591_v51 = vsel %vm8810_vm12, %v441_v41, 0.0  ;;  %v365_v52 = vadd.f32 %v6313_v11, %v364_v44  ;;  %1185 = vrot.lane.b32.xlu0 %v1160_v45, %s6033_s20  ;;  %8931 = vst [vmem:[#allocation24_spill] sm:$0xff] %v6425_v62  ;;  %v6430_v50 = vcombine.low %v740_v24, %v741_v49  ;;  %vm8803_vm14 = vcmp.eq.s32.totalorder %v6425_v62, 1  ;;  %v5869_v45 = vld [vmem:[%s8798_s4 + $0x50] sm:$0xff]  }
 0x125   :  { %v5156_v56 = vpack.c.bf16 %v591_v51, %v591_v51  ;;  %v5649_v57 = vpop.f32.mrf.mxu0  ;;  %v976_v9 = vsel %vm971_vm8, %v973_v5, %v975_v46  ;;  %v6443_v10 = vor.u32 %v1097_v47, %v1096_v55  ;;  %v853_v5 = vor.u32 %v851_v7, %v849_v23  ;;  %v5870_v47 = vld [vmem:[%s8798_s4 + $0x10] sm:$0xff]   ;;  %5321 = vmatprep.subr.bf16.mxu0 %v5869_v45 }
 0x126   :  { %v442_v63 = vmax.f32 %v365_v52, 0.0  ;;  %v742_v6 = vld [vmem:[#allocation2 + $0x1c] sm:$0xf]  ;;  %v1275_v24 = vrot.slane %v1273_v60, 7  ;;  %v1215_v34 = vrot.slane %v6430_v50, 6  ;;  %v1278_v37 = vshrl.u32 %v6430_v50, 16  ;;  %5804 = vmatprep.subr.bf16.mxu1 %v5869_v45  ;;  %5322 = vmatpush3.bf16.msra.mxu0 %v5870_v47 }
 0x127   :  { %717 = vst.msk [vmem:[#allocation2 + $0x24] sm:$0xf] %vm129_vm15, %v5156_v56  ;;  %v367_v8 = vpop.f32.mrf.mxu0  ;;  %1239 = vrot.lane.b32.xlu1 %v1214_v58, %s6027_s5  ;;  %v6457_v25 = vcombine.low %v741_v49, %v742_v6  ;;  %v858_v33 = vsel %vm838_vm10, %v853_v5, %v6428_v4  ;;  %v1281_v38 = vshll.u32 %v6430_v50, 16  ;;  %v6477_v41 = vsel %vm1092_vm11, %v6391_v28, %v6443_v10  ;;  %v6489_v49 = vpop.permute.xlu0 %515 }
 0x128   :  { %v592_v15 = vsel %vm8805_vm13, %v442_v63, 0.0  ;;  %v368_v16 = vadd.f32 %v6313_v11, %v367_v8  ;;  %999 = vrot.lane.b32.xlu0 %v976_v9, %s6027_s5  ;;  %8933 = vst [vmem:[#allocation26_spill] sm:$0xff] %v6489_v49  ;;  %v6491_v53 = vor.u32 %v1275_v24, %v1272_v22  ;;  %v1216_v63 = vsel %vm294_vm1, %v1214_v58, %v1215_v34  ;;  %v5873_v58 = vld [vmem:[%s8798_s4 + $0x8] sm:$0xff]  }
 0x129   :  { %v5157_v20 = vpack.c.bf16 %v592_v15, %v592_v15  ;;  %v5650_v21 = vpop.f32.mrf.mxu0  ;;  %8932 = vst [vmem:[#allocation25_spill] sm:$0xff] %v6457_v25  ;;  %v1161_v55 = vrot.slane %v6457_v25, 6  ;;  %v1280_v8 = vrot.slane %v1278_v37, 6  ;;  %v1283_v9 = vrot.slane %v1281_v38, 7  ;;  %v5871_v15 = vld [vmem:[%s8798_s4 + $0x48] sm:$0xff]   ;;  %5812 = vmatpush3.bf16.msra.mxu1 %v5870_v47 }
 0x12a   :  { %v443_v30 = vmax.f32 %v368_v16, 0.0  ;;  %v6465_v35 = vld [vmem:[#allocation2 + $0x20] sm:$0xf]  ;;  %v6524_v21 = vpop.permute.xlu1 %518  ;;  %5323 = vmatprep.subr.bf16.mxu0 %v5871_v15  ;;  %5805 = vmatprep.subr.bf16.mxu1 %v5871_v15  ;;  %vm8900_vm13 = vsmask.f32 1280 }
 0x12b   :  { %718 = vst.msk [vmem:[#allocation2 + $0x28] sm:$0xf] %vm129_vm15, %v5157_v20  ;;  %v372_v7 = vpop.f32.mrf.mxu0  ;;  %1065 = vrot.lane.b32.xlu1 %v1042_v31, %s6034_s24  ;;  %v6470_v23 = vcombine.low %v742_v6, %v6465_v35  ;;  %v1043_v6 = vrot.slane %v6430_v50, 1  ;;  %v1162_v5 = vsel %vm294_vm1, %v1159_v36, %v1161_v55  ;;  %v5876_v20 = vld [vmem:[%s8798_s4 + $0x40] sm:$0xff]   ;;  %8934 = vst [vmem:[#allocation27_spill] sm:$0xff] %v6524_v21  ;;  %5324 = vmatpush3.bf16.msra.mxu0 %v5873_v58 }
 0x12c   :  { %v593_v42 = vsel %vm8803_vm14, %v443_v30, 0.0  ;;  %v373_v44 = vadd.f32 %v6313_v11, %v372_v7  ;;  %944 = vrot.lane.b32.xlu0 %v858_v33, %s6033_s20  ;;  %vm8804_vm14 = vcmp.eq.s32.totalorder %v6489_v49, 1  ;;  %v1284_v37 = vor.u32 %v1283_v9, %v1280_v8  ;;  %5325 = vmatprep.subr.bf16.mxu0 %v5876_v20 }
 0x12d   :  { %v5158_v51 = vpack.c.bf16 %v593_v42, %v593_v42  ;;  %v5653_v52 = vpop.f32.mrf.mxu0  ;;  %v1287_v57 = vshrl.u32 %v6470_v23, 16  ;;  %v1290_v59 = vshll.u32 %v6470_v23, 16  ;;  %v1217_v24 = vrot.slane %v6470_v23, 6  ;;  %v5877_v42 = vld [vmem:[%s8798_s4] sm:$0xff]   ;;  %5813 = vmatpush3.bf16.msra.mxu1 %v5873_v58 }
 0x12e   :  { %v444_v56 = vmax.f32 %v373_v44, 0.0  ;;  %v744_v33 = vld [vmem:[#allocation2 + $0x24] sm:$0xf]  ;;  %v1044_v36 = vsel %vm971_vm8, %v1041_v2, %v1043_v6  ;;  %v6540_v44 = vpop.permute.xlu0 %521  ;;  %5806 = vmatprep.subr.bf16.mxu1 %v5876_v20  ;;  %v6566_v8 = vpop.permute.xlu1 %524  ;;  %v867_v58 = vshrl.u32 %v6457_v25, 16 }
 0x12f   :  { %719 = vst.msk [vmem:[#allocation2 + $0x2c] sm:$0xf] %vm129_vm15, %v5158_v51  ;;  %v375_v60 = vpop.f32.mrf.mxu0  ;;  %1385 = vrot.lane.b32.xlu1 %v6491_v53, %s6034_s24  ;;  %v1289_v30 = vrot.slane %v1287_v57, 6  ;;  %v1292_v31 = vrot.slane %v1290_v59, 7  ;;  %8935 = vst [vmem:[#allocation28_spill] sm:$0xff] %v6540_v44  ;;  %v6547_v51 = vcombine.low %v6465_v35, %v744_v33  ;;  %5326 = vmatpush3.bf16.msra.mxu0 %v5877_v42 }
 0x130   :  { %v594_v13 = vsel %vm8804_vm14, %v444_v56, 0.0  ;;  %v376_v14 = vadd.f32 %v6313_v11, %v375_v60  ;;  %1241 = vrot.lane.b32.xlu0 %v1216_v63, %s6027_s5  ;;  %vm8806_vm14 = vcmp.eq.s32.totalorder %v6524_v21, 1  ;;  %v1218_v56 = vsel %vm294_vm1, %v1215_v34, %v1217_v24  ;;  %8937 = vst [vmem:[#allocation30_spill] sm:$0xff] %v6566_v8  ;;  %5683 = vmatprep.subr.bf16.mxu0 %v8816_v0 }
 0x131   :  { %v5159_v16 = vpack.c.bf16 %v594_v13, %v594_v13  ;;  %v5654_v17 = vpop.f32.mrf.mxu0  ;;  %8936 = vst [vmem:[#allocation29_spill] sm:$0xff] %v6547_v51  ;;  %v6554_v57 = vor.u32 %v1292_v31, %v1289_v30  ;;  %v1285_v60 = vsel %vm8900_vm13, %v6491_v53, %v1284_v37  ;;  %v977_v63 = vrot.slane %v6457_v25, 1  ;;  %5814 = vmatpush3.bf16.msra.mxu1 %v5877_v42 }
 0x132   :  { %v445_v22 = vmax.f32 %v376_v14, 0.0  ;;  %v6535_v38 = vld [vmem:[#allocation2 + $0x28] sm:$0xf]  ;;  %v863_v34 = vshll.u32 %v6457_v25, 16  ;;  %v1163_v53 = vrot.slane %v6547_v51, 6 }
 0x133   :  { %720 = vst.msk [vmem:[#allocation2 + $0x30] sm:$0xf] %vm129_vm15, %v5159_v16  ;;  %v380_v7 = vpop.f32.mrf.mxu0  ;;  %1187 = vrot.lane.b32.xlu1 %v1162_v5, %s6033_s20  ;;  %v6557_v59 = vcombine.low %v744_v33, %v6535_v38  ;;  %v6575_v16 = vpop.permute.xlu0 %527  ;;  %v1294_v5 = vsel %vm8900_vm13, %v1284_v37, %v6554_v57  ;;  %v978_v31 = vsel %vm971_vm8, %v975_v46, %v977_v63  ;;  %v1100_v46 = vrot.slane %v867_v58, 5 }
 0x134   :  { %v595_v45 = vsel %vm8806_vm14, %v445_v22, 0.0  ;;  %v381_v47 = vadd.f32 %v6313_v11, %v380_v7  ;;  %1067 = vrot.lane.b32.xlu0 %v1044_v36, %s6034_s24  ;;  %vm8807_vm14 = vcmp.eq.s32.totalorder %v6540_v44, 1  ;;  %8938 = vst [vmem:[#allocation31_spill] sm:$0xff] %v6575_v16  ;;  %v6589_v33 = vrot.slane %v863_v34, 1 }
 0x135   :  { %v5160_v32 = vpack.c.bf16 %v595_v45, %v595_v45  ;;  %v5657_v2 = vpop.f32.mrf.mxu0  ;;  %v1296_v20 = vshrl.u32 %v6557_v59, 16  ;;  %v1299_v22 = vshll.u32 %v6557_v59, 16  ;;  %v861_v37 = vor.u32 %v859_v43, %v6428_v4 }
 0x136   :  { %v446_v52 = vmax.f32 %v381_v47, 0.0  ;;  %v1101_v47 = vrot.slane %v863_v34, 6  ;;  %v6601_v2 = vpop.permute.xlu1 %530  ;;  %v746_v43 = vld [vmem:[#allocation2 + $0x2c] sm:$0xf] }
 0x137   :  { %721 = vst.msk [vmem:[#allocation2 + $0x34] sm:$0xf] %vm129_vm15, %v5160_v32  ;;  %v383_v35 = vpop.f32.mrf.mxu0  ;;  %1243 = vrot.lane.b32.xlu1 %v1218_v56, %s6027_s5  ;;  %v1219_v32 = vrot.slane %v6557_v59, 6  ;;  %8939 = vst [vmem:[#allocation32_spill] sm:$0xff] %v6601_v2  ;;  %v1164_v56 = vsel %vm294_vm1, %v1161_v55, %v1163_v53  ;;  %v866_v34 = vsel %vm838_vm10, %v861_v37, %v6589_v33 }
 0x138   :  { %v596_v9 = vsel %vm8807_vm14, %v446_v52, 0.0  ;;  %v384_v13 = vadd.f32 %v6313_v11, %v383_v35  ;;  %1387 = vrot.lane.b32.xlu0 %v1285_v60, %s6034_s24  ;;  %vm8808_vm14 = vcmp.eq.s32.totalorder %v6566_v8, 1  ;;  %v1298_v35 = vrot.slane %v1296_v20, 6 }
 0x139   :  { %v5161_v14 = vpack.c.bf16 %v596_v9, %v596_v9  ;;  %v5658_v15 = vpop.f32.mrf.mxu0  ;;  %v1301_v60 = vrot.slane %v1299_v22, 7  ;;  %v1045_v9 = vrot.slane %v6470_v23, 1  ;;  %v1220_v20 = vsel %vm294_vm1, %v1217_v24, %v1219_v32 }
 0x13a   :  { %v447_v17 = vmax.f32 %v384_v13, 0.0  ;;  %v6614_v13 = vld [vmem:[#allocation2 + $0x30] sm:$0xf]  ;;  %v6628_v22 = vcombine.low %v6535_v38, %v746_v43  ;;  %v8819_v38 = vrot.slane %v6547_v51, 1 }
 0x13b   :  { %722 = vst.msk [vmem:[#allocation2 + $0x38] sm:$0xf] %vm129_vm15, %v5161_v14  ;;  %v388_v30 = vpop.f32.mrf.mxu0  ;;  %1389 = vrot.lane.b32.xlu1 %v1294_v5, %s6034_s24  ;;  %v6616_v14 = vpop.permute.xlu0 %533  ;;  %v1046_v24 = vsel %vm971_vm8, %v1043_v6, %v1045_v9 }
 0x13c   :  { %v597_v7 = vsel %vm8808_vm14, %v447_v17, 0.0  ;;  %v389_v36 = vadd.f32 %v6313_v11, %v388_v30  ;;  %1001 = vrot.lane.b32.xlu0 %v978_v31, %s6027_s5  ;;  %vm8809_vm14 = vcmp.eq.s32.totalorder %v6575_v16, 1  ;;  %8940 = vst [vmem:[#allocation33_spill] sm:$0xff] %v6616_v14  ;;  %8941 = vst [vmem:[#allocation34_spill] sm:$0xff] %v6628_v22  ;;  %v6630_v31 = vor.u32 %v1301_v60, %v1298_v35 }
 0x13d   :  { %v5162_v42 = vpack.c.bf16 %v597_v7, %v597_v7  ;;  %v5661_v45 = vpop.f32.mrf.mxu0  ;;  %v6633_v7 = vcombine.low %v746_v43, %v6614_v13  ;;  %vm8813_vm12 = vcmp.eq.s32.totalorder %v6616_v14, 1  ;;  %v8818_v60 = vrot.slane %v6628_v22, 6 }
 0x13e   :  { %v448_v52 = vmax.f32 %v389_v36, 0.0  ;;  %v6635_v36 = vor.u32 %v1101_v47, %v1100_v46  ;;  %v6647_v45 = vpop.permute.xlu1 %536  ;;  %v879_v1 = vshll.u32 %v6628_v22, 16 }
 0x13f   :  { %723 = vst.msk [vmem:[#allocation2 + $0x3c] sm:$0xf] %vm129_vm15, %v5162_v42  ;;  %v391_v4 = vpop.f32.mrf.mxu0  ;;  %1189 = vrot.lane.b32.xlu1 %v1164_v56, %s6033_s20  ;;  %v871_v42 = vshll.u32 %v6547_v51, 16  ;;  %8942 = vst [vmem:[#allocation35_spill] sm:$0xff] %v6647_v45  ;;  %v769_v56 = vld [vmem:[#allocation2 + $0x70] sm:$0x3]  ;;  %v6658_v43 = vpop.permute.xlu0 %539 }
 0x140   :  { %v598_v55 = vsel %vm8809_vm14, %v448_v52, 0.0  ;;  %v392_v15 = vadd.f32 %v6313_v11, %v391_v4  ;;  %946 = vrot.lane.b32.xlu0 %v866_v34, %s6033_s20  ;;  %vm8812_vm14 = vcmp.eq.s32.totalorder %v6601_v2, 1  ;;  %v6653_v52 = vld [vmem:[#allocation2 + $0x6c] sm:$0xf]  ;;  %vm8820_vm9 = vcmp.eq.s32.totalorder %v6647_v45, 1  ;;  %8943 = vst [vmem:[#allocation36_spill] sm:$0xff] %v6658_v43 }
 0x141   :  { %v5163_v17 = vpack.c.bf16 %v598_v55, %v598_v55  ;;  %v5662_v5 = vpop.f32.mrf.mxu0  ;;  %v1303_v34 = vsel %vm8900_vm13, %v6554_v57, %v6630_v31  ;;  %v1305_v55 = vshrl.u32 %v6633_v7, 16  ;;  %v4983_v57 = vcombine.low %v6653_v52, %v769_v56 }
 0x142   :  { %v449_v30 = vmax.f32 %v392_v15, 0.0  ;;  %v1308_v15 = vshll.u32 %v6633_v7, 16  ;;  %v980_v5 = vsel %vm971_vm8, %v977_v63, %v8819_v38  ;;  %v1166_v56 = vsel %vm294_vm1, %v1163_v53, %v8818_v60 }
 0x143   :  { %724 = vst.msk [vmem:[#allocation2 + $0x40] sm:$0xf] %vm129_vm15, %v5163_v17  ;;  %v396_v37 = vpop.f32.mrf.mxu0  ;;  %1245 = vrot.lane.b32.xlu1 %v1220_v20, %s6027_s5  ;;  %v873_v20 = vrot.slane %v871_v42, 1  ;;  %v1105_v0 = vrot.slane %v871_v42, 6  ;;  %v6724_v38 = vpop.permute.xlu0 %545 }
 0x144   :  { %v599_v47 = vsel %vm8812_vm14, %v449_v30, 0.0  ;;  %v397_v46 = vadd.f32 %v6313_v11, %v396_v37  ;;  %1069 = vrot.lane.b32.xlu0 %v1046_v24, %s6034_s24  ;;  %vm8826_vm14 = vcmp.eq.s32.totalorder %v6658_v43, 1  ;;  %v869_v24 = vor.u32 %v867_v58, %v6589_v33  ;;  %8947 = vst [vmem:[#allocation40_spill] sm:$0xff] %v6724_v38 }
 0x145   :  { %v5164_v6 = vpack.c.bf16 %v599_v47, %v599_v47  ;;  %v5665_v35 = vpop.f32.mrf.mxu0  ;;  %v875_v47 = vshrl.u32 %v6547_v51, 16  ;;  %v1307_v58 = vrot.slane %v1305_v55, 6  ;;  %v1310_v33 = vrot.slane %v1308_v15, 7 }
 0x146   :  { %v450_v4 = vmax.f32 %v397_v46, 0.0  ;;  %v6682_v46 = vld [vmem:[#allocation2 + $0x38] sm:$0xf]  ;;  %v8821_v35 = vrot.slane %v6633_v7, 6  ;;  %v6706_v15 = vrot.slane %v4983_v57, 7 }
 0x147   :  { %725 = vst.msk [vmem:[#allocation2 + $0x44] sm:$0xf] %vm129_vm15, %v5164_v6  ;;  %v399_v17 = vpop.f32.mrf.mxu0  ;;  %1391 = vrot.lane.b32.xlu1 %v1303_v34, %s6034_s24  ;;  %v6691_v34 = vpop.permute.xlu1 %542  ;;  %v6731_v42 = vor.u32 %v1310_v33, %v1307_v58  ;;  %v8948_v58 = vrot.slane %v6547_v51, 1 }
 0x148   :  { %v600_v30 = vsel %vm8813_vm12, %v450_v4, 0.0  ;;  %v400_v37 = vadd.f32 %v6313_v11, %v399_v17  ;;  %1003 = vrot.lane.b32.xlu0 %v980_v5, %s6027_s5  ;;  %v8822_v4 = vrot.slane %v6557_v59, 1  ;;  %8944 = vst [vmem:[#allocation37_spill] sm:$0xff] %v6691_v34  ;;  %v748_v5 = vld [vmem:[#allocation2 + $0x34] sm:$0xf]  ;;  %vm8833_vm12 = vcmp.eq.s32.totalorder %v6691_v34, 1  ;;  %v6778_v2 = vpop.permute.xlu0 %551 }
 0x149   :  { %v5165_v6 = vpack.c.bf16 %v600_v30, %v600_v30  ;;  %v5666_v63 = vpop.f32.mrf.mxu0  ;;  %v6696_v30 = vsel %vm1092_vm11, %v6443_v10, %v6635_v36  ;;  %v6704_v55 = vcombine.low %v748_v5, %v6682_v46  ;;  %v1312_v43 = vsel %vm8900_vm13, %v6630_v31, %v6731_v42  ;;  %8952 = vst [vmem:[#allocation43_spill] sm:$0xff] %v6778_v2 }
 0x14a   :  { %v451_v17 = vmax.f32 %v400_v37, 0.0  ;;  %8945 = vst [vmem:[#allocation38_spill] sm:$0xff] %v6696_v30  ;;  %v874_v63 = vsel %vm838_vm10, %v869_v24, %v873_v20  ;;  %v6709_v37 = vrot.slane %v6402_v39, 7  ;;  %v1048_v57 = vsel %vm971_vm8, %v1045_v9, %v8822_v4  ;;  %v750_v4 = vld [vmem:[#allocation2 + $0x3c] sm:$0xf] }
 0x14b   :  { %726 = vst.msk [vmem:[#allocation2 + $0x48] sm:$0xf] %vm129_vm15, %v5165_v6  ;;  %v404_v53 = vpop.f32.mrf.mxu0  ;;  %1191 = vrot.lane.b32.xlu1 %v1166_v56, %s6033_s20  ;;  %v8825_v56 = vrot.slane %v6628_v22, 1  ;;  %v6722_v39 = vcombine.low %v6614_v13, %v748_v5  ;;  %v877_v13 = vor.u32 %v875_v47, %v873_v20  ;;  %v881_v5 = vrot.slane %v879_v1, 1  ;;  %v6765_v14 = vld [vmem:[#allocation2 + $0x40] sm:$0xf] }
 0x14c   :  { %v601_v10 = vsel %vm8820_vm9, %v451_v17, 0.0  ;;  %v405_v6 = vadd.f32 %v6313_v11, %v404_v53  ;;  %948 = vrot.lane.b32.xlu0 %v874_v63, %s6033_s20  ;;  %v1222_v53 = vsel %vm294_vm1, %v1219_v32, %v8821_v35  ;;  %vm8844_vm9 = vcmp.eq.s32.totalorder %v6724_v38, 1 }
 0x14d   :  { %v5166_v24 = vpack.c.bf16 %v601_v10, %v601_v10  ;;  %v5669_v60 = vpop.f32.mrf.mxu0  ;;  %8946 = vst [vmem:[#allocation39_spill] sm:$0xff] %v6722_v39  ;;  %v1314_v63 = vshrl.u32 %v6704_v55, 16  ;;  %v883_v10 = vshrl.u32 %v6628_v22, 16  ;;  %v982_v33 = vsel %vm971_vm8, %v8948_v58, %v8825_v56 }
 0x14e   :  { %v452_v17 = vmax.f32 %v405_v6, 0.0  ;;  %v1104_v60 = vrot.slane %v875_v47, 5  ;;  %v1317_v20 = vshll.u32 %v6704_v55, 16  ;;  %v1049_v35 = vrot.slane %v6633_v7, 1 }
 0x14f   :  { %727 = vst.msk [vmem:[#allocation2 + $0x4c] sm:$0xf] %vm129_vm15, %v5166_v24  ;;  %v407_v9 = vpop.f32.mrf.mxu0  ;;  %1247 = vrot.lane.b32.xlu1 %v1222_v53, %s6027_s5  ;;  %v6748_v53 = vrot.slane %v879_v1, 6  ;;  %v885_v45 = vor.u32 %v883_v10, %v881_v5  ;;  %v8971_v19 = vrot.slane %v6704_v55, 1 }
 0x150   :  { %v602_v6 = vsel %vm8826_vm14, %v452_v17, 0.0  ;;  %v408_v32 = vadd.f32 %v6313_v11, %v407_v9  ;;  %1071 = vrot.lane.b32.xlu0 %v1048_v57, %s6034_s24  ;;  %v887_v17 = vshll.u32 %v6722_v39, 16  ;;  %v6752_v9 = vpop.permute.xlu1 %548  ;;  %v6758_v56 = vor.u32 %v1105_v0, %v1104_v60 }
 0x151   :  { %v5167_v47 = vpack.c.bf16 %v602_v6, %v602_v6  ;;  %v5670_v24 = vpop.f32.mrf.mxu0  ;;  %8949 = vst [vmem:[#allocation41_spill] sm:$0xff] %v6752_v9  ;;  %vm8856_vm14 = vcmp.eq.s32.totalorder %v6752_v9, 1  ;;  %v882_v6 = vsel %vm838_vm10, %v877_v13, %v881_v5  ;;  %v1319_v60 = vrot.slane %v1317_v20, 7 }
 0x152   :  { %v453_v57 = vmax.f32 %v408_v32, 0.0  ;;  %v1316_v24 = vrot.slane %v1314_v63, 6  ;;  %v8951_v63 = vrot.slane %v6557_v59, 1  ;;  %v889_v32 = vrot.slane %v887_v17, 1 }
 0x153   :  { %728 = vst.msk [vmem:[#allocation2 + $0x50] sm:$0xf] %vm129_vm15, %v5167_v47  ;;  %v412_v1 = vpop.f32.mrf.mxu0  ;;  %1393 = vrot.lane.b32.xlu1 %v1312_v43, %s6034_s24  ;;  %v6772_v47 = vcombine.low %v6682_v46, %v750_v4  ;;  %v6785_v46 = vrot.slane %v883_v10, 5  ;;  %v6798_v34 = vrot.slane %v887_v17, 6  ;;  %v8959_v10 = vrot.slane %v6633_v7, 6 }
 0x154   :  { %v603_v31 = vsel %vm8833_vm12, %v453_v57, 0.0  ;;  %v413_v0 = vadd.f32 %v6313_v11, %v412_v1  ;;  %1005 = vrot.lane.b32.xlu0 %v982_v33, %s6027_s5  ;;  %v1050_v5 = vsel %vm971_vm8, %v8951_v63, %v1049_v35  ;;  %v8953_v1 = vrot.slane %v6722_v39, 6 }
 0x155   :  { %8950 = vst [vmem:[#allocation42_spill] sm:$0xff] %v6772_v47  ;;  %v5168_v43 = vpack.c.bf16 %v603_v31, %v603_v31  ;;  %v5673_v58 = vpop.f32.mrf.mxu0  ;;  %v8954_v33 = vrot.slane %v6628_v22, 6  ;;  %vm8897_vm12 = vcmp.eq.s32.totalorder %v6778_v2, 1  ;;  %v8956_v63 = vrot.slane %v6628_v22, 1 }
 0x156   :  { %v454_v57 = vmax.f32 %v413_v0, 0.0  ;;  %v6788_v58 = vcombine.low %v750_v4, %v6765_v14  ;;  %v8955_v0 = vrot.slane %v6722_v39, 1  ;;  %v891_v4 = vshrl.u32 %v6722_v39, 16 }
 0x157   :  { %v1168_v20 = vsel %vm294_vm1, %v8954_v33, %v8953_v1  ;;  %729 = vst.msk [vmem:[#allocation2 + $0x54] sm:$0xf] %vm129_vm15, %v5168_v43  ;;  %v415_v31 = vpop.f32.mrf.mxu0  ;;  %v6802_v1 = vpop.permute.xlu1 %554  ;;  %v895_v16 = vshll.u32 %v6772_v47, 16  ;;  %v6817_v44 = vsel %vm838_vm10, %v885_v45, %v889_v32 }
 0x158   :  { %1193 = vrot.lane.b32.xlu1 %v1168_v20, %s6033_s20  ;;  %v984_v13 = vsel %vm971_vm8, %v8956_v63, %v8955_v0  ;;  %8957 = vst [vmem:[#allocation44_spill] sm:$0xff] %v6802_v1  ;;  %v604_v43 = vsel %vm8844_vm9, %v454_v57, 0.0  ;;  %v416_v33 = vadd.f32 %v6313_v11, %v415_v31  ;;  %950 = vrot.lane.b32.xlu0 %v882_v6, %s6033_s20  ;;  %v8958_v63 = vrot.slane %v6704_v55, 6 }
 0x159   :  { %v6808_v20 = vor.u32 %v1319_v60, %v1316_v24  ;;  %v5169_v0 = vpack.c.bf16 %v604_v43, %v604_v43  ;;  %v5674_v17 = vpop.f32.mrf.mxu0  ;;  %v893_v57 = vor.u32 %v891_v4, %v889_v32  ;;  %v1323_v31 = vshrl.u32 %v6788_v58, 16  ;;  %v753_v24 = vld [vmem:[#allocation2 + $0x48] sm:$0xf] }
 0x15a   :  { %v1224_v8 = vsel %vm294_vm1, %v8959_v10, %v8958_v63  ;;  %v455_v38 = vmax.f32 %v416_v33, 0.0  ;;  %v1326_v6 = vshll.u32 %v6788_v58, 16  ;;  %v6824_v60 = vsel %vm1092_vm11, %v6635_v36, %v6758_v56  ;;  %v752_v17 = vld [vmem:[#allocation2 + $0x44] sm:$0xf]  ;;  %v6837_v63 = vpop.permute.xlu0 %557  ;;  %v755_v33 = vld [vmem:[#allocation2 + $0x50] sm:$0xf] }
 0x15b   :  { %8960 = vst [vmem:[#allocation45_spill] sm:$0xff] %v6824_v60  ;;  %vm8896_vm9 = vcmp.eq.s32.totalorder %v6802_v1, 1  ;;  %730 = vst.msk [vmem:[#allocation2 + $0x58] sm:$0xf] %vm129_vm15, %v5169_v0  ;;  %v420_v10 = vpop.f32.mrf.mxu0  ;;  %v8961_v32 = vrot.slane %v6704_v55, 1  ;;  %v899_v36 = vshrl.u32 %v6772_v47, 16  ;;  %v6847_v49 = vcombine.low %v752_v17, %v753_v24 }
 0x15c   :  { %1249 = vrot.lane.b32.xlu1 %v1224_v8, %s6027_s5  ;;  %8962 = vst [vmem:[#allocation46_spill] sm:$0xff] %v6837_v63  ;;  %v605_v0 = vsel %vm8856_vm14, %v455_v38, 0.0  ;;  %v421_v21 = vadd.f32 %v6313_v11, %v420_v10  ;;  %1073 = vrot.lane.b32.xlu0 %v1050_v5, %s6034_s24  ;;  %v1321_v8 = vsel %vm8900_vm13, %v6731_v42, %v6808_v20  ;;  %v1325_v38 = vrot.slane %v1323_v31, 6 }
 0x15d   :  { %v6833_v43 = vsel %vm971_vm8, %v1049_v35, %v8961_v32  ;;  %v897_v35 = vrot.slane %v895_v16, 1  ;;  %v5170_v32 = vpack.c.bf16 %v605_v0, %v605_v0  ;;  %v5677_v45 = vpop.f32.mrf.mxu0  ;;  %v1328_v61 = vrot.slane %v1326_v6, 7 }
 0x15e   :  { %v456_v9 = vmax.f32 %v421_v21, 0.0  ;;  %v6851_v10 = vcombine.low %v6765_v14, %v752_v17  ;;  %vm8895_vm14 = vcmp.eq.s32.totalorder %v6837_v63, 1  ;;  %v8964_v5 = vrot.slane %v6772_v47, 6 }
 0x15f   :  { %731 = vst.msk [vmem:[#allocation2 + $0x5c] sm:$0xf] %vm129_vm15, %v5170_v32  ;;  %v423_v42 = vpop.f32.mrf.mxu0  ;;  %v8965_v45 = vrot.slane %v6722_v39, 6  ;;  %v8966_v21 = vrot.slane %v6772_v47, 1  ;;  %v8967_v31 = vrot.slane %v6722_v39, 1  ;;  %v6868_v6 = vrot.slane %v891_v4, 5 }
 0x160   :  { %8963 = vst [vmem:[#allocation47_spill] sm:$0xff] %v6851_v10  ;;  %1395 = vrot.lane.b32.xlu1 %v1321_v8, %s6034_s24  ;;  %v6870_v17 = vrot.slane %v895_v16, 6  ;;  %v606_v8 = vsel %vm8897_vm12, %v456_v9, 0.0  ;;  %v424_v32 = vadd.f32 %v6313_v11, %v423_v42  ;;  %1007 = vrot.lane.b32.xlu0 %v984_v13, %s6027_s5  ;;  %v901_v62 = vor.u32 %v899_v36, %v897_v35 }
 0x161   :  { %v1170_v0 = vsel %vm294_vm1, %v8965_v45, %v8964_v5  ;;  %v6866_v14 = vsel %vm971_vm8, %v8967_v31, %v8966_v21  ;;  %v6877_v5 = vsel %vm838_vm10, %v893_v57, %v897_v35  ;;  %v754_v45 = vld [vmem:[#allocation2 + $0x4c] sm:$0xf]  ;;  %v5171_v29 = vpack.c.bf16 %v606_v8, %v606_v8  ;;  %v5678_v21 = vpop.f32.mrf.mxu0 }
 0x162   :  { %v8968_v4 = vrot.slane %v6788_v58, 6  ;;  %v8969_v16 = vrot.slane %v6704_v55, 6  ;;  %v1332_v9 = vshrl.u32 %v6847_v49, 16  ;;  %v1335_v42 = vshll.u32 %v6847_v49, 16 }
 0x163   :  { %v457_v2 = vmax.f32 %v424_v32, 0.0  ;;  %v1329_v13 = vor.u32 %v1328_v61, %v1325_v38  ;;  %v8970_v57 = vrot.slane %v6788_v58, 1  ;;  %v903_v8 = vshll.u32 %v6851_v10, 16  ;;  %732 = vst.msk [vmem:[#allocation2 + $0x60] sm:$0xf] %vm129_vm15, %v5171_v29  ;;  %v428_v21 = vpop.f32.mrf.mxu0 }
 0x164   :  { %v1226_v31 = vsel %vm294_vm1, %v8969_v16, %v8968_v4  ;;  %1195 = vrot.lane.b32.xlu1 %v1170_v0, %s6033_s20  ;;  %v1171_v4 = vrot.slane %v6851_v10, 6  ;;  %v6897_v16 = vcombine.low %v753_v24, %v754_v45  ;;  %v6899_v32 = vrot.slane %v899_v36, 5  ;;  %952 = vrot.lane.b32.xlu0 %v6817_v44, %s6033_s20 }
 0x165   :  { %v6891_v35 = vsel %vm971_vm8, %v8971_v19, %v8970_v57  ;;  %v6901_v61 = vcombine.low %v754_v45, %v755_v33  ;;  %v607_v38 = vsel %vm8896_vm9, %v457_v2, 0.0  ;;  %v429_v19 = vadd.f32 %v6313_v11, %v428_v21  ;;  %v5681_v48 = vpop.f32.mrf.mxu0 }
 0x166   :  { %8972 = vst [vmem:[#allocation48_spill] sm:$0xff] %v6897_v16  ;;  %v987_v29 = vrot.slane %v6851_v10, 1  ;;  %v8881_v0 = vrot.slane %v6430_v50, 7  ;;  %v5172_v57 = vpack.c.bf16 %v607_v38, %v607_v38  ;;  %v1334_v3 = vrot.slane %v1332_v9, 6  ;;  %v757_v9 = vld [vmem:[#allocation2 + $0x58] sm:$0xf] }
 0x167   :  { %v1337_v24 = vrot.slane %v1335_v42, 7  ;;  %v907_v36 = vshrl.u32 %v6851_v10, 16  ;;  %v458_v45 = vmax.f32 %v429_v19, 0.0  ;;  %v1330_v1 = vsel %vm8900_vm13, %v6808_v20, %v1329_v13  ;;  %v431_v38 = vpop.f32.mrf.mxu0  ;;  %v758_v22 = vld [vmem:[#allocation2 + $0x5c] sm:$0xf] }
 0x168   :  { %v1227_v2 = vrot.slane %v6847_v49, 6  ;;  %v905_v11 = vrot.slane %v903_v8, 1  ;;  %733 = vst.msk [vmem:[#allocation2 + $0x64] sm:$0xf] %vm129_vm15, %v5172_v57  ;;  %1251 = vrot.lane.b32.xlu1 %v1226_v31, %s6027_s5  ;;  %v8973_v44 = vrot.slane %v6772_v47, 6  ;;  %v1341_v42 = vshrl.u32 %v6901_v61, 16  ;;  %1075 = vrot.lane.b32.xlu0 %v6833_v43, %s6034_s24 }
 0x169   :  { %v911_v48 = vshll.u32 %v6897_v16, 16  ;;  %v608_v20 = vsel %vm8895_vm14, %v458_v45, 0.0  ;;  %v8974_v19 = vrot.slane %v6772_v47, 1  ;;  %v1344_v57 = vshll.u32 %v6901_v61, 16  ;;  %v5682_v27 = vpop.f32.mrf.mxu0 }
 0x16a   :  { %v1172_v21 = vsel %vm294_vm1, %v8973_v44, %v1171_v4  ;;  %v756_v44 = vld [vmem:[#allocation2 + $0x54] sm:$0xf]  ;;  %v1417_v38 = vsel %vm1414_vm7, %v6709_v37, %v8881_v0  ;;  %v5173_v40 = vpack.c.bf16 %v608_v20, %v608_v20  ;;  %v1338_v63 = vor.u32 %v1337_v24, %v1334_v3 }
 0x16b   :  { %v6929_v31 = vsel %vm971_vm8, %v8974_v19, %v987_v29  ;;  %v1173_v45 = vrot.slane %v6897_v16, 6  ;;  %v989_v43 = vrot.slane %v6897_v16, 1  ;;  %v8975_v18 = vrot.slane %v6788_v58, 6 }
 0x16c   :  { %v6942_v12 = vsel %vm838_vm10, %v901_v62, %v905_v11  ;;  %v6944_v10 = vrot.slane %v903_v8, 6  ;;  %v909_v47 = vor.u32 %v907_v36, %v905_v11  ;;  %734 = vst.msk [vmem:[#allocation2 + $0x68] sm:$0xf] %vm129_vm15, %v5173_v40  ;;  %1397 = vrot.lane.b32.xlu1 %v1330_v1, %s6034_s24  ;;  %v8976_v3 = vrot.slane %v6847_v49, 1  ;;  %1009 = vrot.lane.b32.xlu0 %v6866_v14, %s6027_s5 }
 0x16d   :  { %v1228_v19 = vsel %vm294_vm1, %v8975_v18, %v1227_v2  ;;  %v8977_v24 = vrot.slane %v6788_v58, 1  ;;  %v6955_v20 = vcombine.low %v755_v33, %v756_v44  ;;  %v913_v18 = vrot.slane %v911_v48, 1 }
 0x16e   :  { %v6957_v0 = vcombine.low %v756_v44, %v757_v9  ;;  %v1229_v62 = vrot.slane %v6901_v61, 6  ;;  %v1343_v40 = vrot.slane %v1341_v42, 6  ;;  %v1346_v8 = vrot.slane %v1344_v57, 7 }
 0x16f   :  { %v6953_v27 = vsel %vm971_vm8, %v8977_v24, %v8976_v3  ;;  %v6962_v1 = vrot.slane %v907_v36, 5  ;;  %v1339_v11 = vsel %vm8900_vm13, %v1329_v13, %v1338_v63  ;;  %v6966_v39 = vsel %vm294_vm1, %v1171_v4, %v1173_v45 }
 0x170   :  { %v6969_v33 = vsel %vm971_vm8, %v987_v29, %v989_v43  ;;  %v915_v44 = vshrl.u32 %v6897_v16, 16  ;;  %vm1656_vm15 = vsmask.f32 5376  ;;  %v6972_v3 = vrot.slane %v911_v48, 6  ;;  %1197 = vrot.lane.b32.xlu1 %v1172_v21, %s6033_s20  ;;  %954 = vrot.lane.b32.xlu0 %v6877_v5, %s6033_s20 }
 0x171   :  { %v1688_v14 = vshrl.u32 %v6709_v37, 16  ;;  %v1691_v42 = vshll.u32 %v6709_v37, 16  ;;  %v1696_v57 = vshrl.u32 %v1417_v38, 16  ;;  %v6978_v13 = vsel %vm838_vm10, %v909_v47, %v913_v18 }
 0x172   :  { %v1350_v4 = vshrl.u32 %v6957_v0, 16  ;;  %v1353_v29 = vshll.u32 %v6957_v0, 16  ;;  %v919_v36 = vshll.u32 %v6955_v20, 16  ;;  %v6986_v48 = vsel %vm294_vm1, %v1227_v2, %v1229_v62 }
 0x173   :  { %v1347_v24 = vor.u32 %v1346_v8, %v1343_v40  ;;  %v1057_v37 = vrot.slane %v6901_v61, 1  ;;  %v917_v16 = vor.u32 %v915_v44, %v913_v18  ;;  %v1175_v21 = vrot.slane %v6955_v20, 6 }
 0x174   :  { %v8892_v51 = vshrl.u32 %v6955_v20, 16  ;;  %v1699_v25 = vshll.u32 %v1417_v38, 16  ;;  %v1690_v60 = vrot.slane %v1688_v14, 2  ;;  %v1693_v26 = vrot.slane %v1691_v42, 3  ;;  %1253 = vrot.lane.b32.xlu1 %v1228_v19, %s6027_s5  ;;  %1077 = vrot.lane.b32.xlu0 %v6891_v35, %s6034_s24 }
 0x175   :  { %v1698_v30 = vrot.slane %v1696_v57, 2  ;;  %v1110_v5 = vor.u32 %v6748_v53, %v6785_v46  ;;  %v1231_v2 = vrot.slane %v6957_v0, 6  ;;  %v1352_v40 = vrot.slane %v1350_v4, 6 }
 0x176   :  { %v1355_v18 = vrot.slane %v1353_v29, 7  ;;  %v6996_v8 = vrot.slane %v919_v36, 1  ;;  %v7000_v47 = vcombine.low %v757_v9, %v758_v22  ;;  %v1701_v38 = vrot.slane %v1699_v25, 3 }
 0x177   :  { %v7004_v14 = vsel %vm1092_vm11, %v6758_v56, %v1110_v5  ;;  %v8888_v53 = vrot.slane %v6470_v23, 7  ;;  %v7008_v46 = vsel %vm8900_vm13, %v1338_v63, %v1347_v24  ;;  %v7011_v19 = vsel %vm294_vm1, %v1173_v45, %v1175_v21 }
 0x178   :  { %v8978_v42 = vrot.slane %v6847_v49, 1  ;;  %v1124_v25 = vrot.slane %v915_v44, 5  ;;  %v8979_v9 = vrot.slane %v6955_v20, 1  ;;  %v7025_v57 = vrot.slane %v919_v36, 6  ;;  %1399 = vrot.lane.b32.xlu1 %v1339_v11, %s6034_s24  ;;  %1011 = vrot.lane.b32.xlu0 %v6929_v31, %s6027_s5 }
 0x179   :  { %v1694_v63 = vor.u32 %v1693_v26, %v1690_v60  ;;  %v1702_v4 = vor.u32 %v1701_v38, %v1698_v30  ;;  %v7031_v45 = vsel %vm294_vm1, %v1229_v62, %v1231_v2  ;;  %v7033_v29 = vor.u32 %v1355_v18, %v1352_v40  ;;  %v7046_v30 = vld [vmem:[#allocation2 + $0x60] sm:$0xf] }
 0x17a   :  { %v7018_v35 = vsel %vm971_vm8, %v8978_v42, %v1057_v37  ;;  %v7023_v56 = vsel %vm971_vm8, %v989_v43, %v8979_v9  ;;  %v7037_v44 = vsel %vm838_vm10, %v917_v16, %v6996_v8  ;;  %v7041_v43 = vrot.slane %v8892_v51, 5 }
 0x17b   :  { %v8891_v26 = vrot.slane %v7000_v47, 6  ;;  %v8893_v60 = vshll.u32 %v7000_v47, 16  ;;  %v7050_v62 = vsel %vm1656_vm15, %v1694_v63, %v1702_v4  ;;  %v8980_v16 = vrot.slane %v6430_v50, 7 }
 0x17c   :  { %v8890_v36 = vshrl.u32 %v7000_v47, 16  ;;  %v1114_v31 = vor.u32 %v6798_v34, %v6868_v6  ;;  %v8889_v38 = vrot.slane %v6557_v59, 7  ;;  %v1422_v42 = vrot.slane %v6633_v7, 7  ;;  %1199 = vrot.lane.b32.xlu1 %v6966_v39, %s6033_s20  ;;  %956 = vrot.lane.b32.xlu0 %v6942_v12, %s6033_s20 }
 0x17d   :  { %v1419_v11 = vsel %vm1414_vm7, %v8980_v16, %v8888_v53  ;;  %v1118_v9 = vor.u32 %v6870_v17, %v6899_v32  ;;  %v1424_v63 = vrot.slane %v6704_v55, 7  ;;  %v7069_v50 = vsel %vm8900_vm13, %v1347_v24, %v7033_v29  ;;  %v762_v53 = vld [vmem:[#allocation2 + $0x64] sm:$0xf] }
 0x17e   :  { %v1721_v40 = vshrl.u32 %v1419_v11, 16  ;;  %v1724_v18 = vshll.u32 %v1419_v11, 16  ;;  %v7072_v16 = vcombine.low %v758_v22, %v7046_v30  ;;  %v7079_v7 = vsel %vm294_vm1, %v1175_v21, %v8891_v26 }
 0x17f   :  { %v7082_v55 = vsel %vm1092_vm11, %v1110_v5, %v1114_v31  ;;  %v1423_v39 = vsel %vm1414_vm7, %v8889_v38, %v1422_v42  ;;  %v7088_v22 = vsel %vm1092_vm11, %v1114_v31, %v1118_v9  ;;  %v7092_v17 = vrot.slane %v8893_v60, 6 }
 0x180   :  { %v1723_v34 = vrot.slane %v1721_v40, 2  ;;  %v1726_v6 = vrot.slane %v1724_v18, 3  ;;  %v7096_v12 = vrot.slane %v8890_v36, 5  ;;  %v1771_v24 = vshrl.u32 %v1423_v39, 16  ;;  %1255 = vrot.lane.b32.xlu1 %v6986_v48, %s6027_s5  ;;  %1079 = vrot.lane.b32.xlu0 %v6953_v27, %s6034_s24 }
 0x181   :  { %v1774_v21 = vshll.u32 %v1423_v39, 16  ;;  %v1425_v5 = vsel %vm1414_vm7, %v1422_v42, %v1424_v63  ;;  %v1122_v11 = vor.u32 %v6944_v10, %v6962_v1  ;;  %v1426_v40 = vrot.slane %v6788_v58, 7  ;;  %v7114_v42 = vld [vmem:[#allocation2 + $0x68] sm:$0xf] }
 0x182   :  { %v7098_v32 = vor.u32 %v1726_v6, %v1723_v34  ;;  %v1233_v18 = vrot.slane %v7072_v16, 6  ;;  %v1359_v31 = vshrl.u32 %v7072_v16, 16  ;;  %v1773_v6 = vrot.slane %v1771_v24, 2 }
 0x183   :  { %v1776_v10 = vrot.slane %v1774_v21, 3  ;;  %v1796_v58 = vshrl.u32 %v1425_v5, 16  ;;  %v1799_v1 = vshll.u32 %v1425_v5, 16  ;;  %v7117_v48 = vsel %vm1092_vm11, %v1118_v9, %v1122_v11 }
 0x184   :  { %v7110_v34 = vsel %vm1656_vm15, %v1702_v4, %v7098_v32  ;;  %v1362_v39 = vshll.u32 %v7072_v16, 16  ;;  %v1427_v38 = vsel %vm1414_vm7, %v1424_v63, %v1426_v40  ;;  %v1428_v36 = vrot.slane %v6847_v49, 7  ;;  %1401 = vrot.lane.b32.xlu1 %v7008_v46, %s6034_s24  ;;  %1013 = vrot.lane.b32.xlu0 %v6969_v33, %s6027_s5 }
 0x185   :  { %v1126_v4 = vor.u32 %v6972_v3, %v1124_v25  ;;  %v7124_v24 = vcombine.low %v7046_v30, %v762_v53  ;;  %v1798_v27 = vrot.slane %v1796_v58, 2  ;;  %v1801_v26 = vrot.slane %v1799_v1, 3 }
 0x186   :  { %v1821_v51 = vshrl.u32 %v1427_v38, 16  ;;  %v7129_v9 = vcombine.low %v762_v53, %v7114_v42  ;;  %v1824_v21 = vshll.u32 %v1427_v38, 16  ;;  %v1429_v5 = vsel %vm1414_vm7, %v1426_v40, %v1428_v36 }
 0x187   :  { %v7133_v63 = vsel %vm1092_vm11, %v1122_v11, %v1126_v4  ;;  %v7137_v49 = vor.u32 %v1776_v10, %v1773_v6  ;;  %v1802_v3 = vor.u32 %v1801_v26, %v1798_v27  ;;  %v1846_v58 = vshrl.u32 %v1429_v5, 16 }
 0x188   :  { %v1823_v25 = vrot.slane %v1821_v51, 2  ;;  %v1826_v1 = vrot.slane %v1824_v21, 3  ;;  %v1849_v60 = vshll.u32 %v1429_v5, 16  ;;  %v1430_v46 = vrot.slane %v6901_v61, 7  ;;  %1201 = vrot.lane.b32.xlu1 %v7011_v19, %s6033_s20  ;;  %958 = vrot.lane.b32.xlu0 %v6978_v13, %s6033_s20 }
 0x189   :  { %v1130_v53 = vor.u32 %v7025_v57, %v7041_v43  ;;  %v7144_v38 = vsel %vm1656_vm15, %v7137_v49, %v1802_v3  ;;  %v1848_v11 = vrot.slane %v1846_v58, 2  ;;  %v1432_v40 = vrot.slane %v6957_v0, 7 }
 0x18a   :  { %v1434_v33 = vrot.slane %v7072_v16, 7  ;;  %v1827_v51 = vor.u32 %v1826_v1, %v1823_v25  ;;  %v1851_v26 = vrot.slane %v1849_v60, 3  ;;  %v1431_v6 = vsel %vm1414_vm7, %v1428_v36, %v1430_v46 }
 0x18b   :  { %v7152_v10 = vsel %vm1092_vm11, %v1126_v4, %v1130_v53  ;;  %v1871_v57 = vshrl.u32 %v1431_v6, 16  ;;  %v1874_v43 = vshll.u32 %v1431_v6, 16  ;;  %v1433_v27 = vsel %vm1414_vm7, %v1430_v46, %v1432_v40 }
 0x18c   :  { %v1435_v21 = vsel %vm1414_vm7, %v1432_v40, %v1434_v33  ;;  %v7159_v5 = vsel %vm1656_vm15, %v1802_v3, %v1827_v51  ;;  %v1852_v19 = vor.u32 %v1851_v26, %v1848_v11  ;;  %v1896_v25 = vshrl.u32 %v1433_v27, 16  ;;  %1257 = vrot.lane.b32.xlu1 %v7031_v45, %s6027_s5  ;;  %1081 = vrot.lane.b32.xlu0 %v7018_v35, %s6034_s24 }
 0x18d   :  { %v1899_v60 = vshll.u32 %v1433_v27, 16  ;;  %v1873_v58 = vrot.slane %v1871_v57, 2  ;;  %v1876_v36 = vrot.slane %v1874_v43, 3  ;;  %v1921_v1 = vshrl.u32 %v1435_v21, 16  ;;  %v7171_v43 = vpop.permute.xlu1 %1183 }
 0x18e   :  { %v1924_v4 = vshll.u32 %v1435_v21, 16  ;;  %v7164_v13 = vsel %vm1656_vm15, %v1827_v51, %v1852_v19  ;;  %v1898_v6 = vrot.slane %v1896_v25, 2  ;;  %v1134_v40 = vor.u32 %v7092_v17, %v7096_v12 }
 0x18f   :  { %v1901_v46 = vrot.slane %v1899_v60, 3  ;;  %v1877_v3 = vor.u32 %v1876_v36, %v1873_v58  ;;  %v1923_v11 = vrot.slane %v1921_v1, 2  ;;  %v1436_v57 = vrot.slane %v7129_v9, 7 }
 0x190   :  { %v1926_v26 = vrot.slane %v1924_v4, 3  ;;  %v7174_v45 = vsel %vm1092_vm11, %v1130_v53, %v1134_v40  ;;  %v1137_v51 = vshrl.u32 %v7124_v24, 16  ;;  %v1140_v21 = vshll.u32 %v7124_v24, 16  ;;  %1403 = vrot.lane.b32.xlu1 %v7069_v50, %s6034_s24  ;;  %1015 = vrot.lane.b32.xlu0 %v7023_v56, %s6027_s5 }
 0x191   :  { %v1902_v27 = vor.u32 %v1901_v46, %v1898_v6  ;;  %v1361_v17 = vrot.slane %v1359_v31, 6  ;;  %v7181_v35 = vsel %vm1656_vm15, %v1852_v19, %v1877_v3  ;;  %v1437_v25 = vsel %vm1414_vm7, %v1434_v33, %v1436_v57  ;;  %v7198_v50 = vpop.permute.xlu1 %997 }
 0x192   :  { %v1927_v12 = vor.u32 %v1926_v26, %v1923_v11  ;;  %v1946_v53 = vshrl.u32 %v1437_v25, 16  ;;  %v1949_v58 = vshll.u32 %v1437_v25, 16  ;;  %v1139_v36 = vrot.slane %v1137_v51, 5 }
 0x193   :  { %v7187_v60 = vsel %vm1656_vm15, %v1877_v3, %v1902_v27  ;;  %v1142_v19 = vrot.slane %v1140_v21, 6  ;;  %v1439_v1 = vsel %vm1414_vm7, %v1436_v57, %v6706_v15  ;;  %v4979_v33 = vcombine.low %v7114_v42, %v7114_v42 }
 0x194   :  { %v7192_v31 = vsel %vm1656_vm15, %v1902_v27, %v1927_v12  ;;  %v1948_v4 = vrot.slane %v1946_v53, 2  ;;  %v1951_v6 = vrot.slane %v1949_v58, 3  ;;  %v1971_v46 = vshrl.u32 %v1439_v1, 16  ;;  %1203 = vrot.lane.b32.xlu1 %v7079_v7, %s6033_s20  ;;  %960 = vrot.lane.b32.xlu0 %v7037_v44, %s6033_s20 }
 0x195   :  { %v1974_v3 = vshll.u32 %v1439_v1, 16  ;;  %v1364_v11 = vrot.slane %v1362_v39, 7  ;;  %v1143_v56 = vor.u32 %v1142_v19, %v1139_v36  ;;  %v1146_v26 = vshrl.u32 %v4979_v33, 16  ;;  %v943_v39 = vpop.permute.xlu1 %942 }
 0x196   :  { %v1149_v27 = vshll.u32 %v4979_v33, 16  ;;  %v8898_v15 = vrot.slane %v6957_v0, 1  ;;  %v1952_v57 = vor.u32 %v1951_v6, %v1948_v4  ;;  %v1973_v51 = vrot.slane %v1971_v46, 2  ;;  %v7215_v7 = vpop.permute.xlu0 %1185  ;;  %v767_v6 = vld [vmem:[#allocation2 + $0x70] sm:$0x1] }
 0x197   :  { %v1976_v21 = vrot.slane %v1974_v3, 3  ;;  %v7208_v25 = vsel %vm1092_vm11, %v1134_v40, %v1143_v56  ;;  %v1148_v53 = vrot.slane %v1146_v26, 5  ;;  %v1234_v1 = vsel %vm294_vm1, %v1231_v2, %v1233_v18  ;;  %v765_v3 = vld [vmem:[#allocation2 + $0x6c] sm:$0x1]  ;;  %v735_v26 = vld [vmem:[#allocation2] sm:$0xc] }
 0x198   :  { %v1151_v58 = vrot.slane %v1149_v27, 6  ;;  %v7211_v36 = vsel %vm1656_vm15, %v1927_v12, %v1952_v57  ;;  %v7222_v44 = vor.u32 %v1364_v11, %v1361_v17  ;;  %1259 = vrot.lane.b32.xlu1 %v1234_v1, %s6027_s5  ;;  %v1060_v12 = vsel %vm971_vm8, %v1057_v37, %v8898_v15  ;;  %v760_v11 = vld [vmem:[#allocation2 + $0x64] sm:$0x7] }
 0x199   :  { %v7213_v19 = vor.u32 %v1976_v21, %v1973_v51  ;;  %v8894_v33 = vrot.slane %v7000_v47, 1  ;;  %1083 = vrot.lane.b32.xlu0 %v1060_v12, %s6034_s24  ;;  %v1240_v17 = vpop.permute.xlu1 %1239  ;;  %v1179_v37 = vrot.slane %v7124_v24, 6  ;;  %v8982_v27 = vrot.slane %v6955_v20, 1 }
 0x19a   :  { %v1152_v40 = vor.u32 %v1151_v58, %v1148_v53  ;;  %v1000_v46 = vpop.permute.xlu0 %999  ;;  %v1366_v61 = vsel %vm8900_vm13, %v7033_v29, %v7222_v44  ;;  %v7253_v29 = vcombine.low %v6653_v52, %v767_v6  ;;  %v8984_v53 = vshrl.u32 %v6955_v20, 16 }
 0x19b   :  { %v7233_v4 = vsel %vm1656_vm15, %v1952_v57, %v7213_v19  ;;  %v8983_v57 = vshll.u32 %v7000_v47, 16  ;;  %v8899_v1 = vrot.slane %v7129_v9, 6  ;;  %v7261_v12 = vcombine.low %v7046_v30, %v760_v11 }
 0x19c   :  { %v7237_v2 = vsel %vm1092_vm11, %v1143_v56, %v1152_v40  ;;  %1405 = vrot.lane.b32.xlu1 %v1366_v61, %s6034_s24  ;;  %v994_v56 = vsel %vm971_vm8, %v8982_v27, %v8894_v33  ;;  %v925_v58 = vor.u32 %v8984_v53, %v6996_v8  ;;  %v4980_v40 = vcombine.low %v7114_v42, %v765_v3  ;;  %v5935_v61 = vld [vmem:[#allocation2 + $0x4] sm:$0xf] }
 0x19d   :  { %8981 = vst [vmem:[#allocation49_spill] sm:$0xff] %v7237_v2  ;;  %v929_v51 = vrot.slane %v8983_v57, 1  ;;  %1017 = vrot.lane.b32.xlu0 %v994_v56, %s6027_s5  ;;  %v1066_v21 = vpop.permute.xlu1 %1065  ;;  %v4951_v27 = vcombine.low %v735_v26, %v5935_v61  ;;  %v8985_v56 = vrot.slane %v7000_v47, 6  ;;  %v1368_v6 = vshrl.u32 %v7129_v9, 16 }
 0x19e   :  { %v945_v57 = vpop.permute.xlu0 %944  ;;  %v1371_v33 = vshll.u32 %v7129_v9, 16  ;;  %vm1440_vm14 = vcmask 261120   ;;  %vm1468_vm9 = vcmask 523264   ;;  %v1377_v30 = vshrl.u32 %v7253_v29, 16 }
 0x19f   :  { %v1180_v52 = vsel %vm294_vm1, %v8985_v56, %v1179_v37  ;;  %v930_v8 = vsel %vm838_vm10, %v925_v58, %v929_v51  ;;  %v1380_v3 = vshll.u32 %v7253_v29, 16  ;;  %vm1495_vm12 = vcmask 785408  }
 0x1a0   :  { %1205 = vrot.lane.b32.xlu1 %v1180_v52, %s6033_s20  ;;  %v1236_v26 = vsel %vm294_vm1, %v1233_v18, %v8899_v1  ;;  %v1181_v53 = vrot.slane %v4980_v40, 6  ;;  %v935_v58 = vshll.u32 %v7261_v12, 16  ;;  %v1524_v61 = vsel %vm1440_vm14, %v6391_v28, %v7171_v43 }
 0x1a1   :  { %962 = vrot.lane.b32.xlu0 %v930_v8, %s6033_s20  ;;  %v1386_v11 = vpop.permute.xlu1 %1385  ;;  %v1443_v56 = vsel %vm1440_vm14, %v4951_v27, %v943_v39  ;;  %v1370_v8 = vrot.slane %v1368_v6, 6  ;;  %v1373_v15 = vrot.slane %v1371_v33, 7  ;;  %v1562_v42 = vsel %vm1468_vm9, %v1524_v61, %v1240_v17 }
 0x1a2   :  { %v1242_v52 = vpop.permute.xlu0 %1241  ;;  %v1445_v2 = vsel %vm1440_vm14, %v6356_v54, %v945_v57  ;;  %v8986_v18 = vrot.slane %v7072_v16, 1  ;;  %v8987_v40 = vrot.slane %v6957_v0, 1  ;;  %v995_v28 = vrot.slane %v7124_v24, 1 }
 0x1a3   :  { %v1588_v43 = vsel %vm1495_vm12, %v1562_v42, %v1386_v11  ;;  %v1237_v39 = vrot.slane %v7253_v29, 6  ;;  %v1470_v33 = vsel %vm1468_vm9, %v1443_v56, %v7198_v50  ;;  %v937_v17 = vrot.slane %v935_v58, 1 }
 0x1a4   :  { %1261 = vrot.lane.b32.xlu1 %v1236_v26, %s6027_s5  ;;  %v1062_v1 = vsel %vm971_vm8, %v8987_v40, %v8986_v18  ;;  %v1379_v27 = vrot.slane %v1377_v30, 6  ;;  %v1382_v57 = vrot.slane %v1380_v3, 7  ;;  %v1497_v6 = vsel %vm1495_vm12, %v1470_v33, %v1066_v21 }
 0x1a5   :  { %1085 = vrot.lane.b32.xlu0 %v1062_v1, %s6034_s24  ;;  %v1188_v54 = vpop.permute.xlu1 %1187  ;;  %v1472_v0 = vsel %vm1468_vm9, %v1445_v2, %v1000_v46  ;;  %v1182_v61 = vsel %vm294_vm1, %v1179_v37, %v1181_v53  ;;  %v1374_v18 = vor.u32 %v1373_v15, %v1370_v8  ;;  %v1672_v42 = vshrl.u32 %v1588_v43, 16 }
 0x1a6   :  { %v1068_v26 = vpop.permute.xlu0 %1067  ;;  %v8988_v50 = vrot.slane %v7000_v47, 1  ;;  %v8989_v30 = vshrl.u32 %v7000_v47, 16  ;;  %v1675_v3 = vshll.u32 %v1588_v43, 16  ;;  %v939_v15 = vshrl.u32 %v7261_v12, 16 }
 0x1a7   :  { %v1499_v1 = vsel %vm1495_vm12, %v1472_v0, %v1068_v26  ;;  %v1527_v37 = vsel %vm1440_vm14, %v6477_v41, %v7215_v7  ;;  %v1657_v11 = vshrl.u32 %v1497_v6, 16  ;;  %v1660_v53 = vshll.u32 %v1497_v6, 16  ;;  %v8990_v7 = vld [vmem:[#allocation38_spill] sm:$0xff] }
 0x1a8   :  { %1207 = vrot.lane.b32.xlu1 %v1182_v61, %s6033_s20  ;;  %v996_v29 = vsel %vm971_vm8, %v8988_v50, %v995_v28  ;;  %v933_v21 = vor.u32 %v8989_v30, %v929_v51  ;;  %v1664_v2 = vshrl.u32 %v1499_v1, 16  ;;  %v1667_v46 = vshll.u32 %v1499_v1, 16 }
 0x1a9   :  { %1019 = vrot.lane.b32.xlu0 %v996_v29, %s6027_s5  ;;  %v1244_v58 = vpop.permute.xlu1 %1243  ;;  %v1383_v56 = vor.u32 %v1382_v57, %v1379_v27  ;;  %v1564_v8 = vsel %vm1468_vm9, %v1527_v37, %v1242_v52  ;;  %v1375_v51 = vsel %vm8900_vm13, %v7222_v44, %v1374_v18  ;;  %v941_v33 = vor.u32 %v939_v15, %v937_v17 }
 0x1aa   :  { %v1388_v40 = vpop.permute.xlu0 %1387  ;;  %v938_v43 = vsel %vm838_vm10, %v933_v21, %v937_v17  ;;  %v1674_v0 = vrot.slane %v1672_v42, 2  ;;  %v1666_v26 = vrot.slane %v1664_v2, 2  ;;  %v1669_v61 = vrot.slane %v1667_v46, 3 }
 0x1ab   :  { %v1590_v1 = vsel %vm1495_vm12, %v1564_v8, %v1388_v40  ;;  %v1677_v41 = vrot.slane %v1675_v3, 3  ;;  %v1530_v27 = vsel %vm1440_vm14, %v8990_v7, %v1188_v54  ;;  %v1659_v6 = vrot.slane %v1657_v11, 2 }
 0x1ac   :  { %1407 = vrot.lane.b32.xlu1 %v1375_v51, %s6034_s24  ;;  %v1679_v57 = vshrl.u32 %v1590_v1, 16  ;;  %v1682_v52 = vshll.u32 %v1590_v1, 16  ;;  %v1662_v44 = vrot.slane %v1660_v53, 3  ;;  %v1566_v50 = vsel %vm1468_vm9, %v1530_v27, %v1244_v58  ;;  %v8993_v1 = vld [vmem:[#allocation21_spill] sm:$0xff] }
 0x1ad   :  { %964 = vrot.lane.b32.xlu0 %v938_v43, %s6033_s20  ;;  %v1390_v17 = vpop.permute.xlu1 %1389  ;;  %v1063_v42 = vrot.slane %v7129_v9, 1  ;;  %v8991_v3 = vrot.slane %v7129_v9, 6  ;;  %v1670_v46 = vor.u32 %v1669_v61, %v1666_v26  ;;  %v1678_v11 = vor.u32 %v1677_v41, %v1674_v0  ;;  %v5878_v43 = vld [vmem:[%s8798_s4 + $0x88] sm:$0xff]  }
 0x1ae   :  { %v1681_v29 = vrot.slane %v1679_v57, 2  ;;  %v1684_v30 = vrot.slane %v1682_v52, 3  ;;  %v1592_v21 = vsel %vm1495_vm12, %v1566_v50, %v1390_v17  ;;  %v1002_v2 = vpop.permute.xlu0 %1001  ;;  %v1663_v58 = vor.u32 %v1662_v44, %v1659_v6  ;;  %v8995_v44 = vld [vmem:[#allocation45_spill] sm:$0xff] }
 0x1af   :  { %v1238_v54 = vsel %vm294_vm1, %v8991_v3, %v1237_v39  ;;  %v1712_v15 = vshrl.u32 %v1592_v21, 16  ;;  %v1715_v37 = vshll.u32 %v1592_v21, 16  ;;  %v1384_v39 = vsel %vm8900_vm13, %v1374_v18, %v1383_v56 }
 0x1b0   :  { %1263 = vrot.lane.b32.xlu1 %v1238_v54, %s6027_s5  ;;  %v1685_v53 = vor.u32 %v1684_v30, %v1681_v29  ;;  %v8992_v61 = vrot.slane %v7072_v16, 1  ;;  %v1671_v41 = vsel %vm1656_vm15, %v1663_v58, %v1670_v46  ;;  %v5879_v16 = vld [vmem:[%s8798_s4 + $0x80] sm:$0xff]   ;;  %v8994_v56 = vmov 0.0  }
 0x1b1   :  { %966 = vrot.lane.b32.xlu0 %v941_v33, %s6033_s20  ;;  %v1714_v8 = vrot.slane %v1712_v15, 2  ;;  %v1717_v40 = vrot.slane %v1715_v37, 3  ;;  %v1190_v51 = vpop.permute.xlu1 %1189  ;;  %v8996_v24 = vrot.slane %v6557_v59, 7  ;;  %vm134_vm13 = vcmask 519168  }
 0x1b2   :  { %v947_v9 = vpop.permute.xlu0 %946  ;;  %v1686_v26 = vsel %vm1656_vm15, %v1678_v11, %v1685_v53  ;;  %v1064_v0 = vsel %vm971_vm8, %v8992_v61, %v1063_v42  ;;  %v1533_v50 = vsel %vm1440_vm14, %v8995_v44, %v1190_v51 }
 0x1b3   :  { %v1447_v33 = vsel %vm1440_vm14, %v8993_v1, %v947_v9  ;;  %2184 = vmatprep.mubr.bf16.mxu0 %v1686_v26  ;;  %v1718_v7 = vor.u32 %v1717_v40, %v1714_v8 }
 0x1b4   :  { %1409 = vrot.lane.b32.xlu1 %v1384_v39, %s6034_s24  ;;  %2185 = vmatmul.mubr.bf16.vlgmr.msra.gmra.mxu0 %v1671_v41  ;;  %v1474_v57 = vsel %vm1468_vm9, %v1447_v33, %v1002_v2 }
 0x1b5   :  { %1087 = vrot.lane.b32.xlu0 %v1064_v0, %s6034_s24  ;;  %v1246_v27 = vpop.permute.xlu1 %1245  ;;  %5684 = vmatpush3.bf16.msra.mxu0 %v5878_v43  ;;  %v1719_v18 = vsel %vm1656_vm15, %v1685_v53, %v1718_v7 }
 0x1b6   :  { %5687 = vmatprep.mubr.msk.bf16.mxu0 %vm6031_vm0, %v8994_v56  ;;  %2192 = vmatprep.mubr.bf16.mxu1 %v1719_v18  ;;  %v1070_v52 = vpop.permute.xlu0 %1069  ;;  %v1568_v30 = vsel %vm1468_vm9, %v1533_v50, %v1246_v27 }
 0x1b7   :  { %5685 = vmatprep.subr.bf16.mxu0 %v8994_v56  ;;  %v1501_v6 = vsel %vm1495_vm12, %v1474_v57, %v1070_v52 }
 0x1b8   :  { %v1704_v17 = vshrl.u32 %v1501_v6, 16  ;;  %v1707_v29 = vshll.u32 %v1501_v6, 16 }
 0x1b9   :  { %1021 = vrot.lane.b32.xlu0 %v995_v28, %s6027_s5  ;;  %v1392_v21 = vpop.permute.xlu1 %1391  ;;  %5686 = vmatpush3.bf16.msra.mxu0 %v5879_v16  ;;  %v8997_v28 = vrot.slane %v6470_v23, 7 }
 0x1ba   :  { %v1706_v3 = vrot.slane %v1704_v17, 2  ;;  %v1709_v2 = vrot.slane %v1707_v29, 3  ;;  %v1594_v54 = vsel %vm1495_vm12, %v1568_v30, %v1392_v21  ;;  %v1004_v15 = vpop.permute.xlu0 %1003 }
 0x1bb   :  { %v1737_v37 = vshrl.u32 %v1594_v54, 16  ;;  %v1740_v11 = vshll.u32 %v1594_v54, 16  ;;  %v1421_v58 = vsel %vm1414_vm7, %v8997_v28, %v8996_v24 }
 0x1bc   :  { %v1710_v53 = vor.u32 %v1709_v2, %v1706_v3  ;;  %5688 = vmatmul.mubr.msk.bf16.vlgmr.msra.gmra.mxu0 %vm1440_vm14, %v7050_v62  ;;  %v1746_v62 = vshrl.u32 %v1421_v58, 16  ;;  %v1749_v59 = vshll.u32 %v1421_v58, 16 }
 0x1bd   :  { %1089 = vrot.lane.b32.xlu0 %v1063_v42, %s6034_s24  ;;  %v1739_v8 = vrot.slane %v1737_v37, 2  ;;  %v1742_v40 = vrot.slane %v1740_v11, 3  ;;  %v1192_v51 = vpop.permute.xlu1 %1191  ;;  %5691 = vmatprep.mubr.msk.bf16.mxu0 %vm6031_vm0, %v8994_v56  ;;  %v8998_v42 = vld [vmem:[#allocation25_spill] sm:$0xff] }
 0x1be   :  { %v949_v43 = vpop.permute.xlu0 %948  ;;  %v1711_v9 = vsel %vm1656_vm15, %v1670_v46, %v1710_v53  ;;  %v1748_v41 = vrot.slane %v1746_v62, 2  ;;  %v1751_v27 = vrot.slane %v1749_v59, 3  ;;  %v1536_v46 = vsel %vm1440_vm14, %v7004_v14, %v1192_v51  ;;  %v8999_v37 = vld [vmem:[#allocation29_spill] sm:$0xff] }
 0x1bf   :  { %v1743_v39 = vor.u32 %v1742_v40, %v1739_v8  ;;  %v1449_v26 = vsel %vm1440_vm14, %v8998_v42, %v949_v43  ;;  %2193 = vmatmul.mubr.bf16.vlgmr.msra.gmra.mxu1 %v1711_v9 }
 0x1c0   :  { %v1476_v0 = vsel %vm1468_vm9, %v1449_v26, %v1004_v15  ;;  %v1752_v30 = vor.u32 %v1751_v27, %v1748_v41 }
 0x1c1   :  { %v1248_v61 = vpop.permute.xlu1 %1247  ;;  %v1744_v23 = vsel %vm1656_vm15, %v1718_v7, %v1743_v39 }
 0x1c2   :  { %2200 = vmatprep.mubr.bf16.mxu1 %v1744_v23  ;;  %v1072_v1 = vpop.permute.xlu0 %1071  ;;  %v1570_v57 = vsel %vm1468_vm9, %v1536_v46, %v1248_v61  ;;  %v1753_v24 = vsel %vm1656_vm15, %v7098_v32, %v1752_v30 }
 0x1c3   :  { %v1503_v33 = vsel %vm1495_vm12, %v1476_v0, %v1072_v1  ;;  %v1778_v0 = vsel %vm1656_vm15, %v1752_v30, %v7137_v49 }
 0x1c4   :  { %v1729_v18 = vshrl.u32 %v1503_v33, 16  ;;  %v1732_v16 = vshll.u32 %v1503_v33, 16  ;;  %5692 = vmatmul.mubr.msk.bf16.gmra.mxu0 %vm1440_vm14, %v7110_v34 }
 0x1c5   :  { %v1394_v52 = vpop.permute.xlu1 %1393  ;;  %5695 = vmatprep.mubr.msk.bf16.mxu0 %vm6031_vm0, %v8994_v56 }
 0x1c6   :  { %v1731_v7 = vrot.slane %v1729_v18, 2  ;;  %v1734_v6 = vrot.slane %v1732_v16, 3  ;;  %v1596_v44 = vsel %vm1495_vm12, %v1570_v57, %v1394_v52  ;;  %v1006_v50 = vpop.permute.xlu0 %1005  ;;  %v9000_v16 = vld [vmem:[#allocation34_spill] sm:$0xff] }
 0x1c7   :  { %v1762_v17 = vshrl.u32 %v1596_v44, 16  ;;  %v1765_v29 = vshll.u32 %v1596_v44, 16 }
 0x1c8   :  { %v1735_v14 = vor.u32 %v1734_v6, %v1731_v7 }
 0x1c9   :  { %v1764_v21 = vrot.slane %v1762_v17, 2  ;;  %v1767_v3 = vrot.slane %v1765_v29, 3 }
 0x1ca   :  { %v1194_v2 = vpop.permute.xlu1 %1193  ;;  %v951_v54 = vpop.permute.xlu0 %950  ;;  %v1736_v34 = vsel %vm1656_vm15, %v1710_v53, %v1735_v14 }
 0x1cb   :  { %v1768_v15 = vor.u32 %v1767_v3, %v1764_v21  ;;  %v1451_v11 = vsel %vm1440_vm14, %v8999_v37, %v951_v54  ;;  %2201 = vmatmul.mubr.bf16.gmra.mxu1 %v1736_v34  ;;  %v1539_v51 = vsel %vm1440_vm14, %v7082_v55, %v1194_v2 }
 0x1cc   :  { %5696 = vmatmul.mubr.msk.bf16.gmra.mxu0 %vm1440_vm14, %v1753_v24  ;;  %v1478_v8 = vsel %vm1468_vm9, %v1451_v11, %v1006_v50 }
 0x1cd   :  { %v1769_v58 = vsel %vm1656_vm15, %v1743_v39, %v1768_v15  ;;  %5699 = vmatprep.mubr.msk.bf16.mxu0 %vm6031_vm0, %v8994_v56 }
 0x1ce   :  { %v1250_v28 = vpop.permute.xlu1 %1249  ;;  %2208 = vmatprep.mubr.bf16.mxu1 %v1769_v58  ;;  %v1074_v53 = vpop.permute.xlu0 %1073 }
 0x1cf   :  { %v1505_v40 = vsel %vm1495_vm12, %v1478_v8, %v1074_v53  ;;  %v1572_v32 = vsel %vm1468_vm9, %v1539_v51, %v1250_v28  ;;  %v9001_v8 = vld [vmem:[#allocation39_spill] sm:$0xff] }
 0x1d0   :  { %v1754_v43 = vshrl.u32 %v1505_v40, 16  ;;  %v1757_v9 = vshll.u32 %v1505_v40, 16 }
 0x1d2   :  { %v1396_v42 = vpop.permute.xlu1 %1395  ;;  %v1756_v26 = vrot.slane %v1754_v43, 2  ;;  %v1759_v62 = vrot.slane %v1757_v9, 3  ;;  %v1008_v59 = vpop.permute.xlu0 %1007 }
 0x1d3   :  { %v1598_v39 = vsel %vm1495_vm12, %v1572_v32, %v1396_v42 }
 0x1d4   :  { %v1787_v61 = vshrl.u32 %v1598_v39, 16  ;;  %v1790_v23 = vshll.u32 %v1598_v39, 16  ;;  %v1760_v1 = vor.u32 %v1759_v62, %v1756_v26  ;;  %5700 = vmatmul.mubr.msk.bf16.gmra.mxu0 %vm1440_vm14, %v1778_v0 }
 0x1d5   :  { %5703 = vmatprep.mubr.msk.bf16.mxu0 %vm6031_vm0, %v8994_v56 }
 0x1d6   :  { %v1789_v33 = vrot.slane %v1787_v61, 2  ;;  %v1792_v55 = vrot.slane %v1790_v23, 3  ;;  %v1196_v41 = vpop.permute.xlu1 %1195  ;;  %v953_v27 = vpop.permute.xlu0 %952  ;;  %v1761_v46 = vsel %vm1656_vm15, %v1735_v14, %v1760_v1 }
 0x1d7   :  { %v1453_v57 = vsel %vm1440_vm14, %v9000_v16, %v953_v27  ;;  %2209 = vmatmul.mubr.bf16.gmra.mxu1 %v1761_v46  ;;  %v1542_v50 = vsel %vm1440_vm14, %v7088_v22, %v1196_v41 }
 0x1d8   :  { %v1793_v18 = vor.u32 %v1792_v55, %v1789_v33  ;;  %v1480_v7 = vsel %vm1468_vm9, %v1453_v57, %v1008_v59  ;;  %v9002_v57 = vld [vmem:[#allocation42_spill] sm:$0xff] }
 0x1da   :  { %v1252_v52 = vpop.permute.xlu1 %1251  ;;  %v1794_v49 = vsel %vm1656_vm15, %v1768_v15, %v1793_v18  ;;  %v1076_v6 = vpop.permute.xlu0 %1075 }
 0x1db   :  { %2216 = vmatprep.mubr.bf16.mxu1 %v1794_v49  ;;  %v1507_v44 = vsel %vm1495_vm12, %v1480_v7, %v1076_v6  ;;  %v1574_v30 = vsel %vm1468_vm9, %v1542_v50, %v1252_v52 }
 0x1dc   :  { %v1779_v17 = vshrl.u32 %v1507_v44, 16  ;;  %v1782_v29 = vshll.u32 %v1507_v44, 16  ;;  %5704 = vmatmul.mubr.msk.bf16.gmra.mxu0 %vm1440_vm14, %v7144_v38 }
 0x1dd   :  { %5707 = vmatprep.mubr.msk.bf16.mxu0 %vm6031_vm0, %v8994_v56 }
 0x1de   :  { %v1398_v14 = vpop.permute.xlu1 %1397  ;;  %v1781_v21 = vrot.slane %v1779_v17, 2  ;;  %v1784_v3 = vrot.slane %v1782_v29, 3  ;;  %v1010_v54 = vpop.permute.xlu0 %1009 }
 0x1df   :  { %v1600_v2 = vsel %vm1495_vm12, %v1574_v30, %v1398_v14 }
 0x1e0   :  { %v1812_v34 = vshrl.u32 %v1600_v2, 16  ;;  %v1815_v15 = vshll.u32 %v1600_v2, 16  ;;  %v1785_v37 = vor.u32 %v1784_v3, %v1781_v21 }
 0x1e2   :  { %v1814_v22 = vrot.slane %v1812_v34, 2  ;;  %v1817_v11 = vrot.slane %v1815_v15, 3  ;;  %v1198_v24 = vpop.permute.xlu1 %1197  ;;  %v955_v28 = vpop.permute.xlu0 %954  ;;  %v1786_v38 = vsel %vm1656_vm15, %v1760_v1, %v1785_v37 }
 0x1e3   :  { %v1455_v53 = vsel %vm1440_vm14, %v9001_v8, %v955_v28  ;;  %2217 = vmatmul.mubr.bf16.gmra.mxu1 %v1786_v38  ;;  %v1545_v42 = vsel %vm1440_vm14, %v7117_v48, %v1198_v24  ;;  %v9003_v38 = vld [vmem:[#allocation47_spill] sm:$0xff]  ;;  %v9004_v8 = vmov 0  }
 0x1e4   :  { %v1818_v58 = vor.u32 %v1817_v11, %v1814_v22  ;;  %5708 = vmatmul.mubr.msk.bf16.gmra.mxu0 %vm1440_vm14, %v7159_v5  ;;  %v1482_v43 = vsel %vm1468_vm9, %v1455_v53, %v1010_v54  ;;  %135 = vst.msk [vmem:[#allocation3] sm:$0xf] %vm134_vm13, %v9004_v8  ;;  %136 = vst.msk [vmem:[#allocation3 + $0x4] sm:$0xf] %vm134_vm13, %v9004_v8 }
 0x1e5   :  { %5711 = vmatprep.mubr.msk.bf16.mxu0 %vm6031_vm0, %v8994_v56  ;;  %137 = vst.msk [vmem:[#allocation3 + $0x6c] sm:$0xf] %vm134_vm13, %v9004_v8  ;;  %138 = vst.msk [vmem:[#allocation3 + $0x70] sm:$0xf] %vm134_vm13, %v9004_v8 }
 0x1e6   :  { %v1254_v40 = vpop.permute.xlu1 %1253  ;;  %v1819_v51 = vsel %vm1656_vm15, %v1793_v18, %v1818_v58  ;;  %v1078_v9 = vpop.permute.xlu0 %1077 }
 0x1e7   :  { %2224 = vmatprep.mubr.bf16.mxu1 %v1819_v51  ;;  %v1509_v32 = vsel %vm1495_vm12, %v1482_v43, %v1078_v9  ;;  %v1576_v39 = vsel %vm1468_vm9, %v1545_v42, %v1254_v40 }
 0x1e8   :  { %v1804_v26 = vshrl.u32 %v1509_v32, 16  ;;  %v1807_v62 = vshll.u32 %v1509_v32, 16 }
 0x1ea   :  { %v1400_v5 = vpop.permute.xlu1 %1399  ;;  %v1806_v59 = vrot.slane %v1804_v26, 2  ;;  %v1809_v61 = vrot.slane %v1807_v62, 3  ;;  %v1012_v0 = vpop.permute.xlu0 %1011 }
 0x1eb   :  { %v1602_v23 = vsel %vm1495_vm12, %v1576_v39, %v1400_v5 }
 0x1ec   :  { %v1837_v1 = vshrl.u32 %v1602_v23, 16  ;;  %v1840_v33 = vshll.u32 %v1602_v23, 16  ;;  %v1810_v55 = vor.u32 %v1809_v61, %v1806_v59  ;;  %5712 = vmatmul.mubr.msk.bf16.gmra.mxu0 %vm1440_vm14, %v7164_v13 }
 0x1ed   :  { %5715 = vmatprep.mubr.msk.bf16.mxu0 %vm6031_vm0, %v8994_v56 }
 0x1ee   :  { %v1839_v41 = vrot.slane %v1837_v1, 2  ;;  %v1842_v27 = vrot.slane %v1840_v33, 3  ;;  %v1200_v46 = vpop.permute.xlu1 %1199  ;;  %v957_v48 = vpop.permute.xlu0 %956  ;;  %v1811_v18 = vsel %vm1656_vm15, %v1785_v37, %v1810_v55 }
 0x1ef   :  { %v1457_v52 = vsel %vm1440_vm14, %v9002_v57, %v957_v48  ;;  %2225 = vmatmul.mubr.bf16.gmra.mxu1 %v1811_v18  ;;  %v1548_v50 = vsel %vm1440_vm14, %v7133_v63, %v1200_v46  ;;  %v9005_v48 = vld [vmem:[#allocation48_spill] sm:$0xff] }
 0x1f0   :  { %v1843_v16 = vor.u32 %v1842_v27, %v1839_v41  ;;  %v1484_v13 = vsel %vm1468_vm9, %v1457_v52, %v1012_v0 }
 0x1f2   :  { %v1256_v49 = vpop.permute.xlu1 %1255  ;;  %v1844_v7 = vsel %vm1656_vm15, %v1818_v58, %v1843_v16  ;;  %v1080_v6 = vpop.permute.xlu0 %1079 }
 0x1f3   :  { %2232 = vmatprep.mubr.bf16.mxu1 %v1844_v7  ;;  %v1511_v44 = vsel %vm1495_vm12, %v1484_v13, %v1080_v6  ;;  %v1578_v30 = vsel %vm1468_vm9, %v1548_v50, %v1256_v49 }
 0x1f4   :  { %v1829_v17 = vshrl.u32 %v1511_v44, 16  ;;  %v1832_v29 = vshll.u32 %v1511_v44, 16  ;;  %5716 = vmatmul.mubr.msk.bf16.gmra.mxu0 %vm1440_vm14, %v7181_v35 }
 0x1f5   :  { %5719 = vmatprep.mubr.msk.bf16.mxu0 %vm6031_vm0, %v8994_v56 }
 0x1f6   :  { %v1402_v14 = vpop.permute.xlu1 %1401  ;;  %v1831_v21 = vrot.slane %v1829_v17, 2  ;;  %v1834_v3 = vrot.slane %v1832_v29, 3  ;;  %v1014_v54 = vpop.permute.xlu0 %1013 }
 0x1f7   :  { %v1604_v2 = vsel %vm1495_vm12, %v1578_v30, %v1402_v14 }
 0x1f8   :  { %v1862_v34 = vshrl.u32 %v1604_v2, 16  ;;  %v1865_v15 = vshll.u32 %v1604_v2, 16  ;;  %v1835_v37 = vor.u32 %v1834_v3, %v1831_v21 }
 0x1fa   :  { %v1864_v63 = vrot.slane %v1862_v34, 2  ;;  %v1867_v22 = vrot.slane %v1865_v15, 3  ;;  %v1202_v11 = vpop.permute.xlu1 %1201  ;;  %v959_v24 = vpop.permute.xlu0 %958  ;;  %v1836_v35 = vsel %vm1656_vm15, %v1810_v55, %v1835_v37 }
 0x1fb   :  { %v1459_v58 = vsel %vm1440_vm14, %v9003_v38, %v959_v24  ;;  %2233 = vmatmul.mubr.bf16.gmra.mxu1 %v1836_v35  ;;  %v1551_v9 = vsel %vm1440_vm14, %v7152_v10, %v1202_v11 }
 0x1fc   :  { %v1868_v28 = vor.u32 %v1867_v22, %v1864_v63  ;;  %5720 = vmatmul.mubr.msk.bf16.gmra.mxu0 %vm1440_vm14, %v7187_v60  ;;  %v1486_v60 = vsel %vm1468_vm9, %v1459_v58, %v1014_v54 }
 0x1fd   :  { %5723 = vmatprep.mubr.msk.bf16.mxu0 %vm6031_vm0, %v8994_v56 }
 0x1fe   :  { %v1258_v53 = vpop.permute.xlu1 %1257  ;;  %v1869_v40 = vsel %vm1656_vm15, %v1843_v16, %v1868_v28  ;;  %v1082_v51 = vpop.permute.xlu0 %1081 }
 0x1ff   :  { %2240 = vmatprep.mubr.bf16.mxu1 %v1869_v40  ;;  %v1513_v43 = vsel %vm1495_vm12, %v1486_v60, %v1082_v51  ;;  %v1580_v26 = vsel %vm1468_vm9, %v1551_v9, %v1258_v53 }
 0x200   :  { %v1854_v32 = vshrl.u32 %v1513_v43, 16  ;;  %v1857_v42 = vshll.u32 %v1513_v43, 16 }
 0x202   :  { %v1404_v62 = vpop.permute.xlu1 %1403  ;;  %v1856_v39 = vrot.slane %v1854_v32, 2  ;;  %v1859_v5 = vrot.slane %v1857_v42, 3  ;;  %v1016_v61 = vpop.permute.xlu0 %1015 }
 0x203   :  { %v1606_v59 = vsel %vm1495_vm12, %v1580_v26, %v1404_v62 }
 0x204   :  { %v1887_v23 = vshrl.u32 %v1606_v59, 16  ;;  %v1890_v0 = vshll.u32 %v1606_v59, 16  ;;  %v1860_v1 = vor.u32 %v1859_v5, %v1856_v39  ;;  %5724 = vmatmul.mubr.msk.bf16.gmra.mxu0 %vm1440_vm14, %v7192_v31 }
 0x205   :  { %5727 = vmatprep.mubr.msk.bf16.mxu0 %vm6031_vm0, %v8994_v56 }
 0x206   :  { %v1889_v33 = vrot.slane %v1887_v23, 2  ;;  %v1892_v55 = vrot.slane %v1890_v0, 3  ;;  %v1204_v41 = vpop.permute.xlu1 %1203  ;;  %v961_v10 = vpop.permute.xlu0 %960  ;;  %v1861_v27 = vsel %vm1656_vm15, %v1835_v37, %v1860_v1 }
 0x207   :  { %v1461_v18 = vsel %vm1440_vm14, %v9005_v48, %v961_v10  ;;  %2241 = vmatmul.mubr.bf16.gmra.mxu1 %v1861_v27  ;;  %v1554_v7 = vsel %vm1440_vm14, %v7174_v45, %v1204_v41 }
 0x208   :  { %v1893_v46 = vor.u32 %v1892_v55, %v1889_v33  ;;  %v1488_v31 = vsel %vm1468_vm9, %v1461_v18, %v1016_v61 }
 0x20a   :  { %v1260_v16 = vpop.permute.xlu1 %1259  ;;  %v1894_v57 = vsel %vm1656_vm15, %v1868_v28, %v1893_v46 }
 0x20b   :  { %2248 = vmatprep.mubr.bf16.mxu1 %v1894_v57  ;;  %v1084_v52 = vpop.permute.xlu0 %1083  ;;  %v1582_v44 = vsel %vm1468_vm9, %v1554_v7, %v1260_v16 }
 0x20c   :  { %v1515_v49 = vsel %vm1495_vm12, %v1488_v31, %v1084_v52  ;;  %5728 = vmatmul.mubr.msk.bf16.gmra.mxu0 %vm1440_vm14, %v7211_v36 }
 0x20d   :  { %v1879_v13 = vshrl.u32 %v1515_v49, 16  ;;  %v1882_v6 = vshll.u32 %v1515_v49, 16  ;;  %5731 = vmatprep.mubr.msk.bf16.mxu0 %vm6031_vm0, %v8994_v56 }
 0x20e   :  { %v1406_v50 = vpop.permute.xlu1 %1405 }
 0x20f   :  { %v1881_v17 = vrot.slane %v1879_v13, 2  ;;  %v1884_v29 = vrot.slane %v1882_v6, 3  ;;  %v1608_v30 = vsel %vm1495_vm12, %v1582_v44, %v1406_v50  ;;  %v1018_v14 = vpop.permute.xlu0 %1017 }
 0x210   :  { %v1912_v21 = vshrl.u32 %v1608_v30, 16  ;;  %v1915_v3 = vshll.u32 %v1608_v30, 16 }
 0x211   :  { %v1885_v2 = vor.u32 %v1884_v29, %v1881_v17 }
 0x212   :  { %v1914_v45 = vrot.slane %v1912_v21, 2  ;;  %v1917_v54 = vrot.slane %v1915_v3, 3  ;;  %v1206_v34 = vpop.permute.xlu1 %1205 }
 0x213   :  { %v963_v15 = vpop.permute.xlu0 %962  ;;  %v1886_v36 = vsel %vm1656_vm15, %v1860_v1, %v1885_v2 }
 0x214   :  { %v1918_v37 = vor.u32 %v1917_v54, %v1914_v45  ;;  %v1463_v63 = vsel %vm1440_vm14, %v6955_v20, %v963_v15  ;;  %2249 = vmatmul.mubr.bf16.gmra.mxu1 %v1886_v36  ;;  %5732 = vmatmul.mubr.msk.bf16.gmra.mxu0 %vm1440_vm14, %v7233_v4  ;;  %v1557_v4 = vsel %vm1440_vm14, %v7208_v25, %v1206_v34  ;;  %v5890_v15 = vld [vmem:[#allocation8 + $0x38] sm:$0xff]  }
 0x215   :  { %5735 = vmatprep.mubr.msk.bf16.mxu0 %vm6031_vm0, %v8994_v56  ;;  %v1490_v24 = vsel %vm1468_vm9, %v1463_v63, %v1018_v14 }
 0x216   :  { %v1262_v22 = vpop.permute.xlu1 %1261  ;;  %v1919_v11 = vsel %vm1656_vm15, %v1893_v46, %v1918_v37 }
 0x217   :  { %2256 = vmatprep.mubr.bf16.mxu1 %v1919_v11  ;;  %v1086_v35 = vpop.permute.xlu0 %1085  ;;  %v1584_v51 = vsel %vm1468_vm9, %v1557_v4, %v1262_v22  ;;  %v7525_v11 = vld [vmem:[#allocation6] ss:$0 sm:$0xff] }
 0x218   :  { %v1517_v28 = vsel %vm1495_vm12, %v1490_v24, %v1086_v35 }
 0x219   :  { %v1904_v38 = vshrl.u32 %v1517_v28, 16  ;;  %v1907_v58 = vshll.u32 %v1517_v28, 16 }
 0x21a   :  { %v1208_v8 = vpop.permute.xlu1 %1207 }
 0x21b   :  { %v1906_v20 = vrot.slane %v1904_v38, 2  ;;  %v1909_v53 = vrot.slane %v1907_v58, 3  ;;  %v1020_v40 = vpop.permute.xlu0 %1019 }
 0x21c   :  { %5736 = vmatmul.mubr.msk.bf16.gmra.mxu0 %vm1440_vm14, %v7213_v19  ;;  %v9006_v19 = vld [vmem:[#allocation49_spill] sm:$0xff] }
 0x21d   :  { %v1910_v60 = vor.u32 %v1909_v53, %v1906_v20  ;;  %v1560_v0 = vsel %vm1440_vm14, %v9006_v19, %v1208_v8  ;;  %v5892_v8 = vld [vmem:[#allocation8 + $0x70] sm:$0xff]  }
 0x21e   :  { %v1408_v43 = vpop.permute.xlu1 %1407  ;;  %v5893_v20 = vld [vmem:[#allocation8 + $0x30] sm:$0xff]  }
 0x21f   :  { %v1610_v9 = vsel %vm1495_vm12, %v1584_v51, %v1408_v43  ;;  %v965_v32 = vpop.permute.xlu0 %964  ;;  %v1911_v42 = vsel %vm1656_vm15, %v1885_v2, %v1910_v60 }
 0x220   :  { %v1937_v26 = vshrl.u32 %v1610_v9, 16  ;;  %v1940_v62 = vshll.u32 %v1610_v9, 16  ;;  %2257 = vmatmul.mubr.bf16.gmra.mxu1 %v1911_v42  ;;  %v1465_v23 = vsel %vm1440_vm14, %v7000_v47, %v965_v32 }
 0x221   :  { %v1492_v10 = vsel %vm1468_vm9, %v1465_v23, %v1020_v40 }
 0x222   :  { %v1939_v39 = vrot.slane %v1937_v26, 2  ;;  %v1942_v5 = vrot.slane %v1940_v62, 3  ;;  %v1264_v59 = vpop.permute.xlu1 %1263 }
 0x223   :  { %v967_v61 = vpop.permute.xlu0 %966  ;;  %v1586_v1 = vsel %vm1468_vm9, %v1560_v0, %v1264_v59 }
 0x224   :  { %v1943_v25 = vor.u32 %v1942_v5, %v1939_v39  ;;  %v1467_v44 = vsel %vm1440_vm14, %v7261_v12, %v967_v61  ;;  %v5889_v12 = vld [vmem:[#allocation8 + $0x78] sm:$0xff]  }
 0x225   :  { %5420 = vmatprep.subr.bf16.mxu1 %v5889_v12 }
 0x226   :  { %v1410_v33 = vpop.permute.xlu1 %1409  ;;  %v1944_v55 = vsel %vm1656_vm15, %v1918_v37, %v1943_v25  ;;  %5421 = vmatpush3.bf16.msra.mxu1 %v5890_v15 }
 0x227   :  { %v1612_v41 = vsel %vm1495_vm12, %v1586_v1, %v1410_v33  ;;  %2264 = vmatprep.mubr.bf16.mxu1 %v1944_v55  ;;  %v1088_v27 = vpop.permute.xlu0 %1087  ;;  %5422 = vmatprep.subr.bf16.mxu1 %v5892_v8 }
 0x228   :  { %v1962_v46 = vshrl.u32 %v1612_v41, 16  ;;  %v1965_v48 = vshll.u32 %v1612_v41, 16  ;;  %v1519_v18 = vsel %vm1495_vm12, %v1492_v10, %v1088_v27 }
 0x229   :  { %v1929_v16 = vshrl.u32 %v1519_v18, 16  ;;  %v1932_v47 = vshll.u32 %v1519_v18, 16  ;;  %v5895_v18 = vld [vmem:[#allocation8 + $0x28] sm:$0xff]  }
 0x22a   :  { %v1964_v57 = vrot.slane %v1962_v46, 2  ;;  %v1967_v31 = vrot.slane %v1965_v48, 3  ;;  %5423 = vmatpush3.bf16.msra.mxu1 %v5893_v20  ;;  %v5894_v48 = vld [vmem:[#allocation8 + $0x68] sm:$0xff]  }
 0x22b   :  { %v1931_v52 = vrot.slane %v1929_v16, 2  ;;  %v1934_v49 = vrot.slane %v1932_v47, 3  ;;  %v1022_v7 = vpop.permute.xlu0 %1021  ;;  %5424 = vmatprep.subr.bf16.mxu1 %v5894_v48  ;;  %v9057_v16 = vld [vmem:[#allocation32_spill] sm:$0xff] }
 0x22c   :  { %v1968_v13 = vor.u32 %v1967_v31, %v1964_v57  ;;  %v1494_v17 = vsel %vm1468_vm9, %v1467_v44, %v1022_v7 }
 0x22d   :  { %v1935_v6 = vor.u32 %v1934_v49, %v1931_v52  ;;  %v2601_v52 = vld [vmem:[#allocation3 + $0x4] sm:$0xf]  ;;  %v2626_v49 = vld [vmem:[#allocation3] sm:$0x8] }
 0x22e   :  { %v1969_v50 = vsel %vm1656_vm15, %v1943_v25, %v1968_v13  ;;  %5425 = vmatpush3.bf16.msra.mxu1 %v5895_v18 }
 0x22f   :  { %v1090_v29 = vpop.permute.xlu0 %1089  ;;  %v1936_v30 = vsel %vm1656_vm15, %v1910_v60, %v1935_v6 }
 0x230   :  { %v1521_v14 = vsel %vm1495_vm12, %v1494_v17, %v1090_v29  ;;  %2265 = vmatmul.mubr.bf16.gmra.mxu1 %v1936_v30  ;;  %v7540_v17 = vcombine.low %v2626_v49, %v2601_v52  ;;  %v5896_v29 = vld [vmem:[#allocation8 + $0x60] sm:$0xff]   ;;  %v9014_v49 = vld [vmem:[#allocation19_spill] sm:$0xff] }
 0x231   :  { %v1954_v21 = vshrl.u32 %v1521_v14, 16  ;;  %v1957_v3 = vshll.u32 %v1521_v14, 16  ;;  %2272 = vmatprep.mubr.bf16.mxu1 %v1969_v50  ;;  %v5897_v30 = vld [vmem:[#allocation8 + $0x20] sm:$0xff]   ;;  %5426 = vmatprep.subr.bf16.mxu1 %v5896_v29  ;;  %vm9015_vm12 = vcmp.eq.s32.totalorder %v9014_v49, 1  ;;  %v5915_v49 = vld [vmem:[#allocation8 + $0xb0] sm:$0xff]  }
 0x232   :  { %5427 = vmatpush3.bf16.msra.mxu1 %v5897_v30 }
 0x233   :  { %v1956_v2 = vrot.slane %v1954_v21, 2  ;;  %v1959_v45 = vrot.slane %v1957_v3, 3 }
 0x235   :  { %v1960_v54 = vor.u32 %v1959_v45, %v1956_v2 }
 0x237   :  { %v1961_v34 = vsel %vm1656_vm15, %v1935_v6, %v1960_v54 }
 0x238   :  { %2273 = vmatmul.mubr.bf16.gmra.mxu1 %v1961_v34 }
 0x239   :  { %2280 = vmatprep.mubr.bf16.mxu1 %v1968_v13 }
 0x240   :  { %2281 = vmatmul.mubr.bf16.gmra.mxu1 %v1960_v54 }
 0x274   :  { %v5327_v36 = vpop.f32.mrf.mxu0 }
 0x276   :  { %v5328_v37 = vpop.f32.mrf.mxu0 }
 0x277   :  { %v5329_v63 = vadd.f32 %v5328_v37, %v5327_v36  ;;  %v2628_v37 = vld [vmem:[#allocation3 + $0x4] sm:$0x8] }
 0x278   :  { %v5330_v22 = vpop.f32.mrf.mxu0 }
 0x279   :  { %v2187_v28 = vadd.f32 %v5329_v63, %v7525_v11 }
 0x27a   :  { %v5331_v24 = vpop.f32.mrf.mxu0 }
 0x27b   :  { %v5332_v35 = vadd.f32 %v5331_v24, %v5330_v22  ;;  %v2706_v24 = vshll.u32 %v7540_v17, 16 }
 0x27c   :  { %v2322_v38 = vpop.f32.mrf.mxu0 }
 0x27d   :  { %v2323_v58 = vadd.f32 %v2322_v38, %v2187_v28  ;;  %v2190_v60 = vadd.f32 %v5332_v35, %v7525_v11 }
 0x27e   :  { %v5689_v53 = vpop.f32.mrf.mxu0 }
 0x27f   :  { %v2424_v40 = vmax.f32 %v2323_v58, 0.0  ;;  %v5333_v4 = vpop.f32.mrf.mxu1 }
 0x280   :  { %v2325_v51 = vpop.f32.mrf.mxu0 }
 0x281   :  { %v2449_v9 = vsel %vm559_vm5, %v2424_v40, 0.0  ;;  %v2326_v32 = vadd.f32 %v2325_v51, %v2190_v60  ;;  %v5334_v42 = vpop.f32.mrf.mxu1 }
 0x282   :  { %v5174_v26 = vpack.c.bf16 %v2449_v9, %v2449_v9  ;;  %v5335_v62 = vadd.f32 %v5334_v42, %v5333_v4  ;;  %v5690_v39 = vpop.f32.mrf.mxu0  ;;  %v2704_v42 = vshrl.u32 %v7540_v17, 16 }
 0x283   :  { %v2425_v5 = vmax.f32 %v2326_v32, 0.0  ;;  %v5336_v59 = vpop.f32.mrf.mxu1 }
 0x284   :  { %2575 = vst.msk [vmem:[#allocation3 + $0x8] sm:$0xf] %vm134_vm13, %v5174_v26  ;;  %v2195_v61 = vadd.f32 %v5335_v62, %v7525_v11  ;;  %v2330_v25 = vpop.f32.mrf.mxu0  ;;  %v2708_v26 = vrot.slane %v2706_v24, 1 }
 0x285   :  { %v2450_v19 = vsel %vm560_vm2, %v2425_v5, 0.0  ;;  %v5337_v0 = vpop.f32.mrf.mxu1 }
 0x286   :  { %v5175_v1 = vpack.c.bf16 %v2450_v19, %v2450_v19  ;;  %v2331_v33 = vadd.f32 %v2330_v25, %v2195_v61  ;;  %v5338_v55 = vadd.f32 %v5337_v0, %v5336_v59  ;;  %v5693_v41 = vpop.f32.mrf.mxu0  ;;  %v5900_v19 = vld [vmem:[#allocation8 + $0x58] sm:$0xff]  }
 0x287   :  { %v5901_v0 = vld [vmem:[#allocation8 + $0x18] sm:$0xff]   ;;  %5428 = vmatprep.subr.bf16.mxu1 %v5900_v19  ;;  %v5906_v19 = vld [vmem:[#allocation8 + $0x48] sm:$0xff]  }
 0x288   :  { %2576 = vst.msk [vmem:[#allocation3 + $0xc] sm:$0xf] %vm134_vm13, %v5175_v1  ;;  %v2426_v10 = vmax.f32 %v2331_v33, 0.0  ;;  %v2198_v27 = vadd.f32 %v5338_v55, %v7525_v11  ;;  %v2333_v46 = vpop.f32.mrf.mxu0  ;;  %5429 = vmatpush3.bf16.msra.mxu1 %v5901_v0 }
 0x28a   :  { %v2451_v47 = vsel %vm561_vm3, %v2426_v10, 0.0  ;;  %v2334_v57 = vadd.f32 %v2333_v46, %v2198_v27  ;;  %v5694_v31 = vpop.f32.mrf.mxu0 }
 0x28b   :  { %v5176_v7 = vpack.c.bf16 %v2451_v47, %v2451_v47  ;;  %v5339_v13 = vpop.f32.mrf.mxu1  ;;  %v2602_v34 = vld [vmem:[#allocation3 + $0x8] sm:$0xf]  ;;  %v2709_v31 = vor.u32 %v2708_v26, %v2704_v42 }
 0x28c   :  { %v2427_v6 = vmax.f32 %v2334_v57, 0.0  ;;  %v2338_v44 = vpop.f32.mrf.mxu0  ;;  %v5056_v20 = vcombine.low %v2628_v37, %v2602_v34 }
 0x28d   :  { %2577 = vst.msk [vmem:[#allocation3 + $0x10] sm:$0xf] %vm134_vm13, %v5176_v7  ;;  %v5340_v50 = vpop.f32.mrf.mxu1 }
 0x28e   :  { %v2452_v21 = vsel %vm562_vm4, %v2427_v6, 0.0  ;;  %v5341_v3 = vadd.f32 %v5340_v50, %v5339_v13  ;;  %v5697_v2 = vpop.f32.mrf.mxu0  ;;  %v2877_v55 = vrot.slane %v5056_v20, 1 }
 0x28f   :  { %v5177_v45 = vpack.c.bf16 %v2452_v21, %v2452_v21  ;;  %v5342_v54 = vpop.f32.mrf.mxu1  ;;  %v2603_v12 = vld [vmem:[#allocation3 + $0xc] sm:$0xf] }
 0x290   :  { %v2203_v15 = vadd.f32 %v5341_v3, %v7525_v11  ;;  %v2341_v36 = vpop.f32.mrf.mxu0  ;;  %v7545_v63 = vcombine.low %v2602_v34, %v2603_v12  ;;  %v2633_v9 = vld [vmem:[#allocation3 + $0xc] sm:$0xe] }
 0x291   :  { %2578 = vst.msk [vmem:[#allocation3 + $0x14] sm:$0xf] %vm134_vm13, %v5177_v45  ;;  %v5343_v22 = vpop.f32.mrf.mxu1 }
 0x292   :  { %v2339_v35 = vadd.f32 %v2338_v44, %v2203_v15  ;;  %v5344_v28 = vadd.f32 %v5343_v22, %v5342_v54  ;;  %v5698_v38 = vpop.f32.mrf.mxu0  ;;  %v2711_v58 = vshll.u32 %v7545_v63, 16  ;;  %v2715_v8 = vshrl.u32 %v7545_v63, 16 }
 0x294   :  { %v2428_v53 = vmax.f32 %v2339_v35, 0.0  ;;  %v2206_v40 = vadd.f32 %v5344_v28, %v7525_v11  ;;  %v2346_v4 = vpop.f32.mrf.mxu0  ;;  %v2604_v60 = vld [vmem:[#allocation3 + $0x10] sm:$0xf]  ;;  %v2930_v51 = vrot.slane %v2711_v58, 6  ;;  %v2929_v62 = vrot.slane %v2715_v8, 5  ;;  %v5903_v35 = vld [vmem:[#allocation8 + $0x50] sm:$0xff]  }
 0x295   :  { %v7552_v32 = vcombine.low %v2603_v12, %v2604_v60  ;;  %v5072_v25 = vcombine.low %v2633_v9, %v2604_v60  ;;  %v2713_v52 = vrot.slane %v2711_v58, 1  ;;  %v5904_v28 = vld [vmem:[#allocation8 + $0x10] sm:$0xff]   ;;  %5430 = vmatprep.subr.bf16.mxu1 %v5903_v35 }
 0x296   :  { %v2453_v5 = vsel %vm563_vm6, %v2428_v53, 0.0  ;;  %v2342_v59 = vadd.f32 %v2341_v36, %v2206_v40  ;;  %v5701_v61 = vpop.f32.mrf.mxu0  ;;  %v7560_v48 = vor.u32 %v2930_v51, %v2929_v62  ;;  %5431 = vmatpush3.bf16.msra.mxu1 %v5904_v28 }
 0x297   :  { %9011 = vst [vmem:[#allocation38_spill] sm:$0xff] %v7552_v32  ;;  %v5178_v1 = vpack.c.bf16 %v2453_v5, %v2453_v5  ;;  %v5345_v33 = vpop.f32.mrf.mxu1  ;;  %v2878_v41 = vrot.slane %v7552_v32, 1  ;;  %v3078_v44 = vshrl.u32 %v5072_v25, 16  ;;  %v3081_v50 = vshll.u32 %v5072_v25, 16  ;;  %v9017_v5 = vld [vmem:[#allocation20_spill] sm:$0xff]  ;;  %5432 = vmatprep.subr.bf16.mxu1 %v5906_v19 }
 0x298   :  { %v2429_v10 = vmax.f32 %v2342_v59, 0.0  ;;  %v2349_v27 = vpop.f32.mrf.mxu0  ;;  %v2605_v46 = vld [vmem:[#allocation3 + $0x14] sm:$0xf]  ;;  %9013 = vst [vmem:[#allocation21_spill] sm:$0xff] %v7560_v48  ;;  %v7577_v54 = vrot.slane %v5072_v25, 7  ;;  %v2714_v12 = vsel %vm838_vm10, %v2709_v31, %v2713_v52  ;;  %v2717_v9 = vor.u32 %v2715_v8, %v2713_v52  ;;  %v5907_v8 = vld [vmem:[#allocation8 + $0x8] sm:$0xff]  }
 0x299   :  { %2579 = vst.msk [vmem:[#allocation3 + $0x18] sm:$0xf] %vm134_vm13, %v5178_v1  ;;  %v5346_v18 = vpop.f32.mrf.mxu1  ;;  %v2879_v47 = vsel %vm971_vm8, %v2877_v55, %v2878_v41  ;;  %v7566_v57 = vcombine.low %v2604_v60, %v2605_v46  ;;  %v3080_v38 = vrot.slane %v3078_v44, 6  ;;  %v3083_v58 = vrot.slane %v3081_v50, 7 }
 0x29a   :  { %v2454_v7 = vsel %vm9015_vm12, %v2429_v10, 0.0  ;;  %v5347_v13 = vadd.f32 %v5346_v18, %v5345_v33  ;;  %v5702_v6 = vpop.f32.mrf.mxu0  ;;  %2902 = vrot.lane.b32.xlu1 %v2879_v47, %s6027_s5  ;;  %v8901_v42 = vrot.slane %v7552_v32, 6  ;;  %v3531_v62 = vshrl.u32 %v7577_v54, 16  ;;  %5433 = vmatpush3.bf16.msra.mxu1 %v5907_v8 }
 0x29b   :  { %v5179_v29 = vpack.c.bf16 %v2454_v7, %v2454_v7  ;;  %v5348_v30 = vpop.f32.mrf.mxu1  ;;  %v2719_v21 = vshll.u32 %v7566_v57, 16  ;;  %v2723_v3 = vshrl.u32 %v7566_v57, 16  ;;  %vm9018_vm14 = vcmp.eq.s32.totalorder %v9017_v5, 1  ;;  %v5913_v5 = vld [vmem:[#allocation8 + $0xf0] sm:$0xff]  }
 0x29c   :  { %v2211_v2 = vadd.f32 %v5347_v13, %v7525_v11  ;;  %v7574_v45 = vpop.f32.mrf.mxu0  ;;  %v7601_v0 = vor.u32 %v3083_v58, %v3080_v38  ;;  %v3534_v1 = vshll.u32 %v7577_v54, 16 }
 0x29d   :  { %2580 = vst.msk [vmem:[#allocation3 + $0x1c] sm:$0xf] %vm134_vm13, %v5179_v29  ;;  %v5349_v34 = vpop.f32.mrf.mxu1  ;;  %v2933_v15 = vrot.slane %v2719_v21, 6  ;;  %v2932_v36 = vrot.slane %v2723_v3, 5 }
 0x29e   :  { %v2347_v37 = vadd.f32 %v2346_v4, %v2211_v2  ;;  %v5350_v22 = vadd.f32 %v5349_v34, %v5348_v30  ;;  %v5705_v24 = vpop.f32.mrf.mxu0  ;;  %2806 = vrot.lane.b32.xlu1 %v2714_v12, %s6027_s5 }
 0x29f   :  { %v7583_v20 = vor.u32 %v2933_v15, %v2932_v36  ;;  %v5908_v15 = vld [vmem:[#allocation8 + $0x40] sm:$0xff]  }
 0x2a0   :  { %v2430_v53 = vmax.f32 %v2347_v37, 0.0  ;;  %v2606_v40 = vld [vmem:[#allocation3 + $0x18] sm:$0xf]  ;;  %v2214_v60 = vadd.f32 %v5350_v22, %v7525_v11  ;;  %v7586_v51 = vpop.f32.mrf.mxu0  ;;  %5434 = vmatprep.subr.bf16.mxu1 %v5908_v15 }
 0x2a1   :  { %v7590_v4 = vcombine.low %v2605_v46, %v2606_v40  ;;  %v7596_v26 = vsel %vm1092_vm11, %v7560_v48, %v7583_v20  ;;  %v5909_v36 = vld [vmem:[#allocation8] sm:$0xff]  }
 0x2a2   :  { %9016 = vst [vmem:[#allocation45_spill] sm:$0xff] %v7596_v26  ;;  %v2455_v59 = vsel %vm9018_vm14, %v2430_v53, 0.0  ;;  %v2350_v61 = vadd.f32 %v2349_v27, %v2214_v60  ;;  %v5706_v25 = vpop.f32.mrf.mxu0  ;;  %v2721_v27 = vrot.slane %v2719_v21, 1  ;;  %v9019_v21 = vld [vmem:[#allocation22_spill] sm:$0xff]  ;;  %vm9022_vm14 = vsmask.f32 1280  ;;  %5435 = vmatpush3.bf16.msra.mxu1 %v5909_v36 }
 0x2a3   :  { %v5180_v33 = vpack.c.bf16 %v2455_v59, %v2455_v59  ;;  %v5351_v55 = vpop.f32.mrf.mxu1  ;;  %v2880_v10 = vrot.slane %v7590_v4, 1  ;;  %v3086_v46 = vshrl.u32 %v7590_v4, 16  ;;  %v3089_v18 = vshll.u32 %v7590_v4, 16  ;;  %5739 = vmatprep.subr.bf16.mxu1 %v8994_v56 }
 0x2a4   :  { %v2607_v47 = vld [vmem:[#allocation3 + $0x1c] sm:$0xf]  ;;  %v2431_v31 = vmax.f32 %v2350_v61, 0.0  ;;  %v7607_v52 = vpop.f32.mrf.mxu0  ;;  %v3050_v7 = vrot.slane %v7590_v4, 6  ;;  %v3223_v13 = vrot.slane %v7590_v4, 7  ;;  %vm9020_vm12 = vcmp.eq.s32.totalorder %v9019_v21, 1 }
 0x2a5   :  { %2581 = vst.msk [vmem:[#allocation3 + $0x20] sm:$0xf] %vm134_vm13, %v5180_v33  ;;  %v7612_v6 = vcombine.low %v2606_v40, %v2607_v47  ;;  %v5352_v44 = vpop.f32.mrf.mxu1  ;;  %v2881_v50 = vsel %vm971_vm8, %v2878_v41, %v2880_v10  ;;  %v3088_v29 = vrot.slane %v3086_v46, 6  ;;  %v3091_v30 = vrot.slane %v3089_v18, 7 }
 0x2a6   :  { %v2456_v2 = vsel %vm9020_vm12, %v2431_v31, 0.0  ;;  %v5353_v34 = vadd.f32 %v5352_v44, %v5351_v55  ;;  %v5709_v12 = vpop.f32.mrf.mxu0  ;;  %2904 = vrot.lane.b32.xlu0 %v2881_v50, %s6027_s5  ;;  %v7627_v37 = vsel %vm294_vm1, %v8901_v42, %v3050_v7  ;;  %v3224_v41 = vsel %vm1414_vm7, %v7577_v54, %v3223_v13 }
 0x2a7   :  { %9021 = vst [vmem:[#allocation25_spill] sm:$0xff] %v7627_v37  ;;  %v5181_v22 = vpack.c.bf16 %v2456_v2, %v2456_v2  ;;  %v5354_v24 = vpop.f32.mrf.mxu1  ;;  %v2727_v35 = vshll.u32 %v7612_v6, 16  ;;  %v2731_v28 = vshrl.u32 %v7612_v6, 16  ;;  %v7635_v38 = vor.u32 %v3091_v30, %v3088_v29 }
 0x2a8   :  { %v2219_v58 = vadd.f32 %v5353_v34, %v7525_v11  ;;  %v7638_v53 = vpop.f32.mrf.mxu0  ;;  %v2722_v40 = vsel %vm838_vm10, %v2717_v9, %v2721_v27  ;;  %v3539_v60 = vshrl.u32 %v3224_v41, 16  ;;  %v3533_v55 = vrot.slane %v3531_v62, 2  ;;  %v9024_v62 = vld [vmem:[#allocation23_spill] sm:$0xff] }
 0x2a9   :  { %2582 = vst.msk [vmem:[#allocation3 + $0x24] sm:$0xf] %vm134_vm13, %v5181_v22  ;;  %v5355_v59 = vpop.f32.mrf.mxu1  ;;  %v2729_v54 = vrot.slane %v2727_v35, 1  ;;  %v2937_v61 = vrot.slane %v2727_v35, 6  ;;  %v2936_v25 = vrot.slane %v2731_v28, 5  ;;  %v7647_v19 = vsel %vm9022_vm14, %v7601_v0, %v7635_v38 }
 0x2aa   :  { %v2355_v8 = vadd.f32 %v7574_v45, %v2219_v58  ;;  %v5356_v33 = vadd.f32 %v5355_v59, %v5354_v24  ;;  %v5710_v9 = vpop.f32.mrf.mxu0  ;;  %2808 = vrot.lane.b32.xlu0 %v2722_v40, %s6027_s5  ;;  %v3536_v46 = vrot.slane %v3534_v1, 3  ;;  %v2725_v18 = vor.u32 %v2723_v3, %v2721_v27 }
 0x2ab   :  { %v7654_v31 = vor.u32 %v2937_v61, %v2936_v25  ;;  %v3541_v45 = vrot.slane %v3539_v60, 2  ;;  %v3542_v2 = vshll.u32 %v3224_v41, 16  ;;  %vm9025_vm12 = vcmp.eq.s32.totalorder %v9024_v62, 1 }
 0x2ac   :  { %v2432_v44 = vmax.f32 %v2355_v8, 0.0  ;;  %v2222_v50 = vadd.f32 %v5356_v33, %v7525_v11  ;;  %v7657_v29 = vpop.f32.mrf.mxu0  ;;  %v2608_v30 = vld [vmem:[#allocation3 + $0x20] sm:$0xf]  ;;  %v2730_v34 = vsel %vm838_vm10, %v2725_v18, %v2729_v54  ;;  %v3537_v36 = vor.u32 %v3536_v46, %v3533_v55  ;;  %v9026_v46 = vld [vmem:[#allocation24_spill] sm:$0xff] }
 0x2ad   :  { %v7660_v12 = vcombine.low %v2607_v47, %v2608_v30  ;;  %v7665_v3 = vsel %vm1092_vm11, %v7583_v20, %v7654_v31  ;;  %v3544_v22 = vrot.slane %v3542_v2, 3  ;;  %vm9027_vm14 = vcmp.eq.s32.totalorder %v9026_v46, 1  ;;  %v9043_v46 = vld [vmem:[#allocation30_spill] sm:$0xff] }
 0x2ae   :  { %9023 = vst [vmem:[#allocation29_spill] sm:$0xff] %v7665_v3  ;;  %v2457_v1 = vsel %vm9025_vm12, %v2432_v44, 0.0  ;;  %v2358_v27 = vadd.f32 %v7586_v51, %v2222_v50  ;;  %v5713_v15 = vpop.f32.mrf.mxu0  ;;  %2810 = vrot.lane.b32.xlu0 %v2730_v34, %s6027_s5  ;;  %vm9030_vm12 = vsmask.f32 1280 }
 0x2af   :  { %v5182_v41 = vpack.c.bf16 %v2457_v1, %v2457_v1  ;;  %v5357_v24 = vpop.f32.mrf.mxu1  ;;  %v2882_v47 = vrot.slane %v7660_v12, 1  ;;  %v3095_v35 = vshrl.u32 %v7660_v12, 16  ;;  %v3098_v58 = vshll.u32 %v7660_v12, 16 }
 0x2b0   :  { %v2433_v20 = vmax.f32 %v2358_v27, 0.0  ;;  %v7674_v40 = vpop.f32.mrf.mxu0  ;;  %v2609_v60 = vld [vmem:[#allocation3 + $0x24] sm:$0xf]  ;;  %v3052_v59 = vrot.slane %v7660_v12, 6  ;;  %v7677_v51 = vor.u32 %v3544_v22, %v3541_v45  ;;  %v3225_v61 = vrot.slane %v7660_v12, 7  ;;  %v5910_v12 = vld [vmem:[#allocation8 + $0xf8] sm:$0xff]  }
 0x2b1   :  { %2583 = vst.msk [vmem:[#allocation3 + $0x28] sm:$0xf] %vm134_vm13, %v5182_v41  ;;  %v5358_v25 = vpop.f32.mrf.mxu1  ;;  %v2883_v8 = vsel %vm971_vm8, %v2880_v10, %v2882_v47  ;;  %v7686_v33 = vcombine.low %v2608_v30, %v2609_v60  ;;  %v3097_v9 = vrot.slane %v3095_v35, 6  ;;  %v3100_v55 = vrot.slane %v3098_v58, 7  ;;  %5514 = vmatprep.subr.bf16.mxu0 %v5910_v12 }
 0x2b2   :  { %v2458_v18 = vsel %vm9027_vm14, %v2433_v20, 0.0  ;;  %v5359_v44 = vadd.f32 %v5358_v25, %v5357_v24  ;;  %v5714_v50 = vpop.f32.mrf.mxu0  ;;  %2906 = vrot.lane.b32.xlu1 %v2883_v8, %s6027_s5  ;;  %v7696_v45 = vsel %vm294_vm1, %v3050_v7, %v3052_v59  ;;  %v7700_v10 = vsel %vm1656_vm15, %v3537_v36, %v7677_v51 }
 0x2b3   :  { %9028 = vst [vmem:[#allocation34_spill] sm:$0xff] %v7696_v45  ;;  %9029 = vst [vmem:[#allocation39_spill] sm:$0xff] %v7700_v10  ;;  %v5183_v30 = vpack.c.bf16 %v2458_v18, %v2458_v18  ;;  %v5360_v2 = vpop.f32.mrf.mxu1  ;;  %v2735_v34 = vshll.u32 %v7686_v33, 16  ;;  %v2739_v1 = vshrl.u32 %v7686_v33, 16  ;;  %v7704_v27 = vor.u32 %v3100_v55, %v3097_v9 }
 0x2b4   :  { %v2227_v15 = vadd.f32 %v5359_v44, %v7525_v11  ;;  %v7707_v22 = vpop.f32.mrf.mxu0  ;;  %v2733_v7 = vor.u32 %v2731_v28, %v2729_v54  ;;  %v3226_v36 = vsel %vm1414_vm7, %v3223_v13, %v3225_v61 }
 0x2b5   :  { %2584 = vst.msk [vmem:[#allocation3 + $0x2c] sm:$0xf] %vm134_vm13, %v5183_v30  ;;  %v5361_v41 = vpop.f32.mrf.mxu1  ;;  %v2737_v24 = vrot.slane %v2735_v34, 1  ;;  %v2941_v35 = vrot.slane %v2735_v34, 6  ;;  %v2940_v58 = vrot.slane %v2739_v1, 5  ;;  %v7720_v20 = vsel %vm9030_vm12, %v7635_v38, %v7704_v27 }
 0x2b6   :  { %v2363_v25 = vadd.f32 %v7607_v52, %v2227_v15  ;;  %v5362_v28 = vadd.f32 %v5361_v41, %v5360_v2  ;;  %v5717_v54 = vpop.f32.mrf.mxu0  ;;  %v3580_v13 = vshrl.u32 %v3226_v36, 16  ;;  %v3583_v50 = vshll.u32 %v3226_v36, 16  ;;  %v9032_v2 = vld [vmem:[#allocation26_spill] sm:$0xff] }
 0x2b7   :  { %v2738_v8 = vsel %vm838_vm10, %v2733_v7, %v2737_v24  ;;  %v7724_v4 = vor.u32 %v2941_v35, %v2940_v58  ;;  %vm9033_vm14 = vcmp.eq.s32.totalorder %v9032_v2, 1 }
 0x2b8   :  { %v2434_v9 = vmax.f32 %v2363_v25, 0.0  ;;  %v2230_v55 = vadd.f32 %v5362_v28, %v7525_v11  ;;  %v7727_v18 = vpop.f32.mrf.mxu0  ;;  %2812 = vrot.lane.b32.xlu0 %v2738_v8, %s6027_s5  ;;  %v2610_v44 = vld [vmem:[#allocation3 + $0x28] sm:$0xf]  ;;  %v3582_v30 = vrot.slane %v3580_v13, 2  ;;  %v3585_v41 = vrot.slane %v3583_v50, 3 }
 0x2b9   :  { %v7730_v38 = vcombine.low %v2609_v60, %v2610_v44  ;;  %v7735_v52 = vsel %vm1092_vm11, %v7654_v31, %v7724_v4 }
 0x2ba   :  { %9031 = vst [vmem:[#allocation42_spill] sm:$0xff] %v7735_v52  ;;  %v2459_v34 = vsel %vm9033_vm14, %v2434_v9, 0.0  ;;  %v2366_v15 = vadd.f32 %v7638_v53, %v2230_v55  ;;  %v5718_v7 = vpop.f32.mrf.mxu0  ;;  %v7746_v13 = vor.u32 %v3585_v41, %v3582_v30  ;;  %vm9038_vm14 = vsmask.f32 1280 }
 0x2bb   :  { %v5184_v35 = vpack.c.bf16 %v2459_v34, %v2459_v34  ;;  %v5363_v58 = vpop.f32.mrf.mxu1  ;;  %v8903_v25 = vrot.slane %v7730_v38, 1  ;;  %v3104_v60 = vshrl.u32 %v7730_v38, 16  ;;  %v3107_v36 = vshll.u32 %v7730_v38, 16  ;;  %v9034_v7 = vld [vmem:[#allocation27_spill] sm:$0xff] }
 0x2bc   :  { %v2435_v28 = vmax.f32 %v2366_v15, 0.0  ;;  %v7743_v54 = vpop.f32.mrf.mxu0  ;;  %v2611_v31 = vld [vmem:[#allocation3 + $0x2c] sm:$0xf]  ;;  %v8902_v8 = vrot.slane %v7730_v38, 6  ;;  %v8904_v53 = vrot.slane %v7730_v38, 7  ;;  %vm9035_vm12 = vcmp.eq.s32.totalorder %v9034_v7, 1 }
 0x2bd   :  { %2585 = vst.msk [vmem:[#allocation3 + $0x30] sm:$0xf] %vm134_vm13, %v5184_v35  ;;  %v5364_v9 = vpop.f32.mrf.mxu1  ;;  %v2885_v55 = vsel %vm971_vm8, %v2882_v47, %v8903_v25  ;;  %v7755_v50 = vcombine.low %v2610_v44, %v2611_v31  ;;  %v3106_v34 = vrot.slane %v3104_v60, 6  ;;  %v3109_v15 = vrot.slane %v3107_v36, 7  ;;  %v5911_v25 = vld [vmem:[#allocation8 + $0xb8] sm:$0xff]  }
 0x2be   :  { %v2460_v42 = vsel %vm9035_vm12, %v2435_v28, 0.0  ;;  %v5365_v30 = vadd.f32 %v5364_v9, %v5363_v58  ;;  %v5721_v41 = vpop.f32.mrf.mxu0  ;;  %2908 = vrot.lane.b32.xlu1 %v2885_v55, %s6027_s5  ;;  %v7765_v35 = vsel %vm294_vm1, %v3052_v59, %v8902_v8  ;;  %v7770_v47 = vsel %vm1656_vm15, %v7677_v51, %v7746_v13  ;;  %5515 = vmatpush3.bf16.msra.mxu0 %v5911_v25 }
 0x2bf   :  { %9036 = vst [vmem:[#allocation47_spill] sm:$0xff] %v7765_v35  ;;  %9037 = vst [vmem:[#allocation48_spill] sm:$0xff] %v7770_v47  ;;  %v5185_v44 = vpack.c.bf16 %v2460_v42, %v2460_v42  ;;  %v5366_v60 = vpop.f32.mrf.mxu1  ;;  %v2743_v36 = vshll.u32 %v7755_v50, 16  ;;  %v8905_v58 = vshrl.u32 %v7755_v50, 16  ;;  %v7774_v28 = vor.u32 %v3109_v15, %v3106_v34  ;;  %5516 = vmatprep.subr.bf16.mxu0 %v5913_v5  ;;  %v5920_v47 = vld [vmem:[#allocation8 + $0xa8] sm:$0xff]  }
 0x2c0   :  { %v2235_v9 = vadd.f32 %v5365_v30, %v7525_v11  ;;  %v7777_v55 = vpop.f32.mrf.mxu0  ;;  %v2741_v41 = vor.u32 %v2739_v1, %v2737_v24  ;;  %v3228_v59 = vsel %vm1414_vm7, %v3225_v61, %v8904_v53  ;;  %v9115_v52 = vrot.slane %v7612_v6, 6 }
 0x2c1   :  { %2586 = vst.msk [vmem:[#allocation3 + $0x34] sm:$0xf] %vm134_vm13, %v5185_v44  ;;  %v5367_v42 = vpop.f32.mrf.mxu1  ;;  %v2745_v51 = vrot.slane %v2743_v36, 1  ;;  %v2945_v8 = vrot.slane %v2743_v36, 6  ;;  %v2944_v34 = vrot.slane %v8905_v58, 5  ;;  %v7790_v15 = vsel %vm9038_vm14, %v7704_v27, %v7774_v28 }
 0x2c2   :  { %v2371_v1 = vadd.f32 %v7657_v29, %v2235_v9  ;;  %v5368_v24 = vadd.f32 %v5367_v42, %v5366_v60  ;;  %v5722_v30 = vpop.f32.mrf.mxu0  ;;  %v3621_v53 = vshrl.u32 %v3228_v59, 16  ;;  %v3624_v2 = vshll.u32 %v3228_v59, 16  ;;  %v9040_v9 = vld [vmem:[#allocation28_spill] sm:$0xff]  ;;  %5517 = vmatpush3.bf16.msra.mxu0 %v5915_v49 }
 0x2c3   :  { %v2746_v61 = vsel %vm838_vm10, %v2741_v41, %v2745_v51  ;;  %v7794_v44 = vor.u32 %v2945_v8, %v2944_v34  ;;  %vm9041_vm12 = vcmp.eq.s32.totalorder %v9040_v9, 1  ;;  %vm9044_vm14 = vcmp.eq.s32.totalorder %v9043_v46, 1 }
 0x2c4   :  { %v2436_v36 = vmax.f32 %v2371_v1, 0.0  ;;  %v2238_v7 = vadd.f32 %v5368_v24, %v7525_v11  ;;  %v7797_v58 = vpop.f32.mrf.mxu0  ;;  %2814 = vrot.lane.b32.xlu0 %v2746_v61, %s6027_s5  ;;  %v2612_v27 = vld [vmem:[#allocation3 + $0x30] sm:$0xf]  ;;  %v3623_v8 = vrot.slane %v3621_v53, 2  ;;  %v3626_v1 = vrot.slane %v3624_v2, 3 }
 0x2c5   :  { %v7800_v29 = vcombine.low %v2611_v31, %v2612_v27  ;;  %v7805_v60 = vsel %vm1092_vm11, %v7724_v4, %v7794_v44 }
 0x2c6   :  { %9039 = vst [vmem:[#allocation49_spill] sm:$0xff] %v7805_v60  ;;  %v2461_v41 = vsel %vm9041_vm12, %v2436_v36, 0.0  ;;  %v2374_v42 = vadd.f32 %v7674_v40, %v2238_v7  ;;  %v5725_v34 = vpop.f32.mrf.mxu0  ;;  %v7816_v9 = vor.u32 %v3626_v1, %v3623_v8  ;;  %v9042_v7 = vrot.slane %v7730_v38, 1 }
 0x2c7   :  { %v5186_v24 = vpack.c.bf16 %v2461_v41, %v2461_v41  ;;  %v5369_v30 = vpop.f32.mrf.mxu1  ;;  %v8906_v59 = vrot.slane %v7800_v29, 1  ;;  %v3113_v31 = vshrl.u32 %v7800_v29, 16  ;;  %v3116_v25 = vshll.u32 %v7800_v29, 16 }
 0x2c8   :  { %v2437_v12 = vmax.f32 %v2374_v42, 0.0  ;;  %v7813_v61 = vpop.f32.mrf.mxu0  ;;  %v2613_v4 = vld [vmem:[#allocation3 + $0x34] sm:$0xf]  ;;  %v9046_v40 = vrot.slane %v7730_v38, 6  ;;  %vm9052_vm12 = vsmask.f32 1280 }
 0x2c9   :  { %2587 = vst.msk [vmem:[#allocation3 + $0x38] sm:$0xf] %vm134_vm13, %v5186_v24  ;;  %v5370_v2 = vpop.f32.mrf.mxu1  ;;  %v2887_v36 = vsel %vm971_vm8, %v9042_v7, %v8906_v59  ;;  %v7825_v41 = vcombine.low %v2612_v27, %v2613_v4  ;;  %v3115_v42 = vrot.slane %v3113_v31, 6  ;;  %v3118_v34 = vrot.slane %v3116_v25, 7 }
 0x2ca   :  { %v2462_v53 = vsel %vm9044_vm14, %v2437_v12, 0.0  ;;  %v5371_v8 = vadd.f32 %v5370_v2, %v5369_v30  ;;  %v5726_v1 = vpop.f32.mrf.mxu0  ;;  %2910 = vrot.lane.b32.xlu1 %v2887_v36, %s6027_s5  ;;  %v9045_v24 = vrot.slane %v7800_v29, 6  ;;  %v7840_v27 = vsel %vm1656_vm15, %v7746_v13, %v7816_v9 }
 0x2cb   :  { %9048 = vst [vmem:[#allocation51_spill] sm:$0xff] %v7840_v27  ;;  %v5187_v31 = vpack.c.bf16 %v2462_v53, %v2462_v53  ;;  %v5372_v25 = vpop.f32.mrf.mxu1  ;;  %v2751_v12 = vshll.u32 %v7825_v41, 16  ;;  %v2755_v30 = vshrl.u32 %v7825_v41, 16  ;;  %v7844_v2 = vor.u32 %v3118_v34, %v3115_v42 }
 0x2cc   :  { %v7835_v62 = vsel %vm294_vm1, %v9046_v40, %v9045_v24  ;;  %v2243_v7 = vadd.f32 %v5371_v8, %v7525_v11  ;;  %v7847_v36 = vpop.f32.mrf.mxu0  ;;  %v9049_v40 = vshrl.u32 %v7755_v50, 16  ;;  %v9050_v24 = vrot.slane %v7800_v29, 7 }
 0x2cd   :  { %9047 = vst [vmem:[#allocation50_spill] sm:$0xff] %v7835_v62  ;;  %v9051_v13 = vrot.slane %v7730_v38, 7  ;;  %2588 = vst.msk [vmem:[#allocation3 + $0x3c] sm:$0xf] %vm134_vm13, %v5187_v31  ;;  %v5373_v59 = vpop.f32.mrf.mxu1  ;;  %v2753_v46 = vrot.slane %v2751_v12, 1  ;;  %v2949_v21 = vrot.slane %v2751_v12, 6  ;;  %v7860_v34 = vsel %vm9052_vm12, %v7774_v28, %v7844_v2 }
 0x2ce   :  { %v2749_v1 = vor.u32 %v9049_v40, %v2745_v51  ;;  %v2948_v42 = vrot.slane %v2755_v30, 5  ;;  %v2379_v8 = vadd.f32 %v7707_v22, %v2243_v7  ;;  %v5374_v51 = vadd.f32 %v5373_v59, %v5372_v25  ;;  %v5729_v40 = vpop.f32.mrf.mxu0 }
 0x2cf   :  { %v3230_v53 = vsel %vm1414_vm7, %v9051_v13, %v9050_v24  ;;  %vm9058_vm12 = vcmp.eq.s32.totalorder %v9057_v16, 1  ;;  %v5919_v16 = vld [vmem:[#allocation8 + $0xe8] sm:$0xff]  }
 0x2d0   :  { %v2754_v38 = vsel %vm838_vm10, %v2749_v1, %v2753_v46  ;;  %v7864_v24 = vor.u32 %v2949_v21, %v2948_v42  ;;  %v2438_v31 = vmax.f32 %v2379_v8, 0.0  ;;  %v2246_v13 = vadd.f32 %v5374_v51, %v7525_v11  ;;  %v7867_v12 = vpop.f32.mrf.mxu0  ;;  %v2614_v39 = vld [vmem:[#allocation3 + $0x38] sm:$0xf]  ;;  %v9054_v21 = vld [vmem:[#allocation31_spill] sm:$0xff]  ;;  %5518 = vmatprep.subr.bf16.mxu0 %v5919_v16 }
 0x2d1   :  { %2816 = vrot.lane.b32.xlu0 %v2754_v38, %s6027_s5  ;;  %v3662_v28 = vshrl.u32 %v3230_v53, 16  ;;  %v3665_v14 = vshll.u32 %v3230_v53, 16  ;;  %v7870_v22 = vcombine.low %v2613_v4, %v2614_v39  ;;  %vm9055_vm14 = vcmp.eq.s32.totalorder %v9054_v21, 1  ;;  %5519 = vmatpush3.bf16.msra.mxu0 %v5920_v47 }
 0x2d2   :  { %v7875_v59 = vsel %vm1092_vm11, %v7794_v44, %v7864_v24  ;;  %v2463_v25 = vsel %vm9055_vm14, %v2438_v31, 0.0  ;;  %v2382_v7 = vadd.f32 %v7727_v18, %v2246_v13  ;;  %v5730_v1 = vpop.f32.mrf.mxu0  ;;  %v9056_v31 = vrot.slane %v7800_v29, 1 }
 0x2d3   :  { %9053 = vst [vmem:[#allocation52_spill] sm:$0xff] %v7875_v59  ;;  %v5188_v42 = vpack.c.bf16 %v2463_v25, %v2463_v25  ;;  %v8907_v5 = vrot.slane %v7870_v22, 1  ;;  %v3122_v53 = vshrl.u32 %v7870_v22, 16  ;;  %v3125_v4 = vshll.u32 %v7870_v22, 16 }
 0x2d4   :  { %v5375_v8 = vpop.f32.mrf.mxu1  ;;  %v2439_v49 = vmax.f32 %v2382_v7, 0.0  ;;  %v7883_v51 = vpop.f32.mrf.mxu0  ;;  %v2615_v40 = vld [vmem:[#allocation3 + $0x3c] sm:$0xf]  ;;  %v3664_v38 = vrot.slane %v3662_v28, 2  ;;  %v3667_v21 = vrot.slane %v3665_v14, 3  ;;  %v9059_v14 = vrot.slane %v7870_v22, 6 }
 0x2d5   :  { %2589 = vst.msk [vmem:[#allocation3 + $0x40] sm:$0xf] %vm134_vm13, %v5188_v42  ;;  %v2889_v13 = vsel %vm971_vm8, %v9056_v31, %v8907_v5  ;;  %v7892_v25 = vcombine.low %v2614_v39, %v2615_v40  ;;  %v3124_v1 = vrot.slane %v3122_v53, 6  ;;  %v3127_v7 = vrot.slane %v3125_v4, 7 }
 0x2d6   :  { %v5376_v18 = vpop.f32.mrf.mxu1  ;;  %v2464_v23 = vsel %vm9058_vm12, %v2439_v49, 0.0  ;;  %v5733_v44 = vpop.f32.mrf.mxu0  ;;  %2912 = vrot.lane.b32.xlu1 %v2889_v13, %s6027_s5  ;;  %v9060_v28 = vrot.slane %v7800_v29, 6  ;;  %vm9062_vm14 = vsmask.f32 1280  ;;  %v9071_v10 = vrot.slane %v7870_v22, 6 }
 0x2d7   :  { %v5377_v43 = vadd.f32 %v5376_v18, %v5375_v8  ;;  %v5189_v27 = vpack.c.bf16 %v2464_v23, %v2464_v23  ;;  %v2759_v39 = vshll.u32 %v7892_v25, 16  ;;  %v2763_v53 = vshrl.u32 %v7892_v25, 16 }
 0x2d8   :  { %v7902_v42 = vsel %vm294_vm1, %v9060_v28, %v9059_v14  ;;  %v5378_v31 = vpop.f32.mrf.mxu1  ;;  %v7906_v4 = vor.u32 %v3127_v7, %v3124_v1  ;;  %v7909_v49 = vpop.f32.mrf.mxu0  ;;  %v2757_v44 = vor.u32 %v2755_v30, %v2753_v46  ;;  %v7911_v18 = vor.u32 %v3667_v21, %v3664_v38 }
 0x2d9   :  { %9061 = vst [vmem:[#allocation53_spill] sm:$0xff] %v7902_v42  ;;  %v2251_v8 = vadd.f32 %v5377_v43, %v7525_v11  ;;  %2590 = vst.msk [vmem:[#allocation3 + $0x44] sm:$0xf] %vm134_vm13, %v5189_v27  ;;  %v2761_v14 = vrot.slane %v2759_v39, 1  ;;  %v2953_v28 = vrot.slane %v2759_v39, 6  ;;  %v2952_v23 = vrot.slane %v2763_v53, 5 }
 0x2da   :  { %v5379_v13 = vpop.f32.mrf.mxu1  ;;  %v7917_v5 = vsel %vm9062_vm14, %v7844_v2, %v7906_v4  ;;  %v5734_v43 = vpop.f32.mrf.mxu0 }
 0x2db   :  { %v2387_v1 = vadd.f32 %v7743_v54, %v2251_v8  ;;  %v5380_v7 = vadd.f32 %v5379_v13, %v5378_v31  ;;  %v2762_v46 = vsel %vm838_vm10, %v2757_v44, %v2761_v14  ;;  %v2954_v39 = vor.u32 %v2953_v28, %v2952_v23  ;;  %v9064_v31 = vld [vmem:[#allocation33_spill] sm:$0xff] }
 0x2dc   :  { %v7922_v21 = vpop.f32.mrf.mxu0  ;;  %2818 = vrot.lane.b32.xlu0 %v2762_v46, %s6027_s5  ;;  %v2616_v38 = vld [vmem:[#allocation3 + $0x40] sm:$0xf]  ;;  %v7930_v54 = vsel %vm1656_vm15, %v7816_v9, %v7911_v18  ;;  %vm9065_vm12 = vcmp.eq.s32.totalorder %v9064_v31, 1 }
 0x2dd   :  { %v2440_v30 = vmax.f32 %v2387_v1, 0.0  ;;  %v2254_v27 = vadd.f32 %v5380_v7, %v7525_v11  ;;  %v7925_v2 = vcombine.low %v2615_v40, %v2616_v38  ;;  %9063 = vst [vmem:[#allocation54_spill] sm:$0xff] %v7930_v54  ;;  %v7937_v1 = vsel %vm1092_vm11, %v7864_v24, %v2954_v39 }
 0x2de   :  { %v5737_v13 = vpop.f32.mrf.mxu0  ;;  %9066 = vst [vmem:[#allocation55_spill] sm:$0xff] %v7937_v1  ;;  %v9067_v24 = vrot.slane %v7870_v22, 1 }
 0x2df   :  { %v2465_v8 = vsel %vm9065_vm12, %v2440_v30, 0.0  ;;  %v2390_v44 = vadd.f32 %v7777_v55, %v2254_v27  ;;  %v8908_v40 = vrot.slane %v7925_v2, 1  ;;  %v3131_v47 = vshrl.u32 %v7925_v2, 16 }
 0x2e0   :  { %v5190_v16 = vpack.c.bf16 %v2465_v8, %v2465_v8  ;;  %v5381_v28 = vpop.f32.mrf.mxu1  ;;  %v3134_v23 = vshll.u32 %v7925_v2, 16  ;;  %v2421_v7 = vpop.f32.mrf.mxu0  ;;  %v2617_v43 = vld [vmem:[#allocation3 + $0x44] sm:$0xf]  ;;  %v3231_v55 = vrot.slane %v7870_v22, 7  ;;  %vm9074_vm12 = vsmask.f32 1280 }
 0x2e1   :  { %v2441_v9 = vmax.f32 %v2390_v44, 0.0  ;;  %v2891_v27 = vsel %vm971_vm8, %v9067_v24, %v8908_v40  ;;  %v7950_v8 = vcombine.low %v2616_v38, %v2617_v43  ;;  %v3133_v13 = vrot.slane %v3131_v47, 6  ;;  %v9068_v44 = vld [vmem:[#allocation35_spill] sm:$0xff] }
 0x2e2   :  { %2591 = vst.msk [vmem:[#allocation3 + $0x48] sm:$0xf] %vm134_vm13, %v5190_v16  ;;  %v5382_v30 = vpop.f32.mrf.mxu1  ;;  %v3136_v31 = vrot.slane %v3134_v23, 7  ;;  %vm9069_vm14 = vcmp.eq.s32.totalorder %v9068_v44, 1  ;;  %v5738_v46 = vpop.f32.mrf.mxu0  ;;  %2914 = vrot.lane.b32.xlu1 %v2891_v27, %s6027_s5  ;;  %v9070_v16 = vrot.slane %v7925_v2, 6  ;;  %v9073_v24 = vrot.slane %v7800_v29, 7 }
 0x2e3   :  { %v2466_v7 = vsel %vm9069_vm14, %v2441_v9, 0.0  ;;  %v5383_v54 = vadd.f32 %v5382_v30, %v5381_v28  ;;  %v2767_v40 = vshll.u32 %v7950_v8, 16  ;;  %v2771_v28 = vshrl.u32 %v7950_v8, 16 }
 0x2e4   :  { %v7960_v1 = vsel %vm294_vm1, %v9071_v10, %v9070_v16  ;;  %v3232_v38 = vsel %vm1414_vm7, %v9073_v24, %v3231_v55  ;;  %v5191_v47 = vpack.c.bf16 %v2466_v7, %v2466_v7  ;;  %v5384_v23 = vpop.f32.mrf.mxu1  ;;  %v7967_v9 = vor.u32 %v3136_v31, %v3133_v13  ;;  %v5922_v13 = vld [vmem:[#allocation8 + $0xe0] sm:$0xff]  }
 0x2e5   :  { %9072 = vst [vmem:[#allocation56_spill] sm:$0xff] %v7960_v1  ;;  %v2259_v46 = vadd.f32 %v5383_v54, %v7525_v11  ;;  %v2765_v30 = vor.u32 %v2763_v53, %v2761_v14  ;;  %v2769_v27 = vrot.slane %v2767_v40, 1  ;;  %v2957_v29 = vrot.slane %v2767_v40, 6  ;;  %5520 = vmatprep.subr.bf16.mxu0 %v5922_v13 }
 0x2e6   :  { %2592 = vst.msk [vmem:[#allocation3 + $0x4c] sm:$0xf] %vm134_vm13, %v5191_v47  ;;  %v5385_v10 = vpop.f32.mrf.mxu1  ;;  %v2956_v16 = vrot.slane %v2771_v28, 5  ;;  %v7975_v7 = vsel %vm9074_vm12, %v7906_v4, %v7967_v9  ;;  %v3703_v14 = vshrl.u32 %v3232_v38, 16  ;;  %v3706_v44 = vshll.u32 %v3232_v38, 16 }
 0x2e7   :  { %v2395_v24 = vadd.f32 %v7797_v58, %v2259_v46  ;;  %v5386_v31 = vadd.f32 %v5385_v10, %v5384_v23  ;;  %v2770_v54 = vsel %vm838_vm10, %v2765_v30, %v2769_v27  ;;  %v9075_v4 = vrot.slane %v7925_v2, 7  ;;  %v9077_v10 = vld [vmem:[#allocation36_spill] sm:$0xff] }
 0x2e8   :  { %v7979_v53 = vor.u32 %v2957_v29, %v2956_v16  ;;  %2820 = vrot.lane.b32.xlu0 %v2770_v54, %s6027_s5  ;;  %v3705_v46 = vrot.slane %v3703_v14, 2  ;;  %vm9078_vm14 = vcmp.eq.s32.totalorder %v9077_v10, 1  ;;  %v3708_v16 = vrot.slane %v3706_v44, 3 }
 0x2e9   :  { %v2442_v22 = vmax.f32 %v2395_v24, 0.0  ;;  %v2262_v47 = vadd.f32 %v5386_v31, %v7525_v11  ;;  %v2618_v40 = vld [vmem:[#allocation3 + $0x48] sm:$0xf]  ;;  %v3234_v1 = vsel %vm1414_vm7, %v3231_v55, %v9075_v4 }
 0x2ea   :  { %v7986_v58 = vcombine.low %v2617_v43, %v2618_v40  ;;  %v7990_v23 = vsel %vm1092_vm11, %v2954_v39, %v7979_v53  ;;  %v3744_v30 = vshrl.u32 %v3234_v1, 16  ;;  %v3747_v24 = vshll.u32 %v3234_v1, 16  ;;  %v5923_v39 = vld [vmem:[#allocation8 + $0xa0] sm:$0xff]  }
 0x2eb   :  { %9076 = vst [vmem:[#allocation57_spill] sm:$0xff] %v7990_v23  ;;  %v2467_v11 = vsel %vm9078_vm14, %v2442_v22, 0.0  ;;  %v2398_v29 = vadd.f32 %v7813_v61, %v2262_v47  ;;  %v3709_v4 = vor.u32 %v3708_v16, %v3705_v46  ;;  %v9079_v61 = vrot.slane %v7925_v2, 1  ;;  %5521 = vmatpush3.bf16.msra.mxu0 %v5923_v39 }
 0x2ec   :  { %v5192_v38 = vpack.c.bf16 %v2467_v11, %v2467_v11  ;;  %v8909_v31 = vrot.slane %v7986_v58, 1  ;;  %v3140_v55 = vshrl.u32 %v7986_v58, 16  ;;  %v3143_v43 = vshll.u32 %v7986_v58, 16  ;;  %v9080_v11 = vld [vmem:[#allocation37_spill] sm:$0xff] }
 0x2ed   :  { %v2443_v13 = vmax.f32 %v2398_v29, 0.0  ;;  %v2619_v54 = vld [vmem:[#allocation3 + $0x4c] sm:$0xf]  ;;  %v8910_v14 = vrot.slane %v7986_v58, 6  ;;  %v3746_v23 = vrot.slane %v3744_v30, 2  ;;  %vm9081_vm12 = vcmp.eq.s32.totalorder %v9080_v11, 1 }
 0x2ee   :  { %2593 = vst.msk [vmem:[#allocation3 + $0x50] sm:$0xf] %vm134_vm13, %v5192_v38  ;;  %v2893_v1 = vsel %vm971_vm8, %v9079_v61, %v8909_v31  ;;  %v8005_v44 = vcombine.low %v2618_v40, %v2619_v54  ;;  %v3142_v22 = vrot.slane %v3140_v55, 6  ;;  %v3145_v47 = vrot.slane %v3143_v43, 7 }
 0x2ef   :  { %v2468_v29 = vsel %vm9081_vm12, %v2443_v13, 0.0  ;;  %2916 = vrot.lane.b32.xlu1 %v2893_v1, %s6027_s5  ;;  %v9082_v46 = vrot.slane %v7925_v2, 6  ;;  %v8019_v16 = vsel %vm1656_vm15, %v7911_v18, %v3709_v4  ;;  %v3749_v40 = vrot.slane %v3747_v24, 3 }
 0x2f0   :  { %9084 = vst [vmem:[#allocation59_spill] sm:$0xff] %v8019_v16  ;;  %v5193_v38 = vpack.c.bf16 %v2468_v29, %v2468_v29  ;;  %v5387_v55 = vpop.f32.mrf.mxu1  ;;  %v2775_v43 = vshll.u32 %v8005_v44, 16  ;;  %v2779_v13 = vshrl.u32 %v8005_v44, 16  ;;  %v8023_v61 = vor.u32 %v3145_v47, %v3142_v22 }
 0x2f1   :  { %v8015_v30 = vsel %vm294_vm1, %v9082_v46, %v8910_v14  ;;  %v2773_v39 = vor.u32 %v2771_v28, %v2769_v27  ;;  %v8025_v1 = vor.u32 %v3749_v40, %v3746_v23  ;;  %v8911_v31 = vrot.slane %v7986_v58, 7 }
 0x2f2   :  { %9083 = vst [vmem:[#allocation58_spill] sm:$0xff] %v8015_v30  ;;  %2594 = vst.msk [vmem:[#allocation3 + $0x54] sm:$0xf] %vm134_vm13, %v5193_v38  ;;  %v5388_v46 = vpop.f32.mrf.mxu1  ;;  %v2777_v14 = vrot.slane %v2775_v43, 1  ;;  %v2961_v18 = vrot.slane %v2775_v43, 6  ;;  %v2960_v11 = vrot.slane %v2779_v13, 5 }
 0x2f3   :  { %vm9085_vm14 = vsmask.f32 1280  ;;  %v5389_v29 = vadd.f32 %v5388_v46, %v5387_v55  ;;  %v8036_v22 = vsel %vm1656_vm15, %v3709_v4, %v8025_v1  ;;  %v9087_v47 = vrot.slane %v7925_v2, 7  ;;  %v8046_v38 = vld [vmem:[#allocation6] ss:$0 sm:$0xff] }
 0x2f4   :  { %v8032_v24 = vsel %vm9085_vm14, %v7967_v9, %v8023_v61  ;;  %9086 = vst [vmem:[#allocation60_spill] sm:$0xff] %v8036_v22  ;;  %v5390_v28 = vpop.f32.mrf.mxu1  ;;  %v2778_v27 = vsel %vm838_vm10, %v2773_v39, %v2777_v14  ;;  %v8039_v23 = vor.u32 %v2961_v18, %v2960_v11  ;;  %v2781_v30 = vor.u32 %v2779_v13, %v2777_v14 }
 0x2f5   :  { %v3236_v40 = vsel %vm1414_vm7, %v9087_v47, %v8911_v31  ;;  %v2267_v9 = vadd.f32 %v8046_v38, %v5389_v29  ;;  %2822 = vrot.lane.b32.xlu0 %v2778_v27, %s6027_s5  ;;  %v2620_v55 = vld [vmem:[#allocation3 + $0x50] sm:$0xf] }
 0x2f6   :  { %v3785_v4 = vshrl.u32 %v3236_v40, 16  ;;  %v3788_v43 = vshll.u32 %v3236_v40, 16  ;;  %v5391_v46 = vpop.f32.mrf.mxu1  ;;  %v8050_v10 = vcombine.low %v2619_v54, %v2620_v55  ;;  %v8055_v11 = vsel %vm1092_vm11, %v7979_v53, %v8039_v23  ;;  %v5924_v53 = vld [vmem:[#allocation8 + $0xd8] sm:$0xff]  }
 0x2f7   :  { %9088 = vst [vmem:[#allocation61_spill] sm:$0xff] %v8055_v11  ;;  %v2403_v2 = vadd.f32 %v7847_v36, %v2267_v9  ;;  %v5392_v39 = vadd.f32 %v5391_v46, %v5390_v28  ;;  %v5925_v11 = vld [vmem:[#allocation8 + $0x98] sm:$0xff]   ;;  %v9089_v28 = vrot.slane %v7986_v58, 1  ;;  %5522 = vmatprep.subr.bf16.mxu0 %v5924_v53 }
 0x2f8   :  { %v3787_v18 = vrot.slane %v3785_v4, 2  ;;  %v5393_v47 = vpop.f32.mrf.mxu1  ;;  %v8913_v29 = vrot.slane %v8050_v10, 1  ;;  %v3149_v27 = vshrl.u32 %v8050_v10, 16  ;;  %v3152_v31 = vshll.u32 %v8050_v10, 16  ;;  %v9090_v40 = vld [vmem:[#allocation40_spill] sm:$0xff]  ;;  %5523 = vmatpush3.bf16.msra.mxu0 %v5925_v11  ;;  %v9095_v11 = vld [vmem:[#allocation41_spill] sm:$0xff] }
 0x2f9   :  { %v2444_v54 = vmax.f32 %v2403_v2, 0.0  ;;  %v2270_v22 = vadd.f32 %v8046_v38, %v5392_v39  ;;  %v2621_v16 = vld [vmem:[#allocation3 + $0x54] sm:$0xf]  ;;  %v3790_v42 = vrot.slane %v3788_v43, 3  ;;  %vm9091_vm12 = vcmp.eq.s32.totalorder %v9090_v40, 1 }
 0x2fa   :  { %v5394_v36 = vpop.f32.mrf.mxu1  ;;  %v2895_v9 = vsel %vm971_vm8, %v9089_v28, %v8913_v29  ;;  %v8068_v4 = vcombine.low %v2620_v55, %v2621_v16  ;;  %v3151_v46 = vrot.slane %v3149_v27, 6  ;;  %v3154_v59 = vrot.slane %v3152_v31, 7  ;;  %v2634_v40 = vld [vmem:[#allocation3 + $0x70] sm:$0x3] }
 0x2fb   :  { %v2469_v2 = vsel %vm9091_vm12, %v2444_v54, 0.0  ;;  %v2406_v39 = vadd.f32 %v7867_v12, %v2270_v22  ;;  %v5395_v14 = vadd.f32 %v5394_v36, %v5393_v47  ;;  %2918 = vrot.lane.b32.xlu1 %v2895_v9, %s6027_s5  ;;  %v9092_v13 = vrot.slane %v8050_v10, 6 }
 0x2fc   :  { %v9093_v43 = vrot.slane %v7986_v58, 6  ;;  %v5194_v55 = vpack.c.bf16 %v2469_v2, %v2469_v2  ;;  %v5396_v28 = vpop.f32.mrf.mxu1  ;;  %v2783_v31 = vshll.u32 %v8068_v4, 16  ;;  %v8912_v27 = vshrl.u32 %v8068_v4, 16 }
 0x2fd   :  { %v8083_v54 = vor.u32 %v3154_v59, %v3151_v46  ;;  %v2445_v12 = vmax.f32 %v2406_v39, 0.0  ;;  %v2275_v22 = vadd.f32 %v8046_v38, %v5395_v14  ;;  %v3791_v47 = vor.u32 %v3790_v42, %v3787_v18 }
 0x2fe   :  { %v8079_v62 = vsel %vm294_vm1, %v9093_v43, %v9092_v13  ;;  %v3237_v53 = vrot.slane %v8050_v10, 7  ;;  %2595 = vst.msk [vmem:[#allocation3 + $0x58] sm:$0xf] %vm134_vm13, %v5194_v55  ;;  %v5397_v36 = vpop.f32.mrf.mxu1  ;;  %v8088_v9 = vrot.slane %v2783_v31, 1  ;;  %v2965_v2 = vrot.slane %v2783_v31, 6 }
 0x2ff   :  { %9094 = vst [vmem:[#allocation62_spill] sm:$0xff] %v8079_v62  ;;  %v2964_v13 = vrot.slane %v8912_v27, 5  ;;  %v8095_v59 = vsel %vm9085_vm14, %v8023_v61, %v8083_v54  ;;  %vm9096_vm12 = vcmp.eq.s32.totalorder %v9095_v11, 1  ;;  %v2411_v42 = vadd.f32 %v7883_v51, %v2275_v22  ;;  %v9099_v22 = vld [vmem:[#allocation43_spill] sm:$0xff] }
 0x300   :  { %v2470_v46 = vsel %vm9096_vm12, %v2445_v12, 0.0  ;;  %v5398_v18 = vadd.f32 %v5397_v36, %v5396_v28  ;;  %v5399_v14 = vpop.f32.mrf.mxu1  ;;  %v2786_v43 = vsel %vm838_vm10, %v2781_v30, %v8088_v9  ;;  %v8108_v61 = vsel %vm1656_vm15, %v8025_v1, %v3791_v47  ;;  %v5930_v62 = vld [vmem:[#allocation8 + $0x88] sm:$0xff]  }
 0x301   :  { %v5195_v39 = vpack.c.bf16 %v2470_v46, %v2470_v46  ;;  %v2446_v55 = vmax.f32 %v2411_v42, 0.0  ;;  %2824 = vrot.lane.b32.xlu0 %v2786_v43, %s6027_s5  ;;  %v8104_v27 = vor.u32 %v2965_v2, %v2964_v13  ;;  %9097 = vst [vmem:[#allocation63_spill] sm:$0xff] %v8108_v61  ;;  %v9098_v28 = vrot.slane %v7986_v58, 7  ;;  %v5927_v42 = vld [vmem:[#allocation8 + $0xd0] sm:$0xff]  }
 0x302   :  { %v2278_v31 = vadd.f32 %v8046_v38, %v5398_v18  ;;  %v5400_v51 = vpop.f32.mrf.mxu1  ;;  %vm9100_vm14 = vcmp.eq.s32.totalorder %v9099_v22, 1  ;;  %v5928_v2 = vld [vmem:[#allocation8 + $0x90] sm:$0xff]   ;;  %5524 = vmatprep.subr.bf16.mxu0 %v5927_v42  ;;  %v2994_v11 = vrot.slane %v7566_v57, 6  ;;  %v8916_v61 = vrot.slane %v7545_v63, 6 }
 0x303   :  { %2596 = vst.msk [vmem:[#allocation3 + $0x5c] sm:$0xf] %vm134_vm13, %v5195_v39  ;;  %v3238_v12 = vsel %vm1414_vm7, %v9098_v28, %v3237_v53  ;;  %v2471_v30 = vsel %vm9100_vm14, %v2446_v55, 0.0  ;;  %v5401_v46 = vadd.f32 %v5400_v51, %v5399_v14  ;;  %v8120_v1 = vsel %vm1092_vm11, %v8039_v23, %v8104_v27  ;;  %5525 = vmatpush3.bf16.msra.mxu0 %v5928_v2  ;;  %v9102_v51 = vld [vmem:[#allocation44_spill] sm:$0xff] }
 0x304   :  { %v2414_v36 = vadd.f32 %v7909_v49, %v2278_v31  ;;  %9101 = vst [vmem:[#allocation64_spill] sm:$0xff] %v8120_v1  ;;  %v5196_v13 = vpack.c.bf16 %v2471_v30, %v2471_v30  ;;  %v5402_v18 = vpop.f32.mrf.mxu1  ;;  %v3826_v39 = vshrl.u32 %v3238_v12, 16  ;;  %v3829_v43 = vshll.u32 %v3238_v12, 16 }
 0x305   :  { %v2283_v28 = vadd.f32 %v8046_v38, %v5401_v46  ;;  %v2622_v29 = vld [vmem:[#allocation3 + $0x58] sm:$0xf]  ;;  %vm9103_vm12 = vcmp.eq.s32.totalorder %v9102_v51, 1  ;;  %v9104_v2 = vrot.slane %v8050_v10, 1 }
 0x306   :  { %v2447_v58 = vmax.f32 %v2414_v36, 0.0  ;;  %2597 = vst.msk [vmem:[#allocation3 + $0x60] sm:$0xf] %vm134_vm13, %v5196_v13  ;;  %v5403_v49 = vpop.f32.mrf.mxu1  ;;  %v8124_v14 = vcombine.low %v2621_v16, %v2622_v29  ;;  %v3828_v55 = vrot.slane %v3826_v39, 2  ;;  %v3831_v31 = vrot.slane %v3829_v43, 3 }
 0x307   :  { %v2419_v30 = vadd.f32 %v7922_v21, %v2283_v28  ;;  %v9105_v21 = vld [vmem:[#allocation46_spill] sm:$0xff] }
 0x308   :  { %v2472_v23 = vsel %vm9103_vm12, %v2447_v58, 0.0  ;;  %v2896_v12 = vrot.slane %v8124_v14, 1  ;;  %v8915_v46 = vrot.slane %v8124_v14, 6  ;;  %v8131_v42 = vor.u32 %v3831_v31, %v3828_v55 }
 0x309   :  { %v5197_v18 = vpack.c.bf16 %v2472_v23, %v2472_v23  ;;  %v2448_v36 = vmax.f32 %v2419_v30, 0.0  ;;  %v8914_v16 = vrot.slane %v8124_v14, 7  ;;  %vm9106_vm14 = vcmp.eq.s32.totalorder %v9105_v21, 1  ;;  %v5937_v21 = vld [vmem:[#allocation3 + $0x4] sm:$0xf] }
 0x30a   :  { %v2623_v38 = vld [vmem:[#allocation3 + $0x5c] sm:$0xf]  ;;  %v2897_v13 = vsel %vm971_vm8, %v9104_v2, %v2896_v12  ;;  %v9107_v58 = vrot.slane %v8050_v10, 6  ;;  %v8152_v49 = vsel %vm1656_vm15, %v3791_v47, %v8131_v42  ;;  %v2835_v30 = vrot.slane %v7540_v17, 1 }
 0x30b   :  { %2598 = vst.msk [vmem:[#allocation3 + $0x64] sm:$0xf] %vm134_vm13, %v5197_v18  ;;  %v8138_v39 = vcombine.low %v2622_v29, %v2623_v38  ;;  %v2473_v43 = vsel %vm9106_vm14, %v2448_v36, 0.0  ;;  %2920 = vrot.lane.b32.xlu1 %v2897_v13, %s6027_s5  ;;  %9109 = vst [vmem:[#allocation66_spill] sm:$0xff] %v8152_v49  ;;  %v8157_v29 = vsel %vm1414_vm7, %v3237_v53, %v8914_v16  ;;  %v2836_v10 = vrot.slane %v7545_v63, 1 }
 0x30c   :  { %v8148_v28 = vsel %vm294_vm1, %v9107_v58, %v8915_v46  ;;  %v5198_v55 = vpack.c.bf16 %v2473_v43, %v2473_v43  ;;  %v2903_v18 = vpop.permute.xlu1 %2902  ;;  %v2600_v36 = vld [vmem:[#allocation3] sm:$0xc]  ;;  %v9110_v47 = vshrl.u32 %v8068_v4, 16  ;;  %v2838_v46 = vrot.slane %v7566_v57, 1 }
 0x30d   :  { %9108 = vst [vmem:[#allocation65_spill] sm:$0xff] %v8148_v28  ;;  %v2791_v31 = vshll.u32 %v8138_v39, 16  ;;  %v2795_v23 = vshrl.u32 %v8138_v39, 16  ;;  %v2624_v2 = vld [vmem:[#allocation3 + $0x60] sm:$0xf]  ;;  %v5041_v17 = vcombine.low %v2600_v36, %v5937_v21  ;;  %v2837_v49 = vsel %vm971_vm8, %v2835_v30, %v2836_v10 }
 0x30e   :  { %2599 = vst.msk [vmem:[#allocation3 + $0x68] sm:$0xf] %vm134_vm13, %v5198_v55  ;;  %v2789_v13 = vor.u32 %v9110_v47, %v8088_v9  ;;  %v8167_v43 = vcombine.low %v2623_v38, %v2624_v2  ;;  %v2631_v55 = vld [vmem:[#allocation3 + $0x6c] sm:$0xf]  ;;  %v3276_v21 = vsel %vm1468_vm9, %v2837_v49, %v2903_v18  ;;  %v2632_v28 = vld [vmem:[#allocation3 + $0x70] sm:$0x1]  ;;  %v2839_v49 = vsel %vm971_vm8, %v2836_v10, %v2838_v46 }
 0x30f   :  { %v2793_v53 = vrot.slane %v2791_v31, 1  ;;  %v2969_v58 = vrot.slane %v2791_v31, 6  ;;  %v2968_v16 = vrot.slane %v2795_v23, 5  ;;  %v5073_v1 = vcombine.low %v2631_v55, %v2634_v40 }
 0x310   :  { %v2898_v22 = vrot.slane %v8167_v43, 1  ;;  %v2807_v9 = vpop.permute.xlu1 %2806  ;;  %v3485_v18 = vshrl.u32 %v3276_v21, 16  ;;  %v8200_v30 = vcombine.low %v2631_v55, %v2632_v28  ;;  %v3068_v55 = vrot.slane %v8167_v43, 6 }
 0x311   :  { %v2794_v51 = vsel %vm838_vm10, %v2789_v13, %v2793_v53  ;;  %v8176_v47 = vor.u32 %v2969_v58, %v2968_v16  ;;  %v3249_v31 = vsel %vm1468_vm9, %v5041_v17, %v2807_v9  ;;  %v3488_v17 = vshll.u32 %v3276_v21, 16 }
 0x312   :  { %2826 = vrot.lane.b32.xlu0 %v2794_v51, %s6027_s5  ;;  %v2625_v38 = vld [vmem:[#allocation3 + $0x64] sm:$0x7]  ;;  %v2899_v36 = vsel %vm971_vm8, %v2896_v12, %v2898_v22  ;;  %v8191_v12 = vsel %vm294_vm1, %v8916_v61, %v2994_v11  ;;  %v2797_v9 = vor.u32 %v2795_v23, %v2793_v53  ;;  %v3470_v35 = vshrl.u32 %v3249_v31, 16 }
 0x313   :  { %v8180_v13 = vcombine.low %v2624_v2, %v2625_v38  ;;  %2922 = vrot.lane.b32.xlu1 %v2899_v36, %s6027_s5  ;;  %v5929_v51 = vld [vmem:[#allocation8 + $0xc8] sm:$0xff]   ;;  %v9113_v36 = vrot.slane %v7612_v6, 1  ;;  %v8205_v10 = vsel %vm1092_vm11, %v8104_v27, %v8176_v47  ;;  %v8215_v28 = vrot.slane %v5073_v1, 7 }
 0x314   :  { %v2627_v58 = vld [vmem:[#allocation3 + $0x64] sm:$0xf]  ;;  %5526 = vmatprep.subr.bf16.mxu0 %v5929_v51  ;;  %9114 = vst [vmem:[#allocation69_spill] sm:$0xff] %v8205_v10  ;;  %v3473_v51 = vshll.u32 %v3249_v31, 16  ;;  %v3487_v21 = vrot.slane %v3485_v18, 2  ;;  %v3490_v1 = vrot.slane %v3488_v17, 3 }
 0x315   :  { %9111 = vst [vmem:[#allocation67_spill] sm:$0xff] %v8180_v13  ;;  %v2799_v16 = vshll.u32 %v8180_v13, 16  ;;  %v8193_v38 = vld [vmem:[#allocation3 + $0x68] sm:$0xf]  ;;  %v8198_v40 = vsel %vm971_vm8, %v2838_v46, %v9113_v36  ;;  %5527 = vmatpush3.bf16.msra.mxu0 %v5930_v62  ;;  %v8213_v46 = vsel %vm294_vm1, %v2994_v11, %v9115_v52  ;;  %v8220_v53 = vcombine.low %v2624_v2, %v2627_v58 }
 0x316   :  { %9112 = vst [vmem:[#allocation68_spill] sm:$0xff] %v8193_v38  ;;  %v8208_v60 = vcombine.low %v2627_v58, %v8193_v38  ;;  %v3072_v52 = vrot.slane %v8200_v30, 6  ;;  %v3867_v11 = vshrl.u32 %v8157_v29, 16  ;;  %v3472_v18 = vrot.slane %v3470_v35, 2 }
 0x317   :  { %v2801_v61 = vrot.slane %v2799_v16, 1  ;;  %v2803_v16 = vshrl.u32 %v8180_v13, 16  ;;  %v3475_v45 = vrot.slane %v3473_v51, 3  ;;  %v2973_v3 = vshrl.u32 %v8220_v53, 16 }
 0x318   :  { %v2900_v23 = vrot.slane %v8208_v60, 1  ;;  %v2905_v62 = vpop.permute.xlu0 %2904  ;;  %v2976_v17 = vshll.u32 %v8220_v53, 16  ;;  %v5069_v35 = vcombine.low %v8193_v38, %v8193_v38 }
 0x319   :  { %v2802_v27 = vsel %vm838_vm10, %v2797_v9, %v2801_v61  ;;  %v3279_v36 = vsel %vm1468_vm9, %v2839_v49, %v2905_v62  ;;  %v9116_v9 = vrot.slane %v8124_v14, 6  ;;  %v2805_v10 = vor.u32 %v2803_v16, %v2801_v61 }
 0x31a   :  { %2828 = vrot.lane.b32.xlu0 %v2802_v27, %s6027_s5  ;;  %v2901_v31 = vsel %vm971_vm8, %v2898_v22, %v2900_v23  ;;  %v3492_v58 = vshrl.u32 %v3279_v36, 16  ;;  %v3495_v27 = vshll.u32 %v3279_v36, 16  ;;  %v3070_v49 = vrot.slane %v8208_v60, 6 }
 0x31b   :  { %v8231_v2 = vsel %vm294_vm1, %v9116_v9, %v3068_v55  ;;  %2924 = vrot.lane.b32.xlu1 %v2901_v31, %s6027_s5  ;;  %v3870_v36 = vshll.u32 %v8157_v29, 16  ;;  %v2975_v51 = vrot.slane %v2973_v3, 5  ;;  %v2978_v16 = vrot.slane %v2976_v17, 6 }
 0x31c   :  { %9117 = vst [vmem:[#allocation70_spill] sm:$0xff] %v8231_v2  ;;  %v3494_v62 = vrot.slane %v3492_v58, 2  ;;  %v3497_v22 = vrot.slane %v3495_v27, 3  ;;  %v2809_v48 = vpop.permute.xlu0 %2808  ;;  %v8244_v31 = vsel %vm294_vm1, %v3068_v55, %v3070_v49  ;;  %v3491_v9 = vor.u32 %v3490_v1, %v3487_v21 }
 0x31d   :  { %v3251_v61 = vsel %vm1468_vm9, %v7545_v63, %v2809_v48  ;;  %v3476_v26 = vor.u32 %v3475_v45, %v3472_v18  ;;  %v2979_v32 = vor.u32 %v2978_v16, %v2975_v51  ;;  %v2982_v37 = vshrl.u32 %v5069_v35, 16  ;;  %v5933_v45 = vld [vmem:[#allocation8 + $0x80] sm:$0xff]  }
 0x31e   :  { %2830 = vrot.lane.b32.xlu0 %v2805_v10, %s6027_s5  ;;  %v8246_v2 = vor.u32 %v3497_v22, %v3494_v62  ;;  %v3477_v58 = vshrl.u32 %v3251_v61, 16  ;;  %v3480_v27 = vshll.u32 %v3251_v61, 16  ;;  %v5932_v10 = vld [vmem:[#allocation8 + $0xc0] sm:$0xff]   ;;  %v2985_v29 = vshll.u32 %v5069_v35, 16  ;;  %v5912_v22 = vld [vmem:[#allocation8 + $0x118] sm:$0xff]  }
 0x31f   :  { %2926 = vrot.lane.b32.xlu1 %v2900_v23, %s6027_s5  ;;  %5528 = vmatprep.subr.bf16.mxu0 %v5932_v10  ;;  %v8254_v55 = vsel %vm294_vm1, %v3070_v49, %v3072_v52  ;;  %v8260_v21 = vsel %vm1092_vm11, %v8176_v47, %v2979_v32  ;;  %v2984_v1 = vrot.slane %v2982_v37, 5  ;;  %v3869_v52 = vrot.slane %v3867_v11, 2  ;;  %v5921_v10 = vld [vmem:[#allocation8 + $0x110] sm:$0xff]  }
 0x320   :  { %v3479_v13 = vrot.slane %v3477_v58, 2  ;;  %v3482_v38 = vrot.slane %v3480_v27, 3  ;;  %v2811_v48 = vpop.permute.xlu0 %2810  ;;  %v3499_v3 = vsel %vm1656_vm15, %v3491_v9, %v8246_v2  ;;  %v2987_v18 = vrot.slane %v2985_v29, 6  ;;  %5529 = vmatpush3.bf16.msra.mxu0 %v5933_v45 }
 0x321   :  { %v3253_v23 = vsel %vm1468_vm9, %v7566_v57, %v2811_v48  ;;  %4337 = vmatprep.mubr.bf16.mxu1 %v3499_v3  ;;  %v3872_v35 = vrot.slane %v3870_v36, 3  ;;  %v3241_v57 = vrot.slane %v8167_v43, 7  ;;  %v3243_v61 = vrot.slane %v8208_v60, 7 }
 0x322   :  { %3195 = vrot.lane.b32.xlu0 %v7647_v19, %s6027_s5  ;;  %v3483_v19 = vor.u32 %v3482_v38, %v3479_v13  ;;  %v3547_v17 = vshrl.u32 %v3253_v23, 16  ;;  %v3550_v62 = vshll.u32 %v3253_v23, 16  ;;  %v2988_v49 = vor.u32 %v2987_v18, %v2984_v1 }
 0x323   :  { %3193 = vrot.lane.b32.xlu1 %v7601_v0, %s6027_s5  ;;  %v2998_v13 = vrot.slane %v7686_v33, 6  ;;  %v3873_v11 = vor.u32 %v3872_v35, %v3869_v52  ;;  %v9118_v36 = vrot.slane %v8124_v14, 7  ;;  %v3244_v48 = vsel %vm1414_vm7, %v3241_v57, %v3243_v61 }
 0x324   :  { %v3549_v51 = vrot.slane %v3547_v17, 2  ;;  %v3552_v47 = vrot.slane %v3550_v62, 3  ;;  %v2907_v16 = vpop.permute.xlu1 %2906  ;;  %v3484_v37 = vsel %vm1656_vm15, %v3476_v26, %v3483_v19  ;;  %v8273_v38 = vsel %vm1092_vm11, %v2979_v32, %v2988_v49 }
 0x325   :  { %v3282_v0 = vsel %vm1468_vm9, %v8198_v40, %v2907_v16  ;;  %4338 = vmatmul.mubr.bf16.vlgmr.msra.gmra.mxu1 %v3484_v37  ;;  %v3242_v9 = vsel %vm1414_vm7, %v9118_v36, %v3241_v57  ;;  %v2842_v26 = vrot.slane %v7686_v33, 1  ;;  %v8285_v32 = vsel %vm1656_vm15, %v8131_v42, %v3873_v11 }
 0x326   :  { %3020 = vrot.lane.b32.xlu0 %v8191_v12, %s6027_s5  ;;  %v3555_v58 = vshrl.u32 %v3282_v0, 16  ;;  %v3558_v27 = vshll.u32 %v3282_v0, 16  ;;  %v9119_v12 = vrot.slane %v7545_v63, 6  ;;  %5740 = vmatpush3.bf16.msra.mxu1 %v5912_v22  ;;  %v3908_v40 = vshrl.u32 %v3242_v9, 16 }
 0x327   :  { %5741 = vmatprep.subr.bf16.mxu1 %v8994_v56  ;;  %v3911_v29 = vshll.u32 %v3242_v9, 16  ;;  %v3246_v3 = vsel %vm1414_vm7, %v3243_v61, %v8215_v28  ;;  %v8290_v23 = vor.u32 %v3552_v47, %v3549_v51  ;;  %v3949_v17 = vshrl.u32 %v3244_v48, 16  ;;  %v5926_v61 = vld [vmem:[#allocation8 + $0x108] sm:$0xff]  }
 0x328   :  { %3018 = vrot.lane.b32.xlu1 %v9119_v12, %s6027_s5  ;;  %v3557_v63 = vrot.slane %v3555_v58, 2  ;;  %v3560_v45 = vrot.slane %v3558_v27, 3  ;;  %v3910_v1 = vrot.slane %v3908_v40, 2  ;;  %v3952_v62 = vshll.u32 %v3244_v48, 16 }
 0x329   :  { %v3913_v18 = vrot.slane %v3911_v29, 3  ;;  %v3990_v22 = vshrl.u32 %v3246_v3, 16  ;;  %v9120_v49 = vrot.slane %v7612_v6, 6  ;;  %v3000_v35 = vrot.slane %v7755_v50, 6 }
 0x32a   :  { %3022 = vrot.lane.b32.xlu0 %v8213_v46, %s6027_s5  ;;  %v3561_v42 = vor.u32 %v3560_v45, %v3557_v63  ;;  %v2813_v52 = vpop.permute.xlu0 %2812  ;;  %5742 = vmatpush3.bf16.msra.mxu1 %v5921_v10  ;;  %v3993_v57 = vshll.u32 %v3246_v3, 16  ;;  %v3951_v47 = vrot.slane %v3949_v17, 2  ;;  %v3954_v16 = vrot.slane %v3952_v62, 3 }
 0x32b   :  { %v2999_v28 = vsel %vm294_vm1, %v9120_v49, %v2998_v13  ;;  %v3255_v46 = vsel %vm1468_vm9, %v7612_v6, %v2813_v52  ;;  %5743 = vmatprep.subr.bf16.mxu1 %v8994_v56  ;;  %v3914_v51 = vor.u32 %v3913_v18, %v3910_v1  ;;  %v3554_v0 = vsel %vm1656_vm15, %v3483_v19, %v8290_v23 }
 0x32c   :  { %3197 = vrot.lane.b32.xlu1 %v7720_v20, %s6027_s5  ;;  %v3588_v37 = vshrl.u32 %v3255_v46, 16  ;;  %v3562_v20 = vsel %vm1656_vm15, %v8246_v2, %v3561_v42  ;;  %v3992_v36 = vrot.slane %v3990_v22, 2  ;;  %v3591_v9 = vshll.u32 %v3255_v46, 16  ;;  %v5931_v2 = vld [vmem:[#allocation8 + $0x100] sm:$0xff]  }
 0x32d   :  { %4345 = vmatprep.mubr.bf16.mxu1 %v3562_v20  ;;  %v8309_v58 = vsel %vm1656_vm15, %v3873_v11, %v3914_v51  ;;  %v3955_v27 = vor.u32 %v3954_v16, %v3951_v47  ;;  %v3995_v12 = vrot.slane %v3993_v57, 3  ;;  %v3001_v10 = vsel %vm294_vm1, %v2998_v13, %v3000_v35 }
 0x32e   :  { %3024 = vrot.lane.b32.xlu0 %v2999_v28, %s6027_s5  ;;  %4346 = vmatmul.mubr.bf16.gmra.mxu1 %v3554_v0  ;;  %v3002_v40 = vrot.slane %v7825_v41, 6  ;;  %v9121_v11 = vrot.slane %v7612_v6, 1  ;;  %v3593_v13 = vrot.slane %v3591_v9, 3  ;;  %v3004_v17 = vrot.slane %v7892_v25, 6 }
 0x32f   :  { %5744 = vmatpush3.bf16.msra.mxu1 %v5926_v61  ;;  %v8316_v19 = vsel %vm1656_vm15, %v3914_v51, %v3955_v27  ;;  %v8318_v29 = vor.u32 %v3995_v12, %v3992_v36  ;;  %v3006_v57 = vrot.slane %v7950_v8, 6  ;;  %v3158_v46 = vshrl.u32 %v8124_v14, 16 }
 0x330   :  { %3199 = vrot.lane.b32.xlu1 %v7790_v15, %s6027_s5  ;;  %v2843_v48 = vsel %vm971_vm8, %v9121_v11, %v2842_v26  ;;  %v2909_v3 = vpop.permute.xlu1 %2908  ;;  %5745 = vmatprep.subr.bf16.mxu1 %v8994_v56  ;;  %v3590_v15 = vrot.slane %v3588_v37, 2  ;;  %v3003_v6 = vsel %vm294_vm1, %v3000_v35, %v3002_v40  ;;  %v3005_v35 = vsel %vm294_vm1, %v3002_v40, %v3004_v17 }
 0x331   :  { %v3285_v63 = vsel %vm1468_vm9, %v2843_v48, %v2909_v3  ;;  %v8330_v45 = vsel %vm1656_vm15, %v3955_v27, %v8318_v29  ;;  %v3161_v61 = vshll.u32 %v8124_v14, 16  ;;  %v2844_v47 = vrot.slane %v7755_v50, 1 }
 0x332   :  { %3026 = vrot.lane.b32.xlu0 %v3001_v10, %s6027_s5  ;;  %v3596_v1 = vshrl.u32 %v3285_v63, 16  ;;  %v3599_v18 = vshll.u32 %v3285_v63, 16  ;;  %v8337_v52 = vor.u32 %v3593_v13, %v3590_v15  ;;  %v3007_v20 = vsel %vm294_vm1, %v3004_v17, %v3006_v57 }
 0x333   :  { %5746 = vmatpush3.bf16.msra.mxu1 %v5931_v2  ;;  %v3008_v14 = vrot.slane %v8005_v44, 6  ;;  %v3160_v0 = vrot.slane %v3158_v46, 6  ;;  %v3163_v36 = vrot.slane %v3161_v61, 7  ;;  %v2845_v9 = vsel %vm971_vm8, %v2842_v26, %v2844_v47  ;;  %v2630_v46 = vld [vmem:[#allocation3 + $0x6c] sm:$0x1] }
 0x334   :  { %3201 = vrot.lane.b32.xlu1 %v7860_v34, %s6027_s5  ;;  %v3598_v62 = vrot.slane %v3596_v1, 2  ;;  %v3601_v22 = vrot.slane %v3599_v18, 3  ;;  %v3595_v37 = vsel %vm1656_vm15, %v8290_v23, %v8337_v52  ;;  %v3170_v23 = vshll.u32 %v8167_v43, 16 }
 0x335   :  { %v3009_v11 = vsel %vm294_vm1, %v3006_v57, %v3008_v14  ;;  %v3164_v48 = vor.u32 %v3163_v36, %v3160_v0  ;;  %v3176_v13 = vshrl.u32 %v8208_v60, 16  ;;  %v3179_v1 = vshll.u32 %v8208_v60, 16 }
 0x336   :  { %3028 = vrot.lane.b32.xlu0 %v3003_v6, %s6027_s5  ;;  %v3602_v49 = vor.u32 %v3601_v22, %v3598_v62  ;;  %v2815_v28 = vpop.permute.xlu0 %2814  ;;  %v2846_v6 = vrot.slane %v7825_v41, 1  ;;  %v3185_v17 = vshrl.u32 %v8200_v30, 16  ;;  %v3188_v57 = vshll.u32 %v8200_v30, 16 }
 0x337   :  { %v3257_v34 = vsel %vm1468_vm9, %v7686_v33, %v2815_v28  ;;  %v3010_v33 = vrot.slane %v8068_v4, 6  ;;  %v3012_v28 = vrot.slane %v8138_v39, 6  ;;  %vm9122_vm7 = vsmask.f32 1280 }
 0x338   :  { %3203 = vrot.lane.b32.xlu1 %v7917_v5, %s6027_s5  ;;  %v3603_v51 = vsel %vm1656_vm15, %v3561_v42, %v3602_v49  ;;  %v3629_v16 = vshrl.u32 %v3257_v34, 16  ;;  %v3632_v5 = vshll.u32 %v3257_v34, 16  ;;  %v3167_v42 = vshrl.u32 %v8167_v43, 16  ;;  %vm9124_vm10 = vmmov %vm9122_vm7 }
 0x339   :  { %4353 = vmatprep.mubr.bf16.mxu1 %v3603_v51  ;;  %v3172_v43 = vrot.slane %v3170_v23, 7  ;;  %v3011_v22 = vsel %vm294_vm1, %v3008_v14, %v3010_v33  ;;  %v3013_v30 = vsel %vm294_vm1, %v3010_v33, %v3012_v28  ;;  %v3187_v0 = vrot.slane %v3185_v17, 6  ;;  %vm9125_vm11 = vmmov %vm9122_vm7 }
 0x33a   :  { %3030 = vrot.lane.b32.xlu0 %v3005_v35, %s6027_s5  ;;  %4354 = vmatmul.mubr.bf16.gmra.mxu1 %v3595_v37  ;;  %v3631_v12 = vrot.slane %v3629_v16, 2  ;;  %v3169_v26 = vrot.slane %v3167_v42, 6  ;;  %v3178_v35 = vrot.slane %v3176_v13, 6  ;;  %v3181_v16 = vrot.slane %v3179_v1, 7  ;;  %vm9126_vm13 = vmmov %vm9122_vm7 }
 0x33b   :  { %v3190_v36 = vrot.slane %v3188_v57, 7  ;;  %v2848_v13 = vrot.slane %v7892_v25, 1 }
 0x33c   :  { %3205 = vrot.lane.b32.xlu1 %v7975_v7, %s6027_s5  ;;  %v2911_v27 = vpop.permute.xlu1 %2910  ;;  %v3634_v7 = vrot.slane %v3632_v5, 3  ;;  %v3173_v34 = vor.u32 %v3172_v43, %v3169_v26  ;;  %v9123_v5 = vld [vmem:[#allocation68_spill] sm:$0xff] }
 0x33d   :  { %v3288_v10 = vsel %vm1468_vm9, %v2845_v9, %v2911_v27  ;;  %v5070_v37 = vcombine.low %v9123_v5, %v2630_v46  ;;  %v3182_v27 = vor.u32 %v3181_v16, %v3178_v35  ;;  %v3191_v33 = vor.u32 %v3190_v36, %v3187_v0 }
 0x33e   :  { %3032 = vrot.lane.b32.xlu0 %v3007_v20, %s6027_s5  ;;  %v3637_v40 = vshrl.u32 %v3288_v10, 16  ;;  %v3640_v2 = vshll.u32 %v3288_v10, 16  ;;  %v3635_v63 = vor.u32 %v3634_v7, %v3631_v12  ;;  %v3174_v14 = vsel %vm9124_vm10, %v3164_v48, %v3173_v34 }
 0x33f   :  { %v3016_v10 = vrot.slane %v5070_v37, 6  ;;  %v3192_v17 = vsel %vm9126_vm13, %v3182_v27, %v3191_v33  ;;  %v2850_v16 = vrot.slane %v7950_v8, 1 }
 0x340   :  { %3207 = vrot.lane.b32.xlu1 %v8032_v24, %s6027_s5  ;;  %v3639_v3 = vrot.slane %v3637_v40, 2  ;;  %v3642_v15 = vrot.slane %v3640_v2, 3 }
 0x341   :  { %v2851_v5 = vsel %vm971_vm8, %v2848_v13, %v2850_v16 }
 0x342   :  { %3034 = vrot.lane.b32.xlu0 %v3009_v11, %s6027_s5  ;;  %v3643_v18 = vor.u32 %v3642_v15, %v3639_v3  ;;  %v3183_v11 = vsel %vm9125_vm11, %v3173_v34, %v3182_v27 }
 0x343   :  { %v2817_v24 = vpop.permute.xlu0 %2816 }
 0x344   :  { %3209 = vrot.lane.b32.xlu1 %v8095_v59, %s6027_s5  ;;  %v3259_v62 = vsel %vm1468_vm9, %v7755_v50, %v2817_v24  ;;  %v3644_v60 = vsel %vm1656_vm15, %v3602_v49, %v3643_v18  ;;  %v3165_v59 = vsel %vm9122_vm7, %v8083_v54, %v3164_v48  ;;  %v3636_v50 = vsel %vm1656_vm15, %v8337_v52, %v3635_v63 }
 0x345   :  { %v3670_v61 = vshrl.u32 %v3259_v62, 16  ;;  %v3673_v51 = vshll.u32 %v3259_v62, 16  ;;  %4361 = vmatprep.mubr.bf16.mxu1 %v3644_v60  ;;  %v3014_v49 = vrot.slane %v8220_v53, 6  ;;  %v2847_v54 = vsel %vm971_vm8, %v2844_v47, %v2846_v6 }
 0x346   :  { %3036 = vrot.lane.b32.xlu0 %v3011_v22, %s6027_s5  ;;  %4362 = vmatmul.mubr.bf16.gmra.mxu1 %v3636_v50 }
 0x347   :  { %v3672_v52 = vrot.slane %v3670_v61, 2  ;;  %v3675_v42 = vrot.slane %v3673_v51, 3  ;;  %v3015_v7 = vsel %vm294_vm1, %v3012_v28, %v3014_v49  ;;  %v3017_v15 = vsel %vm294_vm1, %v3014_v49, %v3016_v10 }
 0x348   :  { %3211 = vrot.lane.b32.xlu1 %v3165_v59, %s6027_s5  ;;  %v2913_v20 = vpop.permute.xlu1 %2912 }
 0x349   :  { %v3291_v9 = vsel %vm1468_vm9, %v2847_v54, %v2913_v20  ;;  %v3676_v2 = vor.u32 %v3675_v42, %v3672_v52 }
 0x34a   :  { %3038 = vrot.lane.b32.xlu0 %v3013_v30, %s6027_s5  ;;  %v3678_v23 = vshrl.u32 %v3291_v9, 16  ;;  %v3681_v12 = vshll.u32 %v3291_v9, 16 }
 0x34b   :  { %v3677_v62 = vsel %vm1656_vm15, %v3635_v63, %v3676_v2 }
 0x34c   :  { %3213 = vrot.lane.b32.xlu1 %v3174_v14, %s6027_s5  ;;  %v3680_v47 = vrot.slane %v3678_v23, 2  ;;  %v3683_v40 = vrot.slane %v3681_v12, 3 }
 0x34e   :  { %3040 = vrot.lane.b32.xlu0 %v3015_v7, %s6027_s5  ;;  %v3684_v48 = vor.u32 %v3683_v40, %v3680_v47  ;;  %v2819_v26 = vpop.permute.xlu0 %2818  ;;  %v2852_v7 = vrot.slane %v8005_v44, 1 }
 0x34f   :  { %v3261_v3 = vsel %vm1468_vm9, %v7825_v41, %v2819_v26  ;;  %v2849_v41 = vsel %vm971_vm8, %v2846_v6, %v2848_v13 }
 0x350   :  { %3215 = vrot.lane.b32.xlu1 %v3183_v11, %s6027_s5  ;;  %v3685_v43 = vsel %vm1656_vm15, %v3643_v18, %v3684_v48  ;;  %v3711_v1 = vshrl.u32 %v3261_v3, 16  ;;  %v3714_v24 = vshll.u32 %v3261_v3, 16 }
 0x351   :  { %4369 = vmatprep.mubr.bf16.mxu1 %v3685_v43 }
 0x352   :  { %3042 = vrot.lane.b32.xlu0 %v3017_v15, %s6027_s5  ;;  %4370 = vmatmul.mubr.bf16.gmra.mxu1 %v3677_v62  ;;  %v3713_v28 = vrot.slane %v3711_v1, 2  ;;  %v3716_v57 = vrot.slane %v3714_v24, 3 }
 0x354   :  { %3217 = vrot.lane.b32.xlu1 %v3192_v17, %s6027_s5  ;;  %v2915_v22 = vpop.permute.xlu1 %2914  ;;  %v3717_v46 = vor.u32 %v3716_v57, %v3713_v28 }
 0x355   :  { %v3294_v60 = vsel %vm1468_vm9, %v2849_v41, %v2915_v22  ;;  %v2854_v22 = vrot.slane %v8068_v4, 1 }
 0x356   :  { %v3719_v18 = vshrl.u32 %v3294_v60, 16  ;;  %v3722_v59 = vshll.u32 %v3294_v60, 16  ;;  %v3718_v49 = vsel %vm1656_vm15, %v3676_v2, %v3717_v46  ;;  %v2853_v2 = vsel %vm971_vm8, %v2850_v16, %v2852_v7 }
 0x357   :  { %v2855_v60 = vsel %vm971_vm8, %v2852_v7, %v2854_v22 }
 0x358   :  { %v3721_v34 = vrot.slane %v3719_v18, 2  ;;  %v3724_v35 = vrot.slane %v3722_v59, 3 }
 0x35a   :  { %v3725_v61 = vor.u32 %v3724_v35, %v3721_v34  ;;  %v2821_v51 = vpop.permute.xlu0 %2820 }
 0x35b   :  { %v3263_v63 = vsel %vm1468_vm9, %v7892_v25, %v2821_v51 }
 0x35c   :  { %v3726_v50 = vsel %vm1656_vm15, %v3684_v48, %v3725_v61  ;;  %v3752_v6 = vshrl.u32 %v3263_v63, 16  ;;  %v3755_v30 = vshll.u32 %v3263_v63, 16 }
 0x35d   :  { %4377 = vmatprep.mubr.bf16.mxu1 %v3726_v50  ;;  %v2856_v50 = vrot.slane %v8138_v39, 1 }
 0x35e   :  { %4378 = vmatmul.mubr.bf16.gmra.mxu1 %v3718_v49  ;;  %v3754_v54 = vrot.slane %v3752_v6, 2  ;;  %v3757_v20 = vrot.slane %v3755_v30, 3 }
 0x360   :  { %v3758_v42 = vor.u32 %v3757_v20, %v3754_v54 }
 0x361   :  { %v2917_v37 = vpop.permute.xlu1 %2916 }
 0x362   :  { %v3297_v14 = vsel %vm1468_vm9, %v2851_v5, %v2917_v37  ;;  %v3759_v40 = vsel %vm1656_vm15, %v3717_v46, %v3758_v42  ;;  %v2857_v37 = vsel %vm971_vm8, %v2854_v22, %v2856_v50 }
 0x363   :  { %v3760_v0 = vshrl.u32 %v3297_v14, 16  ;;  %v3763_v36 = vshll.u32 %v3297_v14, 16 }
 0x365   :  { %v3762_v25 = vrot.slane %v3760_v0, 2  ;;  %v3765_v52 = vrot.slane %v3763_v36, 3 }
 0x367   :  { %v3766_v9 = vor.u32 %v3765_v52, %v3762_v25  ;;  %v2823_v27 = vpop.permute.xlu0 %2822 }
 0x368   :  { %v3265_v23 = vsel %vm1468_vm9, %v7950_v8, %v2823_v27 }
 0x369   :  { %v3767_v12 = vsel %vm1656_vm15, %v3725_v61, %v3766_v9  ;;  %v3793_v10 = vshrl.u32 %v3265_v23, 16  ;;  %v3796_v47 = vshll.u32 %v3265_v23, 16 }
 0x36a   :  { %4385 = vmatprep.mubr.bf16.mxu1 %v3767_v12 }
 0x36b   :  { %4386 = vmatmul.mubr.bf16.gmra.mxu1 %v3759_v40  ;;  %v3795_v33 = vrot.slane %v3793_v10, 2  ;;  %v3798_v48 = vrot.slane %v3796_v47, 3 }
 0x36d   :  { %v2919_v11 = vpop.permute.xlu1 %2918  ;;  %v3799_v13 = vor.u32 %v3798_v48, %v3795_v33 }
 0x36e   :  { %v3300_v26 = vsel %vm1468_vm9, %v2853_v2, %v2919_v11 }
 0x36f   :  { %v3801_v3 = vshrl.u32 %v3300_v26, 16  ;;  %v3804_v15 = vshll.u32 %v3300_v26, 16  ;;  %v3800_v62 = vsel %vm1656_vm15, %v3758_v42, %v3799_v13 }
 0x371   :  { %v3803_v8 = vrot.slane %v3801_v3, 2  ;;  %v3806_v43 = vrot.slane %v3804_v15, 3 }
 0x373   :  { %v3807_v1 = vor.u32 %v3806_v43, %v3803_v8  ;;  %v2825_v24 = vpop.permute.xlu0 %2824 }
 0x374   :  { %v3267_v41 = vsel %vm1468_vm9, %v8005_v44, %v2825_v24 }
 0x375   :  { %v3808_v17 = vsel %vm1656_vm15, %v3766_v9, %v3807_v1  ;;  %v3834_v28 = vshrl.u32 %v3267_v41, 16  ;;  %v3837_v57 = vshll.u32 %v3267_v41, 16 }
 0x376   :  { %4393 = vmatprep.mubr.bf16.mxu1 %v3808_v17 }
 0x377   :  { %4394 = vmatmul.mubr.bf16.gmra.mxu1 %v3800_v62  ;;  %v3836_v59 = vrot.slane %v3834_v28, 2  ;;  %v3839_v34 = vrot.slane %v3837_v57, 3 }
 0x379   :  { %v3840_v16 = vor.u32 %v3839_v34, %v3836_v59 }
 0x37b   :  { %v3841_v0 = vsel %vm1656_vm15, %v3799_v13, %v3840_v16  ;;  %v9127_v13 = vld [vmem:[#allocation67_spill] sm:$0xff] }
 0x37d   :  { %v2921_v18 = vpop.permute.xlu1 %2920 }
 0x37e   :  { %v3303_v35 = vsel %vm1468_vm9, %v2855_v60, %v2921_v18 }
 0x37f   :  { %v3842_v46 = vshrl.u32 %v3303_v35, 16  ;;  %v3845_v61 = vshll.u32 %v3303_v35, 16  ;;  %v9128_v35 = vld [vmem:[#allocation25_spill] sm:$0xff] }
 0x381   :  { %v3844_v51 = vrot.slane %v3842_v46, 2  ;;  %v3847_v63 = vrot.slane %v3845_v61, 3 }
 0x383   :  { %v3848_v44 = vor.u32 %v3847_v63, %v3844_v51 }
 0x384   :  { %v2827_v6 = vpop.permute.xlu0 %2826 }
 0x385   :  { %v3269_v30 = vsel %vm1468_vm9, %v8068_v4, %v2827_v6  ;;  %v2923_v54 = vpop.permute.xlu1 %2922  ;;  %v3849_v20 = vsel %vm1656_vm15, %v3807_v1, %v3848_v44  ;;  %v2858_v4 = vrot.slane %v8220_v53, 1  ;;  %v9129_v6 = vld [vmem:[#allocation38_spill] sm:$0xff] }
 0x386   :  { %v3875_v49 = vshrl.u32 %v3269_v30, 16  ;;  %v3878_v5 = vshll.u32 %v3269_v30, 16  ;;  %v3306_v14 = vsel %vm1468_vm9, %v2857_v37, %v2923_v54  ;;  %4401 = vmatprep.mubr.bf16.mxu1 %v3849_v20  ;;  %v9130_v30 = vrot.slane %v9129_v6, 6 }
 0x387   :  { %v3883_v52 = vshrl.u32 %v3306_v14, 16  ;;  %v3886_v42 = vshll.u32 %v3306_v14, 16  ;;  %4402 = vmatmul.mubr.bf16.gmra.mxu1 %v3841_v0  ;;  %v2859_v11 = vsel %vm971_vm8, %v2856_v50, %v2858_v4 }
 0x388   :  { %v3877_v36 = vrot.slane %v3875_v49, 2  ;;  %v3880_v25 = vrot.slane %v3878_v5, 3 }
 0x389   :  { %v3885_v9 = vrot.slane %v3883_v52, 2  ;;  %v3888_v27 = vrot.slane %v3886_v42, 3  ;;  %v9131_v52 = vld [vmem:[#allocation45_spill] sm:$0xff] }
 0x38a   :  { %v3881_v23 = vor.u32 %v3880_v25, %v3877_v36 }
 0x38b   :  { %v3889_v12 = vor.u32 %v3888_v27, %v3885_v9 }
 0x38c   :  { %v2829_v7 = vpop.permute.xlu0 %2828  ;;  %v3882_v26 = vsel %vm1656_vm15, %v3840_v16, %v3881_v23 }
 0x38d   :  { %v3271_v10 = vsel %vm1468_vm9, %v8138_v39, %v2829_v7  ;;  %v2925_v2 = vpop.permute.xlu1 %2924  ;;  %v3890_v33 = vsel %vm1656_vm15, %v3848_v44, %v3889_v12 }
 0x38e   :  { %v3916_v47 = vshrl.u32 %v3271_v10, 16  ;;  %v3919_v40 = vshll.u32 %v3271_v10, 16  ;;  %v3309_v48 = vsel %vm1468_vm9, %v2859_v11, %v2925_v2  ;;  %4409 = vmatprep.mubr.bf16.mxu1 %v3890_v33 }
 0x38f   :  { %v3924_v15 = vshrl.u32 %v3309_v48, 16  ;;  %v3927_v8 = vshll.u32 %v3309_v48, 16  ;;  %4410 = vmatmul.mubr.bf16.gmra.mxu1 %v3882_v26 }
 0x390   :  { %v3918_v3 = vrot.slane %v3916_v47, 2  ;;  %v3921_v53 = vrot.slane %v3919_v40, 3  ;;  %v2831_v43 = vpop.permute.xlu0 %2830  ;;  %v9132_v47 = vld [vmem:[#allocation21_spill] sm:$0xff] }
 0x391   :  { %v3273_v39 = vsel %vm1468_vm9, %v9127_v13, %v2831_v43  ;;  %v3926_v1 = vrot.slane %v3924_v15, 2  ;;  %v3929_v24 = vrot.slane %v3927_v8, 3  ;;  %v2927_v62 = vpop.permute.xlu1 %2926  ;;  %v9133_v15 = vld [vmem:[#allocation29_spill] sm:$0xff] }
 0x392   :  { %v3957_v17 = vshrl.u32 %v3273_v39, 16  ;;  %v3922_v41 = vor.u32 %v3921_v53, %v3918_v3  ;;  %v3960_v22 = vshll.u32 %v3273_v39, 16  ;;  %v3312_v28 = vsel %vm1468_vm9, %v2858_v4, %v2927_v62 }
 0x393   :  { %v3930_v57 = vor.u32 %v3929_v24, %v3926_v1  ;;  %v3965_v60 = vshrl.u32 %v3312_v28, 16  ;;  %v3968_v18 = vshll.u32 %v3312_v28, 16 }
 0x394   :  { %v3196_v59 = vpop.permute.xlu0 %3195  ;;  %v3959_v34 = vrot.slane %v3957_v17, 2  ;;  %v3962_v44 = vrot.slane %v3960_v22, 3  ;;  %v3923_v37 = vsel %vm1656_vm15, %v3881_v23, %v3922_v41  ;;  %v9134_v17 = vld [vmem:[#allocation34_spill] sm:$0xff] }
 0x395   :  { %v3357_v46 = vsel %vm1468_vm9, %v9128_v35, %v3196_v59  ;;  %v3967_v61 = vrot.slane %v3965_v60, 2  ;;  %v3970_v51 = vrot.slane %v3968_v18, 3  ;;  %v3194_v16 = vpop.permute.xlu1 %3193  ;;  %v3931_v5 = vsel %vm1656_vm15, %v3889_v12, %v3930_v57 }
 0x396   :  { %v3522_v63 = vshrl.u32 %v3357_v46, 16  ;;  %v3525_v50 = vshll.u32 %v3357_v46, 16  ;;  %v3354_v49 = vsel %vm1468_vm9, %v9130_v30, %v3194_v16  ;;  %4417 = vmatprep.mubr.bf16.mxu1 %v3931_v5  ;;  %v8457_v10 = vor.u32 %v3962_v44, %v3959_v34 }
 0x397   :  { %v3971_v54 = vor.u32 %v3970_v51, %v3967_v61  ;;  %v3515_v0 = vshrl.u32 %v3354_v49, 16  ;;  %v3518_v25 = vshll.u32 %v3354_v49, 16  ;;  %4418 = vmatmul.mubr.bf16.gmra.mxu1 %v3923_v37  ;;  %v9135_v61 = vld [vmem:[#allocation42_spill] sm:$0xff] }
 0x398   :  { %v3524_v20 = vrot.slane %v3522_v63, 2  ;;  %v3527_v14 = vrot.slane %v3525_v50, 3  ;;  %v3021_v36 = vpop.permute.xlu0 %3020  ;;  %v3964_v28 = vsel %vm1656_vm15, %v3922_v41, %v8457_v10  ;;  %v9136_v41 = vld [vmem:[#allocation47_spill] sm:$0xff] }
 0x399   :  { %v3318_v42 = vsel %vm1468_vm9, %v9131_v52, %v3021_v36  ;;  %v3517_v9 = vrot.slane %v3515_v0, 2  ;;  %v3520_v12 = vrot.slane %v3518_v25, 3  ;;  %v3972_v40 = vsel %vm1656_vm15, %v3930_v57, %v3971_v54  ;;  %v9137_v52 = vld [vmem:[#allocation49_spill] sm:$0xff] }
 0x39a   :  { %v3507_v27 = vshrl.u32 %v3318_v42, 16  ;;  %v3510_v4 = vshll.u32 %v3318_v42, 16  ;;  %v3019_v7 = vpop.permute.xlu1 %3018  ;;  %v3528_v2 = vor.u32 %v3527_v14, %v3524_v20  ;;  %4425 = vmatprep.mubr.bf16.mxu1 %v3972_v40 }
 0x39b   :  { %v3315_v23 = vsel %vm1468_vm9, %v9132_v47, %v3019_v7  ;;  %v3521_v26 = vor.u32 %v3520_v12, %v3517_v9 }
 0x39c   :  { %v3500_v11 = vshrl.u32 %v3315_v23, 16  ;;  %v3503_v33 = vshll.u32 %v3315_v23, 16  ;;  %v3023_v48 = vpop.permute.xlu0 %3022  ;;  %v3509_v3 = vrot.slane %v3507_v27, 2  ;;  %v3512_v53 = vrot.slane %v3510_v4, 3  ;;  %v9138_v23 = vld [vmem:[#allocation50_spill] sm:$0xff] }
 0x39d   :  { %v3321_v8 = vsel %vm1468_vm9, %v9133_v15, %v3023_v48  ;;  %v3529_v22 = vsel %vm1656_vm15, %v3521_v26, %v3528_v2 }
 0x39e   :  { %v3502_v43 = vrot.slane %v3500_v11, 2  ;;  %v3505_v13 = vrot.slane %v3503_v33, 3  ;;  %v3563_v39 = vshrl.u32 %v3321_v8, 16  ;;  %v3198_v1 = vpop.permute.xlu1 %3197  ;;  %v3566_v24 = vshll.u32 %v3321_v8, 16  ;;  %4473 = vmatprep.mubr.bf16.mxu0 %v3529_v22  ;;  %v9139_v8 = vld [vmem:[#allocation52_spill] sm:$0xff]  ;;  %v9140_v22 = vld [vmem:[#allocation53_spill] sm:$0xff] }
 0x39f   :  { %v3360_v62 = vsel %vm1468_vm9, %v9134_v17, %v3198_v1  ;;  %v3513_v35 = vor.u32 %v3512_v53, %v3509_v3  ;;  %4426 = vmatmul.mubr.bf16.gmra.mxu1 %v3964_v28 }
 0x3a0   :  { %v3506_v57 = vor.u32 %v3505_v13, %v3502_v43  ;;  %v3565_v60 = vrot.slane %v3563_v39, 2  ;;  %v3571_v18 = vshrl.u32 %v3360_v62, 16  ;;  %v3574_v59 = vshll.u32 %v3360_v62, 16  ;;  %v3025_v34 = vpop.permute.xlu0 %3024  ;;  %4433 = vmatprep.mubr.bf16.mxu1 %v3971_v54 }
 0x3a1   :  { %v3568_v46 = vrot.slane %v3566_v24, 3  ;;  %v3324_v51 = vsel %vm1468_vm9, %v9135_v61, %v3025_v34 }
 0x3a2   :  { %v3573_v63 = vrot.slane %v3571_v18, 2  ;;  %v3576_v50 = vrot.slane %v3574_v59, 3  ;;  %v3604_v16 = vshrl.u32 %v3324_v51, 16  ;;  %v3607_v44 = vshll.u32 %v3324_v51, 16  ;;  %v3200_v6 = vpop.permute.xlu1 %3199 }
 0x3a3   :  { %v3569_v30 = vor.u32 %v3568_v46, %v3565_v60  ;;  %v3363_v49 = vsel %vm1468_vm9, %v9136_v41, %v3200_v6  ;;  %v3514_v5 = vsel %vm1656_vm15, %v3506_v57, %v3513_v35  ;;  %v9141_v46 = vld [vmem:[#allocation55_spill] sm:$0xff]  ;;  %v9142_v41 = vld [vmem:[#allocation56_spill] sm:$0xff] }
 0x3a4   :  { %v3577_v37 = vor.u32 %v3576_v50, %v3573_v63  ;;  %v3606_v20 = vrot.slane %v3604_v16, 2  ;;  %v3609_v14 = vrot.slane %v3607_v44, 3  ;;  %v3612_v0 = vshrl.u32 %v3363_v49, 16  ;;  %4474 = vmatmul.mubr.bf16.vlgmr.msra.gmra.mxu0 %v3514_v5  ;;  %v3027_v36 = vpop.permute.xlu0 %3026 }
 0x3a5   :  { %v3615_v25 = vshll.u32 %v3363_v49, 16  ;;  %v3327_v42 = vsel %vm1468_vm9, %v9137_v52, %v3027_v36  ;;  %v3570_v9 = vsel %vm1656_vm15, %v3513_v35, %v3569_v30  ;;  %v9143_v52 = vld [vmem:[#allocation39_spill] sm:$0xff] }
 0x3a6   :  { %v3610_v54 = vor.u32 %v3609_v14, %v3606_v20  ;;  %v3614_v27 = vrot.slane %v3612_v0, 2  ;;  %v3645_v4 = vshrl.u32 %v3327_v42, 16  ;;  %v3648_v7 = vshll.u32 %v3327_v42, 16  ;;  %v3202_v12 = vpop.permute.xlu1 %3201  ;;  %v9144_v42 = vld [vmem:[#allocation57_spill] sm:$0xff] }
 0x3a7   :  { %v3617_v47 = vrot.slane %v3615_v25, 3  ;;  %v3366_v40 = vsel %vm1468_vm9, %v9138_v23, %v3202_v12  ;;  %v3578_v11 = vsel %vm1656_vm15, %v3528_v2, %v3577_v37  ;;  %4434 = vmatmul.mubr.bf16.gmra.mxu1 %v8457_v10 }
 0x3a8   :  { %v3647_v33 = vrot.slane %v3645_v4, 2  ;;  %v3650_v48 = vrot.slane %v3648_v7, 3  ;;  %v3653_v26 = vshrl.u32 %v3366_v40, 16  ;;  %v3656_v3 = vshll.u32 %v3366_v40, 16  ;;  %4481 = vmatprep.mubr.bf16.mxu0 %v3578_v11  ;;  %v3029_v53 = vpop.permute.xlu0 %3028  ;;  %5747 = vmatprep.mubr.msk.bf16.mxu1 %vm6031_vm0, %v8994_v56  ;;  %v9145_v40 = vld [vmem:[#allocation58_spill] sm:$0xff] }
 0x3a9   :  { %v3618_v15 = vor.u32 %v3617_v47, %v3614_v27  ;;  %v3330_v43 = vsel %vm1468_vm9, %v9139_v8, %v3029_v53  ;;  %v3611_v13 = vsel %vm1656_vm15, %v3569_v30, %v3610_v54 }
 0x3aa   :  { %v3651_v39 = vor.u32 %v3650_v48, %v3647_v33  ;;  %v3655_v1 = vrot.slane %v3653_v26, 2  ;;  %v3658_v24 = vrot.slane %v3656_v3, 3  ;;  %v3686_v17 = vshrl.u32 %v3330_v43, 16  ;;  %v3204_v62 = vpop.permute.xlu1 %3203 }
 0x3ab   :  { %v3689_v2 = vshll.u32 %v3330_v43, 16  ;;  %v3369_v28 = vsel %vm1468_vm9, %v9140_v22, %v3204_v62  ;;  %v3619_v57 = vsel %vm1656_vm15, %v3577_v37, %v3618_v15  ;;  %v9146_v43 = vld [vmem:[#allocation61_spill] sm:$0xff] }
 0x3ac   :  { %v3659_v10 = vor.u32 %v3658_v24, %v3655_v1  ;;  %v3688_v60 = vrot.slane %v3686_v17, 2  ;;  %v3694_v18 = vshrl.u32 %v3369_v28, 16  ;;  %v3697_v59 = vshll.u32 %v3369_v28, 16  ;;  %4482 = vmatmul.mubr.bf16.gmra.mxu0 %v3570_v9  ;;  %v3031_v34 = vpop.permute.xlu0 %3030 }
 0x3ad   :  { %v3691_v35 = vrot.slane %v3689_v2, 3  ;;  %4489 = vmatprep.mubr.bf16.mxu0 %v3619_v57  ;;  %v3333_v61 = vsel %vm1468_vm9, %v9141_v46, %v3031_v34  ;;  %v8492_v51 = vsel %vm1656_vm15, %v3610_v54, %v3651_v39  ;;  %v9147_v57 = vld [vmem:[#allocation62_spill] sm:$0xff] }
 0x3ae   :  { %v3696_v63 = vrot.slane %v3694_v18, 2  ;;  %v3699_v50 = vrot.slane %v3697_v59, 3  ;;  %v3727_v16 = vshrl.u32 %v3333_v61, 16  ;;  %v3730_v44 = vshll.u32 %v3333_v61, 16  ;;  %v3206_v6 = vpop.permute.xlu1 %3205  ;;  %v9148_v61 = vld [vmem:[#allocation48_spill] sm:$0xff] }
 0x3af   :  { %v3692_v30 = vor.u32 %v3691_v35, %v3688_v60  ;;  %v3372_v49 = vsel %vm1468_vm9, %v9142_v41, %v3206_v6  ;;  %v3660_v5 = vsel %vm1656_vm15, %v3618_v15, %v3659_v10  ;;  %5748 = vmatmul.mubr.msk.bf16.vlgmr.msra.gmra.mxu1 %vm1468_vm9, %v9143_v52 }
 0x3b0   :  { %v3700_v37 = vor.u32 %v3699_v50, %v3696_v63  ;;  %v3729_v20 = vrot.slane %v3727_v16, 2  ;;  %v3732_v14 = vrot.slane %v3730_v44, 3  ;;  %v3735_v0 = vshrl.u32 %v3372_v49, 16  ;;  %v3033_v36 = vpop.permute.xlu0 %3032  ;;  %5751 = vmatprep.mubr.msk.bf16.mxu1 %vm6031_vm0, %v8994_v56  ;;  %v9149_v63 = vld [vmem:[#allocation64_spill] sm:$0xff] }
 0x3b1   :  { %v3738_v25 = vshll.u32 %v3372_v49, 16  ;;  %v3336_v9 = vsel %vm1468_vm9, %v9144_v42, %v3033_v36  ;;  %v8502_v54 = vsel %vm1656_vm15, %v3651_v39, %v3692_v30 }
 0x3b2   :  { %v3733_v27 = vor.u32 %v3732_v14, %v3729_v20  ;;  %v3737_v4 = vrot.slane %v3735_v0, 2  ;;  %v3768_v7 = vshrl.u32 %v3336_v9, 16  ;;  %v3771_v12 = vshll.u32 %v3336_v9, 16  ;;  %v3208_v47 = vpop.permute.xlu1 %3207 }
 0x3b3   :  { %v3740_v23 = vrot.slane %v3738_v25, 3  ;;  %v3375_v11 = vsel %vm1468_vm9, %v9145_v40, %v3208_v47  ;;  %v3701_v33 = vsel %vm1656_vm15, %v3659_v10, %v3700_v37 }
 0x3b4   :  { %v3770_v48 = vrot.slane %v3768_v7, 2  ;;  %v3773_v26 = vrot.slane %v3771_v12, 3  ;;  %v3776_v3 = vshrl.u32 %v3375_v11, 16  ;;  %v3779_v53 = vshll.u32 %v3375_v11, 16  ;;  %4490 = vmatmul.mubr.bf16.gmra.mxu0 %v3611_v13  ;;  %v3035_v15 = vpop.permute.xlu0 %3034 }
 0x3b5   :  { %v3741_v8 = vor.u32 %v3740_v23, %v3737_v4  ;;  %4497 = vmatprep.mubr.bf16.mxu0 %v3660_v5  ;;  %v3339_v39 = vsel %vm1468_vm9, %v9146_v43, %v3035_v15  ;;  %v8512_v1 = vsel %vm1656_vm15, %v3692_v30, %v3733_v27 }
 0x3b6   :  { %v3774_v24 = vor.u32 %v3773_v26, %v3770_v48  ;;  %v3778_v17 = vrot.slane %v3776_v3, 2  ;;  %v3781_v62 = vrot.slane %v3779_v53, 3  ;;  %v3809_v2 = vshrl.u32 %v3339_v39, 16  ;;  %v3210_v22 = vpop.permute.xlu1 %3209  ;;  %v9152_v26 = vld [vmem:[#allocation70_spill] sm:$0xff] }
 0x3b7   :  { %v3812_v28 = vshll.u32 %v3339_v39, 16  ;;  %v3378_v10 = vsel %vm1468_vm9, %v9147_v57, %v3210_v22  ;;  %v3742_v13 = vsel %vm1656_vm15, %v3700_v37, %v3741_v8  ;;  %5752 = vmatmul.mubr.msk.bf16.gmra.mxu1 %vm1468_vm9, %v9148_v61  ;;  %v9150_v37 = vld [vmem:[#allocation65_spill] sm:$0xff] }
 0x3b8   :  { %v3782_v60 = vor.u32 %v3781_v62, %v3778_v17  ;;  %v3811_v18 = vrot.slane %v3809_v2, 2  ;;  %v3817_v59 = vshrl.u32 %v3378_v10, 16  ;;  %v3820_v34 = vshll.u32 %v3378_v10, 16  ;;  %v3037_v35 = vpop.permute.xlu0 %3036  ;;  %5755 = vmatprep.mubr.msk.bf16.mxu1 %vm6031_vm0, %v8994_v56  ;;  %v9153_v17 = vld [vmem:[#allocation51_spill] sm:$0xff] }
 0x3b9   :  { %v3814_v46 = vrot.slane %v3812_v28, 3  ;;  %v3342_v50 = vsel %vm1468_vm9, %v9149_v63, %v3037_v35  ;;  %v8522_v16 = vsel %vm1656_vm15, %v3733_v27, %v3774_v24  ;;  %v9151_v27 = vld [vmem:[#allocation69_spill] sm:$0xff] }
 0x3ba   :  { %v3819_v44 = vrot.slane %v3817_v59, 2  ;;  %v3822_v6 = vrot.slane %v3820_v34, 3  ;;  %v3850_v30 = vshrl.u32 %v3342_v50, 16  ;;  %v3853_v41 = vshll.u32 %v3342_v50, 16  ;;  %v3212_v49 = vpop.permute.xlu1 %3211 }
 0x3bb   :  { %v3815_v5 = vor.u32 %v3814_v46, %v3811_v18  ;;  %v3381_v20 = vsel %vm1468_vm9, %v9150_v37, %v3212_v49  ;;  %v8529_v14 = vsel %vm1656_vm15, %v3741_v8, %v3782_v60 }
 0x3bc   :  { %v3823_v0 = vor.u32 %v3822_v6, %v3819_v44  ;;  %v3852_v36 = vrot.slane %v3850_v30, 2  ;;  %v3855_v25 = vrot.slane %v3853_v41, 3  ;;  %v3858_v52 = vshrl.u32 %v3381_v20, 16  ;;  %4498 = vmatmul.mubr.bf16.gmra.mxu0 %v8492_v51  ;;  %v3039_v42 = vpop.permute.xlu0 %3038 }
 0x3bd   :  { %v3861_v9 = vshll.u32 %v3381_v20, 16  ;;  %4505 = vmatprep.mubr.bf16.mxu0 %v3701_v33  ;;  %v3345_v4 = vsel %vm1468_vm9, %v9151_v27, %v3039_v42  ;;  %v8535_v7 = vsel %vm1656_vm15, %v3774_v24, %v3815_v5 }
 0x3be   :  { %v3856_v12 = vor.u32 %v3855_v25, %v3852_v36  ;;  %v3860_v47 = vrot.slane %v3858_v52, 2  ;;  %v3891_v23 = vshrl.u32 %v3345_v4, 16  ;;  %v3894_v40 = vshll.u32 %v3345_v4, 16  ;;  %v3214_v11 = vpop.permute.xlu1 %3213  ;;  %v9154_v52 = vld [vmem:[#allocation54_spill] sm:$0xff] }
 0x3bf   :  { %v3863_v48 = vrot.slane %v3861_v9, 3  ;;  %v3384_v3 = vsel %vm1468_vm9, %v9152_v26, %v3214_v11  ;;  %v3824_v51 = vsel %vm1656_vm15, %v3782_v60, %v3823_v0  ;;  %5756 = vmatmul.mubr.msk.bf16.gmra.mxu1 %vm1468_vm9, %v9153_v17 }
 0x3c0   :  { %v3893_v53 = vrot.slane %v3891_v23, 2  ;;  %v3896_v15 = vrot.slane %v3894_v40, 3  ;;  %v3899_v33 = vshrl.u32 %v3384_v3, 16  ;;  %v3902_v8 = vshll.u32 %v3384_v3, 16  ;;  %v3041_v43 = vpop.permute.xlu0 %3040  ;;  %5759 = vmatprep.mubr.msk.bf16.mxu1 %vm6031_vm0, %v8994_v56  ;;  %v9155_v23 = vld [vmem:[#allocation59_spill] sm:$0xff]  ;;  %v9156_v40 = vld [vmem:[#allocation60_spill] sm:$0xff] }
 0x3c1   :  { %v3864_v39 = vor.u32 %v3863_v48, %v3860_v47  ;;  %v3348_v24 = vsel %vm1468_vm9, %v8260_v21, %v3041_v43  ;;  %v3857_v62 = vsel %vm1656_vm15, %v3815_v5, %v3856_v12 }
 0x3c2   :  { %v3897_v2 = vor.u32 %v3896_v15, %v3893_v53  ;;  %v3901_v22 = vrot.slane %v3899_v33, 2  ;;  %v3904_v28 = vrot.slane %v3902_v8, 3  ;;  %v3932_v57 = vshrl.u32 %v3348_v24, 16  ;;  %v3216_v10 = vpop.permute.xlu1 %3215 }
 0x3c3   :  { %v3935_v60 = vshll.u32 %v3348_v24, 16  ;;  %v3387_v18 = vsel %vm1468_vm9, %v8244_v31, %v3216_v10  ;;  %v3865_v59 = vsel %vm1656_vm15, %v3823_v0, %v3864_v39 }
 0x3c4   :  { %v3905_v34 = vor.u32 %v3904_v28, %v3901_v22  ;;  %v3934_v35 = vrot.slane %v3932_v57, 2  ;;  %v3940_v46 = vshrl.u32 %v3387_v18, 16  ;;  %v3943_v21 = vshll.u32 %v3387_v18, 16  ;;  %4506 = vmatmul.mubr.bf16.gmra.mxu0 %v8502_v54  ;;  %v3043_v61 = vpop.permute.xlu0 %3042 }
 0x3c5   :  { %v3937_v63 = vrot.slane %v3935_v60, 3  ;;  %4513 = vmatprep.mubr.bf16.mxu0 %v3742_v13  ;;  %v3351_v50 = vsel %vm1468_vm9, %v8273_v38, %v3043_v61  ;;  %v3898_v44 = vsel %vm1656_vm15, %v3856_v12, %v3897_v2 }
 0x3c6   :  { %v3942_v6 = vrot.slane %v3940_v46, 2  ;;  %v3945_v30 = vrot.slane %v3943_v21, 3  ;;  %v3973_v41 = vshrl.u32 %v3351_v50, 16  ;;  %v3976_v31 = vshll.u32 %v3351_v50, 16  ;;  %v3218_v49 = vpop.permute.xlu1 %3217 }
 0x3c7   :  { %v3938_v5 = vor.u32 %v3937_v63, %v3934_v35  ;;  %v3390_v37 = vsel %vm1468_vm9, %v8254_v55, %v3218_v49  ;;  %v3906_v20 = vsel %vm1656_vm15, %v3864_v39, %v3905_v34  ;;  %5760 = vmatmul.mubr.msk.bf16.gmra.mxu1 %vm1468_vm9, %v9154_v52 }
 0x3c8   :  { %v3946_v54 = vor.u32 %v3945_v30, %v3942_v6  ;;  %v3975_v0 = vrot.slane %v3973_v41, 2  ;;  %v3978_v36 = vrot.slane %v3976_v31, 3  ;;  %v3981_v13 = vshrl.u32 %v3390_v37, 16  ;;  %5763 = vmatprep.mubr.msk.bf16.mxu1 %vm6031_vm0, %v8994_v56 }
 0x3c9   :  { %v3984_v25 = vshll.u32 %v3390_v37, 16  ;;  %v3939_v38 = vsel %vm1656_vm15, %v3897_v2, %v3938_v5 }
 0x3ca   :  { %v3979_v42 = vor.u32 %v3978_v36, %v3975_v0  ;;  %v3983_v9 = vrot.slane %v3981_v13, 2  ;;  %v3947_v27 = vsel %vm1656_vm15, %v3905_v34, %v3946_v54 }
 0x3cb   :  { %v3986_v55 = vrot.slane %v3984_v25, 3 }
 0x3cc   :  { %4514 = vmatmul.mubr.bf16.gmra.mxu0 %v8512_v1  ;;  %v3980_v4 = vsel %vm1656_vm15, %v3938_v5, %v3979_v42  ;;  %v9157_v1 = vld [vmem:[#allocation63_spill] sm:$0xff] }
 0x3cd   :  { %v3987_v12 = vor.u32 %v3986_v55, %v3983_v9  ;;  %4521 = vmatprep.mubr.bf16.mxu0 %v8529_v14 }
 0x3cf   :  { %v3988_v47 = vsel %vm1656_vm15, %v3946_v54, %v3987_v12  ;;  %5764 = vmatmul.mubr.msk.bf16.gmra.mxu1 %vm1468_vm9, %v9155_v23 }
 0x3d0   :  { %5767 = vmatprep.mubr.msk.bf16.mxu1 %vm6031_vm0, %v8994_v56 }
 0x3d4   :  { %4522 = vmatmul.mubr.bf16.gmra.mxu0 %v8522_v16  ;;  %v9158_v16 = vld [vmem:[#allocation66_spill] sm:$0xff] }
 0x3d5   :  { %4529 = vmatprep.mubr.bf16.mxu0 %v3824_v51 }
 0x3d7   :  { %5768 = vmatmul.mubr.msk.bf16.gmra.mxu1 %vm1468_vm9, %v9156_v40 }
 0x3d8   :  { %5771 = vmatprep.mubr.msk.bf16.mxu1 %vm6031_vm0, %v8994_v56 }
 0x3dc   :  { %4530 = vmatmul.mubr.bf16.gmra.mxu0 %v8535_v7 }
 0x3dd   :  { %4537 = vmatprep.mubr.bf16.mxu0 %v3865_v59 }
 0x3df   :  { %5772 = vmatmul.mubr.msk.bf16.gmra.mxu1 %vm1468_vm9, %v9157_v1 }
 0x3e0   :  { %5775 = vmatprep.mubr.msk.bf16.mxu1 %vm6031_vm0, %v8994_v56 }
 0x3e4   :  { %4538 = vmatmul.mubr.bf16.gmra.mxu0 %v3857_v62 }
 0x3e5   :  { %4545 = vmatprep.mubr.bf16.mxu0 %v3906_v20  ;;  %v5436_v14 = vpop.f32.mrf.mxu1 }
 0x3e7   :  { %5776 = vmatmul.mubr.msk.bf16.gmra.mxu1 %vm1468_vm9, %v9158_v16  ;;  %v5437_v11 = vpop.f32.mrf.mxu1 }
 0x3e8   :  { %v8583_v48 = vadd.f32 %v5437_v11, %v5436_v14  ;;  %5779 = vmatprep.mubr.msk.bf16.mxu1 %vm6031_vm0, %v8994_v56 }
 0x3e9   :  { %v5439_v7 = vpop.f32.mrf.mxu1 }
 0x3eb   :  { %v5440_v26 = vpop.f32.mrf.mxu1 }
 0x3ec   :  { %4546 = vmatmul.mubr.bf16.gmra.mxu0 %v3898_v44  ;;  %v8587_v3 = vadd.f32 %v5440_v26, %v5439_v7 }
 0x3ed   :  { %4553 = vmatprep.mubr.bf16.mxu0 %v3947_v27 }
 0x3ee   :  { %v5442_v51 = vpop.f32.mrf.mxu1 }
 0x3ef   :  { %5780 = vmatmul.mubr.msk.bf16.gmra.mxu1 %vm1468_vm9, %v8285_v32 }
 0x3f0   :  { %v5443_v53 = vpop.f32.mrf.mxu1  ;;  %5783 = vmatprep.mubr.msk.bf16.mxu1 %vm6031_vm0, %v8994_v56 }
 0x3f1   :  { %v8593_v15 = vadd.f32 %v5443_v53, %v5442_v51 }
 0x3f2   :  { %v5445_v33 = vpop.f32.mrf.mxu1 }
 0x3f4   :  { %4554 = vmatmul.mubr.bf16.gmra.mxu0 %v3939_v38  ;;  %v5446_v8 = vpop.f32.mrf.mxu1 }
 0x3f5   :  { %4561 = vmatprep.mubr.bf16.mxu0 %v3988_v47  ;;  %v8595_v43 = vadd.f32 %v5446_v8, %v5445_v33 }
 0x3f7   :  { %5784 = vmatmul.mubr.msk.bf16.gmra.mxu1 %vm1468_vm9, %v8309_v58 }
 0x3f8   :  { %5787 = vmatprep.mubr.msk.bf16.mxu1 %vm6031_vm0, %v8994_v56 }
 0x3fa   :  { %v5448_v32 = vpop.f32.mrf.mxu1 }
 0x3fc   :  { %4562 = vmatmul.mubr.bf16.gmra.mxu0 %v3980_v4  ;;  %v5449_v39 = vpop.f32.mrf.mxu1 }
 0x3fd   :  { %4569 = vmatprep.mubr.bf16.mxu0 %v3987_v12  ;;  %v8601_v17 = vadd.f32 %v5449_v39, %v5448_v32 }
 0x3fe   :  { %v5451_v24 = vpop.f32.mrf.mxu1 }
 0x3ff   :  { %5788 = vmatmul.mubr.msk.bf16.gmra.mxu1 %vm1468_vm9, %v8316_v19 }
 0x400   :  { %v5452_v62 = vpop.f32.mrf.mxu1  ;;  %5791 = vmatprep.mubr.msk.bf16.mxu1 %vm6031_vm0, %v8994_v56 }
 0x401   :  { %v8607_v2 = vadd.f32 %v5452_v62, %v5451_v24 }
 0x404   :  { %4570 = vmatmul.mubr.bf16.gmra.mxu0 %v3979_v42 }
 0x406   :  { %v5454_v58 = vpop.f32.mrf.mxu1 }
 0x407   :  { %5792 = vmatmul.mubr.msk.bf16.gmra.mxu1 %vm1468_vm9, %v8330_v45 }
 0x408   :  { %v5455_v22 = vpop.f32.mrf.mxu1  ;;  %5795 = vmatprep.mubr.msk.bf16.mxu1 %vm6031_vm0, %v8994_v56 }
 0x409   :  { %v8613_v28 = vadd.f32 %v5455_v22, %v5454_v58  ;;  %v8651_v22 = vld [vmem:[#allocation9] ss:$0 sm:$0xff] }
 0x40a   :  { %v5457_v57 = vpop.f32.mrf.mxu1 }
 0x40c   :  { %v5458_v10 = vpop.f32.mrf.mxu1 }
 0x40d   :  { %v8615_v19 = vadd.f32 %v5458_v10, %v5457_v57 }
 0x40f   :  { %5796 = vmatmul.mubr.msk.bf16.gmra.mxu1 %vm1468_vm9, %v8318_v29 }
 0x412   :  { %v5460_v60 = vpop.f32.mrf.mxu1 }
 0x414   :  { %v5461_v18 = vpop.f32.mrf.mxu1 }
 0x415   :  { %v8619_v59 = vadd.f32 %v5461_v18, %v5460_v60 }
 0x416   :  { %v5463_v34 = vpop.f32.mrf.mxu1 }
 0x418   :  { %v5464_v35 = vpop.f32.mrf.mxu1 }
 0x419   :  { %v8621_v45 = vadd.f32 %v5464_v35, %v5463_v34  ;;  %v4340_v35 = vadd.f32 %v8583_v48, %v8651_v22 }
 0x41e   :  { %v5466_v46 = vpop.f32.mrf.mxu1 }
 0x420   :  { %v5467_v21 = vpop.f32.mrf.mxu1 }
 0x421   :  { %v8623_v56 = vadd.f32 %v5467_v21, %v5466_v46 }
 0x422   :  { %v5469_v61 = vpop.f32.mrf.mxu1 }
 0x424   :  { %v5470_v63 = vpop.f32.mrf.mxu1 }
 0x425   :  { %v8625_v50 = vadd.f32 %v5470_v63, %v5469_v61 }
 0x42b   :  { %v5472_v44 = vpop.f32.mrf.mxu1 }
 0x42d   :  { %v5473_v6 = vpop.f32.mrf.mxu1 }
 0x42e   :  { %v8627_v30 = vadd.f32 %v5473_v6, %v5472_v44 }
 0x42f   :  { %v5475_v29 = vpop.f32.mrf.mxu1 }
 0x431   :  { %v5476_v41 = vpop.f32.mrf.mxu1 }
 0x432   :  { %v8629_v31 = vadd.f32 %v5476_v41, %v5475_v29  ;;  %v4343_v29 = vadd.f32 %v8587_v3, %v8651_v22  ;;  %v4351_v3 = vadd.f32 %v8595_v43, %v8651_v22  ;;  %v4356_v43 = vadd.f32 %v8601_v17, %v8651_v22 }
 0x437   :  { %v5478_v49 = vpop.f32.mrf.mxu1 }
 0x439   :  { %v5479_v5 = vpop.f32.mrf.mxu1 }
 0x43a   :  { %v8631_v37 = vadd.f32 %v5479_v5, %v5478_v49 }
 0x43b   :  { %v5481_v20 = vpop.f32.mrf.mxu1 }
 0x43d   :  { %v5482_v54 = vpop.f32.mrf.mxu1 }
 0x43e   :  { %v8633_v0 = vadd.f32 %v5482_v54, %v5481_v20 }
 0x447   :  { %v5484_v36 = vpop.f32.mrf.mxu1 }
 0x449   :  { %v5485_v13 = vpop.f32.mrf.mxu1 }
 0x44a   :  { %v8635_v25 = vadd.f32 %v5485_v13, %v5484_v36 }
 0x44b   :  { %v5487_v52 = vpop.f32.mrf.mxu1 }
 0x44d   :  { %v5488_v38 = vpop.f32.mrf.mxu1 }
 0x44e   :  { %v8637_v42 = vadd.f32 %v5488_v38, %v5487_v52  ;;  %v4348_v52 = vadd.f32 %v8593_v15, %v8651_v22 }
 0x44f   :  { %v5490_v9 = vpop.f32.mrf.mxu1 }
 0x451   :  { %v5491_v27 = vpop.f32.mrf.mxu1 }
 0x452   :  { %v8639_v55 = vadd.f32 %v5491_v27, %v5490_v9 }
 0x453   :  { %v5493_v4 = vpop.f32.mrf.mxu1 }
 0x455   :  { %v5494_v12 = vpop.f32.mrf.mxu1 }
 0x456   :  { %v8641_v47 = vadd.f32 %v5494_v12, %v5493_v4 }
 0x457   :  { %v5496_v23 = vpop.f32.mrf.mxu1 }
 0x459   :  { %v5497_v40 = vpop.f32.mrf.mxu1 }
 0x45a   :  { %v8643_v1 = vadd.f32 %v5497_v40, %v5496_v23 }
 0x45b   :  { %v5499_v14 = vpop.f32.mrf.mxu1 }
 0x45d   :  { %v5500_v16 = vpop.f32.mrf.mxu1 }
 0x45e   :  { %v8645_v11 = vadd.f32 %v5500_v16, %v5499_v14 }
 0x45f   :  { %v5502_v7 = vpop.f32.mrf.mxu1 }
 0x461   :  { %v5503_v26 = vpop.f32.mrf.mxu1 }
 0x462   :  { %v8647_v51 = vadd.f32 %v5503_v26, %v5502_v7  ;;  %v9172_v26 = vld [vmem:[#allocation24_spill] sm:$0xff] }
 0x463   :  { %v5505_v33 = vpop.f32.mrf.mxu1 }
 0x464   :  { %v5530_v53 = vpop.f32.mrf.mxu0 }
 0x465   :  { %v5506_v32 = vpop.f32.mrf.mxu1 }
 0x466   :  { %v5531_v8 = vpop.f32.mrf.mxu0  ;;  %v8649_v39 = vadd.f32 %v5506_v32, %v5505_v33 }
 0x467   :  { %v5508_v62 = vpop.f32.mrf.mxu1  ;;  %v5532_v10 = vadd.f32 %v5531_v8, %v5530_v53 }
 0x468   :  { %v5533_v24 = vpop.f32.mrf.mxu0 }
 0x469   :  { %v5509_v57 = vpop.f32.mrf.mxu1  ;;  %v4476_v44 = vadd.f32 %v5532_v10, %v4340_v35 }
 0x46a   :  { %v5534_v58 = vpop.f32.mrf.mxu0  ;;  %v8653_v60 = vadd.f32 %v5509_v57, %v5508_v62 }
 0x46b   :  { %v5511_v34 = vpop.f32.mrf.mxu1  ;;  %v5535_v61 = vadd.f32 %v5534_v58, %v5533_v24 }
 0x46c   :  { %v5536_v18 = vpop.f32.mrf.mxu0 }
 0x46d   :  { %v5512_v21 = vpop.f32.mrf.mxu1  ;;  %v4479_v36 = vadd.f32 %v5535_v61, %v4343_v29  ;;  %v9166_v29 = vld [vmem:[#allocation20_spill] sm:$0xff] }
 0x46e   :  { %v5537_v46 = vpop.f32.mrf.mxu0  ;;  %vm9167_vm1 = vcmp.eq.s32.totalorder %v9166_v29, 1 }
 0x46f   :  { %v4611_v6 = vpop.f32.mrf.mxu1  ;;  %v5538_v20 = vadd.f32 %v5537_v46, %v5536_v18 }
 0x470   :  { %v5539_v63 = vpop.f32.mrf.mxu0  ;;  %v4612_v41 = vadd.f32 %v4611_v6, %v4476_v44  ;;  %v4359_v6 = vadd.f32 %v8607_v2, %v8651_v22  ;;  %v4364_v2 = vadd.f32 %v8613_v28, %v8651_v22 }
 0x471   :  { %v5749_v5 = vpop.f32.mrf.mxu1  ;;  %v4484_v40 = vadd.f32 %v5538_v20, %v4348_v52 }
 0x472   :  { %v5540_v49 = vpop.f32.mrf.mxu0  ;;  %v4713_v48 = vmax.f32 %v4612_v41, 0.0 }
 0x473   :  { %v4614_v13 = vpop.f32.mrf.mxu1  ;;  %v5541_v4 = vadd.f32 %v5540_v49, %v5539_v63  ;;  %v9168_v49 = vld [vmem:[#allocation22_spill] sm:$0xff] }
 0x474   :  { %v5542_v54 = vpop.f32.mrf.mxu0  ;;  %v4615_v38 = vadd.f32 %v4614_v13, %v4479_v36  ;;  %v4738_v7 = vsel %vm559_vm5, %v4713_v48, 0.0  ;;  %vm9169_vm5 = vcmp.eq.s32.totalorder %v9168_v49, 1 }
 0x475   :  { %v5750_v27 = vpop.f32.mrf.mxu1  ;;  %v4487_v58 = vadd.f32 %v5541_v4, %v4351_v3 }
 0x476   :  { %v5543_v9 = vpop.f32.mrf.mxu0  ;;  %v4714_v12 = vmax.f32 %v4615_v38, 0.0 }
 0x477   :  { %v4619_v14 = vpop.f32.mrf.mxu1  ;;  %v5544_v24 = vadd.f32 %v5543_v9, %v5542_v54 }
 0x478   :  { %v5545_v23 = vpop.f32.mrf.mxu0  ;;  %v4739_v53 = vsel %vm560_vm2, %v4714_v12, 0.0  ;;  %v4620_v33 = vadd.f32 %v4619_v14, %v4484_v40 }
 0x479   :  { %v5227_v8 = vpack.c.bf16 %v4739_v53, %v4738_v7  ;;  %v5753_v32 = vpop.f32.mrf.mxu1  ;;  %v4492_v63 = vadd.f32 %v5544_v24, %v4356_v43  ;;  %v4367_v7 = vadd.f32 %v8615_v19, %v8651_v22  ;;  %v4372_v19 = vadd.f32 %v8619_v59, %v8651_v22 }
 0x47a   :  { %v5546_v15 = vpop.f32.mrf.mxu0  ;;  %v4715_v10 = vmax.f32 %v4620_v33, 0.0  ;;  %v9164_v33 = vld [vmem:[#allocation19_spill] sm:$0xff] }
 0x47b   :  { %5228 = vst [vmem:[%s8802_s8] sm:$0xff] %v5227_v8   ;;  %v4622_v57 = vpop.f32.mrf.mxu1  ;;  %v5547_v46 = vadd.f32 %v5546_v15, %v5545_v23  ;;  %vm9165_vm0 = vcmp.eq.s32.totalorder %v9164_v33, 1 }
 0x47c   :  { %v5548_v62 = vpop.f32.mrf.mxu0  ;;  %v4623_v18 = vadd.f32 %v4622_v57, %v4487_v58  ;;  %v4740_v41 = vsel %vm561_vm3, %v4715_v10, 0.0  ;;  %vm9173_vm3 = vcmp.eq.s32.totalorder %v9172_v26, 1 }
 0x47d   :  { %v5754_v35 = vpop.f32.mrf.mxu1  ;;  %v4495_v48 = vadd.f32 %v5547_v46, %v4359_v6  ;;  %v4375_v6 = vadd.f32 %v8621_v45, %v8651_v22  ;;  %v4380_v45 = vadd.f32 %v8623_v56, %v8651_v22 }
 0x47e   :  { %v5549_v34 = vpop.f32.mrf.mxu0  ;;  %v4716_v21 = vmax.f32 %v4623_v18, 0.0 }
 0x47f   :  { %v4627_v44 = vpop.f32.mrf.mxu1  ;;  %v5550_v13 = vadd.f32 %v5549_v34, %v5548_v62 }
 0x480   :  { %v5551_v61 = vpop.f32.mrf.mxu0  ;;  %v4741_v5 = vsel %vm562_vm4, %v4716_v21, 0.0  ;;  %v4628_v20 = vadd.f32 %v4627_v44, %v4492_v63 }
 0x481   :  { %v5232_v54 = vpack.c.bf16 %v4741_v5, %v4740_v41  ;;  %v5757_v36 = vpop.f32.mrf.mxu1  ;;  %v4500_v3 = vadd.f32 %v5550_v13, %v4364_v2 }
 0x482   :  { %v5552_v17 = vpop.f32.mrf.mxu0  ;;  %v4717_v9 = vmax.f32 %v4628_v20, 0.0 }
 0x483   :  { %5284 = vst [vmem:[%s8802_s8 + $0x8] sm:$0xff] %v5232_v54   ;;  %v4630_v38 = vpop.f32.mrf.mxu1  ;;  %v5553_v23 = vadd.f32 %v5552_v17, %v5551_v61 }
 0x484   :  { %v5554_v52 = vpop.f32.mrf.mxu0  ;;  %v4631_v27 = vadd.f32 %v4630_v38, %v4495_v48  ;;  %v4742_v53 = vsel %vm563_vm6, %v4717_v9, 0.0 }
 0x485   :  { %v5758_v12 = vpop.f32.mrf.mxu1  ;;  %v4503_v57 = vadd.f32 %v5553_v23, %v4367_v7 }
 0x486   :  { %v5555_v4 = vpop.f32.mrf.mxu0  ;;  %v4718_v40 = vmax.f32 %v4631_v27, 0.0 }
 0x487   :  { %v4635_v16 = vpop.f32.mrf.mxu1  ;;  %v5556_v62 = vadd.f32 %v5555_v4, %v5554_v52 }
 0x488   :  { %v5557_v14 = vpop.f32.mrf.mxu0  ;;  %v4743_v15 = vsel %vm9165_vm0, %v4718_v40, 0.0  ;;  %v4636_v8 = vadd.f32 %v4635_v16, %v4500_v3  ;;  %v4383_v3 = vadd.f32 %v8625_v50, %v8651_v22  ;;  %v9170_v16 = vld [vmem:[#allocation23_spill] sm:$0xff]  ;;  %v4388_v50 = vadd.f32 %v8627_v30, %v8651_v22 }
 0x489   :  { %v5237_v32 = vpack.c.bf16 %v4743_v15, %v4742_v53  ;;  %v5761_v24 = vpop.f32.mrf.mxu1  ;;  %v4508_v63 = vadd.f32 %v5556_v62, %v4372_v19  ;;  %vm9171_vm2 = vcmp.eq.s32.totalorder %v9170_v16, 1 }
 0x48a   :  { %v5558_v28 = vpop.f32.mrf.mxu0  ;;  %v4719_v10 = vmax.f32 %v4636_v8, 0.0 }
 0x48b   :  { %5285 = vst [vmem:[%s8802_s8 + $0x10] sm:$0xff] %v5237_v32   ;;  %v4638_v43 = vpop.f32.mrf.mxu1  ;;  %v5559_v46 = vadd.f32 %v5558_v28, %v5557_v14 }
 0x48c   :  { %v5560_v58 = vpop.f32.mrf.mxu0  ;;  %v4639_v18 = vadd.f32 %v4638_v43, %v4503_v57  ;;  %v4744_v41 = vsel %vm9167_vm1, %v4719_v10, 0.0 }
 0x48d   :  { %v5762_v35 = vpop.f32.mrf.mxu1  ;;  %v4511_v52 = vadd.f32 %v5559_v46, %v4375_v6 }
 0x48e   :  { %v5561_v34 = vpop.f32.mrf.mxu0  ;;  %v4720_v21 = vmax.f32 %v4639_v18, 0.0 }
 0x48f   :  { %v4643_v44 = vpop.f32.mrf.mxu1  ;;  %v5562_v36 = vadd.f32 %v5561_v34, %v5560_v58 }
 0x490   :  { %v5563_v61 = vpop.f32.mrf.mxu0  ;;  %v4745_v5 = vsel %vm9169_vm5, %v4720_v21, 0.0  ;;  %v4644_v20 = vadd.f32 %v4643_v44, %v4508_v63  ;;  %v4391_v21 = vadd.f32 %v8629_v31, %v8651_v22  ;;  %v9176_v44 = vld [vmem:[#allocation27_spill] sm:$0xff]  ;;  %v4396_v31 = vadd.f32 %v8631_v37, %v8651_v22 }
 0x491   :  { %v5242_v17 = vpack.c.bf16 %v4745_v5, %v4744_v41  ;;  %v5765_v54 = vpop.f32.mrf.mxu1  ;;  %v4516_v40 = vadd.f32 %v5562_v36, %v4380_v45  ;;  %vm9177_vm6 = vcmp.eq.s32.totalorder %v9176_v44, 1 }
 0x492   :  { %v5564_v59 = vpop.f32.mrf.mxu0  ;;  %v4721_v38 = vmax.f32 %v4644_v20, 0.0 }
 0x493   :  { %5286 = vst [vmem:[%s8802_s8 + $0x18] sm:$0xff] %v5242_v17   ;;  %v4646_v48 = vpop.f32.mrf.mxu1  ;;  %v5565_v4 = vadd.f32 %v5564_v59, %v5563_v61  ;;  %v9174_v61 = vld [vmem:[#allocation26_spill] sm:$0xff] }
 0x494   :  { %v5566_v13 = vpop.f32.mrf.mxu0  ;;  %v4647_v2 = vadd.f32 %v4646_v48, %v4511_v52  ;;  %v4746_v7 = vsel %vm9171_vm2, %v4721_v38, 0.0  ;;  %vm9175_vm4 = vcmp.eq.s32.totalorder %v9174_v61, 1 }
 0x495   :  { %v5766_v27 = vpop.f32.mrf.mxu1  ;;  %v4519_v24 = vadd.f32 %v5565_v4, %v4383_v3  ;;  %v9178_v4 = vld [vmem:[#allocation28_spill] sm:$0xff] }
 0x496   :  { %v5567_v9 = vpop.f32.mrf.mxu0  ;;  %v4722_v12 = vmax.f32 %v4647_v2, 0.0  ;;  %v4399_v27 = vadd.f32 %v8633_v0, %v8651_v22  ;;  %vm9179_vm8 = vcmp.eq.s32.totalorder %v9178_v4, 1  ;;  %v4404_v0 = vadd.f32 %v8635_v25, %v8651_v22 }
 0x497   :  { %v4651_v14 = vpop.f32.mrf.mxu1  ;;  %v5568_v28 = vadd.f32 %v5567_v9, %v5566_v13 }
 0x498   :  { %v5569_v23 = vpop.f32.mrf.mxu0  ;;  %v4747_v53 = vsel %vm9173_vm3, %v4722_v12, 0.0  ;;  %v4652_v33 = vadd.f32 %v4651_v14, %v4516_v40 }
 0x499   :  { %v5247_v15 = vpack.c.bf16 %v4747_v53, %v4746_v7  ;;  %v5769_v8 = vpop.f32.mrf.mxu1  ;;  %v4524_v35 = vadd.f32 %v5568_v28, %v4388_v50 }
 0x49a   :  { %v5570_v56 = vpop.f32.mrf.mxu0  ;;  %v4723_v58 = vmax.f32 %v4652_v33, 0.0 }
 0x49b   :  { %5287 = vst [vmem:[%s8802_s8 + $0x20] sm:$0xff] %v5247_v15   ;;  %v4654_v62 = vpop.f32.mrf.mxu1  ;;  %v5571_v10 = vadd.f32 %v5570_v56, %v5569_v23  ;;  %v9180_v23 = vld [vmem:[#allocation30_spill] sm:$0xff] }
 0x49c   :  { %v5572_v32 = vpop.f32.mrf.mxu0  ;;  %v4655_v57 = vadd.f32 %v4654_v62, %v4519_v24  ;;  %v4748_v63 = vsel %vm9175_vm4, %v4723_v58, 0.0  ;;  %vm9181_vm9 = vcmp.eq.s32.totalorder %v9180_v23, 1 }
 0x49d   :  { %v5770_v19 = vpop.f32.mrf.mxu1  ;;  %v4527_v59 = vadd.f32 %v5571_v10, %v4391_v21  ;;  %v9184_v10 = vld [vmem:[#allocation32_spill] sm:$0xff] }
 0x49e   :  { %v5573_v43 = vpop.f32.mrf.mxu0  ;;  %v4724_v18 = vmax.f32 %v4655_v57, 0.0  ;;  %v4407_v57 = vadd.f32 %v8637_v42, %v8651_v22  ;;  %vm9185_vm12 = vcmp.eq.s32.totalorder %v9184_v10, 1  ;;  %v4412_v42 = vadd.f32 %v8639_v55, %v8651_v22 }
 0x49f   :  { %v4659_v46 = vpop.f32.mrf.mxu1  ;;  %v5574_v5 = vadd.f32 %v5573_v43, %v5572_v32  ;;  %v9182_v43 = vld [vmem:[#allocation31_spill] sm:$0xff] }
 0x4a0   :  { %v5575_v34 = vpop.f32.mrf.mxu0  ;;  %v4749_v6 = vsel %vm9177_vm6, %v4724_v18, 0.0  ;;  %v4660_v29 = vadd.f32 %v4659_v46, %v4524_v35  ;;  %vm9183_vm15 = vcmp.eq.s32.totalorder %v9182_v43, 1 }
 0x4a1   :  { %v5252_v41 = vpack.c.bf16 %v4749_v6, %v4748_v63  ;;  %v5773_v49 = vpop.f32.mrf.mxu1  ;;  %v4532_v2 = vadd.f32 %v5574_v5, %v4396_v31  ;;  %v4415_v31 = vadd.f32 %v8641_v47, %v8651_v22  ;;  %v4420_v47 = vadd.f32 %v8643_v1, %v8651_v22 }
 0x4a2   :  { %v5576_v30 = vpop.f32.mrf.mxu0  ;;  %v4725_v54 = vmax.f32 %v4660_v29, 0.0 }
 0x4a3   :  { %5288 = vst [vmem:[%s8802_s8 + $0x28] sm:$0xff] %v5252_v41   ;;  %v4662_v17 = vpop.f32.mrf.mxu1  ;;  %v5577_v48 = vadd.f32 %v5576_v30, %v5575_v34 }
 0x4a4   :  { %v5578_v20 = vpop.f32.mrf.mxu0  ;;  %v4663_v36 = vadd.f32 %v4662_v17, %v4527_v59  ;;  %v4750_v12 = vsel %vm9179_vm8, %v4725_v54, 0.0  ;;  %v9186_v54 = vld [vmem:[#allocation33_spill] sm:$0xff] }
 0x4a5   :  { %v5774_v52 = vpop.f32.mrf.mxu1  ;;  %v4535_v53 = vadd.f32 %v5577_v48, %v4399_v27  ;;  %vm9187_vm14 = vcmp.eq.s32.totalorder %v9186_v54, 1 }
 0x4a6   :  { %v5579_v13 = vpop.f32.mrf.mxu0  ;;  %v4726_v45 = vmax.f32 %v4663_v36, 0.0 }
 0x4a7   :  { %v4667_v9 = vpop.f32.mrf.mxu1  ;;  %v5580_v7 = vadd.f32 %v5579_v13, %v5578_v20  ;;  %v9188_v13 = vld [vmem:[#allocation35_spill] sm:$0xff] }
 0x4a8   :  { %v5581_v38 = vpop.f32.mrf.mxu0  ;;  %v4751_v40 = vsel %vm9181_vm9, %v4726_v45, 0.0  ;;  %v4668_v14 = vadd.f32 %v4667_v9, %v4532_v2  ;;  %vm9189_vm7 = vcmp.eq.s32.totalorder %v9188_v13, 1  ;;  %v9198_v13 = vld [vmem:[#allocation43_spill] sm:$0xff] }
 0x4a9   :  { %v5257_v3 = vpack.c.bf16 %v4751_v40, %v4750_v12  ;;  %v5777_v16 = vpop.f32.mrf.mxu1  ;;  %v4540_v50 = vadd.f32 %v5580_v7, %v4404_v0  ;;  %vm9199_vm1 = vcmp.eq.s32.totalorder %v9198_v13, 1 }
 0x4aa   :  { %v5582_v37 = vpop.f32.mrf.mxu0  ;;  %v4727_v56 = vmax.f32 %v4668_v14, 0.0 }
 0x4ab   :  { %5289 = vst [vmem:[%s8802_s8 + $0x30] sm:$0xff] %v5257_v3   ;;  %v4670_v33 = vpop.f32.mrf.mxu1  ;;  %v5583_v32 = vadd.f32 %v5582_v37, %v5581_v38 }
 0x4ac   :  { %v5584_v26 = vpop.f32.mrf.mxu0  ;;  %v4671_v15 = vadd.f32 %v4670_v33, %v4535_v53  ;;  %v4752_v19 = vsel %vm9183_vm15, %v4727_v56, 0.0  ;;  %v4423_v53 = vadd.f32 %v8645_v11, %v8651_v22  ;;  %v9190_v33 = vld [vmem:[#allocation36_spill] sm:$0xff]  ;;  %v9192_v56 = vld [vmem:[#allocation37_spill] sm:$0xff]  ;;  %v4428_v11 = vadd.f32 %v8647_v51, %v8651_v22 }
 0x4ad   :  { %v5778_v28 = vpop.f32.mrf.mxu1  ;;  %v4543_v63 = vadd.f32 %v5583_v32, %v4407_v57  ;;  %vm9191_vm10 = vcmp.eq.s32.totalorder %v9190_v33, 1  ;;  %vm9193_vm11 = vcmp.eq.s32.totalorder %v9192_v56, 1 }
 0x4ae   :  { %v5585_v8 = vpop.f32.mrf.mxu0  ;;  %v4728_v24 = vmax.f32 %v4671_v15, 0.0 }
 0x4af   :  { %v4675_v58 = vpop.f32.mrf.mxu1  ;;  %v5586_v21 = vadd.f32 %v5585_v8, %v5584_v26 }
 0x4b0   :  { %v5587_v62 = vpop.f32.mrf.mxu0  ;;  %v4753_v18 = vsel %vm9185_vm12, %v4728_v24, 0.0  ;;  %v4676_v34 = vadd.f32 %v4675_v58, %v4540_v50 }
 0x4b1   :  { %v5262_v35 = vpack.c.bf16 %v4753_v18, %v4752_v19  ;;  %v5781_v46 = vpop.f32.mrf.mxu1  ;;  %v4548_v59 = vadd.f32 %v5586_v21, %v4412_v42  ;;  %v4431_v21 = vadd.f32 %v8649_v39, %v8651_v22  ;;  %v4436_v39 = vadd.f32 %v8653_v60, %v8651_v22  ;;  %v9202_v60 = vld [vmem:[#allocation46_spill] sm:$0xff] }
 0x4b2   :  { %v5588_v25 = vpop.f32.mrf.mxu0  ;;  %v4729_v6 = vmax.f32 %v4676_v34, 0.0  ;;  %vm9203_vm2 = vcmp.eq.s32.totalorder %v9202_v60, 1 }
 0x4b3   :  { %5290 = vst [vmem:[%s8802_s8 + $0x38] sm:$0xff] %v5262_v35   ;;  %v4678_v44 = vpop.f32.mrf.mxu1  ;;  %v5589_v49 = vadd.f32 %v5588_v25, %v5587_v62 }
 0x4b4   :  { %v5590_v61 = vpop.f32.mrf.mxu0  ;;  %v4679_v29 = vadd.f32 %v4678_v44, %v4543_v63  ;;  %v4754_v36 = vsel %vm9187_vm14, %v4729_v6, 0.0  ;;  %v9196_v44 = vld [vmem:[#allocation41_spill] sm:$0xff] }
 0x4b5   :  { %v5782_v41 = vpop.f32.mrf.mxu1  ;;  %v4551_v27 = vadd.f32 %v5589_v49, %v4415_v31  ;;  %vm9197_vm0 = vcmp.eq.s32.totalorder %v9196_v44, 1 }
 0x4b6   :  { %v5591_v30 = vpop.f32.mrf.mxu0  ;;  %v4730_v5 = vmax.f32 %v4679_v29, 0.0 }
 0x4b7   :  { %v4683_v17 = vpop.f32.mrf.mxu1  ;;  %v5592_v2 = vadd.f32 %v5591_v30, %v5590_v61  ;;  %v9194_v61 = vld [vmem:[#allocation40_spill] sm:$0xff] }
 0x4b8   :  { %v5593_v20 = vpop.f32.mrf.mxu0  ;;  %v4755_v52 = vsel %vm9189_vm7, %v4730_v5, 0.0  ;;  %v4684_v48 = vadd.f32 %v4683_v17, %v4548_v59  ;;  %vm9195_vm13 = vcmp.eq.s32.totalorder %v9194_v61, 1 }
 0x4b9   :  { %v5267_v45 = vpack.c.bf16 %v4755_v52, %v4754_v36  ;;  %v5785_v38 = vpop.f32.mrf.mxu1  ;;  %v4556_v7 = vadd.f32 %v5592_v2, %v4420_v47 }
 0x4ba   :  { %v5594_v55 = vpop.f32.mrf.mxu0  ;;  %v4731_v12 = vmax.f32 %v4684_v48, 0.0  ;;  %v9200_v48 = vld [vmem:[#allocation44_spill] sm:$0xff] }
 0x4bb   :  { %5291 = vst [vmem:[%s8802_s8 + $0x40] sm:$0xff] %v5267_v45   ;;  %v4686_v4 = vpop.f32.mrf.mxu1  ;;  %v5595_v37 = vadd.f32 %v5594_v55, %v5593_v20  ;;  %vm9201_vm5 = vcmp.eq.s32.totalorder %v9200_v48, 1 }
 0x4bc   :  { %v5596_v9 = vpop.f32.mrf.mxu0  ;;  %v4687_v23 = vadd.f32 %v4686_v4, %v4551_v27  ;;  %v4756_v0 = vsel %vm9191_vm10, %v4731_v12, 0.0 }
 0x4bd   :  { %v5786_v14 = vpop.f32.mrf.mxu1  ;;  %v4559_v50 = vadd.f32 %v5595_v37, %v4423_v53 }
 0x4be   :  { %v5597_v40 = vpop.f32.mrf.mxu0  ;;  %v4732_v3 = vmax.f32 %v4687_v23, 0.0 }
 0x4bf   :  { %v4691_v26 = vpop.f32.mrf.mxu1  ;;  %v5598_v24 = vadd.f32 %v5597_v40, %v5596_v9 }
 0x4c0   :  { %v5599_v16 = vpop.f32.mrf.mxu0  ;;  %v4757_v15 = vsel %vm9193_vm11, %v4732_v3, 0.0  ;;  %v4692_v8 = vadd.f32 %v4691_v26, %v4556_v7 }
 0x4c1   :  { %v5272_v28 = vpack.c.bf16 %v4757_v15, %v4756_v0  ;;  %v5789_v32 = vpop.f32.mrf.mxu1  ;;  %v4564_v35 = vadd.f32 %v5598_v24, %v4428_v11 }
 0x4c2   :  { %v5600_v1 = vpop.f32.mrf.mxu0  ;;  %v4733_v57 = vmax.f32 %v4692_v8, 0.0 }
 0x4c3   :  { %5292 = vst [vmem:[%s8802_s8 + $0x48] sm:$0xff] %v5272_v28   ;;  %v4694_v58 = vpop.f32.mrf.mxu1  ;;  %v5601_v18 = vadd.f32 %v5600_v1, %v5599_v16 }
 0x4c4   :  { %v5602_v62 = vpop.f32.mrf.mxu0  ;;  %v4695_v43 = vadd.f32 %v4694_v58, %v4559_v50  ;;  %v4758_v63 = vsel %vm9195_vm13, %v4733_v57, 0.0 }
 0x4c5   :  { %v5790_v10 = vpop.f32.mrf.mxu1  ;;  %v4567_v49 = vadd.f32 %v5601_v18, %v4431_v21 }
 0x4c6   :  { %v5603_v19 = vpop.f32.mrf.mxu0  ;;  %v4734_v34 = vmax.f32 %v4695_v43, 0.0 }
 0x4c7   :  { %v4699_v46 = vpop.f32.mrf.mxu1  ;;  %v5604_v41 = vadd.f32 %v5603_v19, %v5602_v62 }
 0x4c8   :  { %v5605_v25 = vpop.f32.mrf.mxu0  ;;  %v4759_v42 = vsel %vm9197_vm0, %v4734_v34, 0.0  ;;  %v4700_v6 = vadd.f32 %v4699_v46, %v4564_v35 }
 0x4c9   :  { %v5277_v29 = vpack.c.bf16 %v4759_v42, %v4758_v63  ;;  %v5793_v30 = vpop.f32.mrf.mxu1  ;;  %v4572_v54 = vadd.f32 %v5604_v41, %v4436_v39 }
 0x4ca   :  { %v5606_v51 = vpop.f32.mrf.mxu0  ;;  %v4735_v20 = vmax.f32 %v4700_v6, 0.0 }
 0x4cb   :  { %5293 = vst [vmem:[%s8802_s8 + $0x50] sm:$0xff] %v5277_v29   ;;  %v4702_v5 = vpop.f32.mrf.mxu1 }
 0x4cc   :  { %v4703_v59 = vadd.f32 %v4702_v5, %v4567_v49  ;;  %v4760_v52 = vsel %vm9199_vm1, %v4735_v20, 0.0 }
 0x4cd   :  { %v5794_v17 = vpop.f32.mrf.mxu1 }
 0x4ce   :  { %v4736_v31 = vmax.f32 %v4703_v59, 0.0 }
 0x4cf   :  { %v4707_v36 = vpop.f32.mrf.mxu1 }
 0x4d0   :  { %v4761_v55 = vsel %vm9201_vm5, %v4736_v31, 0.0  ;;  %v4708_v45 = vadd.f32 %v4707_v36, %v4572_v54 }
 0x4d1   :  { %v5282_v38 = vpack.c.bf16 %v4761_v55, %v4760_v52  ;;  %v5797_v2 = vpop.f32.mrf.mxu1 }
 0x4d2   :  { %v4737_v9 = vmax.f32 %v4708_v45, 0.0 }
 0x4d3   :  { %5294 = vst [vmem:[%s8802_s8 + $0x58] sm:$0xff] %v5282_v38   ;;  %v4710_v22 = vpop.f32.mrf.mxu1 }
 0x4d4   :  { %v4762_v27 = vsel %vm9203_vm2, %v4737_v9, 0.0 }
 0x4d5   :  { %v5223_v4 = vpack.c.bf16 %v4762_v27, %v4762_v27  ;;  %v5798_v47 = vpop.f32.mrf.mxu1 }
 0x4d7   :  { %4888 = vst [vmem:[%s8802_s8 + $0x60] sm:$0xf] %v5223_v4 }
 0x4d8   :  { %4893 = vsyncpa [#allocation5], 1 }
 0x4d9   :  { %4894 = vsyncpa [#allocation7], 1 }
 0x4da   :  { %4895 = vsyncpa [#allocation10], 1 }

</bundles_post_ra>
